<compile_context>
chip_gen: v6e
topology: v6e:2x2x1
jax: 0.10.0
libtpu: 0.0.40
codegen_flags: <defaults>
</compile_context>

<pallas_src>
import functools
import math

import jax
import jax.numpy as jnp
from jax.experimental import pallas as pl
from jax.experimental.pallas import tpu as pltpu

# ----------------------------- configuration --------------------------------
OUT_CHANNELS = 16
HIDDEN = 32          # hidden_channels
FILTER = 64          # filter_channels
N_HEADS = 4
N_LAYERS = 2
KERNEL_SIZE = 3      # FFN conv kernel size
HEAD_DIM = HIDDEN // N_HEADS
LN_EPS = 1e-5

LAYER_PARAM_ORDER = ("wqkv", "bqkv", "wo", "bo", "g1", "bt1",
                     "w_ffn1", "b_ffn1", "w_ffn2", "b_ffn2", "g2", "bt2")
N_LP = len(LAYER_PARAM_ORDER)


# ------------------------------- helpers -------------------------------------
def _const_spec(arr):
    """Full-array block, same block every grid step (weight stays VMEM-resident)."""
    nd = arr.ndim
    return pl.BlockSpec(tuple(arr.shape), lambda *args, _nd=nd: (0,) * _nd)


def _layernorm(s, g, b):
    """LayerNorm over the channel axis (axis 0) for (C, T) activations.

    One-pass statistics: var = E[x^2] - mean^2 (clamped for safety)."""
    mean = jnp.mean(s, axis=0, keepdims=True)
    ex2 = jnp.mean(s * s, axis=0, keepdims=True)
    var = jnp.maximum(ex2 - mean * mean, 0.0)
    return (s - mean) * jax.lax.rsqrt(var + LN_EPS) * g + b


# ------------------------------- fused kernel ---------------------------------
def _fused_prosody_kernel(lens_ref, x_ref, noise_ref, *rest, noice_scale):
    n_layer_w = N_LAYERS * N_LP
    layer_refs = rest[:n_layer_w]
    wp_ref = rest[n_layer_w]
    bp_ref = rest[n_layer_w + 1]
    out_ref = rest[n_layer_w + 2]

    f32 = jnp.float32
    Tp = x_ref.shape[-1]                         # padded, multiple of 128 (lanes)
    b = pl.program_id(0)
    length = lens_ref[b]                         # valid frames for this batch row

    # Masks rebuilt in-kernel from the SMEM length (no mask DMA, no (T,T) mask).
    t_idx = jax.lax.broadcasted_iota(jnp.int32, (1, Tp), 1)
    mask = (t_idx < length).astype(f32)          # (1, Tp)
    key_ok = t_idx < length                      # broadcasts over query rows

    # x already contains the f0 embedding (fused in glue); Encoder masks its input.
    h = x_ref[0] * mask                          # (C, Tp): channels on sublanes, T on lanes

    for l in range(N_LAYERS):
        (wqkv_ref, bqkv_ref, wo_ref, bo_ref, g1_ref, bt1_ref,
         w1_ref, b1_ref, w2_ref, b2_ref, g2_ref, bt2_ref) = \
            layer_refs[l * N_LP:(l + 1) * N_LP]

        # ---- multi-head self-attention (fused QKV; q-scale folded into wqkv) ----
        qkv = jnp.dot(wqkv_ref[...], h, preferred_element_type=f32) + bqkv_ref[...]  # (3C, Tp)
        # One time-major copy of Q per layer so the score matmul is a standard
        # (Tq, D) @ (D, Tk) contraction; K/V stay channels-first.
        q_t = jnp.transpose(qkv[:HIDDEN, :])                                         # (Tp, C)
        y = jnp.zeros((HIDDEN, Tp), f32)
        for hh in range(N_HEADS):
            lo, hi = hh * HEAD_DIM, (hh + 1) * HEAD_DIM
            k = qkv[HIDDEN + lo:HIDDEN + hi, :]                  # (D, Tp) sublane-aligned
            v = qkv[2 * HIDDEN + lo:2 * HIDDEN + hi, :]          # (D, Tp)
            scores = jnp.dot(q_t[:, lo:hi], k,
                             preferred_element_type=f32)         # (Tq, Tk)
            scores = jnp.where(key_ok, scores, -1e4)             # masked_fill(mask==0, -1e4)
            scores = scores - jnp.max(scores, axis=-1, keepdims=True)
            p = jnp.exp(scores)
            p = p * pl.reciprocal(jnp.sum(p, axis=-1, keepdims=True), approx=True)
            o_h = jax.lax.dot_general(v, p, (((1,), (1,)), ((), ())),
                                      preferred_element_type=f32)   # (D, Tq)
            # concat-free head merge: Wo @ concat == sum_h Wo[:, head h cols] @ o_h
            y = y + jnp.dot(wo_ref[hh], o_h, preferred_element_type=f32)
        y = y + bo_ref[...]

        h = _layernorm(h + y, g1_ref[...], bt1_ref[...])

        # ---- FFN: conv(k=3) -> relu -> conv(k=3); taps are lane rolls over T ----
        hm = h * mask
        prev = jnp.where(t_idx >= 1, pltpu.roll(hm, 1, 1), 0.0)          # x[t-1]
        nxt = jnp.where(t_idx < Tp - 1, pltpu.roll(hm, Tp - 1, 1), 0.0)  # x[t+1]
        f = (jnp.dot(w1_ref[0], prev, preferred_element_type=f32)
             + jnp.dot(w1_ref[1], hm, preferred_element_type=f32)
             + jnp.dot(w1_ref[2], nxt, preferred_element_type=f32)
             + b1_ref[...])
        f = jnp.maximum(f, 0.0) * mask

        fprev = jnp.where(t_idx >= 1, pltpu.roll(f, 1, 1), 0.0)
        fnxt = jnp.where(t_idx < Tp - 1, pltpu.roll(f, Tp - 1, 1), 0.0)
        y = (jnp.dot(w2_ref[0], fprev, preferred_element_type=f32)
             + jnp.dot(w2_ref[1], f, preferred_element_type=f32)
             + jnp.dot(w2_ref[2], fnxt, preferred_element_type=f32)
             + b2_ref[...])
        y = y * mask

        h = _layernorm(h + y, g2_ref[...], bt2_ref[...])

    # ---- encoder tail mask + proj (1x1 conv) + fused reparameterization -----
    h = h * mask
    stats = (jnp.dot(wp_ref[...], h, preferred_element_type=f32) + bp_ref[...]) * mask
    m = stats[:OUT_CHANNELS, :]
    logs = stats[OUT_CHANNELS:, :]
    z = (m + noise_ref[0] * jnp.exp(logs) * noice_scale) * mask

    # Single packed, lane-dense (last dim = Tp) output: [z; m; logs] on sublanes.
    out_ref[0, 0:OUT_CHANNELS, :] = z
    out_ref[0, OUT_CHANNELS:2 * OUT_CHANNELS, :] = m
    out_ref[0, 2 * OUT_CHANNELS:3 * OUT_CHANNELS, :] = logs


# ------------------------------ glue wrapper ----------------------------------
@functools.partial(jax.jit, static_argnames=("noice_scale",))
def prosody_encoder_forward(params, x, x_mask, f0, noise, noice_scale=1.0):
    """x: (B, C, T)  x_mask: (B, 1, T)  f0: (B, T) int32  noise: (B, out, T).

    All tensors are channels-first (PyTorch NCT layout)."""
    B, C, T = x.shape
    Tp = ((T + 127) // 128) * 128                # lane-dense time axis
    pad_t = Tp - T

    # f0 embedding gather + add fused by XLA in glue; kernel sees one input stream.
    xe = x + jnp.transpose(params["f0_emb"][f0], (0, 2, 1))
    xe = jnp.pad(xe, ((0, 0), (0, 0), (0, pad_t)))
    noise_p = jnp.pad(noise, ((0, 0), (0, 0), (0, pad_t)))

    # Per-batch valid length -> SMEM via scalar prefetch; masks rebuilt in-kernel.
    lengths = jnp.sum(x_mask[:, 0, :], axis=-1).astype(jnp.int32)

    flat_w = []
    for lp in params["layers"]:
        flat_w.extend(lp[k] for k in LAYER_PARAM_ORDER)
    flat_w.extend([params["w_proj"], params["b_proj"]])

    grid_spec = pltpu.PrefetchScalarGridSpec(
        num_scalar_prefetch=1,
        grid=(B,),
        in_specs=[
            pl.BlockSpec((1, HIDDEN, Tp), lambda b, *_: (b, 0, 0)),          # x (+ f0 emb)
            pl.BlockSpec((1, OUT_CHANNELS, Tp), lambda b, *_: (b, 0, 0)),    # noise
            *[_const_spec(w) for w in flat_w],                               # VMEM-resident weights
        ],
        out_specs=pl.BlockSpec((1, 3 * OUT_CHANNELS, Tp), lambda b, *_: (b, 0, 0)),
    )

    # T-aware VMEM budget with v7x (64 MiB physical) headroom; per-head score
    # intermediates are O(Tp^2) until the q-block loop lands (see TODO above).
    vmem_limit = int(min(64 * 1024 * 1024,
                         max(32 * 1024 * 1024, 16 * Tp * Tp + (4 << 20))))

    kern = functools.partial(_fused_prosody_kernel, noice_scale=float(noice_scale))
    packed = pl.pallas_call(
        kern,
        out_shape=jax.ShapeDtypeStruct((B, 3 * OUT_CHANNELS, Tp), jnp.float32),
        grid_spec=grid_spec,
        compiler_params=pltpu.CompilerParams(
            dimension_semantics=("parallel",),   # shard batch across TCs (v7x megacore)
            vmem_limit_bytes=vmem_limit,
        ),
    )(lengths, xe, noise_p, *flat_w)

    z = packed[:, :OUT_CHANNELS, :T]
    m = packed[:, OUT_CHANNELS:2 * OUT_CHANNELS, :T]
    logs = packed[:, 2 * OUT_CHANNELS:, :T]
    return z, m, logs, x_mask


# ------------------------------ parameters ------------------------------------
def init_params(key):
    keys = iter(jax.random.split(key, 256))

    def nrm(shape, scale=0.1):
        return scale * jax.random.normal(next(keys), shape, dtype=jnp.float32)

    q_scale = 1.0 / math.sqrt(HEAD_DIM)   # query scaling folded into wqkv's q rows

    params = {
        "f0_emb": nrm((256, HIDDEN), 1.0),             # nn.Embedding(256, hidden): N(0, 1)
        "w_proj": nrm((2 * OUT_CHANNELS, HIDDEN)),      # y = W @ x (channels-first)
        "b_proj": jnp.zeros((2 * OUT_CHANNELS, 1), jnp.float32),
        "layers": [],
    }
    for _ in range(N_LAYERS):
        wq = nrm((HIDDEN, HIDDEN))
        wk = nrm((HIDDEN, HIDDEN))
        wv = nrm((HIDDEN, HIDDEN))
        wo = nrm((HIDDEN, HIDDEN))
        lp = {
            # (3C, C): rows [0,C) = scaled Wq, [C,2C) = Wk, [2C,3C) = Wv
            "wqkv": jnp.concatenate([wq * q_scale, wk, wv], axis=0),
            "bqkv": jnp.zeros((3 * HIDDEN, 1), jnp.float32),
            # Wo pre-split per head on the leading axis: (H, C, D), Wo_h = Wo[:, h*D:(h+1)*D]
            "wo": jnp.transpose(wo.reshape(HIDDEN, N_HEADS, HEAD_DIM), (1, 0, 2)),
            "bo": jnp.zeros((HIDDEN, 1), jnp.float32),
            "g1": jnp.ones((HIDDEN, 1), jnp.float32),
            "bt1": jnp.zeros((HIDDEN, 1), jnp.float32),
            # conv weights per tap: (K, Cout, Cin); tap j multiplies x[t + j - 1]
            "w_ffn1": nrm((KERNEL_SIZE, FILTER, HIDDEN)),
            "b_ffn1": jnp.zeros((FILTER, 1), jnp.float32),
            "w_ffn2": nrm((KERNEL_SIZE, HIDDEN, FILTER)),
            "b_ffn2": jnp.zeros((HIDDEN, 1), jnp.float32),
            "g2": jnp.ones((HIDDEN, 1), jnp.float32),
            "bt2": jnp.zeros((HIDDEN, 1), jnp.float32),
        }
        params["layers"].append(lp)
    return params


# --------------------------------- main ----------------------------------------
if __name__ == "__main__":
    B, T = 2, 8
    key = jax.random.PRNGKey(0)
    kx, kf, kn = jax.random.split(key, 3)

    x = jax.random.normal(kx, (B, HIDDEN, T), jnp.float32)          # PyTorch NCT layout
    f0 = jax.random.randint(kf, (B, T), 0, 256, jnp.int32)
    lengths = jnp.array([T, T - 2], jnp.int32)
    x_mask = (jnp.arange(T)[None, :] < lengths[:, None]).astype(jnp.float32)[:, None, :]
    # randn_like(m) done with JAX PRNG in glue, fed to the fused reparam stage.
    noise = jax.random.normal(kn, (B, OUT_CHANNELS, T), jnp.float32)

    params = init_params(jax.random.PRNGKey(42))

    z, m, logs, mask_out = prosody_encoder_forward(params, x, x_mask, f0, noise,
                                                   noice_scale=1.0)
    jax.block_until_ready((z, m, logs, mask_out))

    assert z.shape == (B, OUT_CHANNELS, T)
    assert m.shape == (B, OUT_CHANNELS, T)
    assert logs.shape == (B, OUT_CHANNELS, T)
    assert mask_out.shape == (B, 1, T)
    assert bool(jnp.all(jnp.isfinite(z)))
    print("KERNEL_OK")
</pallas_src>

<mosaic_0001>
module attributes {stable_mosaic.version = 11 : i64} {
  func.func @_fused_prosody_kernel(%arg0: i32, %arg1: memref<2xi32, #tpu.memory_space<smem>>, %arg2: memref<1x32x128xf32, #tpu.memory_space<vmem>>, %arg3: memref<1x16x128xf32, #tpu.memory_space<vmem>>, %arg4: memref<96x32xf32, #tpu.memory_space<vmem>>, %arg5: memref<96x1xf32, #tpu.memory_space<vmem>>, %arg6: memref<4x32x8xf32, #tpu.memory_space<vmem>>, %arg7: memref<32x1xf32, #tpu.memory_space<vmem>>, %arg8: memref<32x1xf32, #tpu.memory_space<vmem>>, %arg9: memref<32x1xf32, #tpu.memory_space<vmem>>, %arg10: memref<3x64x32xf32, #tpu.memory_space<vmem>>, %arg11: memref<64x1xf32, #tpu.memory_space<vmem>>, %arg12: memref<3x32x64xf32, #tpu.memory_space<vmem>>, %arg13: memref<32x1xf32, #tpu.memory_space<vmem>>, %arg14: memref<32x1xf32, #tpu.memory_space<vmem>>, %arg15: memref<32x1xf32, #tpu.memory_space<vmem>>, %arg16: memref<96x32xf32, #tpu.memory_space<vmem>>, %arg17: memref<96x1xf32, #tpu.memory_space<vmem>>, %arg18: memref<4x32x8xf32, #tpu.memory_space<vmem>>, %arg19: memref<32x1xf32, #tpu.memory_space<vmem>>, %arg20: memref<32x1xf32, #tpu.memory_space<vmem>>, %arg21: memref<32x1xf32, #tpu.memory_space<vmem>>, %arg22: memref<3x64x32xf32, #tpu.memory_space<vmem>>, %arg23: memref<64x1xf32, #tpu.memory_space<vmem>>, %arg24: memref<3x32x64xf32, #tpu.memory_space<vmem>>, %arg25: memref<32x1xf32, #tpu.memory_space<vmem>>, %arg26: memref<32x1xf32, #tpu.memory_space<vmem>>, %arg27: memref<32x1xf32, #tpu.memory_space<vmem>>, %arg28: memref<32x32xf32, #tpu.memory_space<vmem>>, %arg29: memref<32x1xf32, #tpu.memory_space<vmem>>, %arg30: memref<1x48x128xf32, #tpu.memory_space<vmem>>) attributes {dimension_semantics = [#tpu.dimension_semantics<parallel>], iteration_bounds = array<i64: 2>, scalar_prefetch = 1 : i64, scratch_operands = 0 : i64, tpu.core_type = #tpu.core_type<tc>, window_params = [{transform_indices = @transform_0, window_bounds = array<i64: 1, 32, 128>}, {transform_indices = @transform_1, window_bounds = array<i64: 1, 16, 128>}, {pipeline_mode = #tpu.pipeline_mode<synchronous>, transform_indices = @transform_2, window_bounds = array<i64: 96, 32>}, {pipeline_mode = #tpu.pipeline_mode<synchronous>, transform_indices = @transform_3, window_bounds = array<i64: 96, 1>}, {pipeline_mode = #tpu.pipeline_mode<synchronous>, transform_indices = @transform_4, window_bounds = array<i64: 4, 32, 8>}, {pipeline_mode = #tpu.pipeline_mode<synchronous>, transform_indices = @transform_5, window_bounds = array<i64: 32, 1>}, {pipeline_mode = #tpu.pipeline_mode<synchronous>, transform_indices = @transform_6, window_bounds = array<i64: 32, 1>}, {pipeline_mode = #tpu.pipeline_mode<synchronous>, transform_indices = @transform_7, window_bounds = array<i64: 32, 1>}, {pipeline_mode = #tpu.pipeline_mode<synchronous>, transform_indices = @transform_8, window_bounds = array<i64: 3, 64, 32>}, {pipeline_mode = #tpu.pipeline_mode<synchronous>, transform_indices = @transform_9, window_bounds = array<i64: 64, 1>}, {pipeline_mode = #tpu.pipeline_mode<synchronous>, transform_indices = @transform_10, window_bounds = array<i64: 3, 32, 64>}, {pipeline_mode = #tpu.pipeline_mode<synchronous>, transform_indices = @transform_11, window_bounds = array<i64: 32, 1>}, {pipeline_mode = #tpu.pipeline_mode<synchronous>, transform_indices = @transform_12, window_bounds = array<i64: 32, 1>}, {pipeline_mode = #tpu.pipeline_mode<synchronous>, transform_indices = @transform_13, window_bounds = array<i64: 32, 1>}, {pipeline_mode = #tpu.pipeline_mode<synchronous>, transform_indices = @transform_14, window_bounds = array<i64: 96, 32>}, {pipeline_mode = #tpu.pipeline_mode<synchronous>, transform_indices = @transform_15, window_bounds = array<i64: 96, 1>}, {pipeline_mode = #tpu.pipeline_mode<synchronous>, transform_indices = @transform_16, window_bounds = array<i64: 4, 32, 8>}, {pipeline_mode = #tpu.pipeline_mode<synchronous>, transform_indices = @transform_17, window_bounds = array<i64: 32, 1>}, {pipeline_mode = #tpu.pipeline_mode<synchronous>, transform_indices = @transform_18, window_bounds = array<i64: 32, 1>}, {pipeline_mode = #tpu.pipeline_mode<synchronous>, transform_indices = @transform_19, window_bounds = array<i64: 32, 1>}, {pipeline_mode = #tpu.pipeline_mode<synchronous>, transform_indices = @transform_20, window_bounds = array<i64: 3, 64, 32>}, {pipeline_mode = #tpu.pipeline_mode<synchronous>, transform_indices = @transform_21, window_bounds = array<i64: 64, 1>}, {pipeline_mode = #tpu.pipeline_mode<synchronous>, transform_indices = @transform_22, window_bounds = array<i64: 3, 32, 64>}, {pipeline_mode = #tpu.pipeline_mode<synchronous>, transform_indices = @transform_23, window_bounds = array<i64: 32, 1>}, {pipeline_mode = #tpu.pipeline_mode<synchronous>, transform_indices = @transform_24, window_bounds = array<i64: 32, 1>}, {pipeline_mode = #tpu.pipeline_mode<synchronous>, transform_indices = @transform_25, window_bounds = array<i64: 32, 1>}, {pipeline_mode = #tpu.pipeline_mode<synchronous>, transform_indices = @transform_26, window_bounds = array<i64: 32, 32>}, {pipeline_mode = #tpu.pipeline_mode<synchronous>, transform_indices = @transform_27, window_bounds = array<i64: 32, 1>}, {transform_indices = @transform_28, window_bounds = array<i64: 1, 48, 128>}]} {
    %0 = arith.index_cast %arg0 : i32 to index
    %1 = memref.load %arg1[%0] : memref<2xi32, #tpu.memory_space<smem>>
    %2 = tpu.iota {dimensions = array<i32: 1>} : vector<1x128xi32>
    %3 = vector.broadcast %1 : i32 to vector<1x128xi32>
    %4 = arith.cmpi slt, %2, %3 : vector<1x128xi32>
    %5 = arith.extui %4 : vector<1x128xi1> to vector<1x128xi32>
    %6 = arith.sitofp %5 : vector<1x128xi32> to vector<1x128xf32>
    %7 = vector.broadcast %1 : i32 to vector<1x128xi32>
    %8 = arith.cmpi slt, %2, %7 : vector<1x128xi32>
    %c0 = arith.constant 0 : index
    %c0_0 = arith.constant 0 : index
    %c0_1 = arith.constant 0 : index
    %9 = vector.load %arg2[%c0, %c0_0, %c0_1] : memref<1x32x128xf32, #tpu.memory_space<vmem>>, vector<1x32x128xf32>
    %10 = vector.shape_cast %9 : vector<1x32x128xf32> to vector<32x128xf32>
    %11 = vector.broadcast %6 : vector<1x128xf32> to vector<32x128xf32>
    %12 = arith.mulf %10, %11 : vector<32x128xf32>
    %c0_2 = arith.constant 0 : index
    %c0_3 = arith.constant 0 : index
    %13 = vector.load %arg4[%c0_2, %c0_3] : memref<96x32xf32, #tpu.memory_space<vmem>>, vector<96x32xf32>
    %cst = arith.constant dense<0.000000e+00> : vector<96x128xf32>
    %14 = tpu.matmul %13, %12, %cst {dimension_numbers = #tpu.dot_dimension_numbers<[1], [0], [0], [1], [0, 0, 1, 1], [], []>} : vector<96x32xf32>, vector<32x128xf32>, vector<96x128xf32> -> vector<96x128xf32>
    %c0_4 = arith.constant 0 : index
    %c0_5 = arith.constant 0 : index
    %15 = vector.load %arg5[%c0_4, %c0_5] : memref<96x1xf32, #tpu.memory_space<vmem>>, vector<96x1xf32>
    %16 = vector.broadcast %15 : vector<96x1xf32> to vector<96x128xf32>
    %17 = arith.addf %14, %16 : vector<96x128xf32>
    %18 = vector.extract_strided_slice %17 {offsets = [0, 0], sizes = [32, 128], strides = [1, 1]} : vector<96x128xf32> to vector<32x128xf32>
    %19 = tpu.transpose %18, [1, 0] : vector<32x128xf32> -> vector<128x32xf32>
    %cst_6 = arith.constant 0.000000e+00 : f32
    %20 = vector.broadcast %cst_6 : f32 to vector<32x128xf32>
    %21 = vector.extract_strided_slice %17 {offsets = [32, 0], sizes = [8, 128], strides = [1, 1]} : vector<96x128xf32> to vector<8x128xf32>
    %22 = vector.extract_strided_slice %17 {offsets = [64, 0], sizes = [8, 128], strides = [1, 1]} : vector<96x128xf32> to vector<8x128xf32>
    %23 = vector.extract_strided_slice %19 {offsets = [0, 0], sizes = [128, 8], strides = [1, 1]} : vector<128x32xf32> to vector<128x8xf32>
    %cst_7 = arith.constant dense<0.000000e+00> : vector<128x128xf32>
    %24 = tpu.matmul %23, %21, %cst_7 {dimension_numbers = #tpu.dot_dimension_numbers<[1], [0], [0], [1], [0, 0, 1, 1], [], []>} : vector<128x8xf32>, vector<8x128xf32>, vector<128x128xf32> -> vector<128x128xf32>
    %cst_8 = arith.constant -1.000000e+04 : f32
    %25 = vector.shape_cast %8 : vector<1x128xi1> to vector<1x128xi1>
    %26 = vector.broadcast %25 : vector<1x128xi1> to vector<128x128xi1>
    %27 = vector.broadcast %cst_8 : f32 to vector<128x128xf32>
    %28 = arith.select %26, %24, %27 : vector<128x128xi1>, vector<128x128xf32>
    %cst_9 = arith.constant dense<0xFF800000> : vector<128xf32>
    %29 = vector.multi_reduction <maximumf>, %28, %cst_9 [1] : vector<128x128xf32> to vector<128xf32>
    %30 = vector.shape_cast %29 : vector<128xf32> to vector<128x1xf32>
    %31 = vector.broadcast %30 : vector<128x1xf32> to vector<128x128xf32>
    %32 = arith.subf %28, %31 : vector<128x128xf32>
    %33 = math.exp %32 : vector<128x128xf32>
    %cst_10 = arith.constant dense<0.000000e+00> : vector<128xf32>
    %34 = vector.multi_reduction <add>, %33, %cst_10 [1] : vector<128x128xf32> to vector<128xf32>
    %35 = vector.shape_cast %34 : vector<128xf32> to vector<128x1xf32>
    %36 = tpu.reciprocal %35 {approx = true} : vector<128x1xf32> -> vector<128x1xf32>
    %37 = vector.broadcast %36 : vector<128x1xf32> to vector<128x128xf32>
    %38 = arith.mulf %33, %37 : vector<128x128xf32>
    %cst_11 = arith.constant dense<0.000000e+00> : vector<8x128xf32>
    %39 = tpu.matmul %22, %38, %cst_11 {dimension_numbers = #tpu.dot_dimension_numbers<[1], [1], [0], [0], [0, 0, 1, 0], [], []>} : vector<8x128xf32>, vector<128x128xf32>, vector<8x128xf32> -> vector<8x128xf32>
    %c0_12 = arith.constant 0 : index
    %c0_13 = arith.constant 0 : index
    %c0_14 = arith.constant 0 : index
    %40 = vector.load %arg6[%c0_12, %c0_13, %c0_14] : memref<4x32x8xf32, #tpu.memory_space<vmem>>, vector<1x32x8xf32>
    %41 = vector.shape_cast %40 : vector<1x32x8xf32> to vector<32x8xf32>
    %cst_15 = arith.constant dense<0.000000e+00> : vector<32x128xf32>
    %42 = tpu.matmul %41, %39, %cst_15 {dimension_numbers = #tpu.dot_dimension_numbers<[1], [0], [0], [1], [0, 0, 1, 1], [], []>} : vector<32x8xf32>, vector<8x128xf32>, vector<32x128xf32> -> vector<32x128xf32>
    %43 = arith.addf %20, %42 : vector<32x128xf32>
    %44 = vector.extract_strided_slice %17 {offsets = [40, 0], sizes = [8, 128], strides = [1, 1]} : vector<96x128xf32> to vector<8x128xf32>
    %45 = vector.extract_strided_slice %17 {offsets = [72, 0], sizes = [8, 128], strides = [1, 1]} : vector<96x128xf32> to vector<8x128xf32>
    %46 = vector.extract_strided_slice %19 {offsets = [0, 8], sizes = [128, 8], strides = [1, 1]} : vector<128x32xf32> to vector<128x8xf32>
    %cst_16 = arith.constant dense<0.000000e+00> : vector<128x128xf32>
    %47 = tpu.matmul %46, %44, %cst_16 {dimension_numbers = #tpu.dot_dimension_numbers<[1], [0], [0], [1], [0, 0, 1, 1], [], []>} : vector<128x8xf32>, vector<8x128xf32>, vector<128x128xf32> -> vector<128x128xf32>
    %cst_17 = arith.constant -1.000000e+04 : f32
    %48 = vector.shape_cast %8 : vector<1x128xi1> to vector<1x128xi1>
    %49 = vector.broadcast %48 : vector<1x128xi1> to vector<128x128xi1>
    %50 = vector.broadcast %cst_17 : f32 to vector<128x128xf32>
    %51 = arith.select %49, %47, %50 : vector<128x128xi1>, vector<128x128xf32>
    %cst_18 = arith.constant dense<0xFF800000> : vector<128xf32>
    %52 = vector.multi_reduction <maximumf>, %51, %cst_18 [1] : vector<128x128xf32> to vector<128xf32>
    %53 = vector.shape_cast %52 : vector<128xf32> to vector<128x1xf32>
    %54 = vector.broadcast %53 : vector<128x1xf32> to vector<128x128xf32>
    %55 = arith.subf %51, %54 : vector<128x128xf32>
    %56 = math.exp %55 : vector<128x128xf32>
    %cst_19 = arith.constant dense<0.000000e+00> : vector<128xf32>
    %57 = vector.multi_reduction <add>, %56, %cst_19 [1] : vector<128x128xf32> to vector<128xf32>
    %58 = vector.shape_cast %57 : vector<128xf32> to vector<128x1xf32>
    %59 = tpu.reciprocal %58 {approx = true} : vector<128x1xf32> -> vector<128x1xf32>
    %60 = vector.broadcast %59 : vector<128x1xf32> to vector<128x128xf32>
    %61 = arith.mulf %56, %60 : vector<128x128xf32>
    %cst_20 = arith.constant dense<0.000000e+00> : vector<8x128xf32>
    %62 = tpu.matmul %45, %61, %cst_20 {dimension_numbers = #tpu.dot_dimension_numbers<[1], [1], [0], [0], [0, 0, 1, 0], [], []>} : vector<8x128xf32>, vector<128x128xf32>, vector<8x128xf32> -> vector<8x128xf32>
    %c1 = arith.constant 1 : index
    %c0_21 = arith.constant 0 : index
    %c0_22 = arith.constant 0 : index
    %63 = vector.load %arg6[%c1, %c0_21, %c0_22] : memref<4x32x8xf32, #tpu.memory_space<vmem>>, vector<1x32x8xf32>
    %64 = vector.shape_cast %63 : vector<1x32x8xf32> to vector<32x8xf32>
    %cst_23 = arith.constant dense<0.000000e+00> : vector<32x128xf32>
    %65 = tpu.matmul %64, %62, %cst_23 {dimension_numbers = #tpu.dot_dimension_numbers<[1], [0], [0], [1], [0, 0, 1, 1], [], []>} : vector<32x8xf32>, vector<8x128xf32>, vector<32x128xf32> -> vector<32x128xf32>
    %66 = arith.addf %43, %65 : vector<32x128xf32>
    %67 = vector.extract_strided_slice %17 {offsets = [48, 0], sizes = [8, 128], strides = [1, 1]} : vector<96x128xf32> to vector<8x128xf32>
    %68 = vector.extract_strided_slice %17 {offsets = [80, 0], sizes = [8, 128], strides = [1, 1]} : vector<96x128xf32> to vector<8x128xf32>
    %69 = vector.extract_strided_slice %19 {offsets = [0, 16], sizes = [128, 8], strides = [1, 1]} : vector<128x32xf32> to vector<128x8xf32>
    %cst_24 = arith.constant dense<0.000000e+00> : vector<128x128xf32>
    %70 = tpu.matmul %69, %67, %cst_24 {dimension_numbers = #tpu.dot_dimension_numbers<[1], [0], [0], [1], [0, 0, 1, 1], [], []>} : vector<128x8xf32>, vector<8x128xf32>, vector<128x128xf32> -> vector<128x128xf32>
    %cst_25 = arith.constant -1.000000e+04 : f32
    %71 = vector.shape_cast %8 : vector<1x128xi1> to vector<1x128xi1>
    %72 = vector.broadcast %71 : vector<1x128xi1> to vector<128x128xi1>
    %73 = vector.broadcast %cst_25 : f32 to vector<128x128xf32>
    %74 = arith.select %72, %70, %73 : vector<128x128xi1>, vector<128x128xf32>
    %cst_26 = arith.constant dense<0xFF800000> : vector<128xf32>
    %75 = vector.multi_reduction <maximumf>, %74, %cst_26 [1] : vector<128x128xf32> to vector<128xf32>
    %76 = vector.shape_cast %75 : vector<128xf32> to vector<128x1xf32>
    %77 = vector.broadcast %76 : vector<128x1xf32> to vector<128x128xf32>
    %78 = arith.subf %74, %77 : vector<128x128xf32>
    %79 = math.exp %78 : vector<128x128xf32>
    %cst_27 = arith.constant dense<0.000000e+00> : vector<128xf32>
    %80 = vector.multi_reduction <add>, %79, %cst_27 [1] : vector<128x128xf32> to vector<128xf32>
    %81 = vector.shape_cast %80 : vector<128xf32> to vector<128x1xf32>
    %82 = tpu.reciprocal %81 {approx = true} : vector<128x1xf32> -> vector<128x1xf32>
    %83 = vector.broadcast %82 : vector<128x1xf32> to vector<128x128xf32>
    %84 = arith.mulf %79, %83 : vector<128x128xf32>
    %cst_28 = arith.constant dense<0.000000e+00> : vector<8x128xf32>
    %85 = tpu.matmul %68, %84, %cst_28 {dimension_numbers = #tpu.dot_dimension_numbers<[1], [1], [0], [0], [0, 0, 1, 0], [], []>} : vector<8x128xf32>, vector<128x128xf32>, vector<8x128xf32> -> vector<8x128xf32>
    %c2 = arith.constant 2 : index
    %c0_29 = arith.constant 0 : index
    %c0_30 = arith.constant 0 : index
    %86 = vector.load %arg6[%c2, %c0_29, %c0_30] : memref<4x32x8xf32, #tpu.memory_space<vmem>>, vector<1x32x8xf32>
    %87 = vector.shape_cast %86 : vector<1x32x8xf32> to vector<32x8xf32>
    %cst_31 = arith.constant dense<0.000000e+00> : vector<32x128xf32>
    %88 = tpu.matmul %87, %85, %cst_31 {dimension_numbers = #tpu.dot_dimension_numbers<[1], [0], [0], [1], [0, 0, 1, 1], [], []>} : vector<32x8xf32>, vector<8x128xf32>, vector<32x128xf32> -> vector<32x128xf32>
    %89 = arith.addf %66, %88 : vector<32x128xf32>
    %90 = vector.extract_strided_slice %17 {offsets = [56, 0], sizes = [8, 128], strides = [1, 1]} : vector<96x128xf32> to vector<8x128xf32>
    %91 = vector.extract_strided_slice %17 {offsets = [88, 0], sizes = [8, 128], strides = [1, 1]} : vector<96x128xf32> to vector<8x128xf32>
    %92 = vector.extract_strided_slice %19 {offsets = [0, 24], sizes = [128, 8], strides = [1, 1]} : vector<128x32xf32> to vector<128x8xf32>
    %cst_32 = arith.constant dense<0.000000e+00> : vector<128x128xf32>
    %93 = tpu.matmul %92, %90, %cst_32 {dimension_numbers = #tpu.dot_dimension_numbers<[1], [0], [0], [1], [0, 0, 1, 1], [], []>} : vector<128x8xf32>, vector<8x128xf32>, vector<128x128xf32> -> vector<128x128xf32>
    %cst_33 = arith.constant -1.000000e+04 : f32
    %94 = vector.shape_cast %8 : vector<1x128xi1> to vector<1x128xi1>
    %95 = vector.broadcast %94 : vector<1x128xi1> to vector<128x128xi1>
    %96 = vector.broadcast %cst_33 : f32 to vector<128x128xf32>
    %97 = arith.select %95, %93, %96 : vector<128x128xi1>, vector<128x128xf32>
    %cst_34 = arith.constant dense<0xFF800000> : vector<128xf32>
    %98 = vector.multi_reduction <maximumf>, %97, %cst_34 [1] : vector<128x128xf32> to vector<128xf32>
    %99 = vector.shape_cast %98 : vector<128xf32> to vector<128x1xf32>
    %100 = vector.broadcast %99 : vector<128x1xf32> to vector<128x128xf32>
    %101 = arith.subf %97, %100 : vector<128x128xf32>
    %102 = math.exp %101 : vector<128x128xf32>
    %cst_35 = arith.constant dense<0.000000e+00> : vector<128xf32>
    %103 = vector.multi_reduction <add>, %102, %cst_35 [1] : vector<128x128xf32> to vector<128xf32>
    %104 = vector.shape_cast %103 : vector<128xf32> to vector<128x1xf32>
    %105 = tpu.reciprocal %104 {approx = true} : vector<128x1xf32> -> vector<128x1xf32>
    %106 = vector.broadcast %105 : vector<128x1xf32> to vector<128x128xf32>
    %107 = arith.mulf %102, %106 : vector<128x128xf32>
    %cst_36 = arith.constant dense<0.000000e+00> : vector<8x128xf32>
    %108 = tpu.matmul %91, %107, %cst_36 {dimension_numbers = #tpu.dot_dimension_numbers<[1], [1], [0], [0], [0, 0, 1, 0], [], []>} : vector<8x128xf32>, vector<128x128xf32>, vector<8x128xf32> -> vector<8x128xf32>
    %c3 = arith.constant 3 : index
    %c0_37 = arith.constant 0 : index
    %c0_38 = arith.constant 0 : index
    %109 = vector.load %arg6[%c3, %c0_37, %c0_38] : memref<4x32x8xf32, #tpu.memory_space<vmem>>, vector<1x32x8xf32>
    %110 = vector.shape_cast %109 : vector<1x32x8xf32> to vector<32x8xf32>
    %cst_39 = arith.constant dense<0.000000e+00> : vector<32x128xf32>
    %111 = tpu.matmul %110, %108, %cst_39 {dimension_numbers = #tpu.dot_dimension_numbers<[1], [0], [0], [1], [0, 0, 1, 1], [], []>} : vector<32x8xf32>, vector<8x128xf32>, vector<32x128xf32> -> vector<32x128xf32>
    %112 = arith.addf %89, %111 : vector<32x128xf32>
    %c0_40 = arith.constant 0 : index
    %c0_41 = arith.constant 0 : index
    %113 = vector.load %arg7[%c0_40, %c0_41] : memref<32x1xf32, #tpu.memory_space<vmem>>, vector<32x1xf32>
    %114 = vector.broadcast %113 : vector<32x1xf32> to vector<32x128xf32>
    %115 = arith.addf %112, %114 : vector<32x128xf32>
    %116 = arith.addf %12, %115 : vector<32x128xf32>
    %c0_42 = arith.constant 0 : index
    %c0_43 = arith.constant 0 : index
    %117 = vector.load %arg8[%c0_42, %c0_43] : memref<32x1xf32, #tpu.memory_space<vmem>>, vector<32x1xf32>
    %c0_44 = arith.constant 0 : index
    %c0_45 = arith.constant 0 : index
    %118 = vector.load %arg9[%c0_44, %c0_45] : memref<32x1xf32, #tpu.memory_space<vmem>>, vector<32x1xf32>
    %cst_46 = arith.constant dense<0.000000e+00> : vector<128xf32>
    %119 = vector.multi_reduction <add>, %116, %cst_46 [0] : vector<32x128xf32> to vector<128xf32>
    %120 = vector.shape_cast %119 : vector<128xf32> to vector<1x128xf32>
    %cst_47 = arith.constant 3.200000e+01 : f32
    %121 = vector.broadcast %cst_47 : f32 to vector<1x128xf32>
    %122 = arith.divf %120, %121 : vector<1x128xf32>
    %123 = arith.mulf %116, %116 : vector<32x128xf32>
    %cst_48 = arith.constant dense<0.000000e+00> : vector<128xf32>
    %124 = vector.multi_reduction <add>, %123, %cst_48 [0] : vector<32x128xf32> to vector<128xf32>
    %125 = vector.shape_cast %124 : vector<128xf32> to vector<1x128xf32>
    %cst_49 = arith.constant 3.200000e+01 : f32
    %126 = vector.broadcast %cst_49 : f32 to vector<1x128xf32>
    %127 = arith.divf %125, %126 : vector<1x128xf32>
    %128 = arith.mulf %122, %122 : vector<1x128xf32>
    %129 = arith.subf %127, %128 : vector<1x128xf32>
    %cst_50 = arith.constant 0.000000e+00 : f32
    %130 = vector.broadcast %cst_50 : f32 to vector<1x128xf32>
    %131 = arith.maximumf %129, %130 : vector<1x128xf32>
    %132 = vector.broadcast %122 : vector<1x128xf32> to vector<32x128xf32>
    %133 = arith.subf %116, %132 : vector<32x128xf32>
    %cst_51 = arith.constant 9.99999974E-6 : f32
    %134 = vector.broadcast %cst_51 : f32 to vector<1x128xf32>
    %135 = arith.addf %131, %134 : vector<1x128xf32>
    %136 = math.rsqrt %135 : vector<1x128xf32>
    %137 = vector.broadcast %136 : vector<1x128xf32> to vector<32x128xf32>
    %138 = arith.mulf %133, %137 : vector<32x128xf32>
    %139 = vector.broadcast %117 : vector<32x1xf32> to vector<32x128xf32>
    %140 = arith.mulf %138, %139 : vector<32x128xf32>
    %141 = vector.broadcast %118 : vector<32x1xf32> to vector<32x128xf32>
    %142 = arith.addf %140, %141 : vector<32x128xf32>
    %143 = vector.broadcast %6 : vector<1x128xf32> to vector<32x128xf32>
    %144 = arith.mulf %142, %143 : vector<32x128xf32>
    %c1_i32 = arith.constant 1 : i32
    %145 = vector.broadcast %c1_i32 : i32 to vector<1x128xi32>
    %146 = arith.cmpi sge, %2, %145 : vector<1x128xi32>
    %c1_i32_52 = arith.constant 1 : i32
    %147 = tpu.dynamic_rotate %144 by %c1_i32_52 dim 1 : vector<32x128xf32>, i32 -> vector<32x128xf32>
    %cst_53 = arith.constant 0.000000e+00 : f32
    %148 = vector.shape_cast %146 : vector<1x128xi1> to vector<1x128xi1>
    %149 = vector.broadcast %148 : vector<1x128xi1> to vector<32x128xi1>
    %150 = vector.broadcast %cst_53 : f32 to vector<32x128xf32>
    %151 = arith.select %149, %147, %150 : vector<32x128xi1>, vector<32x128xf32>
    %c127_i32 = arith.constant 127 : i32
    %152 = vector.broadcast %c127_i32 : i32 to vector<1x128xi32>
    %153 = arith.cmpi slt, %2, %152 : vector<1x128xi32>
    %c127_i32_54 = arith.constant 127 : i32
    %154 = tpu.dynamic_rotate %144 by %c127_i32_54 dim 1 : vector<32x128xf32>, i32 -> vector<32x128xf32>
    %cst_55 = arith.constant 0.000000e+00 : f32
    %155 = vector.shape_cast %153 : vector<1x128xi1> to vector<1x128xi1>
    %156 = vector.broadcast %155 : vector<1x128xi1> to vector<32x128xi1>
    %157 = vector.broadcast %cst_55 : f32 to vector<32x128xf32>
    %158 = arith.select %156, %154, %157 : vector<32x128xi1>, vector<32x128xf32>
    %c0_56 = arith.constant 0 : index
    %c0_57 = arith.constant 0 : index
    %c0_58 = arith.constant 0 : index
    %159 = vector.load %arg10[%c0_56, %c0_57, %c0_58] : memref<3x64x32xf32, #tpu.memory_space<vmem>>, vector<1x64x32xf32>
    %160 = vector.shape_cast %159 : vector<1x64x32xf32> to vector<64x32xf32>
    %cst_59 = arith.constant dense<0.000000e+00> : vector<64x128xf32>
    %161 = tpu.matmul %160, %151, %cst_59 {dimension_numbers = #tpu.dot_dimension_numbers<[1], [0], [0], [1], [0, 0, 1, 1], [], []>} : vector<64x32xf32>, vector<32x128xf32>, vector<64x128xf32> -> vector<64x128xf32>
    %c1_60 = arith.constant 1 : index
    %c0_61 = arith.constant 0 : index
    %c0_62 = arith.constant 0 : index
    %162 = vector.load %arg10[%c1_60, %c0_61, %c0_62] : memref<3x64x32xf32, #tpu.memory_space<vmem>>, vector<1x64x32xf32>
    %163 = vector.shape_cast %162 : vector<1x64x32xf32> to vector<64x32xf32>
    %cst_63 = arith.constant dense<0.000000e+00> : vector<64x128xf32>
    %164 = tpu.matmul %163, %144, %cst_63 {dimension_numbers = #tpu.dot_dimension_numbers<[1], [0], [0], [1], [0, 0, 1, 1], [], []>} : vector<64x32xf32>, vector<32x128xf32>, vector<64x128xf32> -> vector<64x128xf32>
    %165 = arith.addf %161, %164 : vector<64x128xf32>
    %c2_64 = arith.constant 2 : index
    %c0_65 = arith.constant 0 : index
    %c0_66 = arith.constant 0 : index
    %166 = vector.load %arg10[%c2_64, %c0_65, %c0_66] : memref<3x64x32xf32, #tpu.memory_space<vmem>>, vector<1x64x32xf32>
    %167 = vector.shape_cast %166 : vector<1x64x32xf32> to vector<64x32xf32>
    %cst_67 = arith.constant dense<0.000000e+00> : vector<64x128xf32>
    %168 = tpu.matmul %167, %158, %cst_67 {dimension_numbers = #tpu.dot_dimension_numbers<[1], [0], [0], [1], [0, 0, 1, 1], [], []>} : vector<64x32xf32>, vector<32x128xf32>, vector<64x128xf32> -> vector<64x128xf32>
    %169 = arith.addf %165, %168 : vector<64x128xf32>
    %c0_68 = arith.constant 0 : index
    %c0_69 = arith.constant 0 : index
    %170 = vector.load %arg11[%c0_68, %c0_69] : memref<64x1xf32, #tpu.memory_space<vmem>>, vector<64x1xf32>
    %171 = vector.broadcast %170 : vector<64x1xf32> to vector<64x128xf32>
    %172 = arith.addf %169, %171 : vector<64x128xf32>
    %cst_70 = arith.constant 0.000000e+00 : f32
    %173 = vector.broadcast %cst_70 : f32 to vector<64x128xf32>
    %174 = arith.maximumf %172, %173 : vector<64x128xf32>
    %175 = vector.broadcast %6 : vector<1x128xf32> to vector<64x128xf32>
    %176 = arith.mulf %174, %175 : vector<64x128xf32>
    %c1_i32_71 = arith.constant 1 : i32
    %177 = vector.broadcast %c1_i32_71 : i32 to vector<1x128xi32>
    %178 = arith.cmpi sge, %2, %177 : vector<1x128xi32>
    %c1_i32_72 = arith.constant 1 : i32
    %179 = tpu.dynamic_rotate %176 by %c1_i32_72 dim 1 : vector<64x128xf32>, i32 -> vector<64x128xf32>
    %cst_73 = arith.constant 0.000000e+00 : f32
    %180 = vector.shape_cast %178 : vector<1x128xi1> to vector<1x128xi1>
    %181 = vector.broadcast %180 : vector<1x128xi1> to vector<64x128xi1>
    %182 = vector.broadcast %cst_73 : f32 to vector<64x128xf32>
    %183 = arith.select %181, %179, %182 : vector<64x128xi1>, vector<64x128xf32>
    %c127_i32_74 = arith.constant 127 : i32
    %184 = vector.broadcast %c127_i32_74 : i32 to vector<1x128xi32>
    %185 = arith.cmpi slt, %2, %184 : vector<1x128xi32>
    %c127_i32_75 = arith.constant 127 : i32
    %186 = tpu.dynamic_rotate %176 by %c127_i32_75 dim 1 : vector<64x128xf32>, i32 -> vector<64x128xf32>
    %cst_76 = arith.constant 0.000000e+00 : f32
    %187 = vector.shape_cast %185 : vector<1x128xi1> to vector<1x128xi1>
    %188 = vector.broadcast %187 : vector<1x128xi1> to vector<64x128xi1>
    %189 = vector.broadcast %cst_76 : f32 to vector<64x128xf32>
    %190 = arith.select %188, %186, %189 : vector<64x128xi1>, vector<64x128xf32>
    %c0_77 = arith.constant 0 : index
    %c0_78 = arith.constant 0 : index
    %c0_79 = arith.constant 0 : index
    %191 = vector.load %arg12[%c0_77, %c0_78, %c0_79] : memref<3x32x64xf32, #tpu.memory_space<vmem>>, vector<1x32x64xf32>
    %192 = vector.shape_cast %191 : vector<1x32x64xf32> to vector<32x64xf32>
    %cst_80 = arith.constant dense<0.000000e+00> : vector<32x128xf32>
    %193 = tpu.matmul %192, %183, %cst_80 {dimension_numbers = #tpu.dot_dimension_numbers<[1], [0], [0], [1], [0, 0, 1, 1], [], []>} : vector<32x64xf32>, vector<64x128xf32>, vector<32x128xf32> -> vector<32x128xf32>
    %c1_81 = arith.constant 1 : index
    %c0_82 = arith.constant 0 : index
    %c0_83 = arith.constant 0 : index
    %194 = vector.load %arg12[%c1_81, %c0_82, %c0_83] : memref<3x32x64xf32, #tpu.memory_space<vmem>>, vector<1x32x64xf32>
    %195 = vector.shape_cast %194 : vector<1x32x64xf32> to vector<32x64xf32>
    %cst_84 = arith.constant dense<0.000000e+00> : vector<32x128xf32>
    %196 = tpu.matmul %195, %176, %cst_84 {dimension_numbers = #tpu.dot_dimension_numbers<[1], [0], [0], [1], [0, 0, 1, 1], [], []>} : vector<32x64xf32>, vector<64x128xf32>, vector<32x128xf32> -> vector<32x128xf32>
    %197 = arith.addf %193, %196 : vector<32x128xf32>
    %c2_85 = arith.constant 2 : index
    %c0_86 = arith.constant 0 : index
    %c0_87 = arith.constant 0 : index
    %198 = vector.load %arg12[%c2_85, %c0_86, %c0_87] : memref<3x32x64xf32, #tpu.memory_space<vmem>>, vector<1x32x64xf32>
    %199 = vector.shape_cast %198 : vector<1x32x64xf32> to vector<32x64xf32>
    %cst_88 = arith.constant dense<0.000000e+00> : vector<32x128xf32>
    %200 = tpu.matmul %199, %190, %cst_88 {dimension_numbers = #tpu.dot_dimension_numbers<[1], [0], [0], [1], [0, 0, 1, 1], [], []>} : vector<32x64xf32>, vector<64x128xf32>, vector<32x128xf32> -> vector<32x128xf32>
    %201 = arith.addf %197, %200 : vector<32x128xf32>
    %c0_89 = arith.constant 0 : index
    %c0_90 = arith.constant 0 : index
    %202 = vector.load %arg13[%c0_89, %c0_90] : memref<32x1xf32, #tpu.memory_space<vmem>>, vector<32x1xf32>
    %203 = vector.broadcast %202 : vector<32x1xf32> to vector<32x128xf32>
    %204 = arith.addf %201, %203 : vector<32x128xf32>
    %205 = vector.broadcast %6 : vector<1x128xf32> to vector<32x128xf32>
    %206 = arith.mulf %204, %205 : vector<32x128xf32>
    %207 = arith.addf %142, %206 : vector<32x128xf32>
    %c0_91 = arith.constant 0 : index
    %c0_92 = arith.constant 0 : index
    %208 = vector.load %arg14[%c0_91, %c0_92] : memref<32x1xf32, #tpu.memory_space<vmem>>, vector<32x1xf32>
    %c0_93 = arith.constant 0 : index
    %c0_94 = arith.constant 0 : index
    %209 = vector.load %arg15[%c0_93, %c0_94] : memref<32x1xf32, #tpu.memory_space<vmem>>, vector<32x1xf32>
    %cst_95 = arith.constant dense<0.000000e+00> : vector<128xf32>
    %210 = vector.multi_reduction <add>, %207, %cst_95 [0] : vector<32x128xf32> to vector<128xf32>
    %211 = vector.shape_cast %210 : vector<128xf32> to vector<1x128xf32>
    %cst_96 = arith.constant 3.200000e+01 : f32
    %212 = vector.broadcast %cst_96 : f32 to vector<1x128xf32>
    %213 = arith.divf %211, %212 : vector<1x128xf32>
    %214 = arith.mulf %207, %207 : vector<32x128xf32>
    %cst_97 = arith.constant dense<0.000000e+00> : vector<128xf32>
    %215 = vector.multi_reduction <add>, %214, %cst_97 [0] : vector<32x128xf32> to vector<128xf32>
    %216 = vector.shape_cast %215 : vector<128xf32> to vector<1x128xf32>
    %cst_98 = arith.constant 3.200000e+01 : f32
    %217 = vector.broadcast %cst_98 : f32 to vector<1x128xf32>
    %218 = arith.divf %216, %217 : vector<1x128xf32>
    %219 = arith.mulf %213, %213 : vector<1x128xf32>
    %220 = arith.subf %218, %219 : vector<1x128xf32>
    %cst_99 = arith.constant 0.000000e+00 : f32
    %221 = vector.broadcast %cst_99 : f32 to vector<1x128xf32>
    %222 = arith.maximumf %220, %221 : vector<1x128xf32>
    %223 = vector.broadcast %213 : vector<1x128xf32> to vector<32x128xf32>
    %224 = arith.subf %207, %223 : vector<32x128xf32>
    %cst_100 = arith.constant 9.99999974E-6 : f32
    %225 = vector.broadcast %cst_100 : f32 to vector<1x128xf32>
    %226 = arith.addf %222, %225 : vector<1x128xf32>
    %227 = math.rsqrt %226 : vector<1x128xf32>
    %228 = vector.broadcast %227 : vector<1x128xf32> to vector<32x128xf32>
    %229 = arith.mulf %224, %228 : vector<32x128xf32>
    %230 = vector.broadcast %208 : vector<32x1xf32> to vector<32x128xf32>
    %231 = arith.mulf %229, %230 : vector<32x128xf32>
    %232 = vector.broadcast %209 : vector<32x1xf32> to vector<32x128xf32>
    %233 = arith.addf %231, %232 : vector<32x128xf32>
    %c0_101 = arith.constant 0 : index
    %c0_102 = arith.constant 0 : index
    %234 = vector.load %arg16[%c0_101, %c0_102] : memref<96x32xf32, #tpu.memory_space<vmem>>, vector<96x32xf32>
    %cst_103 = arith.constant dense<0.000000e+00> : vector<96x128xf32>
    %235 = tpu.matmul %234, %233, %cst_103 {dimension_numbers = #tpu.dot_dimension_numbers<[1], [0], [0], [1], [0, 0, 1, 1], [], []>} : vector<96x32xf32>, vector<32x128xf32>, vector<96x128xf32> -> vector<96x128xf32>
    %c0_104 = arith.constant 0 : index
    %c0_105 = arith.constant 0 : index
    %236 = vector.load %arg17[%c0_104, %c0_105] : memref<96x1xf32, #tpu.memory_space<vmem>>, vector<96x1xf32>
    %237 = vector.broadcast %236 : vector<96x1xf32> to vector<96x128xf32>
    %238 = arith.addf %235, %237 : vector<96x128xf32>
    %239 = vector.extract_strided_slice %238 {offsets = [0, 0], sizes = [32, 128], strides = [1, 1]} : vector<96x128xf32> to vector<32x128xf32>
    %240 = tpu.transpose %239, [1, 0] : vector<32x128xf32> -> vector<128x32xf32>
    %cst_106 = arith.constant 0.000000e+00 : f32
    %241 = vector.broadcast %cst_106 : f32 to vector<32x128xf32>
    %242 = vector.extract_strided_slice %238 {offsets = [32, 0], sizes = [8, 128], strides = [1, 1]} : vector<96x128xf32> to vector<8x128xf32>
    %243 = vector.extract_strided_slice %238 {offsets = [64, 0], sizes = [8, 128], strides = [1, 1]} : vector<96x128xf32> to vector<8x128xf32>
    %244 = vector.extract_strided_slice %240 {offsets = [0, 0], sizes = [128, 8], strides = [1, 1]} : vector<128x32xf32> to vector<128x8xf32>
    %cst_107 = arith.constant dense<0.000000e+00> : vector<128x128xf32>
    %245 = tpu.matmul %244, %242, %cst_107 {dimension_numbers = #tpu.dot_dimension_numbers<[1], [0], [0], [1], [0, 0, 1, 1], [], []>} : vector<128x8xf32>, vector<8x128xf32>, vector<128x128xf32> -> vector<128x128xf32>
    %cst_108 = arith.constant -1.000000e+04 : f32
    %246 = vector.shape_cast %8 : vector<1x128xi1> to vector<1x128xi1>
    %247 = vector.broadcast %246 : vector<1x128xi1> to vector<128x128xi1>
    %248 = vector.broadcast %cst_108 : f32 to vector<128x128xf32>
    %249 = arith.select %247, %245, %248 : vector<128x128xi1>, vector<128x128xf32>
    %cst_109 = arith.constant dense<0xFF800000> : vector<128xf32>
    %250 = vector.multi_reduction <maximumf>, %249, %cst_109 [1] : vector<128x128xf32> to vector<128xf32>
    %251 = vector.shape_cast %250 : vector<128xf32> to vector<128x1xf32>
    %252 = vector.broadcast %251 : vector<128x1xf32> to vector<128x128xf32>
    %253 = arith.subf %249, %252 : vector<128x128xf32>
    %254 = math.exp %253 : vector<128x128xf32>
    %cst_110 = arith.constant dense<0.000000e+00> : vector<128xf32>
    %255 = vector.multi_reduction <add>, %254, %cst_110 [1] : vector<128x128xf32> to vector<128xf32>
    %256 = vector.shape_cast %255 : vector<128xf32> to vector<128x1xf32>
    %257 = tpu.reciprocal %256 {approx = true} : vector<128x1xf32> -> vector<128x1xf32>
    %258 = vector.broadcast %257 : vector<128x1xf32> to vector<128x128xf32>
    %259 = arith.mulf %254, %258 : vector<128x128xf32>
    %cst_111 = arith.constant dense<0.000000e+00> : vector<8x128xf32>
    %260 = tpu.matmul %243, %259, %cst_111 {dimension_numbers = #tpu.dot_dimension_numbers<[1], [1], [0], [0], [0, 0, 1, 0], [], []>} : vector<8x128xf32>, vector<128x128xf32>, vector<8x128xf32> -> vector<8x128xf32>
    %c0_112 = arith.constant 0 : index
    %c0_113 = arith.constant 0 : index
    %c0_114 = arith.constant 0 : index
    %261 = vector.load %arg18[%c0_112, %c0_113, %c0_114] : memref<4x32x8xf32, #tpu.memory_space<vmem>>, vector<1x32x8xf32>
    %262 = vector.shape_cast %261 : vector<1x32x8xf32> to vector<32x8xf32>
    %cst_115 = arith.constant dense<0.000000e+00> : vector<32x128xf32>
    %263 = tpu.matmul %262, %260, %cst_115 {dimension_numbers = #tpu.dot_dimension_numbers<[1], [0], [0], [1], [0, 0, 1, 1], [], []>} : vector<32x8xf32>, vector<8x128xf32>, vector<32x128xf32> -> vector<32x128xf32>
    %264 = arith.addf %241, %263 : vector<32x128xf32>
    %265 = vector.extract_strided_slice %238 {offsets = [40, 0], sizes = [8, 128], strides = [1, 1]} : vector<96x128xf32> to vector<8x128xf32>
    %266 = vector.extract_strided_slice %238 {offsets = [72, 0], sizes = [8, 128], strides = [1, 1]} : vector<96x128xf32> to vector<8x128xf32>
    %267 = vector.extract_strided_slice %240 {offsets = [0, 8], sizes = [128, 8], strides = [1, 1]} : vector<128x32xf32> to vector<128x8xf32>
    %cst_116 = arith.constant dense<0.000000e+00> : vector<128x128xf32>
    %268 = tpu.matmul %267, %265, %cst_116 {dimension_numbers = #tpu.dot_dimension_numbers<[1], [0], [0], [1], [0, 0, 1, 1], [], []>} : vector<128x8xf32>, vector<8x128xf32>, vector<128x128xf32> -> vector<128x128xf32>
    %cst_117 = arith.constant -1.000000e+04 : f32
    %269 = vector.shape_cast %8 : vector<1x128xi1> to vector<1x128xi1>
    %270 = vector.broadcast %269 : vector<1x128xi1> to vector<128x128xi1>
    %271 = vector.broadcast %cst_117 : f32 to vector<128x128xf32>
    %272 = arith.select %270, %268, %271 : vector<128x128xi1>, vector<128x128xf32>
    %cst_118 = arith.constant dense<0xFF800000> : vector<128xf32>
    %273 = vector.multi_reduction <maximumf>, %272, %cst_118 [1] : vector<128x128xf32> to vector<128xf32>
    %274 = vector.shape_cast %273 : vector<128xf32> to vector<128x1xf32>
    %275 = vector.broadcast %274 : vector<128x1xf32> to vector<128x128xf32>
    %276 = arith.subf %272, %275 : vector<128x128xf32>
    %277 = math.exp %276 : vector<128x128xf32>
    %cst_119 = arith.constant dense<0.000000e+00> : vector<128xf32>
    %278 = vector.multi_reduction <add>, %277, %cst_119 [1] : vector<128x128xf32> to vector<128xf32>
    %279 = vector.shape_cast %278 : vector<128xf32> to vector<128x1xf32>
    %280 = tpu.reciprocal %279 {approx = true} : vector<128x1xf32> -> vector<128x1xf32>
    %281 = vector.broadcast %280 : vector<128x1xf32> to vector<128x128xf32>
    %282 = arith.mulf %277, %281 : vector<128x128xf32>
    %cst_120 = arith.constant dense<0.000000e+00> : vector<8x128xf32>
    %283 = tpu.matmul %266, %282, %cst_120 {dimension_numbers = #tpu.dot_dimension_numbers<[1], [1], [0], [0], [0, 0, 1, 0], [], []>} : vector<8x128xf32>, vector<128x128xf32>, vector<8x128xf32> -> vector<8x128xf32>
    %c1_121 = arith.constant 1 : index
    %c0_122 = arith.constant 0 : index
    %c0_123 = arith.constant 0 : index
    %284 = vector.load %arg18[%c1_121, %c0_122, %c0_123] : memref<4x32x8xf32, #tpu.memory_space<vmem>>, vector<1x32x8xf32>
    %285 = vector.shape_cast %284 : vector<1x32x8xf32> to vector<32x8xf32>
    %cst_124 = arith.constant dense<0.000000e+00> : vector<32x128xf32>
    %286 = tpu.matmul %285, %283, %cst_124 {dimension_numbers = #tpu.dot_dimension_numbers<[1], [0], [0], [1], [0, 0, 1, 1], [], []>} : vector<32x8xf32>, vector<8x128xf32>, vector<32x128xf32> -> vector<32x128xf32>
    %287 = arith.addf %264, %286 : vector<32x128xf32>
    %288 = vector.extract_strided_slice %238 {offsets = [48, 0], sizes = [8, 128], strides = [1, 1]} : vector<96x128xf32> to vector<8x128xf32>
    %289 = vector.extract_strided_slice %238 {offsets = [80, 0], sizes = [8, 128], strides = [1, 1]} : vector<96x128xf32> to vector<8x128xf32>
    %290 = vector.extract_strided_slice %240 {offsets = [0, 16], sizes = [128, 8], strides = [1, 1]} : vector<128x32xf32> to vector<128x8xf32>
    %cst_125 = arith.constant dense<0.000000e+00> : vector<128x128xf32>
    %291 = tpu.matmul %290, %288, %cst_125 {dimension_numbers = #tpu.dot_dimension_numbers<[1], [0], [0], [1], [0, 0, 1, 1], [], []>} : vector<128x8xf32>, vector<8x128xf32>, vector<128x128xf32> -> vector<128x128xf32>
    %cst_126 = arith.constant -1.000000e+04 : f32
    %292 = vector.shape_cast %8 : vector<1x128xi1> to vector<1x128xi1>
    %293 = vector.broadcast %292 : vector<1x128xi1> to vector<128x128xi1>
    %294 = vector.broadcast %cst_126 : f32 to vector<128x128xf32>
    %295 = arith.select %293, %291, %294 : vector<128x128xi1>, vector<128x128xf32>
    %cst_127 = arith.constant dense<0xFF800000> : vector<128xf32>
    %296 = vector.multi_reduction <maximumf>, %295, %cst_127 [1] : vector<128x128xf32> to vector<128xf32>
    %297 = vector.shape_cast %296 : vector<128xf32> to vector<128x1xf32>
    %298 = vector.broadcast %297 : vector<128x1xf32> to vector<128x128xf32>
    %299 = arith.subf %295, %298 : vector<128x128xf32>
    %300 = math.exp %299 : vector<128x128xf32>
    %cst_128 = arith.constant dense<0.000000e+00> : vector<128xf32>
    %301 = vector.multi_reduction <add>, %300, %cst_128 [1] : vector<128x128xf32> to vector<128xf32>
    %302 = vector.shape_cast %301 : vector<128xf32> to vector<128x1xf32>
    %303 = tpu.reciprocal %302 {approx = true} : vector<128x1xf32> -> vector<128x1xf32>
    %304 = vector.broadcast %303 : vector<128x1xf32> to vector<128x128xf32>
    %305 = arith.mulf %300, %304 : vector<128x128xf32>
    %cst_129 = arith.constant dense<0.000000e+00> : vector<8x128xf32>
    %306 = tpu.matmul %289, %305, %cst_129 {dimension_numbers = #tpu.dot_dimension_numbers<[1], [1], [0], [0], [0, 0, 1, 0], [], []>} : vector<8x128xf32>, vector<128x128xf32>, vector<8x128xf32> -> vector<8x128xf32>
    %c2_130 = arith.constant 2 : index
    %c0_131 = arith.constant 0 : index
    %c0_132 = arith.constant 0 : index
    %307 = vector.load %arg18[%c2_130, %c0_131, %c0_132] : memref<4x32x8xf32, #tpu.memory_space<vmem>>, vector<1x32x8xf32>
    %308 = vector.shape_cast %307 : vector<1x32x8xf32> to vector<32x8xf32>
    %cst_133 = arith.constant dense<0.000000e+00> : vector<32x128xf32>
    %309 = tpu.matmul %308, %306, %cst_133 {dimension_numbers = #tpu.dot_dimension_numbers<[1], [0], [0], [1], [0, 0, 1, 1], [], []>} : vector<32x8xf32>, vector<8x128xf32>, vector<32x128xf32> -> vector<32x128xf32>
    %310 = arith.addf %287, %309 : vector<32x128xf32>
    %311 = vector.extract_strided_slice %238 {offsets = [56, 0], sizes = [8, 128], strides = [1, 1]} : vector<96x128xf32> to vector<8x128xf32>
    %312 = vector.extract_strided_slice %238 {offsets = [88, 0], sizes = [8, 128], strides = [1, 1]} : vector<96x128xf32> to vector<8x128xf32>
    %313 = vector.extract_strided_slice %240 {offsets = [0, 24], sizes = [128, 8], strides = [1, 1]} : vector<128x32xf32> to vector<128x8xf32>
    %cst_134 = arith.constant dense<0.000000e+00> : vector<128x128xf32>
    %314 = tpu.matmul %313, %311, %cst_134 {dimension_numbers = #tpu.dot_dimension_numbers<[1], [0], [0], [1], [0, 0, 1, 1], [], []>} : vector<128x8xf32>, vector<8x128xf32>, vector<128x128xf32> -> vector<128x128xf32>
    %cst_135 = arith.constant -1.000000e+04 : f32
    %315 = vector.shape_cast %8 : vector<1x128xi1> to vector<1x128xi1>
    %316 = vector.broadcast %315 : vector<1x128xi1> to vector<128x128xi1>
    %317 = vector.broadcast %cst_135 : f32 to vector<128x128xf32>
    %318 = arith.select %316, %314, %317 : vector<128x128xi1>, vector<128x128xf32>
    %cst_136 = arith.constant dense<0xFF800000> : vector<128xf32>
    %319 = vector.multi_reduction <maximumf>, %318, %cst_136 [1] : vector<128x128xf32> to vector<128xf32>
    %320 = vector.shape_cast %319 : vector<128xf32> to vector<128x1xf32>
    %321 = vector.broadcast %320 : vector<128x1xf32> to vector<128x128xf32>
    %322 = arith.subf %318, %321 : vector<128x128xf32>
    %323 = math.exp %322 : vector<128x128xf32>
    %cst_137 = arith.constant dense<0.000000e+00> : vector<128xf32>
    %324 = vector.multi_reduction <add>, %323, %cst_137 [1] : vector<128x128xf32> to vector<128xf32>
    %325 = vector.shape_cast %324 : vector<128xf32> to vector<128x1xf32>
    %326 = tpu.reciprocal %325 {approx = true} : vector<128x1xf32> -> vector<128x1xf32>
    %327 = vector.broadcast %326 : vector<128x1xf32> to vector<128x128xf32>
    %328 = arith.mulf %323, %327 : vector<128x128xf32>
    %cst_138 = arith.constant dense<0.000000e+00> : vector<8x128xf32>
    %329 = tpu.matmul %312, %328, %cst_138 {dimension_numbers = #tpu.dot_dimension_numbers<[1], [1], [0], [0], [0, 0, 1, 0], [], []>} : vector<8x128xf32>, vector<128x128xf32>, vector<8x128xf32> -> vector<8x128xf32>
    %c3_139 = arith.constant 3 : index
    %c0_140 = arith.constant 0 : index
    %c0_141 = arith.constant 0 : index
    %330 = vector.load %arg18[%c3_139, %c0_140, %c0_141] : memref<4x32x8xf32, #tpu.memory_space<vmem>>, vector<1x32x8xf32>
    %331 = vector.shape_cast %330 : vector<1x32x8xf32> to vector<32x8xf32>
    %cst_142 = arith.constant dense<0.000000e+00> : vector<32x128xf32>
    %332 = tpu.matmul %331, %329, %cst_142 {dimension_numbers = #tpu.dot_dimension_numbers<[1], [0], [0], [1], [0, 0, 1, 1], [], []>} : vector<32x8xf32>, vector<8x128xf32>, vector<32x128xf32> -> vector<32x128xf32>
    %333 = arith.addf %310, %332 : vector<32x128xf32>
    %c0_143 = arith.constant 0 : index
    %c0_144 = arith.constant 0 : index
    %334 = vector.load %arg19[%c0_143, %c0_144] : memref<32x1xf32, #tpu.memory_space<vmem>>, vector<32x1xf32>
    %335 = vector.broadcast %334 : vector<32x1xf32> to vector<32x128xf32>
    %336 = arith.addf %333, %335 : vector<32x128xf32>
    %337 = arith.addf %233, %336 : vector<32x128xf32>
    %c0_145 = arith.constant 0 : index
    %c0_146 = arith.constant 0 : index
    %338 = vector.load %arg20[%c0_145, %c0_146] : memref<32x1xf32, #tpu.memory_space<vmem>>, vector<32x1xf32>
    %c0_147 = arith.constant 0 : index
    %c0_148 = arith.constant 0 : index
    %339 = vector.load %arg21[%c0_147, %c0_148] : memref<32x1xf32, #tpu.memory_space<vmem>>, vector<32x1xf32>
    %cst_149 = arith.constant dense<0.000000e+00> : vector<128xf32>
    %340 = vector.multi_reduction <add>, %337, %cst_149 [0] : vector<32x128xf32> to vector<128xf32>
    %341 = vector.shape_cast %340 : vector<128xf32> to vector<1x128xf32>
    %cst_150 = arith.constant 3.200000e+01 : f32
    %342 = vector.broadcast %cst_150 : f32 to vector<1x128xf32>
    %343 = arith.divf %341, %342 : vector<1x128xf32>
    %344 = arith.mulf %337, %337 : vector<32x128xf32>
    %cst_151 = arith.constant dense<0.000000e+00> : vector<128xf32>
    %345 = vector.multi_reduction <add>, %344, %cst_151 [0] : vector<32x128xf32> to vector<128xf32>
    %346 = vector.shape_cast %345 : vector<128xf32> to vector<1x128xf32>
    %cst_152 = arith.constant 3.200000e+01 : f32
    %347 = vector.broadcast %cst_152 : f32 to vector<1x128xf32>
    %348 = arith.divf %346, %347 : vector<1x128xf32>
    %349 = arith.mulf %343, %343 : vector<1x128xf32>
    %350 = arith.subf %348, %349 : vector<1x128xf32>
    %cst_153 = arith.constant 0.000000e+00 : f32
    %351 = vector.broadcast %cst_153 : f32 to vector<1x128xf32>
    %352 = arith.maximumf %350, %351 : vector<1x128xf32>
    %353 = vector.broadcast %343 : vector<1x128xf32> to vector<32x128xf32>
    %354 = arith.subf %337, %353 : vector<32x128xf32>
    %cst_154 = arith.constant 9.99999974E-6 : f32
    %355 = vector.broadcast %cst_154 : f32 to vector<1x128xf32>
    %356 = arith.addf %352, %355 : vector<1x128xf32>
    %357 = math.rsqrt %356 : vector<1x128xf32>
    %358 = vector.broadcast %357 : vector<1x128xf32> to vector<32x128xf32>
    %359 = arith.mulf %354, %358 : vector<32x128xf32>
    %360 = vector.broadcast %338 : vector<32x1xf32> to vector<32x128xf32>
    %361 = arith.mulf %359, %360 : vector<32x128xf32>
    %362 = vector.broadcast %339 : vector<32x1xf32> to vector<32x128xf32>
    %363 = arith.addf %361, %362 : vector<32x128xf32>
    %364 = vector.broadcast %6 : vector<1x128xf32> to vector<32x128xf32>
    %365 = arith.mulf %363, %364 : vector<32x128xf32>
    %c1_i32_155 = arith.constant 1 : i32
    %366 = vector.broadcast %c1_i32_155 : i32 to vector<1x128xi32>
    %367 = arith.cmpi sge, %2, %366 : vector<1x128xi32>
    %c1_i32_156 = arith.constant 1 : i32
    %368 = tpu.dynamic_rotate %365 by %c1_i32_156 dim 1 : vector<32x128xf32>, i32 -> vector<32x128xf32>
    %cst_157 = arith.constant 0.000000e+00 : f32
    %369 = vector.shape_cast %367 : vector<1x128xi1> to vector<1x128xi1>
    %370 = vector.broadcast %369 : vector<1x128xi1> to vector<32x128xi1>
    %371 = vector.broadcast %cst_157 : f32 to vector<32x128xf32>
    %372 = arith.select %370, %368, %371 : vector<32x128xi1>, vector<32x128xf32>
    %c127_i32_158 = arith.constant 127 : i32
    %373 = vector.broadcast %c127_i32_158 : i32 to vector<1x128xi32>
    %374 = arith.cmpi slt, %2, %373 : vector<1x128xi32>
    %c127_i32_159 = arith.constant 127 : i32
    %375 = tpu.dynamic_rotate %365 by %c127_i32_159 dim 1 : vector<32x128xf32>, i32 -> vector<32x128xf32>
    %cst_160 = arith.constant 0.000000e+00 : f32
    %376 = vector.shape_cast %374 : vector<1x128xi1> to vector<1x128xi1>
    %377 = vector.broadcast %376 : vector<1x128xi1> to vector<32x128xi1>
    %378 = vector.broadcast %cst_160 : f32 to vector<32x128xf32>
    %379 = arith.select %377, %375, %378 : vector<32x128xi1>, vector<32x128xf32>
    %c0_161 = arith.constant 0 : index
    %c0_162 = arith.constant 0 : index
    %c0_163 = arith.constant 0 : index
    %380 = vector.load %arg22[%c0_161, %c0_162, %c0_163] : memref<3x64x32xf32, #tpu.memory_space<vmem>>, vector<1x64x32xf32>
    %381 = vector.shape_cast %380 : vector<1x64x32xf32> to vector<64x32xf32>
    %cst_164 = arith.constant dense<0.000000e+00> : vector<64x128xf32>
    %382 = tpu.matmul %381, %372, %cst_164 {dimension_numbers = #tpu.dot_dimension_numbers<[1], [0], [0], [1], [0, 0, 1, 1], [], []>} : vector<64x32xf32>, vector<32x128xf32>, vector<64x128xf32> -> vector<64x128xf32>
    %c1_165 = arith.constant 1 : index
    %c0_166 = arith.constant 0 : index
    %c0_167 = arith.constant 0 : index
    %383 = vector.load %arg22[%c1_165, %c0_166, %c0_167] : memref<3x64x32xf32, #tpu.memory_space<vmem>>, vector<1x64x32xf32>
    %384 = vector.shape_cast %383 : vector<1x64x32xf32> to vector<64x32xf32>
    %cst_168 = arith.constant dense<0.000000e+00> : vector<64x128xf32>
    %385 = tpu.matmul %384, %365, %cst_168 {dimension_numbers = #tpu.dot_dimension_numbers<[1], [0], [0], [1], [0, 0, 1, 1], [], []>} : vector<64x32xf32>, vector<32x128xf32>, vector<64x128xf32> -> vector<64x128xf32>
    %386 = arith.addf %382, %385 : vector<64x128xf32>
    %c2_169 = arith.constant 2 : index
    %c0_170 = arith.constant 0 : index
    %c0_171 = arith.constant 0 : index
    %387 = vector.load %arg22[%c2_169, %c0_170, %c0_171] : memref<3x64x32xf32, #tpu.memory_space<vmem>>, vector<1x64x32xf32>
    %388 = vector.shape_cast %387 : vector<1x64x32xf32> to vector<64x32xf32>
    %cst_172 = arith.constant dense<0.000000e+00> : vector<64x128xf32>
    %389 = tpu.matmul %388, %379, %cst_172 {dimension_numbers = #tpu.dot_dimension_numbers<[1], [0], [0], [1], [0, 0, 1, 1], [], []>} : vector<64x32xf32>, vector<32x128xf32>, vector<64x128xf32> -> vector<64x128xf32>
    %390 = arith.addf %386, %389 : vector<64x128xf32>
    %c0_173 = arith.constant 0 : index
    %c0_174 = arith.constant 0 : index
    %391 = vector.load %arg23[%c0_173, %c0_174] : memref<64x1xf32, #tpu.memory_space<vmem>>, vector<64x1xf32>
    %392 = vector.broadcast %391 : vector<64x1xf32> to vector<64x128xf32>
    %393 = arith.addf %390, %392 : vector<64x128xf32>
    %cst_175 = arith.constant 0.000000e+00 : f32
    %394 = vector.broadcast %cst_175 : f32 to vector<64x128xf32>
    %395 = arith.maximumf %393, %394 : vector<64x128xf32>
    %396 = vector.broadcast %6 : vector<1x128xf32> to vector<64x128xf32>
    %397 = arith.mulf %395, %396 : vector<64x128xf32>
    %c1_i32_176 = arith.constant 1 : i32
    %398 = vector.broadcast %c1_i32_176 : i32 to vector<1x128xi32>
    %399 = arith.cmpi sge, %2, %398 : vector<1x128xi32>
    %c1_i32_177 = arith.constant 1 : i32
    %400 = tpu.dynamic_rotate %397 by %c1_i32_177 dim 1 : vector<64x128xf32>, i32 -> vector<64x128xf32>
    %cst_178 = arith.constant 0.000000e+00 : f32
    %401 = vector.shape_cast %399 : vector<1x128xi1> to vector<1x128xi1>
    %402 = vector.broadcast %401 : vector<1x128xi1> to vector<64x128xi1>
    %403 = vector.broadcast %cst_178 : f32 to vector<64x128xf32>
    %404 = arith.select %402, %400, %403 : vector<64x128xi1>, vector<64x128xf32>
    %c127_i32_179 = arith.constant 127 : i32
    %405 = vector.broadcast %c127_i32_179 : i32 to vector<1x128xi32>
    %406 = arith.cmpi slt, %2, %405 : vector<1x128xi32>
    %c127_i32_180 = arith.constant 127 : i32
    %407 = tpu.dynamic_rotate %397 by %c127_i32_180 dim 1 : vector<64x128xf32>, i32 -> vector<64x128xf32>
    %cst_181 = arith.constant 0.000000e+00 : f32
    %408 = vector.shape_cast %406 : vector<1x128xi1> to vector<1x128xi1>
    %409 = vector.broadcast %408 : vector<1x128xi1> to vector<64x128xi1>
    %410 = vector.broadcast %cst_181 : f32 to vector<64x128xf32>
    %411 = arith.select %409, %407, %410 : vector<64x128xi1>, vector<64x128xf32>
    %c0_182 = arith.constant 0 : index
    %c0_183 = arith.constant 0 : index
    %c0_184 = arith.constant 0 : index
    %412 = vector.load %arg24[%c0_182, %c0_183, %c0_184] : memref<3x32x64xf32, #tpu.memory_space<vmem>>, vector<1x32x64xf32>
    %413 = vector.shape_cast %412 : vector<1x32x64xf32> to vector<32x64xf32>
    %cst_185 = arith.constant dense<0.000000e+00> : vector<32x128xf32>
    %414 = tpu.matmul %413, %404, %cst_185 {dimension_numbers = #tpu.dot_dimension_numbers<[1], [0], [0], [1], [0, 0, 1, 1], [], []>} : vector<32x64xf32>, vector<64x128xf32>, vector<32x128xf32> -> vector<32x128xf32>
    %c1_186 = arith.constant 1 : index
    %c0_187 = arith.constant 0 : index
    %c0_188 = arith.constant 0 : index
    %415 = vector.load %arg24[%c1_186, %c0_187, %c0_188] : memref<3x32x64xf32, #tpu.memory_space<vmem>>, vector<1x32x64xf32>
    %416 = vector.shape_cast %415 : vector<1x32x64xf32> to vector<32x64xf32>
    %cst_189 = arith.constant dense<0.000000e+00> : vector<32x128xf32>
    %417 = tpu.matmul %416, %397, %cst_189 {dimension_numbers = #tpu.dot_dimension_numbers<[1], [0], [0], [1], [0, 0, 1, 1], [], []>} : vector<32x64xf32>, vector<64x128xf32>, vector<32x128xf32> -> vector<32x128xf32>
    %418 = arith.addf %414, %417 : vector<32x128xf32>
    %c2_190 = arith.constant 2 : index
    %c0_191 = arith.constant 0 : index
    %c0_192 = arith.constant 0 : index
    %419 = vector.load %arg24[%c2_190, %c0_191, %c0_192] : memref<3x32x64xf32, #tpu.memory_space<vmem>>, vector<1x32x64xf32>
    %420 = vector.shape_cast %419 : vector<1x32x64xf32> to vector<32x64xf32>
    %cst_193 = arith.constant dense<0.000000e+00> : vector<32x128xf32>
    %421 = tpu.matmul %420, %411, %cst_193 {dimension_numbers = #tpu.dot_dimension_numbers<[1], [0], [0], [1], [0, 0, 1, 1], [], []>} : vector<32x64xf32>, vector<64x128xf32>, vector<32x128xf32> -> vector<32x128xf32>
    %422 = arith.addf %418, %421 : vector<32x128xf32>
    %c0_194 = arith.constant 0 : index
    %c0_195 = arith.constant 0 : index
    %423 = vector.load %arg25[%c0_194, %c0_195] : memref<32x1xf32, #tpu.memory_space<vmem>>, vector<32x1xf32>
    %424 = vector.broadcast %423 : vector<32x1xf32> to vector<32x128xf32>
    %425 = arith.addf %422, %424 : vector<32x128xf32>
    %426 = vector.broadcast %6 : vector<1x128xf32> to vector<32x128xf32>
    %427 = arith.mulf %425, %426 : vector<32x128xf32>
    %428 = arith.addf %363, %427 : vector<32x128xf32>
    %c0_196 = arith.constant 0 : index
    %c0_197 = arith.constant 0 : index
    %429 = vector.load %arg26[%c0_196, %c0_197] : memref<32x1xf32, #tpu.memory_space<vmem>>, vector<32x1xf32>
    %c0_198 = arith.constant 0 : index
    %c0_199 = arith.constant 0 : index
    %430 = vector.load %arg27[%c0_198, %c0_199] : memref<32x1xf32, #tpu.memory_space<vmem>>, vector<32x1xf32>
    %cst_200 = arith.constant dense<0.000000e+00> : vector<128xf32>
    %431 = vector.multi_reduction <add>, %428, %cst_200 [0] : vector<32x128xf32> to vector<128xf32>
    %432 = vector.shape_cast %431 : vector<128xf32> to vector<1x128xf32>
    %cst_201 = arith.constant 3.200000e+01 : f32
    %433 = vector.broadcast %cst_201 : f32 to vector<1x128xf32>
    %434 = arith.divf %432, %433 : vector<1x128xf32>
    %435 = arith.mulf %428, %428 : vector<32x128xf32>
    %cst_202 = arith.constant dense<0.000000e+00> : vector<128xf32>
    %436 = vector.multi_reduction <add>, %435, %cst_202 [0] : vector<32x128xf32> to vector<128xf32>
    %437 = vector.shape_cast %436 : vector<128xf32> to vector<1x128xf32>
    %cst_203 = arith.constant 3.200000e+01 : f32
    %438 = vector.broadcast %cst_203 : f32 to vector<1x128xf32>
    %439 = arith.divf %437, %438 : vector<1x128xf32>
    %440 = arith.mulf %434, %434 : vector<1x128xf32>
    %441 = arith.subf %439, %440 : vector<1x128xf32>
    %cst_204 = arith.constant 0.000000e+00 : f32
    %442 = vector.broadcast %cst_204 : f32 to vector<1x128xf32>
    %443 = arith.maximumf %441, %442 : vector<1x128xf32>
    %444 = vector.broadcast %434 : vector<1x128xf32> to vector<32x128xf32>
    %445 = arith.subf %428, %444 : vector<32x128xf32>
    %cst_205 = arith.constant 9.99999974E-6 : f32
    %446 = vector.broadcast %cst_205 : f32 to vector<1x128xf32>
    %447 = arith.addf %443, %446 : vector<1x128xf32>
    %448 = math.rsqrt %447 : vector<1x128xf32>
    %449 = vector.broadcast %448 : vector<1x128xf32> to vector<32x128xf32>
    %450 = arith.mulf %445, %449 : vector<32x128xf32>
    %451 = vector.broadcast %429 : vector<32x1xf32> to vector<32x128xf32>
    %452 = arith.mulf %450, %451 : vector<32x128xf32>
    %453 = vector.broadcast %430 : vector<32x1xf32> to vector<32x128xf32>
    %454 = arith.addf %452, %453 : vector<32x128xf32>
    %455 = vector.broadcast %6 : vector<1x128xf32> to vector<32x128xf32>
    %456 = arith.mulf %454, %455 : vector<32x128xf32>
    %c0_206 = arith.constant 0 : index
    %c0_207 = arith.constant 0 : index
    %457 = vector.load %arg28[%c0_206, %c0_207] : memref<32x32xf32, #tpu.memory_space<vmem>>, vector<32x32xf32>
    %cst_208 = arith.constant dense<0.000000e+00> : vector<32x128xf32>
    %458 = tpu.matmul %457, %456, %cst_208 {dimension_numbers = #tpu.dot_dimension_numbers<[1], [0], [0], [1], [0, 0, 1, 1], [], []>} : vector<32x32xf32>, vector<32x128xf32>, vector<32x128xf32> -> vector<32x128xf32>
    %c0_209 = arith.constant 0 : index
    %c0_210 = arith.constant 0 : index
    %459 = vector.load %arg29[%c0_209, %c0_210] : memref<32x1xf32, #tpu.memory_space<vmem>>, vector<32x1xf32>
    %460 = vector.broadcast %459 : vector<32x1xf32> to vector<32x128xf32>
    %461 = arith.addf %458, %460 : vector<32x128xf32>
    %462 = vector.broadcast %6 : vector<1x128xf32> to vector<32x128xf32>
    %463 = arith.mulf %461, %462 : vector<32x128xf32>
    %464 = vector.extract_strided_slice %463 {offsets = [0, 0], sizes = [16, 128], strides = [1, 1]} : vector<32x128xf32> to vector<16x128xf32>
    %465 = vector.extract_strided_slice %463 {offsets = [16, 0], sizes = [16, 128], strides = [1, 1]} : vector<32x128xf32> to vector<16x128xf32>
    %c0_211 = arith.constant 0 : index
    %c0_212 = arith.constant 0 : index
    %c0_213 = arith.constant 0 : index
    %466 = vector.load %arg3[%c0_211, %c0_212, %c0_213] : memref<1x16x128xf32, #tpu.memory_space<vmem>>, vector<1x16x128xf32>
    %467 = vector.shape_cast %466 : vector<1x16x128xf32> to vector<16x128xf32>
    %468 = math.exp %465 : vector<16x128xf32>
    %469 = arith.mulf %467, %468 : vector<16x128xf32>
    %cst_214 = arith.constant 1.000000e+00 : f32
    %470 = vector.broadcast %cst_214 : f32 to vector<16x128xf32>
    %471 = arith.mulf %469, %470 : vector<16x128xf32>
    %472 = arith.addf %464, %471 : vector<16x128xf32>
    %473 = vector.broadcast %6 : vector<1x128xf32> to vector<16x128xf32>
    %474 = arith.mulf %472, %473 : vector<16x128xf32>
    %c0_215 = arith.constant 0 : index
    %c0_216 = arith.constant 0 : index
    %c0_217 = arith.constant 0 : index
    %475 = vector.load %arg30[%c0_215, %c0_216, %c0_217] : memref<1x48x128xf32, #tpu.memory_space<vmem>>, vector<1x16x128xf32>
    %476 = vector.shape_cast %475 : vector<1x16x128xf32> to vector<16x128xf32>
    %477 = vector.shape_cast %474 : vector<16x128xf32> to vector<1x16x128xf32>
    tpu.vector_store %arg30[%c0_215, %c0_216, %c0_217], %477 {strides = array<i32>} : memref<1x48x128xf32, #tpu.memory_space<vmem>>, vector<1x16x128xf32>,
    %c0_218 = arith.constant 0 : index
    %c16 = arith.constant 16 : index
    %c0_219 = arith.constant 0 : index
    %478 = vector.load %arg30[%c0_218, %c16, %c0_219] : memref<1x48x128xf32, #tpu.memory_space<vmem>>, vector<1x16x128xf32>
    %479 = vector.shape_cast %478 : vector<1x16x128xf32> to vector<16x128xf32>
    %480 = vector.shape_cast %464 : vector<16x128xf32> to vector<1x16x128xf32>
    tpu.vector_store %arg30[%c0_218, %c16, %c0_219], %480 {strides = array<i32>} : memref<1x48x128xf32, #tpu.memory_space<vmem>>, vector<1x16x128xf32>,
    %c0_220 = arith.constant 0 : index
    %c32 = arith.constant 32 : index
    %c0_221 = arith.constant 0 : index
    %481 = vector.load %arg30[%c0_220, %c32, %c0_221] : memref<1x48x128xf32, #tpu.memory_space<vmem>>, vector<1x16x128xf32>
    %482 = vector.shape_cast %481 : vector<1x16x128xf32> to vector<16x128xf32>
    %483 = vector.shape_cast %465 : vector<16x128xf32> to vector<1x16x128xf32>
    tpu.vector_store %arg30[%c0_220, %c32, %c0_221], %483 {strides = array<i32>} : memref<1x48x128xf32, #tpu.memory_space<vmem>>, vector<1x16x128xf32>,
    return
  }
  func.func @transform_0(%arg0: i32, %arg1: memref<2xi32, #tpu.memory_space<smem>>) -> (i32, i32, i32) {
    %c0_i32 = arith.constant 0 : i32
    %c0_i32_0 = arith.constant 0 : i32
    %c0_i32_1 = arith.constant 0 : i32
    return %arg0, %c0_i32, %c0_i32_0 : i32, i32, i32
  }
  func.func @transform_1(%arg0: i32, %arg1: memref<2xi32, #tpu.memory_space<smem>>) -> (i32, i32, i32) {
    %c0_i32 = arith.constant 0 : i32
    %c0_i32_0 = arith.constant 0 : i32
    %c0_i32_1 = arith.constant 0 : i32
    return %arg0, %c0_i32, %c0_i32_0 : i32, i32, i32
  }
  func.func @transform_2(%arg0: i32, %arg1: memref<2xi32, #tpu.memory_space<smem>>) -> (i32, i32) {
    %c0_i32 = arith.constant 0 : i32
    %c0_i32_0 = arith.constant 0 : i32
    %c0_i32_1 = arith.constant 0 : i32
    return %c0_i32, %c0_i32_0 : i32, i32
  }
  func.func @transform_3(%arg0: i32, %arg1: memref<2xi32, #tpu.memory_space<smem>>) -> (i32, i32) {
    %c0_i32 = arith.constant 0 : i32
    %c0_i32_0 = arith.constant 0 : i32
    %c0_i32_1 = arith.constant 0 : i32
    return %c0_i32, %c0_i32_0 : i32, i32
  }
  func.func @transform_4(%arg0: i32, %arg1: memref<2xi32, #tpu.memory_space<smem>>) -> (i32, i32, i32) {
    %c0_i32 = arith.constant 0 : i32
    %c0_i32_0 = arith.constant 0 : i32
    %c0_i32_1 = arith.constant 0 : i32
    %c0_i32_2 = arith.constant 0 : i32
    return %c0_i32, %c0_i32_0, %c0_i32_1 : i32, i32, i32
  }
  func.func @transform_5(%arg0: i32, %arg1: memref<2xi32, #tpu.memory_space<smem>>) -> (i32, i32) {
    %c0_i32 = arith.constant 0 : i32
    %c0_i32_0 = arith.constant 0 : i32
    %c0_i32_1 = arith.constant 0 : i32
    return %c0_i32, %c0_i32_0 : i32, i32
  }
  func.func @transform_6(%arg0: i32, %arg1: memref<2xi32, #tpu.memory_space<smem>>) -> (i32, i32) {
    %c0_i32 = arith.constant 0 : i32
    %c0_i32_0 = arith.constant 0 : i32
    %c0_i32_1 = arith.constant 0 : i32
    return %c0_i32, %c0_i32_0 : i32, i32
  }
  func.func @transform_7(%arg0: i32, %arg1: memref<2xi32, #tpu.memory_space<smem>>) -> (i32, i32) {
    %c0_i32 = arith.constant 0 : i32
    %c0_i32_0 = arith.constant 0 : i32
    %c0_i32_1 = arith.constant 0 : i32
    return %c0_i32, %c0_i32_0 : i32, i32
  }
  func.func @transform_8(%arg0: i32, %arg1: memref<2xi32, #tpu.memory_space<smem>>) -> (i32, i32, i32) {
    %c0_i32 = arith.constant 0 : i32
    %c0_i32_0 = arith.constant 0 : i32
    %c0_i32_1 = arith.constant 0 : i32
    %c0_i32_2 = arith.constant 0 : i32
    return %c0_i32, %c0_i32_0, %c0_i32_1 : i32, i32, i32
  }
  func.func @transform_9(%arg0: i32, %arg1: memref<2xi32, #tpu.memory_space<smem>>) -> (i32, i32) {
    %c0_i32 = arith.constant 0 : i32
    %c0_i32_0 = arith.constant 0 : i32
    %c0_i32_1 = arith.constant 0 : i32
    return %c0_i32, %c0_i32_0 : i32, i32
  }
  func.func @transform_10(%arg0: i32, %arg1: memref<2xi32, #tpu.memory_space<smem>>) -> (i32, i32, i32) {
    %c0_i32 = arith.constant 0 : i32
    %c0_i32_0 = arith.constant 0 : i32
    %c0_i32_1 = arith.constant 0 : i32
    %c0_i32_2 = arith.constant 0 : i32
    return %c0_i32, %c0_i32_0, %c0_i32_1 : i32, i32, i32
  }
  func.func @transform_11(%arg0: i32, %arg1: memref<2xi32, #tpu.memory_space<smem>>) -> (i32, i32) {
    %c0_i32 = arith.constant 0 : i32
    %c0_i32_0 = arith.constant 0 : i32
    %c0_i32_1 = arith.constant 0 : i32
    return %c0_i32, %c0_i32_0 : i32, i32
  }
  func.func @transform_12(%arg0: i32, %arg1: memref<2xi32, #tpu.memory_space<smem>>) -> (i32, i32) {
    %c0_i32 = arith.constant 0 : i32
    %c0_i32_0 = arith.constant 0 : i32
    %c0_i32_1 = arith.constant 0 : i32
    return %c0_i32, %c0_i32_0 : i32, i32
  }
  func.func @transform_13(%arg0: i32, %arg1: memref<2xi32, #tpu.memory_space<smem>>) -> (i32, i32) {
    %c0_i32 = arith.constant 0 : i32
    %c0_i32_0 = arith.constant 0 : i32
    %c0_i32_1 = arith.constant 0 : i32
    return %c0_i32, %c0_i32_0 : i32, i32
  }
  func.func @transform_14(%arg0: i32, %arg1: memref<2xi32, #tpu.memory_space<smem>>) -> (i32, i32) {
    %c0_i32 = arith.constant 0 : i32
    %c0_i32_0 = arith.constant 0 : i32
    %c0_i32_1 = arith.constant 0 : i32
    return %c0_i32, %c0_i32_0 : i32, i32
  }
  func.func @transform_15(%arg0: i32, %arg1: memref<2xi32, #tpu.memory_space<smem>>) -> (i32, i32) {
    %c0_i32 = arith.constant 0 : i32
    %c0_i32_0 = arith.constant 0 : i32
    %c0_i32_1 = arith.constant 0 : i32
    return %c0_i32, %c0_i32_0 : i32, i32
  }
  func.func @transform_16(%arg0: i32, %arg1: memref<2xi32, #tpu.memory_space<smem>>) -> (i32, i32, i32) {
    %c0_i32 = arith.constant 0 : i32
    %c0_i32_0 = arith.constant 0 : i32
    %c0_i32_1 = arith.constant 0 : i32
    %c0_i32_2 = arith.constant 0 : i32
    return %c0_i32, %c0_i32_0, %c0_i32_1 : i32, i32, i32
  }
  func.func @transform_17(%arg0: i32, %arg1: memref<2xi32, #tpu.memory_space<smem>>) -> (i32, i32) {
    %c0_i32 = arith.constant 0 : i32
    %c0_i32_0 = arith.constant 0 : i32
    %c0_i32_1 = arith.constant 0 : i32
    return %c0_i32, %c0_i32_0 : i32, i32
  }
  func.func @transform_18(%arg0: i32, %arg1: memref<2xi32, #tpu.memory_space<smem>>) -> (i32, i32) {
    %c0_i32 = arith.constant 0 : i32
    %c0_i32_0 = arith.constant 0 : i32
    %c0_i32_1 = arith.constant 0 : i32
    return %c0_i32, %c0_i32_0 : i32, i32
  }
  func.func @transform_19(%arg0: i32, %arg1: memref<2xi32, #tpu.memory_space<smem>>) -> (i32, i32) {
    %c0_i32 = arith.constant 0 : i32
    %c0_i32_0 = arith.constant 0 : i32
    %c0_i32_1 = arith.constant 0 : i32
    return %c0_i32, %c0_i32_0 : i32, i32
  }
  func.func @transform_20(%arg0: i32, %arg1: memref<2xi32, #tpu.memory_space<smem>>) -> (i32, i32, i32) {
    %c0_i32 = arith.constant 0 : i32
    %c0_i32_0 = arith.constant 0 : i32
    %c0_i32_1 = arith.constant 0 : i32
    %c0_i32_2 = arith.constant 0 : i32
    return %c0_i32, %c0_i32_0, %c0_i32_1 : i32, i32, i32
  }
  func.func @transform_21(%arg0: i32, %arg1: memref<2xi32, #tpu.memory_space<smem>>) -> (i32, i32) {
    %c0_i32 = arith.constant 0 : i32
    %c0_i32_0 = arith.constant 0 : i32
    %c0_i32_1 = arith.constant 0 : i32
    return %c0_i32, %c0_i32_0 : i32, i32
  }
  func.func @transform_22(%arg0: i32, %arg1: memref<2xi32, #tpu.memory_space<smem>>) -> (i32, i32, i32) {
    %c0_i32 = arith.constant 0 : i32
    %c0_i32_0 = arith.constant 0 : i32
    %c0_i32_1 = arith.constant 0 : i32
    %c0_i32_2 = arith.constant 0 : i32
    return %c0_i32, %c0_i32_0, %c0_i32_1 : i32, i32, i32
  }
  func.func @transform_23(%arg0: i32, %arg1: memref<2xi32, #tpu.memory_space<smem>>) -> (i32, i32) {
    %c0_i32 = arith.constant 0 : i32
    %c0_i32_0 = arith.constant 0 : i32
    %c0_i32_1 = arith.constant 0 : i32
    return %c0_i32, %c0_i32_0 : i32, i32
  }
  func.func @transform_24(%arg0: i32, %arg1: memref<2xi32, #tpu.memory_space<smem>>) -> (i32, i32) {
    %c0_i32 = arith.constant 0 : i32
    %c0_i32_0 = arith.constant 0 : i32
    %c0_i32_1 = arith.constant 0 : i32
    return %c0_i32, %c0_i32_0 : i32, i32
  }
  func.func @transform_25(%arg0: i32, %arg1: memref<2xi32, #tpu.memory_space<smem>>) -> (i32, i32) {
    %c0_i32 = arith.constant 0 : i32
    %c0_i32_0 = arith.constant 0 : i32
    %c0_i32_1 = arith.constant 0 : i32
    return %c0_i32, %c0_i32_0 : i32, i32
  }
  func.func @transform_26(%arg0: i32, %arg1: memref<2xi32, #tpu.memory_space<smem>>) -> (i32, i32) {
    %c0_i32 = arith.constant 0 : i32
    %c0_i32_0 = arith.constant 0 : i32
    %c0_i32_1 = arith.constant 0 : i32
    return %c0_i32, %c0_i32_0 : i32, i32
  }
  func.func @transform_27(%arg0: i32, %arg1: memref<2xi32, #tpu.memory_space<smem>>) -> (i32, i32) {
    %c0_i32 = arith.constant 0 : i32
    %c0_i32_0 = arith.constant 0 : i32
    %c0_i32_1 = arith.constant 0 : i32
    return %c0_i32, %c0_i32_0 : i32, i32
  }
  func.func @transform_28(%arg0: i32, %arg1: memref<2xi32, #tpu.memory_space<smem>>) -> (i32, i32, i32) {
    %c0_i32 = arith.constant 0 : i32
    %c0_i32_0 = arith.constant 0 : i32
    %c0_i32_1 = arith.constant 0 : i32
    return %arg0, %c0_i32, %c0_i32_0 : i32, i32, i32
  }
}

</mosaic_0001>

<bundles_post_ra>
// kernel: prosody_encoder_forward.1
= control target key start
LH: loop header
LB: loop body
LE: loop exit
PB: predicated region body
PF: predicated region fallthrough
CT: control target
= control target key end

     0   :  { %s10660_s6 = smov 1   ;;  %s10661_s10 = smov 2   ;;  %s13409_s0 = inlined_call_operand.smem [shape: u32[30], index: -1, kind: input, shape index: {}] }
   0x1   :  { %s10706_s5 = sld [smem:[%s13409_s0]]   ;;  %s10662_s14 = smov 3  }
   0x2   :  { %s10711_s9 = sld [smem:[%s13409_s0 + %s10660_s6]]   ;;  %s10663_s18 = smov 4  }
   0x3   :  { %s10716_s13 = sld [smem:[%s13409_s0 + %s10661_s10]]   ;;  %s10664_s22 = smov 5  }
   0x4   :  { %s10721_s17 = sld [smem:[%s13409_s0 + %s10662_s14]]   ;;  %s10665_s26 = smov 6  }
   0x5   :  { %s10726_s21 = sld [smem:[%s13409_s0 + %s10663_s18]]   ;;  %s10666_s30 = smov 7  }
   0x6   :  { %s10731_s25 = sld [smem:[%s13409_s0 + %s10664_s22]]   ;;  %s10667_s4 = smov 8  }
   0x7   :  { %s10736_s29 = sld [smem:[%s13409_s0 + %s10665_s26]]   ;;  %s10668_s10 = smov 9  }
   0x8   :  { %s10741_s3 = sld [smem:[%s13409_s0 + %s10666_s30]]   ;;  %s10669_s15 = smov 10  }
   0x9   :  { %13461 = sst [smem:[#allocation5_spill]] %s10716_s13  ;;  %s10670_s20 = smov 11  }
   0xa   :  { %s10746_s8 = sld [smem:[%s13409_s0 + %s10667_s4]]   ;;  %s10671_s26 = smov 12  }
   0xb   :  { %s10751_s14 = sld [smem:[%s13409_s0 + %s10668_s10]]   ;;  %s10672_s1 = smov 13  }
   0xc   :  { %s10756_s19 = sld [smem:[%s13409_s0 + %s10669_s15]]   ;;  %s10673_s7 = smov 14  }
   0xd   :  { %s10761_s24 = sld [smem:[%s13409_s0 + %s10670_s20]]   ;;  %s10674_s15 = smov 15  }
   0xe   :  { %s10766_s30 = sld [smem:[%s13409_s0 + %s10671_s26]]   ;;  %s10675_s22 = smov 16  }
   0xf   :  { %s10771_s6 = sld [smem:[%s13409_s0 + %s10672_s1]]   ;;  %s10676_s28 = smov 17  }
  0x10   :  { %s10776_s12 = sld [smem:[%s13409_s0 + %s10673_s7]]   ;;  %s10677_s7 = smov 18  }
  0x11   :  { %s10781_s20 = sld [smem:[%s13409_s0 + %s10674_s15]]   ;;  %s10678_s15 = smov 19  }
  0x12   :  { %s10786_s27 = sld [smem:[%s13409_s0 + %s10675_s22]]   ;;  %s10679_s22 = smov 20  }
  0x13   :  { %s10791_s4 = sld [smem:[%s13409_s0 + %s10676_s28]]   ;;  %s10680_s28 = smov 21  }
  0x14   :  { %s10796_s13 = sld [smem:[%s13409_s0 + %s10677_s7]]   ;;  %s10681_s7 = smov 22  }
  0x15   :  { %s10806_s1 = sld [smem:[%s13409_s0 + %s10679_s22]]   ;;  %s10683_s22 = smov 24  }
  0x16   :  { %s10811_s10 = sld [smem:[%s13409_s0 + %s10680_s28]]  }
  0x17   :  { %13462 = sst [smem:[#allocation6_spill]] %s10781_s20 }
  0x18   :  { %13463 = sst [smem:[#allocation7_spill]] %s10786_s27 }
  0x19   :  { %13464 = sst [smem:[#allocation8_spill]] %s10791_s4  ;;  %s10684_s4 = smov 25  }
  0x1a   :  { %13465 = sst [smem:[#allocation9_spill]] %s10796_s13  ;;  %s10685_s13 = smov 26  }
  0x1b   :  { %s10801_s20 = sld [smem:[%s13409_s0 + %s10678_s15]]   ;;  %s10682_s15 = smov 23  }
  0x1c   :  { %13467 = sst [smem:[#allocation11_spill]] %s10806_s1  ;;  %s64_s1 = sshll.u32 %s10706_s5, 4  ;;  %s65_s1 = int_to_ptr.vmem [resolvable:$true] %s64_s1 }
  0x1d   :  { %13468 = sst [smem:[#allocation12_spill]] %s10811_s10  ;;  %p10643_p1 = scmp.lt.s32.totalorder %s65_s1, %s65_s1 }
  0x1e   :  { %s10816_s16 = sld [smem:[%s13409_s0 + %s10681_s7]]   ;;  %s10638_s7 = scalar_lea.vmem %s65_s1, 16 }
  0x1f   :  { %s10821_s23 = sld [smem:[%s13409_s0 + %s10682_s15]]   ;;  %p10639_p0 = scmp.ne.s32.totalorder %s65_s1, %s10638_s7 }
  0x20   :  { %s10826_s27 = sld [smem:[%s13409_s0 + %s10683_s22]]   ;;  %s10687_s22 = smov 28  }
  0x21   :  { %13466 = sst [smem:[#allocation10_spill]] %s10801_s20  ;;  %s10686_s20 = smov 27  }
  0x22   :  { %s10831_s10 = sld [smem:[%s13409_s0 + %s10684_s4]]   ;;  %s10688_s4 = smov 29  }
  0x23   :  { %s10847_s28 = sld [smem:[%s13409_s0 + %s10687_s22]]   ;;  %p10644_p2 = scmp.lt.s32.totalorder %s10638_s7, %s10638_s7 }
  0x24   :  { %13469 = sst [smem:[#allocation13_spill]] %s10816_s16 }
  0x25   :  { %13470 = sst [smem:[#allocation14_spill]] %s10821_s23  ;;  %p10645_p3 = por %p10644_p2, %p10643_p1 }
  0x26   :  { %13471 = sst [smem:[#allocation15_spill]] %s10826_s27 }
  0x27   :  { %s10836_s16 = sld [smem:[%s13409_s0 + %s10685_s13]]   ;;  %p10646_p4 = pnand %p10645_p3, %p10639_p0 }
  0x28   :  { %13472 = sst [smem:[#allocation16_spill]] %s10831_s10 }
  0x29   :  { %s10841_s23 = sld [smem:[%s13409_s0 + %s10686_s20]]  }
  0x2a   :  { %s10852_s13 = sld [smem:[%s13409_s0 + %s10688_s4]]  }
  0x2b   :  { %10649 = shalt.err (!%p10646_p4)  }
  0x2c   :  { %s10689_s5 = smov [#allocation3]  }
  0x2d   :  { %67 = dma.vmem_to_smem %s65_s1, 16, %s10689_s5, [#allocation2] }
  0x2e   :  { %10654 = dma.done.wait [#allocation2], 16 }
  0x2f   :  { %10655 = vsyncadd [#allocation2], 4294967280 }
  0x30   :  { %69 = sfence }
  0x31   :  { %s10854_s27 = smov 0  }
  0x32 LB: > { %s8304_s0 = sadd.s32 4294967295, %s10658_s27   ;;  %p8308_p5 = scmp.ge.s32.totalorder %s10658_s27, 1  ;;  %s10658_s27 = sphi %s10854_s27, %s75_s27  }
  0x33   : > { %p809_p6 = scmp.lt.s32.totalorder %s10658_s27, 3 }
  0x35   : > { %p810_p7 = pnand %p8308_p5, %p809_p6 }
  0x37   : > { %813 = sbr.rel (%p810_p7) target bundleno = 8045 (0x1f6d), region = 132 }
  0x3c   : > { %p888_p8 = scmp.lt.s32.totalorder %s8304_s0, 1  ;;  %s903_s10 = sld [smem:[#allocation3 + %s8304_s0]]  ;;  %v904_v0 = vlaneseq  ;;  %v918_v1 = vld [vmem:[%s10721_s17] sm:$0xff]  ;;  %vm1002_vm0 = vcmask 261120   ;;  %v10690_v2 = vmov 0   ;;  %v932_v4 = vld [vmem:[%s10726_s21 + $0x10] sm:$0xff] }
  0x3d   : > { %9203 = vmatprep.mubr.msk.f32.mxu0 %vm1002_vm0, %v918_v1  ;;  %10112 = vset.pattern.permute.xlu0 %v10690_v2  ;;  %v930_v3 = vld [vmem:[%s10726_s21] sm:$0xff]  ;;  %v931_v6 = vld [vmem:[%s10726_s21 + $0x8] sm:$0xff]  ;;  %v933_v7 = vld [vmem:[%s10726_s21 + $0x18] sm:$0xff]  ;;  %v13474_v10 = vmov 0  ;;  %v13421_v12 = vmov 0.0   ;;  %vm1196_vm2 = vcmask 64512  }
  0x3e   : > { %s13544_s0 = smov (!%p888_p8, %s8304_s0), 1  ;;  %10113 = vset.pattern.permute.xlu1 %v10690_v2  ;;  %v10868_v5 = vand.u32 127, %v904_v0  ;;  %944 = vperm.xlu0 %10112, %v930_v3   ;;  %v935_v15 = vld [vmem:[%s10726_s21 + $0x28] sm:$0xff]  ;;  %v934_v20 = vld [vmem:[%s10726_s21 + $0x20] sm:$0xff]  ;;  %v920_v23 = vld [vmem:[%s10721_s17 + $0x10] sm:$0xff]  ;;  %s10692_s15 = smov 120  }
  0x3f   : > { %954 = vperm.xlu1 %10113, %v932_v4   ;;  %s8697_s11 = sshll.u32 %s13544_s0, 5  ;;  %v919_v22 = vld [vmem:[%s10721_s17 + $0x8] sm:$0xff]  ;;  %v921_v24 = vld [vmem:[%s10721_s17 + $0x18] sm:$0xff]  ;;  %v922_v25 = vld [vmem:[%s10721_s17 + $0x20] sm:$0xff]  ;;  %vm10693_vm3 = vmmov 0   ;;  %s10694_s18 = smov 112  }
  0x40   : > { %13473 = vst [vmem:[#allocation17_spill] sm:$0xff] %v10868_v5  ;;  %s892_s20 = scalar_lea.vmem %s10711_s9, %s8697_s11  ;;  %v923_v26 = vld [vmem:[%s10721_s17 + $0x28] sm:$0xff]  ;;  %v924_v45 = vld [vmem:[%s10721_s17 + $0x30] sm:$0xff]  ;;  %v925_v46 = vld [vmem:[%s10721_s17 + $0x38] sm:$0xff]  ;;  %s10695_s1 = smov 104   ;;  %vm4063_vm6 = vcmask 523264  }
  0x41   : > { %v913_v9 = vld [vmem:[%s892_s20 + $0x18] sm:$0xff]  ;;  %v912_v11 = vld [vmem:[%s892_s20 + $0x10] sm:$0xff]  ;;  %v911_v14 = vld [vmem:[%s892_s20 + $0x8] sm:$0xff]  ;;  %s10696_s22 = smov 1   ;;  %s10697_s26 = smov 127  }
  0x42   : > { %v906_v8 = vstv %s903_s10  ;;  %949 = vperm.xlu0 %10112, %v931_v6   ;;  %v910_v18 = vld [vmem:[%s892_s20] sm:$0xff]  ;;  %v927_v48 = vld [vmem:[%s10721_s17 + $0x48] sm:$0xff]  ;;  %v928_v49 = vld [vmem:[%s10721_s17 + $0x50] sm:$0xff]  ;;  %s13510_s4 = sld [smem:[#allocation7_spill]] }
  0x43   : > { %vm10875_vm1 = vcmp.lt.s32.totalorder %v10868_v5, %v906_v8  ;;  %959 = vperm.xlu1 %10113, %v933_v7   ;;  %v926_v47 = vld [vmem:[%s10721_s17 + $0x40] sm:$0xff]  ;;  %v929_v50 = vld [vmem:[%s10721_s17 + $0x58] sm:$0xff]  ;;  %s13511_s2 = sld [smem:[#allocation6_spill]] }
  0x44   : > { %v13475_v10 = vsel %vm10875_vm1, 4294967295, %v13474_v10  ;;  %v10882_v13 = vsel %vm10875_vm1, 1.0, %v13421_v12  ;;  %s13526_s7 = sld [smem:[#allocation8_spill]] }
  0x45   : > { %13476 = vst [vmem:[#allocation18_spill] sm:$0xff] %v13475_v10  ;;  %13477 = vst [vmem:[#allocation19_spill] sm:$0xff] %v10882_v13  ;;  %v10886_v16 = vmul.f32 %v10882_v13, %v913_v9  ;;  %v10889_v17 = vmul.f32 %v10882_v13, %v912_v11  ;;  %v10893_v19 = vmul.f32 %v10882_v13, %v911_v14  ;;  %s13528_s5 = sld [smem:[#allocation9_spill]] }
  0x46   : > { %v10899_v21 = vmul.f32 %v10882_v13, %v910_v18  ;;  %s13529_s10 = sld [smem:[#allocation10_spill]] }
  0x47   : > { %13478 = vst [vmem:[#allocation20_spill] sm:$0xff] %v10886_v16  ;;  %13479 = vst [vmem:[#allocation21_spill] sm:$0xff] %v10889_v17  ;;  %9195 = vmatprep.subr.mxu0 %v10886_v16  ;;  %969 = vperm.xlu1 %10113, %v935_v15   ;;  %s13530_s11 = sld [smem:[#allocation11_spill]] }
  0x48   : > { %13480 = vst [vmem:[#allocation22_spill] sm:$0xff] %v10893_v19  ;;  %9196 = vmatpush3.msra.mxu0 %v10886_v16  ;;  %13481 = vst [vmem:[#allocation23_spill] sm:$0xff] %v10899_v21  ;;  %s13531_s20 = sld [smem:[#allocation12_spill]] }
  0x49   : > { %9197 = vmatprep.subr.mxu0 %v10889_v17 }
  0x4a   : > { %9198 = vmatpush3.msra.mxu0 %v10889_v17 }
  0x4b   : > { %9199 = vmatprep.subr.mxu0 %v10893_v19  ;;  %964 = vperm.xlu1 %10113, %v934_v20  }
  0x4c   : > { %9200 = vmatpush3.msra.mxu0 %v10893_v19 }
  0x4d   : > { %9201 = vmatprep.subr.mxu0 %v10899_v21 }
  0x4e   : > { %9202 = vmatpush3.msra.mxu0 %v10899_v21 }
  0x4f   : > { %9204 = vmatmul.mubr.msk.f32.vlgmr.msra.gmra.mxu0 %vm1002_vm0, %v919_v22 }
  0x50   : > { %9206 = vmatprep.mubr.msk.f32.mxu0 %vm1002_vm0, %v920_v23 }
  0x53   : > { %9207 = vmatmul.mubr.msk.f32.gmra.mxu0 %vm1002_vm0, %v921_v24 }
  0x54   : > { %9209 = vmatprep.mubr.msk.f32.mxu0 %vm1002_vm0, %v922_v25 }
  0x57   : > { %9210 = vmatmul.mubr.msk.f32.gmra.mxu0 %vm1002_vm0, %v923_v26 }
  0x58   : > { %9212 = vmatprep.mubr.msk.f32.mxu0 %vm1002_vm0, %v924_v45 }
  0x5b   : > { %9213 = vmatmul.mubr.msk.f32.gmra.mxu0 %vm1002_vm0, %v925_v46 }
  0x5c   : > { %9215 = vmatprep.mubr.msk.f32.mxu0 %vm1002_vm0, %v926_v47 }
  0x5f   : > { %9216 = vmatmul.mubr.msk.f32.gmra.mxu0 %vm1002_vm0, %v927_v48 }
  0x60   : > { %9218 = vmatprep.mubr.msk.f32.mxu0 %vm1002_vm0, %v928_v49 }
  0x63   : > { %9219 = vmatmul.mubr.msk.f32.gmra.mxu0 %vm1002_vm0, %v929_v50 }
  0xb9   : > { %v945_v29 = vpop.permute.xlu0 %944 }
  0xba   : > { %v955_v27 = vpop.permute.xlu1 %954 }
  0xbd   : > { %v950_v34 = vpop.permute.xlu0 %949 }
  0xbe   : > { %v960_v28 = vpop.permute.xlu1 %959 }
  0xc2   : > { %v970_v32 = vpop.permute.xlu1 %969 }
  0xc6   : > { %v965_v39 = vpop.permute.xlu1 %964 }
 0x10f   : > { %v9205_v30 = vpop.f32.mrf.mxu0 }
 0x110   : > { %v1111_v37 = vadd.f32 %v9205_v30, %v950_v34 }
 0x111   : > { %v1105_v31 = vpop.f32.mrf.mxu0 }
 0x112   : > { %v1106_v33 = vadd.f32 %v1105_v31, %v945_v29 }
 0x113   : > { %v9208_v35 = vpop.f32.mrf.mxu0 }
 0x114   : > { %1164 = vxpose.xlu0.b32.start [1/4] (short) %v1106_v33, 128  ;;  %v1121_v44 = vadd.f32 %v9208_v35, %v960_v28 }
 0x115   : > { %v1115_v36 = vpop.f32.mrf.mxu0 }
 0x116   : > { %v1116_v42 = vadd.f32 %v1115_v36, %v955_v27 }
 0x117   : > { %v9211_v38 = vpop.f32.mrf.mxu0 }
 0x118   : > { %v1131_v40 = vadd.f32 %v9211_v38, %v970_v32  ;;  %1165 = vxpose.xlu0.b32.cont [2/4] (short) %v1111_v37, 128 }
 0x119   : > { %v1125_v41 = vpop.f32.mrf.mxu0 }
 0x11a   : > { %9282 = vmatprep.subr.mxu0 %v1131_v40  ;;  %v1126_v43 = vadd.f32 %v1125_v41, %v965_v39 }
 0x11b   : > { %9283 = vmatpush3.msra.mxu0 %v1131_v40  ;;  %v11086_v47 = vpop.f32.mrf.mxu0 }
 0x11c   : > { %9221 = vmatprep.subr.mxu1 %v1126_v43  ;;  %1166 = vxpose.xlu0.b32.cont [3/4] (short) %v1116_v42, 128  ;;  %13486 = vst [vmem:[#allocation28_spill] sm:$0xff] %v11086_v47 }
 0x11d   : > { %9222 = vmatpush3.msra.mxu1 %v1126_v43  ;;  %9308 = vmatprep.subr.mxu0 %v13421_v12  ;;  %v11088_v48 = vpop.f32.mrf.mxu0 }
 0x11e   : > { %9247 = vmatprep.subr.mxu1 %v13421_v12  ;;  %13487 = vst [vmem:[#allocation29_spill] sm:$0xff] %v11088_v48 }
 0x11f   : > { %v11090_v49 = vpop.f32.mrf.mxu0 }
 0x120   : > { %1167 = vxpose.xlu0.b32.end [4/4] (short) %v1121_v44, 128  ;;  %13488 = vst [vmem:[#allocation30_spill] sm:$0xff] %v11090_v49 }
 0x121   : > { %v11092_v50 = vpop.f32.mrf.mxu0 }
 0x122   : > { %13489 = vst [vmem:[#allocation31_spill] sm:$0xff] %v11092_v50 }
 0x190   : > { %v10930_v51 = vpop.trf.xlu0 }
 0x191   : > { %9223 = vmatprep.mubr.msk.f32.mxu1 %vm1196_vm2, %v10930_v51  ;;  %1625 = vrot.lane.b32.xlu1 %v10930_v51, %s10692_s15 }
 0x194   : > { %v10936_v52 = vpop.trf.xlu0 }
 0x195   : > { %9224 = vmatmul.mubr.msk.f32.vlgmr.msra.gmra.mxu1 %vm1196_vm2, %v10936_v52  ;;  %1627 = vrot.lane.b32.xlu1 %v10936_v52, %s10692_s15 }
 0x198   : > { %v10942_v53 = vpop.trf.xlu0 }
 0x199   : > { %9226 = vmatprep.mubr.msk.f32.mxu1 %vm1196_vm2, %v10942_v53  ;;  %1629 = vrot.lane.b32.xlu1 %v10942_v53, %s10692_s15 }
 0x19c   : > { %v10948_v54 = vpop.trf.xlu0 }
 0x19d   : > { %9227 = vmatmul.mubr.msk.f32.gmra.mxu1 %vm1196_vm2, %v10948_v54  ;;  %1631 = vrot.lane.b32.xlu1 %v10948_v54, %s10692_s15 }
 0x1a0   : > { %v10954_v55 = vpop.trf.xlu0 }
 0x1a1   : > { %9229 = vmatprep.mubr.msk.f32.mxu1 %vm1196_vm2, %v10954_v55  ;;  %1633 = vrot.lane.b32.xlu1 %v10954_v55, %s10692_s15 }
 0x1a4   : > { %v10960_v56 = vpop.trf.xlu0 }
 0x1a5   : > { %9230 = vmatmul.mubr.msk.f32.gmra.mxu1 %vm1196_vm2, %v10960_v56  ;;  %1635 = vrot.lane.b32.xlu1 %v10960_v56, %s10692_s15 }
 0x1a8   : > { %v10966_v57 = vpop.trf.xlu0 }
 0x1a9   : > { %9232 = vmatprep.mubr.msk.f32.mxu1 %vm1196_vm2, %v10966_v57  ;;  %1637 = vrot.lane.b32.xlu1 %v10966_v57, %s10692_s15 }
 0x1ac   : > { %v10972_v58 = vpop.trf.xlu0 }
 0x1ad   : > { %9233 = vmatmul.mubr.msk.f32.gmra.mxu1 %vm1196_vm2, %v10972_v58  ;;  %1639 = vrot.lane.b32.xlu1 %v10972_v58, %s10692_s15 }
 0x1b0   : > { %v10978_v59 = vpop.trf.xlu0 }
 0x1b1   : > { %9235 = vmatprep.mubr.msk.f32.mxu1 %vm1196_vm2, %v10978_v59  ;;  %1641 = vrot.lane.b32.xlu1 %v10978_v59, %s10692_s15 }
 0x1b4   : > { %v10984_v60 = vpop.trf.xlu0 }
 0x1b5   : > { %9236 = vmatmul.mubr.msk.f32.gmra.mxu1 %vm1196_vm2, %v10984_v60  ;;  %1643 = vrot.lane.b32.xlu0 %v10984_v60, %s10692_s15 }
 0x1b8   : > { %v10990_v61 = vpop.trf.xlu0 }
 0x1b9   : > { %9238 = vmatprep.mubr.msk.f32.mxu1 %vm1196_vm2, %v10990_v61  ;;  %1645 = vrot.lane.b32.xlu1 %v10990_v61, %s10692_s15 }
 0x1bc   : > { %v10996_v62 = vpop.trf.xlu0 }
 0x1bd   : > { %9239 = vmatmul.mubr.msk.f32.gmra.mxu1 %vm1196_vm2, %v10996_v62  ;;  %1647 = vrot.lane.b32.xlu1 %v10996_v62, %s10692_s15 }
 0x1c0   : > { %v11002_v63 = vpop.trf.xlu0 }
 0x1c1   : > { %13482 = vst [vmem:[#allocation24_spill] sm:$0xff] %v11002_v63  ;;  %9241 = vmatprep.mubr.msk.f32.mxu1 %vm1196_vm2, %v11002_v63  ;;  %1649 = vrot.lane.b32.xlu1 %v11002_v63, %s10692_s15 }
 0x1c4   : > { %v11008_v0 = vpop.trf.xlu0 }
 0x1c5   : > { %13483 = vst [vmem:[#allocation25_spill] sm:$0xff] %v11008_v0  ;;  %9242 = vmatmul.mubr.msk.f32.gmra.mxu1 %vm1196_vm2, %v11008_v0  ;;  %1651 = vrot.lane.b32.xlu1 %v11008_v0, %s10692_s15 }
 0x1c8   : > { %v11014_v1 = vpop.trf.xlu0 }
 0x1c9   : > { %13484 = vst [vmem:[#allocation26_spill] sm:$0xff] %v11014_v1  ;;  %9244 = vmatprep.mubr.msk.f32.mxu1 %vm1196_vm2, %v11014_v1  ;;  %1653 = vrot.lane.b32.xlu1 %v11014_v1, %s10692_s15 }
 0x1cc   : > { %v11020_v2 = vpop.trf.xlu0 }
 0x1cd   : > { %13485 = vst [vmem:[#allocation27_spill] sm:$0xff] %v11020_v2  ;;  %9245 = vmatmul.mubr.msk.f32.gmra.mxu1 %vm1196_vm2, %v11020_v2  ;;  %1655 = vrot.lane.b32.xlu1 %v11020_v2, %s10692_s15 }
 0x203   : > { %v1626_v3 = vpop.permute.xlu1 %1625 }
 0x204   : > { %9284 = vmatprep.mubr.msk.f32.mxu0 %vm1196_vm2, %v1626_v3  ;;  %v11094_v3 = vpop.f32.mrf.mxu0 }
 0x205   : > { %13490 = vst [vmem:[#allocation32_spill] sm:$0xff] %v11094_v3 }
 0x207   : > { %v1628_v4 = vpop.permute.xlu1 %1627 }
 0x208   : > { %9285 = vmatmul.mubr.msk.f32.vlgmr.msra.gmra.mxu0 %vm1196_vm2, %v1628_v4  ;;  %v11096_v4 = vpop.f32.mrf.mxu0 }
 0x209   : > { %13491 = vst [vmem:[#allocation33_spill] sm:$0xff] %v11096_v4 }
 0x20b   : > { %v1630_v6 = vpop.permute.xlu1 %1629 }
 0x20c   : > { %9287 = vmatprep.mubr.msk.f32.mxu0 %vm1196_vm2, %v1630_v6 }
 0x20f   : > { %v1632_v7 = vpop.permute.xlu1 %1631 }
 0x210   : > { %9288 = vmatmul.mubr.msk.f32.gmra.mxu0 %vm1196_vm2, %v1632_v7 }
 0x213   : > { %v1634_v8 = vpop.permute.xlu1 %1633 }
 0x214   : > { %9290 = vmatprep.mubr.msk.f32.mxu0 %vm1196_vm2, %v1634_v8 }
 0x217   : > { %v1636_v9 = vpop.permute.xlu1 %1635 }
 0x218   : > { %9291 = vmatmul.mubr.msk.f32.gmra.mxu0 %vm1196_vm2, %v1636_v9 }
 0x21b   : > { %v1638_v11 = vpop.permute.xlu1 %1637 }
 0x21c   : > { %9293 = vmatprep.mubr.msk.f32.mxu0 %vm1196_vm2, %v1638_v11 }
 0x21f   : > { %v1640_v14 = vpop.permute.xlu1 %1639 }
 0x220   : > { %9294 = vmatmul.mubr.msk.f32.gmra.mxu0 %vm1196_vm2, %v1640_v14 }
 0x223   : > { %v1642_v15 = vpop.permute.xlu1 %1641 }
 0x224   : > { %9296 = vmatprep.mubr.msk.f32.mxu0 %vm1196_vm2, %v1642_v15 }
 0x227   : > { %v1644_v18 = vpop.permute.xlu0 %1643 }
 0x228   : > { %9297 = vmatmul.mubr.msk.f32.gmra.mxu0 %vm1196_vm2, %v1644_v18 }
 0x22b   : > { %v1646_v20 = vpop.permute.xlu1 %1645 }
 0x22c   : > { %9299 = vmatprep.mubr.msk.f32.mxu0 %vm1196_vm2, %v1646_v20 }
 0x22f   : > { %v1648_v22 = vpop.permute.xlu1 %1647 }
 0x230   : > { %9300 = vmatmul.mubr.msk.f32.gmra.mxu0 %vm1196_vm2, %v1648_v22 }
 0x233   : > { %v1650_v23 = vpop.permute.xlu1 %1649 }
 0x234   : > { %9302 = vmatprep.mubr.msk.f32.mxu0 %vm1196_vm2, %v1650_v23 }
 0x237   : > { %v1652_v24 = vpop.permute.xlu1 %1651 }
 0x238   : > { %9303 = vmatmul.mubr.msk.f32.gmra.mxu0 %vm1196_vm2, %v1652_v24 }
 0x23b   : > { %v1654_v25 = vpop.permute.xlu1 %1653 }
 0x23c   : > { %9305 = vmatprep.mubr.msk.f32.mxu0 %vm1196_vm2, %v1654_v25 }
 0x23f   : > { %v1656_v26 = vpop.permute.xlu1 %1655 }
 0x240   : > { %9306 = vmatmul.mubr.msk.f32.gmra.mxu0 %vm1196_vm2, %v1656_v26 }
 0x255   : > { %v11042_v27 = vpop.f32.mrf.mxu1 }
 0x257   : > { %v11044_v28 = vpop.f32.mrf.mxu1 }
 0x25d   : > { %v11046_v29 = vpop.f32.mrf.mxu1 }
 0x25f   : > { %v11048_v30 = vpop.f32.mrf.mxu1 }
 0x265   : > { %v11050_v31 = vpop.f32.mrf.mxu1 }
 0x266   : > { %v11218_v17 = vsel %vm10875_vm1, %v11050_v31, -10000.0  ;;  %v11236_v31 = vsel %vm10875_vm1, %v11048_v30, -10000.0 }
 0x267   : > { %v11052_v32 = vpop.f32.mrf.mxu1 }
 0x268   : > { %v11224_v16 = vsel %vm10875_vm1, %v11052_v32, -10000.0  ;;  %v11242_v32 = vsel %vm10875_vm1, %v11042_v27, -10000.0 }
 0x26d   : > { %v11054_v33 = vpop.f32.mrf.mxu1 }
 0x26f   : > { %v11056_v34 = vpop.f32.mrf.mxu1 }
 0x275   : > { %v11058_v35 = vpop.f32.mrf.mxu1 }
 0x277   : > { %v11060_v36 = vpop.f32.mrf.mxu1 }
 0x27d   : > { %v11062_v37 = vpop.f32.mrf.mxu1 }
 0x27f   : > { %v11064_v38 = vpop.f32.mrf.mxu1 }
 0x285   : > { %v9243_v39 = vpop.f32.mrf.mxu1 }
 0x286   : > { %v11068_v40 = vsel %vm10875_vm1, %v9243_v39, -10000.0 }
 0x287   : > { %v1371_v41 = vpop.f32.mrf.mxu1  ;;  %1433 = vmax.xlane.f32.xlu1 %v11068_v40 }
 0x288   : > { %v11073_v42 = vsel %vm10875_vm1, %v1371_v41, -10000.0 }
 0x289   : > { %1431 = vmax.xlane.f32.xlu0 %v11073_v42 }
 0x28d   : > { %v9246_v43 = vpop.f32.mrf.mxu1 }
 0x28e   : > { %v11078_v44 = vsel %vm10875_vm1, %v9246_v43, -10000.0 }
 0x28f   : > { %v1381_v45 = vpop.f32.mrf.mxu1  ;;  %1437 = vmax.xlane.f32.xlu1 %v11078_v44 }
 0x290   : > { %v11083_v46 = vsel %vm10875_vm1, %v1381_v45, -10000.0 }
 0x293   : > { %1435 = vmax.xlane.f32.xlu1 %v11083_v46 }
 0x2c8   : > { %v9286_v6 = vpop.f32.mrf.mxu0 }
 0x2ca   : > { %v1755_v7 = vpop.f32.mrf.mxu0 }
 0x2d0   : > { %v9289_v8 = vpop.f32.mrf.mxu0 }
 0x2d1   : > { %v11115_v26 = vsel %vm10875_vm1, %v9289_v8, -10000.0  ;;  %v11130_v8 = vsel %vm10875_vm1, %v9286_v6, -10000.0 }
 0x2d2   : > { %v1765_v9 = vpop.f32.mrf.mxu0 }
 0x2d3   : > { %v11125_v43 = vsel %vm10875_vm1, %v1765_v9, -10000.0  ;;  %v11140_v9 = vsel %vm10875_vm1, %v1755_v7, -10000.0 }
 0x2d8   : > { %v9292_v11 = vpop.f32.mrf.mxu0 }
 0x2d9   : > { %v11105_v22 = vsel %vm10875_vm1, %v9292_v11, -10000.0 }
 0x2da   : > { %v1775_v14 = vpop.f32.mrf.mxu0 }
 0x2db   : > { %v11110_v24 = vsel %vm10875_vm1, %v1775_v14, -10000.0 }
 0x2e0   : > { %v9295_v15 = vpop.f32.mrf.mxu0 }
 0x2e2   : > { %v1785_v18 = vpop.f32.mrf.mxu0 }
 0x2e3   : > { %v11100_v20 = vsel %vm10875_vm1, %v1785_v18, -10000.0 }
 0x2e4   : > { %1862 = vmax.xlane.f32.xlu0 %v11100_v20 }
 0x2e8   : > { %1860 = vmax.xlane.f32.xlu0 %v11105_v22  ;;  %v9298_v23 = vpop.f32.mrf.mxu0 }
 0x2ea   : > { %v1795_v25 = vpop.f32.mrf.mxu0 }
 0x2ec   : > { %1858 = vmax.xlane.f32.xlu0 %v11110_v24 }
 0x2f0   : > { %1856 = vmax.xlane.f32.xlu0 %v11115_v26  ;;  %v9301_v39 = vpop.f32.mrf.mxu0 }
 0x2f1   : > { %v11120_v41 = vsel %vm10875_vm1, %v9301_v39, -10000.0  ;;  %v11151_v39 = vsel %vm10875_vm1, %v11044_v28, -10000.0  ;;  %v11166_v28 = vsel %vm10875_vm1, %v11062_v37, -10000.0  ;;  %v11188_v37 = vsel %vm10875_vm1, %v11058_v35, -10000.0 }
 0x2f2   : > { %1872 = vmax.xlane.f32.xlu1 %v11120_v41  ;;  %v1805_v45 = vpop.f32.mrf.mxu0  ;;  %v11205_v35 = vsel %vm10875_vm1, %v11054_v33, -10000.0 }
 0x2f4   : > { %1854 = vmax.xlane.f32.xlu0 %v11125_v43 }
 0x2f8   : > { %1852 = vmax.xlane.f32.xlu0 %v11130_v8  ;;  %v9304_v11 = vpop.f32.mrf.mxu0 }
 0x2f9   : > { %v11135_v14 = vsel %vm10875_vm1, %v9304_v11, -10000.0 }
 0x2fa   : > { %1876 = vmax.xlane.f32.xlu1 %v11135_v14  ;;  %v1815_v18 = vpop.f32.mrf.mxu0 }
 0x2fb   : > { %v11145_v6 = vsel %vm10875_vm1, %v1815_v18, -10000.0  ;;  %v11160_v18 = vsel %vm10875_vm1, %v1805_v45, -10000.0  ;;  %v11182_v45 = vsel %vm10875_vm1, %v1795_v25, -10000.0 }
 0x2fc   : > { %1850 = vmax.xlane.f32.xlu0 %v11140_v9 }
 0x2fe   : > { %1874 = vmax.xlane.f32.xlu1 %v11145_v6 }
 0x300   : > { %1407 = vmax.xlane.f32.xlu0 %v11151_v39  ;;  %v9307_v11 = vpop.f32.mrf.mxu0 }
 0x301   : > { %v1849_v7 = vsel %vm10875_vm1, %v9307_v11, -10000.0  ;;  %v11171_v11 = vsel %vm10875_vm1, %v9298_v23, -10000.0  ;;  %v11193_v23 = vsel %vm10875_vm1, %v9295_v15, -10000.0  ;;  %v11211_v15 = vsel %vm10875_vm1, %v11056_v34, -10000.0 }
 0x302   : > { %1880 = vmax.xlane.f32.xlu1 %v1849_v7  ;;  %v1825_v12 = vpop.f32.mrf.mxu0 }
 0x303   : > { %v1848_v5 = vsel %vm10875_vm1, %v1825_v12, -10000.0  ;;  %v11177_v12 = vsel %vm10875_vm1, %v11064_v38, -10000.0  ;;  %v11199_v38 = vsel %vm10875_vm1, %v11060_v36, -10000.0 }
 0x306   : > { %1878 = vmax.xlane.f32.xlu1 %v1848_v5 }
 0x30a   : > { %1870 = vmax.xlane.f32.xlu1 %v11160_v18 }
 0x30e   : > { %1429 = vmax.xlane.f32.xlu1 %v11166_v28 }
 0x310   : > { %v1434_v25 = vpop.xlane.xlu1 %1433 }
 0x311   : > { %v1452_v47 = vsub.f32 %v11068_v40, %v1434_v25 }
 0x312   : > { %1868 = vmax.xlane.f32.xlu1 %v11171_v11  ;;  %v1432_v10 = vpop.xlane.xlu0 %1431 }
 0x313   : > { %v1481_v2 = vmul.f32 1.442695, %v1452_v47  ;;  %v1451_v1 = vsub.f32 %v11073_v42, %v1432_v10 }
 0x316   : > { %1427 = vmax.xlane.f32.xlu1 %v11177_v12 }
 0x318   : > { %v1438_v13 = vpop.xlane.xlu1 %1437 }
 0x319   : > { %v1454_v36 = vsub.f32 %v11078_v44, %v1438_v13  ;;  %v11230_v13 = vsel %vm10875_vm1, %v11046_v29, -10000.0 }
 0x31a   : > { %1866 = vmax.xlane.f32.xlu1 %v11182_v45 }
 0x31b   : > { %v1485_v33 = vmul.f32 1.442695, %v1454_v36 }
 0x31c   : > { %v1436_v29 = vpop.xlane.xlu1 %1435 }
 0x31d   : > { %10114 = vpow2.f32 %v1485_v33  ;;  %v1453_v30 = vsub.f32 %v11083_v46, %v1436_v29 }
 0x31e   : > { %1425 = vmax.xlane.f32.xlu1 %v11188_v37 }
 0x31f   : > { %v1483_v4 = vmul.f32 1.442695, %v1453_v30 }
 0x322   : > { %1864 = vmax.xlane.f32.xlu1 %v11193_v23 }
 0x326   : > { %1423 = vmax.xlane.f32.xlu1 %v11199_v38 }
 0x32a   : > { %1421 = vmax.xlane.f32.xlu1 %v11205_v35  ;;  %v11245_v34 = vpop.eup %10114 }
 0x32e   : > { %1419 = vmax.xlane.f32.xlu1 %v11211_v15 }
 0x332   : > { %1417 = vmax.xlane.f32.xlu1 %v11218_v17 }
 0x336   : > { %1415 = vmax.xlane.f32.xlu1 %v11224_v16 }
 0x33a   : > { %1413 = vmax.xlane.f32.xlu1 %v11230_v13 }
 0x33e   : > { %1411 = vmax.xlane.f32.xlu1 %v11236_v31 }
 0x342   : > { %1409 = vmax.xlane.f32.xlu1 %v11242_v32 }
 0x346   : > { %1517 = vadd.xlane.f32.xlu1 %v11245_v34 }
 0x37b   : > { %v1873_v44 = vpop.xlane.xlu1 %1872 }
 0x383   : > { %v1877_v36 = vpop.xlane.xlu1 %1876 }
 0x384   : > { %v1895_v48 = vsub.f32 %v11135_v14, %v1877_v36 }
 0x386   : > { %v1924_v63 = vmul.f32 1.442695, %v1895_v48 }
 0x387   : > { %v1875_v33 = vpop.xlane.xlu1 %1874 }
 0x388   : > { %v1894_v46 = vsub.f32 %v11145_v6, %v1875_v33 }
 0x38b   : > { %v1881_v21 = vpop.xlane.xlu1 %1880 }
 0x38c   : > { %v1897_v19 = vsub.f32 %v1849_v7, %v1881_v21  ;;  %v1893_v21 = vsub.f32 %v11120_v41, %v1873_v44  ;;  %v1922_v7 = vmul.f32 1.442695, %v1894_v46 }
 0x38e   : > { %v1928_v3 = vmul.f32 1.442695, %v1897_v19  ;;  %v1479_v19 = vmul.f32 1.442695, %v1451_v1  ;;  %v1920_v47 = vmul.f32 1.442695, %v1893_v21 }
 0x38f   : > { %v1879_v27 = vpop.xlane.xlu1 %1878 }
 0x390   : > { %10116 = vpow2.f32 %v1928_v3  ;;  %v1896_v50 = vsub.f32 %v1848_v5, %v1879_v27  ;;  %v1863_v5 = vpop.xlane.xlu0 %1862 }
 0x391   : > { %10118 = vpow2.f32 %v1483_v4 }
 0x392   : > { %v1926_v49 = vmul.f32 1.442695, %v1896_v50 }
 0x393   : > { %v1871_v0 = vpop.xlane.xlu1 %1870 }
 0x394   : > { %10120 = vpow2.f32 %v1926_v49  ;;  %v1892_v10 = vsub.f32 %v11160_v18, %v1871_v0 }
 0x395   : > { %10122 = vpow2.f32 %v1481_v2 }
 0x396   : > { %10124 = vpow2.f32 %v1924_v63  ;;  %v1918_v1 = vmul.f32 1.442695, %v1892_v10  ;;  %v1861_v63 = vpop.xlane.xlu0 %1860 }
 0x397   : > { %v1430_v40 = vpop.xlane.xlu1 %1429  ;;  %10126 = vpow2.f32 %v1479_v19 }
 0x398   : > { %v1450_v3 = vsub.f32 %v11166_v28, %v1430_v40  ;;  %10128 = vpow2.f32 %v1922_v7 }
 0x399   : > { %10130 = vpow2.f32 %v1920_v47  ;;  %v1887_v47 = vsub.f32 %v11105_v22, %v1861_v63 }
 0x39a   : > { %v1477_v48 = vmul.f32 1.442695, %v1450_v3 }
 0x39b   : > { %v1869_v42 = vpop.xlane.xlu1 %1868 }
 0x39c   : > { %10132 = vpow2.f32 %v1477_v48  ;;  %v1891_v4 = vsub.f32 %v11171_v11, %v1869_v42  ;;  %v1859_v11 = vpop.xlane.xlu0 %1858 }
 0x39d   : > { %v11256_v50 = vpop.eup %10116  ;;  %10134 = vpow2.f32 %v1918_v1  ;;  %v1908_v1 = vmul.f32 1.442695, %v1887_v47 }
 0x39e   : > { %1960 = vadd.xlane.f32.xlu1 %v11256_v50  ;;  %v11259_v49 = vpop.eup %10118  ;;  %v1916_v28 = vmul.f32 1.442695, %v1891_v4 }
 0x39f   : > { %v1428_v2 = vpop.xlane.xlu1 %1427 }
 0x3a0   : > { %v1449_v41 = vsub.f32 %v11177_v12, %v1428_v2  ;;  %v1857_v21 = vpop.xlane.xlu0 %1856  ;;  %v1886_v2 = vsub.f32 %v11110_v24, %v1859_v11 }
 0x3a1   : > { %v11263_v14 = vpop.eup %10120 }
 0x3a2   : > { %v1475_v0 = vmul.f32 1.442695, %v1449_v41  ;;  %1515 = vadd.xlane.f32.xlu1 %v11259_v49  ;;  %1958 = vadd.xlane.f32.xlu0 %v11263_v14  ;;  %v11267_v18 = vpop.eup %10122 }
 0x3a3   : > { %v1867_v6 = vpop.xlane.xlu1 %1866  ;;  %v11270_v29 = vpop.eup %10124 }
 0x3a4   : > { %10136 = vpow2.f32 %v1475_v0  ;;  %v1890_v25 = vsub.f32 %v11182_v45, %v1867_v6  ;;  %v11274_v36 = vpop.eup %10126  ;;  %v1888_v45 = vsub.f32 %v11100_v20, %v1863_v5  ;;  %v1855_v48 = vpop.xlane.xlu0 %1854  ;;  %v1885_v0 = vsub.f32 %v11115_v26, %v1857_v21 }
 0x3a5   : > { %10138 = vpow2.f32 %v1916_v28  ;;  %v11277_v30 = vpop.eup %10128 }
 0x3a6   : > { %1513 = vadd.xlane.f32.xlu1 %v11267_v18  ;;  %1956 = vadd.xlane.f32.xlu0 %v11270_v29  ;;  %v1914_v12 = vmul.f32 1.442695, %v1890_v25  ;;  %v11282_v19 = vpop.eup %10130  ;;  %v1910_v3 = vmul.f32 1.442695, %v1888_v45 }
 0x3a7   : > { %v1426_v44 = vpop.xlane.xlu1 %1425 }
 0x3a8   : > { %v1448_v33 = vsub.f32 %v11188_v37, %v1426_v44  ;;  %10140 = vpow2.f32 %v1914_v12  ;;  %v1853_v25 = vpop.xlane.xlu0 %1852  ;;  %v1884_v44 = vsub.f32 %v11125_v43, %v1855_v48 }
 0x3a9   : > { %v11285_v7 = vpop.eup %10132  ;;  %v1883_v21 = vsub.f32 %v11130_v8, %v1853_v25 }
 0x3aa   : > { %v1473_v27 = vmul.f32 1.442695, %v1448_v33  ;;  %1954 = vadd.xlane.f32.xlu0 %v11277_v30  ;;  %1511 = vadd.xlane.f32.xlu1 %v11274_v36  ;;  %v11290_v20 = vpop.eup %10134 }
 0x3ab   : > { %v1865_v46 = vpop.xlane.xlu1 %1864 }
 0x3ac   : > { %10142 = vpow2.f32 %v1473_v27  ;;  %v1889_v40 = vsub.f32 %v11193_v23, %v1865_v46  ;;  %v1851_v45 = vpop.xlane.xlu0 %1850 }
 0x3ae   : > { %v1912_v37 = vmul.f32 1.442695, %v1889_v40  ;;  %1952 = vadd.xlane.f32.xlu0 %v11282_v19  ;;  %1509 = vadd.xlane.f32.xlu1 %v11285_v7 }
 0x3af   : > { %v1424_v10 = vpop.xlane.xlu1 %1423 }
 0x3b0   : > { %10144 = vpow2.f32 %v1912_v37  ;;  %v1447_v5 = vsub.f32 %v11199_v38, %v1424_v10  ;;  %v1906_v38 = vmul.f32 1.442695, %v1886_v2  ;;  %v1882_v10 = vsub.f32 %v11140_v9, %v1851_v45  ;;  %v1408_v8 = vpop.xlane.xlu0 %1407 }
 0x3b1   : > { %v11293_v42 = vpop.eup %10136  ;;  %10146 = vpow2.f32 %v1910_v3 }
 0x3b2   : > { %v1471_v23 = vmul.f32 1.442695, %v1447_v5  ;;  %1950 = vadd.xlane.f32.xlu0 %v11290_v20  ;;  %1507 = vadd.xlane.f32.xlu1 %v11293_v42  ;;  %v11299_v63 = vpop.eup %10138  ;;  %v1898_v2 = vmul.f32 1.442695, %v1882_v10  ;;  %v938_v10 = vld [vmem:[%s10726_s21 + $0x40] sm:$0xff] }
 0x3b3   : > { %v1422_v4 = vpop.xlane.xlu1 %1421 }
 0x3b4   : > { %10148 = vpow2.f32 %v1471_v23  ;;  %v1446_v22 = vsub.f32 %v11205_v35, %v1422_v4  ;;  %v1904_v35 = vmul.f32 1.442695, %v1885_v0  ;;  %v1439_v4 = vsub.f32 %v11151_v39, %v1408_v8  ;;  %v13495_v8 = vld [vmem:[#allocation26_spill] sm:$0xff] }
 0x3b5   : > { %10150 = vpow2.f32 %v1908_v1  ;;  %v11303_v28 = vpop.eup %10140 }
 0x3b6   : > { %v1469_v41 = vmul.f32 1.442695, %v1446_v22  ;;  %1948 = vadd.xlane.f32.xlu0 %v11299_v63  ;;  %v1455_v0 = vmul.f32 1.442695, %v1439_v4 }
 0x3b7   : > { %v1420_v6 = vpop.xlane.xlu1 %1419 }
 0x3b8   : > { %10152 = vpow2.f32 %v1469_v41  ;;  %v1445_v24 = vsub.f32 %v11211_v15, %v1420_v6  ;;  %v1902_v15 = vmul.f32 1.442695, %v1884_v44 }
 0x3b9   : > { %v11306_v11 = vpop.eup %10142  ;;  %10154 = vpow2.f32 %v1906_v38 }
 0x3ba   : > { %v1467_v12 = vmul.f32 1.442695, %v1445_v24  ;;  %1946 = vadd.xlane.f32.xlu0 %v11303_v28  ;;  %1505 = vadd.xlane.f32.xlu1 %v11306_v11 }
 0x3bb   : > { %v1418_v33 = vpop.xlane.xlu1 %1417 }
 0x3bc   : > { %10156 = vpow2.f32 %v1467_v12  ;;  %v1444_v26 = vsub.f32 %v11218_v17, %v1418_v33  ;;  %v1900_v17 = vmul.f32 1.442695, %v1883_v21 }
 0x3bd   : > { %v11312_v27 = vpop.eup %10144  ;;  %10158 = vpow2.f32 %v1904_v35 }
 0x3be   : > { %v1465_v46 = vmul.f32 1.442695, %v1444_v26  ;;  %1944 = vadd.xlane.f32.xlu0 %v11312_v27  ;;  %v11316_v37 = vpop.eup %10146 }
 0x3bf   : > { %v1416_v40 = vpop.xlane.xlu1 %1415 }
 0x3c0   : > { %10160 = vpow2.f32 %v1465_v46  ;;  %v1443_v43 = vsub.f32 %v11224_v16, %v1416_v40 }
 0x3c1   : > { %v11319_v3 = vpop.eup %10148  ;;  %10162 = vpow2.f32 %v1902_v15 }
 0x3c2   : > { %v1463_v47 = vmul.f32 1.442695, %v1443_v43  ;;  %1503 = vadd.xlane.f32.xlu1 %v11319_v3  ;;  %1942 = vadd.xlane.f32.xlu0 %v11316_v37  ;;  %v11324_v48 = vpop.eup %10150  ;;  %v13492_v43 = vmov 0.0  }
 0x3c3   : > { %v1414_v5 = vpop.xlane.xlu1 %1413  ;;  %9340 = vmatprep.mubr.msk.f32.mxu0 %vm10693_vm3, %v13492_v43  ;;  %9279 = vmatprep.mubr.msk.f32.mxu1 %vm10693_vm3, %v13492_v43 }
 0x3c4   : > { %10164 = vpow2.f32 %v1463_v47  ;;  %v1442_v23 = vsub.f32 %v11230_v13, %v1414_v5  ;;  %v939_v47 = vld [vmem:[%s10726_s21 + $0x48] sm:$0xff]  ;;  %v13494_v5 = vld [vmem:[#allocation25_spill] sm:$0xff] }
 0x3c5   : > { %v11327_v1 = vpop.eup %10152  ;;  %10166 = vpow2.f32 %v1900_v17  ;;  %v936_v17 = vld [vmem:[%s10726_s21 + $0x30] sm:$0xff] }
 0x3c6   : > { %v1461_v16 = vmul.f32 1.442695, %v1442_v23  ;;  %1501 = vadd.xlane.f32.xlu1 %v11327_v1  ;;  %1940 = vadd.xlane.f32.xlu0 %v11324_v48  ;;  %v11332_v9 = vpop.eup %10154  ;;  %v13496_v23 = vld [vmem:[#allocation27_spill] sm:$0xff] }
 0x3c7   : > { %v1412_v22 = vpop.xlane.xlu1 %1411 }
 0x3c8   : > { %10168 = vpow2.f32 %v1461_v16  ;;  %v1441_v41 = vsub.f32 %v11236_v31, %v1412_v22 }
 0x3c9   : > { %v11335_v38 = vpop.eup %10156  ;;  %10170 = vpow2.f32 %v1898_v2 }
 0x3ca   : > { %v1459_v13 = vmul.f32 1.442695, %v1441_v41  ;;  %1499 = vadd.xlane.f32.xlu1 %v11335_v38  ;;  %1938 = vadd.xlane.f32.xlu0 %v11332_v9  ;;  %v11339_v25 = vpop.eup %10158 }
 0x3cb   : > { %v1410_v6 = vpop.xlane.xlu1 %1409 }
 0x3cc   : > { %10172 = vpow2.f32 %v1459_v13  ;;  %v1440_v39 = vsub.f32 %v11242_v32, %v1410_v6 }
 0x3cd   : > { %v11342_v24 = vpop.eup %10160  ;;  %10174 = vpow2.f32 %v1455_v0 }
 0x3ce   : > { %v1457_v12 = vmul.f32 1.442695, %v1440_v39  ;;  %1497 = vadd.xlane.f32.xlu1 %v11342_v24  ;;  %1936 = vadd.xlane.f32.xlu0 %v11339_v25  ;;  %v11346_v35 = vpop.eup %10162 }
 0x3cf   : > { %v1518_v31 = vpop.xlane.xlu1 %1517 }
 0x3d0   : > { %10176 = vpow2.f32 %v1457_v12 }
 0x3d1   : > { %v11348_v44 = vpop.eup %10164  ;;  %10178 = vrcp.f32 %v1518_v31 }
 0x3d2   : > { %1495 = vadd.xlane.f32.xlu1 %v11348_v44  ;;  %1934 = vadd.xlane.f32.xlu0 %v11346_v35  ;;  %v11352_v32 = vpop.eup %10166 }
 0x3d5   : > { %v11354_v33 = vpop.eup %10168 }
 0x3d6   : > { %1493 = vadd.xlane.f32.xlu1 %v11354_v33  ;;  %1932 = vadd.xlane.f32.xlu0 %v11352_v32  ;;  %v11358_v26 = vpop.eup %10170 }
 0x3d9   : > { %v11360_v45 = vpop.eup %10172 }
 0x3da   : > { %1491 = vadd.xlane.f32.xlu1 %v11360_v45  ;;  %1930 = vadd.xlane.f32.xlu0 %v11358_v26  ;;  %v11364_v46 = vpop.eup %10174 }
 0x3dd   : > { %v11366_v15 = vpop.eup %10176 }
 0x3de   : > { %v10179_v21 = vpop.eup %10178  ;;  %1489 = vadd.xlane.f32.xlu1 %v11366_v15  ;;  %1487 = vadd.xlane.f32.xlu0 %v11364_v46 }
 0x3df   : > { %v1550_v40 = vmul.f32 %v10179_v21, %v11245_v34  ;;  %v13493_v34 = vld [vmem:[#allocation24_spill] sm:$0xff] }
 0x3e1   : > { %9248 = vmatpush3.xpose.msra.mxu1 %v1550_v40 }
 0x3e2   : > { %9249 = vmatprep.subr.mxu1 %v13492_v43 }
 0x3ef   : > { %989 = vperm.xlu1 %10113, %v939_v47  }
 0x3f3   : > { %974 = vperm.xlu1 %10113, %v936_v17  }
 0x3f4   : > { %984 = vperm.xlu0 %10112, %v938_v10  }
 0x3f7   : > { %2263 = vrot.lane.b32.xlu1 %v10930_v51, %s10694_s18 }
 0x3f8   : > { %2265 = vrot.lane.b32.xlu0 %v10936_v52, %s10694_s18 }
 0x3fb   : > { %2267 = vrot.lane.b32.xlu1 %v10942_v53, %s10694_s18 }
 0x3fc   : > { %2269 = vrot.lane.b32.xlu0 %v10948_v54, %s10694_s18 }
 0x3ff   : > { %2271 = vrot.lane.b32.xlu1 %v10954_v55, %s10694_s18 }
 0x400   : > { %2273 = vrot.lane.b32.xlu0 %v10960_v56, %s10694_s18 }
 0x403   : > { %2275 = vrot.lane.b32.xlu1 %v10966_v57, %s10694_s18 }
 0x404   : > { %2277 = vrot.lane.b32.xlu0 %v10972_v58, %s10694_s18 }
 0x407   : > { %2279 = vrot.lane.b32.xlu1 %v10978_v59, %s10694_s18 }
 0x408   : > { %2281 = vrot.lane.b32.xlu0 %v10984_v60, %s10694_s18 }
 0x40b   : > { %2283 = vrot.lane.b32.xlu1 %v10990_v61, %s10694_s18 }
 0x40c   : > { %2285 = vrot.lane.b32.xlu0 %v10996_v62, %s10694_s18 }
 0x40f   : > { %2287 = vrot.lane.b32.xlu1 %v13493_v34, %s10694_s18 }
 0x410   : > { %2289 = vrot.lane.b32.xlu0 %v13494_v5, %s10694_s18 }
 0x413   : > { %2291 = vrot.lane.b32.xlu1 %v13495_v8, %s10694_s18 }
 0x414   : > { %2293 = vrot.lane.b32.xlu0 %v13496_v23, %s10694_s18 }
 0x427   : > { %v1961_v16 = vpop.xlane.xlu1 %1960 }
 0x428   : > { %10180 = vrcp.f32 %v1961_v16 }
 0x42b   : > { %v1516_v2 = vpop.xlane.xlu1 %1515  ;;  %v1959_v4 = vpop.xlane.xlu0 %1958 }
 0x42c   : > { %10182 = vrcp.f32 %v1516_v2 }
 0x42d   : > { %10184 = vrcp.f32 %v1959_v4 }
 0x42f   : > { %v1514_v22 = vpop.xlane.xlu1 %1513  ;;  %v1957_v41 = vpop.xlane.xlu0 %1956 }
 0x430   : > { %10186 = vrcp.f32 %v1514_v22 }
 0x431   : > { %10188 = vrcp.f32 %v1957_v41 }
 0x433   : > { %v1512_v13 = vpop.xlane.xlu1 %1511  ;;  %v1955_v0 = vpop.xlane.xlu0 %1954 }
 0x434   : > { %10190 = vrcp.f32 %v1512_v13 }
 0x435   : > { %v10181_v6 = vpop.eup %10180  ;;  %10192 = vrcp.f32 %v1955_v0 }
 0x436   : > { %v1993_v39 = vmul.f32 %v10181_v6, %v11256_v50 }
 0x437   : > { %v1510_v12 = vpop.xlane.xlu1 %1509  ;;  %v1953_v31 = vpop.xlane.xlu0 %1952 }
 0x438   : > { %10194 = vrcp.f32 %v1510_v12  ;;  %9309 = vmatpush3.xpose.msra.mxu0 %v1993_v39 }
 0x439   : > { %v10183_v21 = vpop.eup %10182  ;;  %10196 = vrcp.f32 %v1953_v31  ;;  %9310 = vmatprep.subr.mxu0 %v13492_v43 }
 0x43a   : > { %v10185_v40 = vpop.eup %10184  ;;  %v1549_v47 = vmul.f32 %v10183_v21, %v11259_v49 }
 0x43b   : > { %v1508_v17 = vpop.xlane.xlu1 %1507  ;;  %v1951_v10 = vpop.xlane.xlu0 %1950  ;;  %v1992_v16 = vmul.f32 %v10185_v40, %v11263_v14 }
 0x43c   : > { %10198 = vrcp.f32 %v1508_v17  ;;  %9250 = vmatpush3.xpose.msra.mxu1 %v1549_v47 }
 0x43d   : > { %v10187_v2 = vpop.eup %10186  ;;  %10200 = vrcp.f32 %v1951_v10  ;;  %9311 = vmatpush3.xpose.msra.mxu0 %v1992_v16  ;;  %9251 = vmatprep.subr.mxu1 %v13492_v43 }
 0x43e   : > { %v10189_v50 = vpop.eup %10188  ;;  %9312 = vmatprep.subr.mxu0 %v13492_v43  ;;  %v1548_v4 = vmul.f32 %v10187_v2, %v11267_v18 }
 0x43f   : > { %v1949_v22 = vpop.xlane.xlu0 %1948  ;;  %v1991_v41 = vmul.f32 %v10189_v50, %v11270_v29 }
 0x440   : > { %10202 = vrcp.f32 %v1949_v22  ;;  %9252 = vmatpush3.xpose.msra.mxu1 %v1548_v4 }
 0x441   : > { %v10191_v49 = vpop.eup %10190  ;;  %9313 = vmatpush3.xpose.msra.mxu0 %v1991_v41  ;;  %9253 = vmatprep.subr.mxu1 %v13492_v43 }
 0x442   : > { %v10193_v14 = vpop.eup %10192  ;;  %9314 = vmatprep.subr.mxu0 %v13492_v43  ;;  %v1547_v13 = vmul.f32 %v10191_v49, %v11274_v36 }
 0x443   : > { %v1506_v0 = vpop.xlane.xlu1 %1505  ;;  %v1947_v6 = vpop.xlane.xlu0 %1946  ;;  %v1990_v39 = vmul.f32 %v10193_v14, %v11277_v30 }
 0x444   : > { %10204 = vrcp.f32 %v1506_v0  ;;  %9254 = vmatpush3.xpose.msra.mxu1 %v1547_v13 }
 0x445   : > { %v10195_v18 = vpop.eup %10194  ;;  %10206 = vrcp.f32 %v1947_v6  ;;  %9315 = vmatpush3.xpose.msra.mxu0 %v1990_v39  ;;  %9255 = vmatprep.subr.mxu1 %v13492_v43 }
 0x446   : > { %v10197_v29 = vpop.eup %10196  ;;  %9316 = vmatprep.subr.mxu0 %v13492_v43  ;;  %v1546_v12 = vmul.f32 %v10195_v18, %v11285_v7 }
 0x447   : > { %v1945_v31 = vpop.xlane.xlu0 %1944  ;;  %v1989_v21 = vmul.f32 %v10197_v29, %v11282_v19 }
 0x448   : > { %10208 = vrcp.f32 %v1945_v31  ;;  %9256 = vmatpush3.xpose.msra.mxu1 %v1546_v12 }
 0x449   : > { %v10199_v36 = vpop.eup %10198  ;;  %9317 = vmatpush3.xpose.msra.mxu0 %v1989_v21  ;;  %9257 = vmatprep.subr.mxu1 %v13492_v43 }
 0x44a   : > { %v10201_v30 = vpop.eup %10200  ;;  %9318 = vmatprep.subr.mxu0 %v13492_v43  ;;  %v1545_v40 = vmul.f32 %v10199_v36, %v11293_v42 }
 0x44b   : > { %v1504_v47 = vpop.xlane.xlu1 %1503  ;;  %v1943_v17 = vpop.xlane.xlu0 %1942  ;;  %v1988_v10 = vmul.f32 %v10201_v30, %v11290_v20 }
 0x44c   : > { %10210 = vrcp.f32 %v1504_v47  ;;  %9258 = vmatpush3.xpose.msra.mxu1 %v1545_v40 }
 0x44d   : > { %v10203_v7 = vpop.eup %10202  ;;  %10212 = vrcp.f32 %v1943_v17  ;;  %9319 = vmatpush3.xpose.msra.mxu0 %v1988_v10  ;;  %9259 = vmatprep.subr.mxu1 %v13492_v43 }
 0x44e   : > { %9320 = vmatprep.subr.mxu0 %v13492_v43  ;;  %v1987_v19 = vmul.f32 %v10203_v7, %v11299_v63 }
 0x44f   : > { %v1502_v16 = vpop.xlane.xlu1 %1501  ;;  %v1941_v2 = vpop.xlane.xlu0 %1940 }
 0x450   : > { %10214 = vrcp.f32 %v1502_v16 }
 0x451   : > { %v10205_v50 = vpop.eup %10204  ;;  %10216 = vrcp.f32 %v1941_v2  ;;  %9321 = vmatpush3.xpose.msra.mxu0 %v1987_v19 }
 0x452   : > { %v10207_v42 = vpop.eup %10206  ;;  %9322 = vmatprep.subr.mxu0 %v13492_v43  ;;  %v1544_v20 = vmul.f32 %v10205_v50, %v11306_v11 }
 0x453   : > { %v1500_v4 = vpop.xlane.xlu1 %1499  ;;  %v1939_v22 = vpop.xlane.xlu0 %1938  ;;  %v1986_v41 = vmul.f32 %v10207_v42, %v11303_v28 }
 0x454   : > { %10218 = vrcp.f32 %v1500_v4  ;;  %9260 = vmatpush3.xpose.msra.mxu1 %v1544_v20 }
 0x455   : > { %v10209_v49 = vpop.eup %10208  ;;  %10220 = vrcp.f32 %v1939_v22  ;;  %9323 = vmatpush3.xpose.msra.mxu0 %v1986_v41  ;;  %9261 = vmatprep.subr.mxu1 %v13492_v43 }
 0x456   : > { %9324 = vmatprep.subr.mxu0 %v13492_v43  ;;  %v1985_v63 = vmul.f32 %v10209_v49, %v11312_v27 }
 0x457   : > { %v1498_v14 = vpop.xlane.xlu1 %1497  ;;  %v1937_v13 = vpop.xlane.xlu0 %1936 }
 0x458   : > { %10222 = vrcp.f32 %v1498_v14 }
 0x459   : > { %v10211_v0 = vpop.eup %10210  ;;  %10224 = vrcp.f32 %v1937_v13  ;;  %9325 = vmatpush3.xpose.msra.mxu0 %v1985_v63  ;;  %v13498_v13 = vld [vmem:[#allocation31_spill] sm:$0xff] }
 0x45a   : > { %v10213_v11 = vpop.eup %10212  ;;  %9326 = vmatprep.subr.mxu0 %v13492_v43  ;;  %v1543_v28 = vmul.f32 %v10211_v0, %v11319_v3 }
 0x45b   : > { %v1496_v6 = vpop.xlane.xlu1 %1495  ;;  %v1935_v39 = vpop.xlane.xlu0 %1934  ;;  %v1984_v18 = vmul.f32 %v10213_v11, %v11316_v37  ;;  %v8359_v11 = vld [vmem:[%s10731_s25 + $0x20] sm:$0xff] }
 0x45c   : > { %10226 = vrcp.f32 %v1496_v6  ;;  %9262 = vmatpush3.xpose.msra.mxu1 %v1543_v28  ;;  %v8360_v6 = vld [vmem:[%s10731_s25 + $0x28] sm:$0xff] }
 0x45d   : > { %v10215_v29 = vpop.eup %10214  ;;  %10228 = vrcp.f32 %v1935_v39  ;;  %9327 = vmatpush3.xpose.msra.mxu0 %v1984_v18  ;;  %9263 = vmatprep.subr.mxu1 %v13492_v43  ;;  %v8361_v18 = vld [vmem:[%s10731_s25 + $0x30] sm:$0xff] }
 0x45e   : > { %v10217_v27 = vpop.eup %10216  ;;  %9328 = vmatprep.subr.mxu0 %v13492_v43  ;;  %v1542_v12 = vmul.f32 %v10215_v29, %v11327_v1 }
 0x45f   : > { %v1494_v31 = vpop.xlane.xlu1 %1493  ;;  %v1933_v21 = vpop.xlane.xlu0 %1932  ;;  %v1983_v3 = vmul.f32 %v10217_v27, %v11324_v48  ;;  %v8362_v27 = vld [vmem:[%s10731_s25 + $0x38] sm:$0xff] }
 0x460   : > { %10230 = vrcp.f32 %v1494_v31  ;;  %9264 = vmatpush3.xpose.msra.mxu1 %v1542_v12  ;;  %v1621_v12 = vld [vmem:[%s10731_s25] sm:$0xff] }
 0x461   : > { %v10219_v36 = vpop.eup %10218  ;;  %10232 = vrcp.f32 %v1933_v21  ;;  %9329 = vmatpush3.xpose.msra.mxu0 %v1983_v3  ;;  %9265 = vmatprep.subr.mxu1 %v13492_v43  ;;  %v13499_v3 = vld [vmem:[#allocation29_spill] sm:$0xff] }
 0x462   : > { %v10221_v37 = vpop.eup %10220  ;;  %9330 = vmatprep.subr.mxu0 %v13492_v43  ;;  %v1541_v30 = vmul.f32 %v10219_v36, %v11335_v38 }
 0x463   : > { %v1492_v40 = vpop.xlane.xlu1 %1491  ;;  %v1931_v47 = vpop.xlane.xlu0 %1930  ;;  %v1982_v1 = vmul.f32 %v10221_v37, %v11332_v9  ;;  %v1622_v37 = vld [vmem:[%s10731_s25 + $0x8] sm:$0xff] }
 0x464   : > { %10234 = vrcp.f32 %v1492_v40  ;;  %9266 = vmatpush3.xpose.msra.mxu1 %v1541_v30  ;;  %v1623_v40 = vld [vmem:[%s10731_s25 + $0x10] sm:$0xff] }
 0x465   : > { %v10223_v17 = vpop.eup %10222  ;;  %10236 = vrcp.f32 %v1931_v47  ;;  %9331 = vmatpush3.xpose.msra.mxu0 %v1982_v1  ;;  %9267 = vmatprep.subr.mxu1 %v13492_v43  ;;  %v1624_v1 = vld [vmem:[%s10731_s25 + $0x18] sm:$0xff] }
 0x466   : > { %v10225_v48 = vpop.eup %10224  ;;  %9332 = vmatprep.subr.mxu0 %v13492_v43  ;;  %v1540_v10 = vmul.f32 %v10223_v17, %v11342_v24 }
 0x467   : > { %v1490_v7 = vpop.xlane.xlu1 %1489  ;;  %v1488_v19 = vpop.xlane.xlu0 %1487  ;;  %v1981_v38 = vmul.f32 %v10225_v48, %v11339_v25 }
 0x468   : > { %10238 = vrcp.f32 %v1490_v7  ;;  %9268 = vmatpush3.xpose.msra.mxu1 %v1540_v10 }
 0x469   : > { %v10227_v16 = vpop.eup %10226  ;;  %9333 = vmatpush3.xpose.msra.mxu0 %v1981_v38  ;;  %9269 = vmatprep.subr.mxu1 %v13492_v43  ;;  %10240 = vrcp.f32 %v1488_v19 }
 0x46a   : > { %v10229_v9 = vpop.eup %10228  ;;  %9334 = vmatprep.subr.mxu0 %v13492_v43  ;;  %v1539_v2 = vmul.f32 %v10227_v16, %v11348_v44 }
 0x46b   : > { %v1980_v50 = vmul.f32 %v10229_v9, %v11346_v35  ;;  %v990_v22 = vpop.permute.xlu1 %989 }
 0x46c   : > { %9270 = vmatpush3.xpose.msra.mxu1 %v1539_v2 }
 0x46d   : > { %v10231_v24 = vpop.eup %10230  ;;  %9335 = vmatpush3.xpose.msra.mxu0 %v1980_v50  ;;  %9271 = vmatprep.subr.mxu1 %v13492_v43 }
 0x46e   : > { %v10233_v25 = vpop.eup %10232  ;;  %9336 = vmatprep.subr.mxu0 %v13492_v43  ;;  %v1538_v42 = vmul.f32 %v10231_v24, %v11354_v33 }
 0x46f   : > { %v1979_v20 = vmul.f32 %v10233_v25, %v11352_v32  ;;  %v13497_v32 = vld [vmem:[#allocation30_spill] sm:$0xff]  ;;  %v975_v28 = vpop.permute.xlu1 %974 }
 0x470   : > { %9272 = vmatpush3.xpose.msra.mxu1 %v1538_v42  ;;  %v1151_v33 = vadd.f32 %v13497_v32, %v990_v22  ;;  %v1136_v36 = vadd.f32 %v13499_v3, %v975_v28 }
 0x471   : > { %v10235_v4 = vpop.eup %10234  ;;  %9337 = vmatpush3.xpose.msra.mxu0 %v1979_v20  ;;  %9273 = vmatprep.subr.mxu1 %v13492_v43 }
 0x472   : > { %v10237_v44 = vpop.eup %10236  ;;  %9338 = vmatprep.subr.mxu0 %v13492_v43  ;;  %v1537_v35 = vmul.f32 %v10235_v4, %v11360_v45  ;;  %v985_v45 = vpop.permute.xlu0 %984 }
 0x473   : > { %v1978_v41 = vmul.f32 %v10237_v44, %v11358_v26  ;;  %v1146_v0 = vadd.f32 %v13498_v13, %v985_v45  ;;  %v2264_v39 = vpop.permute.xlu1 %2263 }
 0x474   : > { %9274 = vmatpush3.xpose.msra.mxu1 %v1537_v35 }
 0x475   : > { %v10239_v49 = vpop.eup %10238  ;;  %9339 = vmatpush3.xpose.msra.mxu0 %v1978_v41  ;;  %9275 = vmatprep.subr.mxu1 %v13492_v43 }
 0x476   : > { %v1536_v63 = vmul.f32 %v10239_v49, %v11366_v15  ;;  %v10241_v14 = vpop.eup %10240 }
 0x477   : > { %v1535_v26 = vmul.f32 %v10241_v14, %v11364_v46  ;;  %v2266_v46 = vpop.permute.xlu0 %2265  ;;  %v2268_v31 = vpop.permute.xlu1 %2267 }
 0x478   : > { %9341 = vmatmul.mubr.f32.vlgmr.msra.gmra.mxu0 %v1151_v33  ;;  %9276 = vmatpush3.xpose.msra.mxu1 %v1536_v63 }
 0x479   : > { %9277 = vmatprep.subr.mxu1 %v13492_v43 }
 0x47b   : > { %v2270_v47 = vpop.permute.xlu0 %2269  ;;  %v2272_v17 = vpop.permute.xlu1 %2271 }
 0x47c   : > { %9278 = vmatpush3.xpose.msra.mxu1 %v1535_v26 }
 0x47f   : > { %9280 = vmatmul.mubr.f32.vlgmr.msra.gmra.mxu1 %v1146_v0  ;;  %v2274_v48 = vpop.permute.xlu0 %2273  ;;  %v2276_v10 = vpop.permute.xlu1 %2275 }
 0x480   : > { %9345 = vmatprep.mubr.msk.f32.mxu1 %vm1196_vm2, %v8359_v11 }
 0x483   : > { %v2278_v7 = vpop.permute.xlu0 %2277  ;;  %v2280_v19 = vpop.permute.xlu1 %2279 }
 0x487   : > { %v2282_v38 = vpop.permute.xlu0 %2281  ;;  %v2284_v16 = vpop.permute.xlu1 %2283 }
 0x48b   : > { %v2286_v9 = vpop.permute.xlu0 %2285  ;;  %v2288_v2 = vpop.permute.xlu1 %2287 }
 0x48f   : > { %v2290_v50 = vpop.permute.xlu0 %2289  ;;  %v2292_v24 = vpop.permute.xlu1 %2291 }
 0x493   : > { %v2294_v25 = vpop.permute.xlu0 %2293 }
 0x538   : > { %v2060_v15 = vpop.f32.mrf.mxu0 }
 0x539   : > { %9343 = vmatprep.subr.mxu1 %v2060_v15 }
 0x53a   : > { %v9342_v29 = vpop.f32.mrf.mxu0  ;;  %9344 = vmatpush3.msra.mxu1 %v2060_v15 }
 0x53b   : > { %9346 = vmatmul.mubr.msk.f32.vlgmr.msra.gmra.mxu1 %vm1196_vm2, %v8360_v6 }
 0x53c   : > { %9348 = vmatprep.mubr.msk.f32.mxu1 %vm1196_vm2, %v8361_v18 }
 0x53f   : > { %9349 = vmatmul.mubr.msk.f32.gmra.mxu1 %vm1196_vm2, %v8362_v27  ;;  %v1617_v21 = vpop.f32.mrf.mxu1 }
 0x540   : > { %9351 = vmatprep.subr.mxu1 %v1617_v21  ;;  %9353 = vmatprep.mubr.msk.f32.mxu1 %vm1196_vm2, %v1621_v12 }
 0x541   : > { %v9281_v30 = vpop.f32.mrf.mxu1  ;;  %9352 = vmatpush3.msra.mxu1 %v1617_v21 }
 0x542   : > { %9359 = vmatprep.subr.mxu1 %v1136_v36 }
 0x543   : > { %9354 = vmatmul.mubr.msk.f32.vlgmr.msra.gmra.mxu1 %vm1196_vm2, %v1622_v37 }
 0x544   : > { %9360 = vmatpush3.msra.mxu1 %v1136_v36  ;;  %9356 = vmatprep.mubr.msk.f32.mxu1 %vm1196_vm2, %v1623_v40 }
 0x545   : > { %9385 = vmatprep.subr.mxu1 %v13492_v43 }
 0x547   : > { %9357 = vmatmul.mubr.msk.f32.gmra.mxu1 %vm1196_vm2, %v1624_v1 }
 0x548   : > { %9361 = vmatprep.mubr.msk.f32.mxu1 %vm1196_vm2, %v2264_v39 }
 0x54b   : > { %9362 = vmatmul.mubr.msk.f32.vlgmr.msra.gmra.mxu1 %vm1196_vm2, %v2266_v46 }
 0x54c   : > { %9364 = vmatprep.mubr.msk.f32.mxu1 %vm1196_vm2, %v2268_v31 }
 0x54f   : > { %9365 = vmatmul.mubr.msk.f32.gmra.mxu1 %vm1196_vm2, %v2270_v47 }
 0x550   : > { %9367 = vmatprep.mubr.msk.f32.mxu1 %vm1196_vm2, %v2272_v17 }
 0x553   : > { %9368 = vmatmul.mubr.msk.f32.gmra.mxu1 %vm1196_vm2, %v2274_v48 }
 0x554   : > { %9370 = vmatprep.mubr.msk.f32.mxu1 %vm1196_vm2, %v2276_v10 }
 0x557   : > { %9371 = vmatmul.mubr.msk.f32.gmra.mxu1 %vm1196_vm2, %v2278_v7 }
 0x558   : > { %9373 = vmatprep.mubr.msk.f32.mxu1 %vm1196_vm2, %v2280_v19 }
 0x55b   : > { %9374 = vmatmul.mubr.msk.f32.gmra.mxu1 %vm1196_vm2, %v2282_v38 }
 0x55c   : > { %9376 = vmatprep.mubr.msk.f32.mxu1 %vm1196_vm2, %v2284_v16 }
 0x55f   : > { %9377 = vmatmul.mubr.msk.f32.gmra.mxu1 %vm1196_vm2, %v2286_v9 }
 0x560   : > { %9379 = vmatprep.mubr.msk.f32.mxu1 %vm1196_vm2, %v2288_v2 }
 0x563   : > { %9380 = vmatmul.mubr.msk.f32.gmra.mxu1 %vm1196_vm2, %v2290_v50 }
 0x564   : > { %9382 = vmatprep.mubr.msk.f32.mxu1 %vm1196_vm2, %v2292_v24 }
 0x567   : > { %9383 = vmatmul.mubr.msk.f32.gmra.mxu1 %vm1196_vm2, %v2294_v25 }
 0x568   : > { %9417 = vmatprep.mubr.msk.f32.mxu1 %vm10693_vm3, %v13492_v43 }
 0x5fb   : > { %v9347_v42 = vpop.f32.mrf.mxu1 }
 0x5fd   : > { %v11509_v20 = vpop.f32.mrf.mxu1 }
 0x5ff   : > { %v9350_v4 = vpop.f32.mrf.mxu1 }
 0x601   : > { %v11511_v44 = vpop.f32.mrf.mxu1 }
 0x603   : > { %v9355_v35 = vpop.f32.mrf.mxu1 }
 0x604   : > { %v11513_v22 = vadd.f32 %v9355_v35, %v9347_v42 }
 0x605   : > { %v11515_v41 = vpop.f32.mrf.mxu1 }
 0x607   : > { %v9358_v49 = vpop.f32.mrf.mxu1 }
 0x608   : > { %v11517_v32 = vadd.f32 %v9358_v49, %v9350_v4 }
 0x609   : > { %v11519_v33 = vpop.f32.mrf.mxu1 }
 0x60b   : > { %v9363_v63 = vpop.f32.mrf.mxu1 }
 0x60c   : > { %v11562_v9 = vsel %vm10875_vm1, %v9363_v63, -10000.0 }
 0x60d   : > { %v2393_v14 = vpop.f32.mrf.mxu1 }
 0x60e   : > { %v11557_v16 = vsel %vm10875_vm1, %v2393_v14, -10000.0 }
 0x60f   : > { %v9366_v45 = vpop.f32.mrf.mxu1 }
 0x610   : > { %v11552_v38 = vsel %vm10875_vm1, %v9366_v45, -10000.0 }
 0x611   : > { %v2403_v26 = vpop.f32.mrf.mxu1 }
 0x612   : > { %v11547_v19 = vsel %vm10875_vm1, %v2403_v26, -10000.0 }
 0x613   : > { %v9369_v13 = vpop.f32.mrf.mxu1 }
 0x614   : > { %v2477_v7 = vsel %vm10875_vm1, %v9369_v13, -10000.0 }
 0x615   : > { %v2413_v0 = vpop.f32.mrf.mxu1 }
 0x616   : > { %v2476_v10 = vsel %vm10875_vm1, %v2413_v0, -10000.0 }
 0x617   : > { %v9372_v11 = vpop.f32.mrf.mxu1 }
 0x618   : > { %v2479_v48 = vsel %vm10875_vm1, %v9372_v11, -10000.0 }
 0x619   : > { %v2423_v28 = vpop.f32.mrf.mxu1 }
 0x61a   : > { %v2478_v17 = vsel %vm10875_vm1, %v2423_v28, -10000.0 }
 0x61b   : > { %v9375_v15 = vpop.f32.mrf.mxu1 }
 0x61c   : > { %v2481_v1 = vsel %vm10875_vm1, %v9375_v15, -10000.0 }
 0x61d   : > { %v2433_v6 = vpop.f32.mrf.mxu1 }
 0x61e   : > { %v2480_v47 = vsel %vm10875_vm1, %v2433_v6, -10000.0 }
 0x61f   : > { %v9378_v39 = vpop.f32.mrf.mxu1 }
 0x620   : > { %v2483_v40 = vsel %vm10875_vm1, %v9378_v39, -10000.0 }
 0x621   : > { %v2443_v18 = vpop.f32.mrf.mxu1 }
 0x622   : > { %v2482_v30 = vsel %vm10875_vm1, %v2443_v18, -10000.0 }
 0x623   : > { %v9381_v29 = vpop.f32.mrf.mxu1 }
 0x624   : > { %v2485_v37 = vsel %vm10875_vm1, %v9381_v29, -10000.0 }
 0x625   : > { %v2453_v46 = vpop.f32.mrf.mxu1 }
 0x626   : > { %v2484_v36 = vsel %vm10875_vm1, %v2453_v46, -10000.0 }
 0x627   : > { %v9384_v27 = vpop.f32.mrf.mxu1 }
 0x628   : > { %v2487_v31 = vsel %vm10875_vm1, %v9384_v27, -10000.0 }
 0x629   : > { %2518 = vmax.xlane.f32.xlu1 %v2487_v31  ;;  %v2463_v21 = vpop.f32.mrf.mxu1 }
 0x62a   : > { %v2486_v3 = vsel %vm10875_vm1, %v2463_v21, -10000.0 }
 0x62b   : > { %2516 = vmax.xlane.f32.xlu0 %v2486_v3 }
 0x62d   : > { %2512 = vmax.xlane.f32.xlu1 %v2484_v36 }
 0x62f   : > { %2514 = vmax.xlane.f32.xlu0 %v2485_v37 }
 0x631   : > { %2508 = vmax.xlane.f32.xlu1 %v2482_v30 }
 0x633   : > { %2510 = vmax.xlane.f32.xlu0 %v2483_v40 }
 0x635   : > { %2504 = vmax.xlane.f32.xlu1 %v2480_v47 }
 0x637   : > { %2506 = vmax.xlane.f32.xlu0 %v2481_v1 }
 0x639   : > { %2500 = vmax.xlane.f32.xlu1 %v2478_v17 }
 0x63b   : > { %2502 = vmax.xlane.f32.xlu0 %v2479_v48 }
 0x63d   : > { %2496 = vmax.xlane.f32.xlu1 %v2476_v10 }
 0x63f   : > { %2498 = vmax.xlane.f32.xlu0 %v2477_v7 }
 0x641   : > { %2492 = vmax.xlane.f32.xlu1 %v11547_v19 }
 0x643   : > { %2494 = vmax.xlane.f32.xlu0 %v11552_v38 }
 0x645   : > { %2488 = vmax.xlane.f32.xlu1 %v11557_v16 }
 0x647   : > { %2490 = vmax.xlane.f32.xlu0 %v11562_v9 }
 0x6b2   : > { %v2519_v2 = vpop.xlane.xlu1 %2518 }
 0x6b3   : > { %v2535_v50 = vsub.f32 %v2487_v31, %v2519_v2 }
 0x6b4   : > { %v2517_v24 = vpop.xlane.xlu0 %2516 }
 0x6b5   : > { %v2566_v25 = vmul.f32 1.442695, %v2535_v50  ;;  %v2534_v42 = vsub.f32 %v2486_v3, %v2517_v24 }
 0x6b6   : > { %v2513_v4 = vpop.xlane.xlu1 %2512 }
 0x6b7   : > { %10242 = vpow2.f32 %v2566_v25  ;;  %v2564_v35 = vmul.f32 1.442695, %v2534_v42  ;;  %v2532_v49 = vsub.f32 %v2484_v36, %v2513_v4 }
 0x6b8   : > { %v2515_v45 = vpop.xlane.xlu0 %2514 }
 0x6b9   : > { %10244 = vpow2.f32 %v2564_v35  ;;  %v2560_v14 = vmul.f32 1.442695, %v2532_v49  ;;  %v2533_v26 = vsub.f32 %v2485_v37, %v2515_v45 }
 0x6ba   : > { %v2509_v13 = vpop.xlane.xlu1 %2508 }
 0x6bb   : > { %v2562_v0 = vmul.f32 1.442695, %v2533_v26  ;;  %v2530_v11 = vsub.f32 %v2482_v30, %v2509_v13  ;;  %10246 = vpow2.f32 %v2560_v14 }
 0x6bc   : > { %v2511_v63 = vpop.xlane.xlu0 %2510 }
 0x6bd   : > { %10248 = vpow2.f32 %v2562_v0  ;;  %v2556_v28 = vmul.f32 1.442695, %v2530_v11  ;;  %v2531_v15 = vsub.f32 %v2483_v40, %v2511_v63 }
 0x6be   : > { %v2505_v6 = vpop.xlane.xlu1 %2504 }
 0x6bf   : > { %v2558_v39 = vmul.f32 1.442695, %v2531_v15  ;;  %v2528_v18 = vsub.f32 %v2480_v47, %v2505_v6  ;;  %10250 = vpow2.f32 %v2556_v28 }
 0x6c0   : > { %v2507_v29 = vpop.xlane.xlu0 %2506 }
 0x6c1   : > { %10252 = vpow2.f32 %v2558_v39  ;;  %v2552_v46 = vmul.f32 1.442695, %v2528_v18  ;;  %v2529_v27 = vsub.f32 %v2481_v1, %v2507_v29 }
 0x6c2   : > { %v2501_v31 = vpop.xlane.xlu1 %2500 }
 0x6c3   : > { %v2554_v21 = vmul.f32 1.442695, %v2529_v27  ;;  %v2526_v3 = vsub.f32 %v2478_v17, %v2501_v31  ;;  %10254 = vpow2.f32 %v2552_v46 }
 0x6c4   : > { %v11565_v36 = vpop.eup %10242  ;;  %v2503_v37 = vpop.xlane.xlu0 %2502 }
 0x6c5   : > { %10256 = vpow2.f32 %v2554_v21  ;;  %v2548_v30 = vmul.f32 1.442695, %v2526_v3  ;;  %v2527_v2 = vsub.f32 %v2479_v48, %v2503_v37  ;;  %2598 = vadd.xlane.f32.xlu0 %v11565_v36  ;;  %v937_v21 = vld [vmem:[%s10726_s21 + $0x38] sm:$0xff]  ;;  %v940_v3 = vld [vmem:[%s10726_s21 + $0x50] sm:$0xff] }
 0x6c6   : > { %v11568_v40 = vpop.eup %10244  ;;  %v2497_v47 = vpop.xlane.xlu1 %2496 }
 0x6c7   : > { %v2550_v50 = vmul.f32 1.442695, %v2527_v2  ;;  %v2524_v24 = vsub.f32 %v2476_v10, %v2497_v47  ;;  %2596 = vadd.xlane.f32.xlu1 %v11568_v40  ;;  %10258 = vpow2.f32 %v2548_v30 }
 0x6c8   : > { %v2499_v1 = vpop.xlane.xlu0 %2498  ;;  %v11571_v25 = vpop.eup %10246 }
 0x6c9   : > { %10260 = vpow2.f32 %v2550_v50  ;;  %v2544_v17 = vmul.f32 1.442695, %v2524_v24  ;;  %v2525_v42 = vsub.f32 %v2477_v7, %v2499_v1 }
 0x6ca   : > { %v11573_v4 = vpop.eup %10248  ;;  %v2493_v35 = vpop.xlane.xlu1 %2492 }
 0x6cb   : > { %v2546_v48 = vmul.f32 1.442695, %v2525_v42  ;;  %v2522_v49 = vsub.f32 %v11547_v19, %v2493_v35  ;;  %2592 = vadd.xlane.f32.xlu1 %v11571_v25  ;;  %2594 = vadd.xlane.f32.xlu0 %v11573_v4  ;;  %10262 = vpow2.f32 %v2544_v17 }
 0x6cc   : > { %v2495_v10 = vpop.xlane.xlu0 %2494  ;;  %v11578_v45 = vpop.eup %10250 }
 0x6cd   : > { %10264 = vpow2.f32 %v2546_v48  ;;  %v2540_v14 = vmul.f32 1.442695, %v2522_v49  ;;  %v2523_v26 = vsub.f32 %v11552_v38, %v2495_v10 }
 0x6ce   : > { %v11581_v13 = vpop.eup %10252  ;;  %v2489_v7 = vpop.xlane.xlu1 %2488 }
 0x6cf   : > { %v2542_v0 = vmul.f32 1.442695, %v2523_v26  ;;  %v2520_v11 = vsub.f32 %v11557_v16, %v2489_v7  ;;  %2588 = vadd.xlane.f32.xlu1 %v11578_v45  ;;  %2590 = vadd.xlane.f32.xlu0 %v11581_v13  ;;  %10266 = vpow2.f32 %v2540_v14 }
 0x6d0   : > { %v2491_v19 = vpop.xlane.xlu0 %2490  ;;  %v11586_v63 = vpop.eup %10254 }
 0x6d1   : > { %10268 = vpow2.f32 %v2542_v0  ;;  %v2536_v28 = vmul.f32 1.442695, %v2520_v11  ;;  %v2521_v15 = vsub.f32 %v11562_v9, %v2491_v19 }
 0x6d2   : > { %v11589_v6 = vpop.eup %10256 }
 0x6d3   : > { %v2538_v38 = vmul.f32 1.442695, %v2521_v15  ;;  %2584 = vadd.xlane.f32.xlu1 %v11586_v63  ;;  %2586 = vadd.xlane.f32.xlu0 %v11589_v6  ;;  %10270 = vpow2.f32 %v2536_v28 }
 0x6d4   : > { %v11593_v16 = vpop.eup %10258 }
 0x6d5   : > { %10272 = vpow2.f32 %v2538_v38 }
 0x6d6   : > { %v11595_v39 = vpop.eup %10260 }
 0x6d7   : > { %2580 = vadd.xlane.f32.xlu1 %v11593_v16  ;;  %2582 = vadd.xlane.f32.xlu0 %v11595_v39 }
 0x6d8   : > { %v11599_v9 = vpop.eup %10262 }
 0x6da   : > { %v11601_v18 = vpop.eup %10264 }
 0x6db   : > { %2576 = vadd.xlane.f32.xlu1 %v11599_v9  ;;  %2578 = vadd.xlane.f32.xlu0 %v11601_v18 }
 0x6dc   : > { %v11605_v29 = vpop.eup %10266 }
 0x6de   : > { %v11607_v46 = vpop.eup %10268 }
 0x6df   : > { %2572 = vadd.xlane.f32.xlu1 %v11605_v29  ;;  %2574 = vadd.xlane.f32.xlu0 %v11607_v46 }
 0x6e0   : > { %v11611_v27 = vpop.eup %10270 }
 0x6e2   : > { %v11613_v31 = vpop.eup %10272 }
 0x6e3   : > { %2568 = vadd.xlane.f32.xlu1 %v11611_v27  ;;  %2570 = vadd.xlane.f32.xlu0 %v11613_v31 }
 0x6f4   : > { %979 = vperm.xlu1 %10113, %v937_v21  }
 0x6f8   : > { %2808 = vrot.lane.b32.xlu1 %v10930_v51, %s10695_s1 }
 0x6f9   : > { %994 = vperm.xlu0 %10112, %v940_v3  }
 0x6fc   : > { %2812 = vrot.lane.b32.xlu1 %v10942_v53, %s10695_s1 }
 0x6fd   : > { %2810 = vrot.lane.b32.xlu0 %v10936_v52, %s10695_s1 }
 0x700   : > { %2816 = vrot.lane.b32.xlu1 %v10954_v55, %s10695_s1 }
 0x701   : > { %2814 = vrot.lane.b32.xlu0 %v10948_v54, %s10695_s1 }
 0x704   : > { %2820 = vrot.lane.b32.xlu1 %v10966_v57, %s10695_s1 }
 0x705   : > { %2818 = vrot.lane.b32.xlu0 %v10960_v56, %s10695_s1 }
 0x708   : > { %2824 = vrot.lane.b32.xlu1 %v10978_v59, %s10695_s1 }
 0x709   : > { %2822 = vrot.lane.b32.xlu0 %v10972_v58, %s10695_s1 }
 0x70c   : > { %2828 = vrot.lane.b32.xlu1 %v10990_v61, %s10695_s1 }
 0x70d   : > { %2826 = vrot.lane.b32.xlu0 %v10984_v60, %s10695_s1 }
 0x710   : > { %2832 = vrot.lane.b32.xlu1 %v13493_v34, %s10695_s1 }
 0x711   : > { %2830 = vrot.lane.b32.xlu0 %v10996_v62, %s10695_s1 }
 0x714   : > { %2836 = vrot.lane.b32.xlu1 %v13495_v8, %s10695_s1 }
 0x715   : > { %2834 = vrot.lane.b32.xlu0 %v13494_v5, %s10695_s1 }
 0x719   : > { %2838 = vrot.lane.b32.xlu0 %v13496_v23, %s10695_s1 }
 0x74e   : > { %v2599_v51 = vpop.xlane.xlu0 %2598 }
 0x74f   : > { %10274 = vrcp.f32 %v2599_v51 }
 0x750   : > { %v2597_v52 = vpop.xlane.xlu1 %2596 }
 0x751   : > { %10276 = vrcp.f32 %v2597_v52 }
 0x754   : > { %v2595_v53 = vpop.xlane.xlu0 %2594  ;;  %v2593_v54 = vpop.xlane.xlu1 %2592 }
 0x755   : > { %10278 = vrcp.f32 %v2595_v53  ;;  %v8388_v53 = vld [vmem:[%s10731_s25 + $0x48] sm:$0xff] }
 0x756   : > { %10280 = vrcp.f32 %v2593_v54  ;;  %v13502_v54 = vld [vmem:[#allocation28_spill] sm:$0xff] }
 0x758   : > { %v2591_v55 = vpop.xlane.xlu0 %2590  ;;  %v2589_v59 = vpop.xlane.xlu1 %2588 }
 0x759   : > { %10282 = vrcp.f32 %v2591_v55 }
 0x75a   : > { %10284 = vrcp.f32 %v2589_v59 }
 0x75c   : > { %v10275_v56 = vpop.eup %10274  ;;  %v2587_v61 = vpop.xlane.xlu0 %2586 }
 0x75d   : > { %v2631_v57 = vmul.f32 %v10275_v56, %v11565_v36  ;;  %10286 = vrcp.f32 %v2587_v61  ;;  %v2585_v8 = vpop.xlane.xlu1 %2584  ;;  %v8389_v56 = vld [vmem:[%s10731_s25 + $0x50] sm:$0xff] }
 0x75e   : > { %v10277_v58 = vpop.eup %10276  ;;  %10288 = vrcp.f32 %v2585_v8 }
 0x75f   : > { %9386 = vmatpush3.xpose.msra.mxu1 %v2631_v57  ;;  %v2630_v60 = vmul.f32 %v10277_v58, %v11568_v40  ;;  %v8390_v58 = vld [vmem:[%s10731_s25 + $0x58] sm:$0xff] }
 0x760   : > { %9387 = vmatprep.subr.mxu1 %v13492_v43  ;;  %v2583_v37 = vpop.xlane.xlu0 %2582 }
 0x761   : > { %10290 = vrcp.f32 %v2583_v37  ;;  %v2581_v40 = vpop.xlane.xlu1 %2580 }
 0x762   : > { %v10279_v62 = vpop.eup %10278  ;;  %10292 = vrcp.f32 %v2581_v40 }
 0x763   : > { %9388 = vmatpush3.xpose.msra.mxu1 %v2630_v60  ;;  %v2629_v34 = vmul.f32 %v10279_v62, %v11573_v4  ;;  %v10281_v5 = vpop.eup %10280 }
 0x764   : > { %9389 = vmatprep.subr.mxu1 %v13492_v43  ;;  %v2628_v23 = vmul.f32 %v10281_v5, %v11571_v25  ;;  %v2579_v24 = vpop.xlane.xlu0 %2578 }
 0x765   : > { %10294 = vrcp.f32 %v2579_v24  ;;  %v2577_v17 = vpop.xlane.xlu1 %2576 }
 0x766   : > { %v10283_v36 = vpop.eup %10282  ;;  %10296 = vrcp.f32 %v2577_v17 }
 0x767   : > { %9390 = vmatpush3.xpose.msra.mxu1 %v2629_v34  ;;  %v2627_v30 = vmul.f32 %v10283_v36, %v11581_v13  ;;  %v10285_v2 = vpop.eup %10284 }
 0x768   : > { %9391 = vmatprep.subr.mxu1 %v13492_v43  ;;  %v2626_v47 = vmul.f32 %v10285_v2, %v11578_v45  ;;  %v2575_v35 = vpop.xlane.xlu0 %2574 }
 0x769   : > { %10298 = vrcp.f32 %v2575_v35  ;;  %v2573_v10 = vpop.xlane.xlu1 %2572 }
 0x76a   : > { %v10287_v50 = vpop.eup %10286  ;;  %10300 = vrcp.f32 %v2573_v10 }
 0x76b   : > { %9392 = vmatpush3.xpose.msra.mxu1 %v2628_v23  ;;  %v2625_v1 = vmul.f32 %v10287_v50, %v11589_v6  ;;  %v10289_v25 = vpop.eup %10288 }
 0x76c   : > { %9393 = vmatprep.subr.mxu1 %v13492_v43  ;;  %v2624_v42 = vmul.f32 %v10289_v25, %v11586_v63  ;;  %v2571_v26 = vpop.xlane.xlu0 %2570 }
 0x76d   : > { %10302 = vrcp.f32 %v2571_v26  ;;  %v2569_v0 = vpop.xlane.xlu1 %2568 }
 0x76e   : > { %v10291_v4 = vpop.eup %10290  ;;  %10304 = vrcp.f32 %v2569_v0 }
 0x76f   : > { %9394 = vmatpush3.xpose.msra.mxu1 %v2627_v30  ;;  %v2623_v48 = vmul.f32 %v10291_v4, %v11595_v39  ;;  %v10293_v49 = vpop.eup %10292 }
 0x770   : > { %9395 = vmatprep.subr.mxu1 %v13492_v43  ;;  %v2622_v45 = vmul.f32 %v10293_v49, %v11593_v16 }
 0x771   : > { %v980_v21 = vpop.permute.xlu1 %979 }
 0x772   : > { %v10295_v14 = vpop.eup %10294  ;;  %v1141_v55 = vadd.f32 %v13502_v54, %v980_v21 }
 0x773   : > { %9396 = vmatpush3.xpose.msra.mxu1 %v2626_v47  ;;  %v2621_v13 = vmul.f32 %v10295_v14, %v11601_v18  ;;  %v10297_v7 = vpop.eup %10296  ;;  %v13501_v18 = vld [vmem:[#allocation33_spill] sm:$0xff] }
 0x774   : > { %9397 = vmatprep.subr.mxu1 %v13492_v43  ;;  %v2620_v11 = vmul.f32 %v10297_v7, %v11599_v9  ;;  %v995_v39 = vpop.permute.xlu0 %994 }
 0x775   : > { %v2809_v3 = vpop.permute.xlu1 %2808 }
 0x776   : > { %v10299_v19 = vpop.eup %10298 }
 0x777   : > { %9398 = vmatpush3.xpose.msra.mxu1 %v2625_v1  ;;  %v2619_v63 = vmul.f32 %v10299_v19, %v11607_v46  ;;  %v10301_v28 = vpop.eup %10300  ;;  %v1156_v46 = vadd.f32 %v13501_v18, %v995_v39  ;;  %v2255_v1 = vadd.f32 %v11519_v33, %v11511_v44 }
 0x778   : > { %9399 = vmatprep.subr.mxu1 %v13492_v43  ;;  %v2618_v15 = vmul.f32 %v10301_v28, %v11605_v29  ;;  %v8387_v29 = vld [vmem:[%s10731_s25 + $0x40] sm:$0xff] }
 0x779   : > { %9422 = vmatprep.mubr.msk.f32.mxu0 %vm1196_vm2, %v8387_v29  ;;  %v2813_v51 = vpop.permute.xlu1 %2812 }
 0x77a   : > { %v10303_v6 = vpop.eup %10302 }
 0x77b   : > { %9400 = vmatpush3.xpose.msra.mxu1 %v2624_v42  ;;  %v2617_v38 = vmul.f32 %v10303_v6, %v11613_v31  ;;  %v10305_v16 = vpop.eup %10304  ;;  %v2811_v31 = vpop.permute.xlu0 %2810 }
 0x77c   : > { %9401 = vmatprep.subr.mxu1 %v13492_v43  ;;  %v2616_v9 = vmul.f32 %v10305_v16, %v11611_v27 }
 0x77d   : > { %v2817_v59 = vpop.permute.xlu1 %2816 }
 0x77f   : > { %9402 = vmatpush3.xpose.msra.mxu1 %v2623_v48  ;;  %v2815_v57 = vpop.permute.xlu0 %2814 }
 0x780   : > { %9403 = vmatprep.subr.mxu1 %v13492_v43 }
 0x781   : > { %v2821_v61 = vpop.permute.xlu1 %2820 }
 0x783   : > { %9404 = vmatpush3.xpose.msra.mxu1 %v2622_v45  ;;  %v2819_v60 = vpop.permute.xlu0 %2818 }
 0x784   : > { %9405 = vmatprep.subr.mxu1 %v13492_v43 }
 0x785   : > { %v2825_v34 = vpop.permute.xlu1 %2824 }
 0x787   : > { %9406 = vmatpush3.xpose.msra.mxu1 %v2621_v13  ;;  %v2823_v62 = vpop.permute.xlu0 %2822 }
 0x788   : > { %9407 = vmatprep.subr.mxu1 %v13492_v43 }
 0x789   : > { %v2829_v8 = vpop.permute.xlu1 %2828 }
 0x78b   : > { %9408 = vmatpush3.xpose.msra.mxu1 %v2620_v11  ;;  %v2827_v5 = vpop.permute.xlu0 %2826 }
 0x78c   : > { %9409 = vmatprep.subr.mxu1 %v13492_v43 }
 0x78d   : > { %v2833_v36 = vpop.permute.xlu1 %2832 }
 0x78f   : > { %9410 = vmatpush3.xpose.msra.mxu1 %v2619_v63  ;;  %v2831_v23 = vpop.permute.xlu0 %2830 }
 0x790   : > { %9411 = vmatprep.subr.mxu1 %v13492_v43 }
 0x791   : > { %v2837_v30 = vpop.permute.xlu1 %2836 }
 0x793   : > { %9412 = vmatpush3.xpose.msra.mxu1 %v2618_v15  ;;  %v2835_v37 = vpop.permute.xlu0 %2834 }
 0x794   : > { %9413 = vmatprep.subr.mxu1 %v13492_v43 }
 0x797   : > { %9414 = vmatpush3.xpose.msra.mxu1 %v2617_v38  ;;  %v2839_v2 = vpop.permute.xlu0 %2838 }
 0x798   : > { %9415 = vmatprep.subr.mxu1 %v13492_v43 }
 0x79b   : > { %9416 = vmatpush3.xpose.msra.mxu1 %v2616_v9 }
 0x79e   : > { %9418 = vmatmul.mubr.f32.vlgmr.msra.gmra.mxu1 %v1156_v46 }
 0x85e   : > { %v2698_v52 = vpop.f32.mrf.mxu1 }
 0x85f   : > { %9420 = vmatprep.subr.mxu0 %v2698_v52 }
 0x860   : > { %v9419_v27 = vpop.f32.mrf.mxu1  ;;  %9421 = vmatpush3.msra.mxu0 %v2698_v52 }
 0x861   : > { %9423 = vmatmul.mubr.msk.f32.vlgmr.msra.gmra.mxu0 %vm1196_vm2, %v8388_v53  ;;  %9428 = vmatprep.subr.mxu0 %v1141_v55 }
 0x862   : > { %9429 = vmatpush3.msra.mxu0 %v1141_v55  ;;  %9425 = vmatprep.mubr.msk.f32.mxu0 %vm1196_vm2, %v8389_v56 }
 0x863   : > { %9454 = vmatprep.subr.mxu0 %v13492_v43 }
 0x865   : > { %9426 = vmatmul.mubr.msk.f32.gmra.mxu0 %vm1196_vm2, %v8390_v58 }
 0x866   : > { %9430 = vmatprep.mubr.msk.f32.mxu0 %vm1196_vm2, %v2809_v3 }
 0x869   : > { %9431 = vmatmul.mubr.msk.f32.vlgmr.msra.gmra.mxu0 %vm1196_vm2, %v2811_v31 }
 0x86a   : > { %9433 = vmatprep.mubr.msk.f32.mxu0 %vm1196_vm2, %v2813_v51 }
 0x86d   : > { %9434 = vmatmul.mubr.msk.f32.gmra.mxu0 %vm1196_vm2, %v2815_v57 }
 0x86e   : > { %9436 = vmatprep.mubr.msk.f32.mxu0 %vm1196_vm2, %v2817_v59 }
 0x871   : > { %9437 = vmatmul.mubr.msk.f32.gmra.mxu0 %vm1196_vm2, %v2819_v60 }
 0x872   : > { %9439 = vmatprep.mubr.msk.f32.mxu0 %vm1196_vm2, %v2821_v61 }
 0x875   : > { %9440 = vmatmul.mubr.msk.f32.gmra.mxu0 %vm1196_vm2, %v2823_v62 }
 0x876   : > { %9442 = vmatprep.mubr.msk.f32.mxu0 %vm1196_vm2, %v2825_v34 }
 0x879   : > { %9443 = vmatmul.mubr.msk.f32.gmra.mxu0 %vm1196_vm2, %v2827_v5 }
 0x87a   : > { %9445 = vmatprep.mubr.msk.f32.mxu0 %vm1196_vm2, %v2829_v8 }
 0x87d   : > { %9446 = vmatmul.mubr.msk.f32.gmra.mxu0 %vm1196_vm2, %v2831_v23 }
 0x87e   : > { %9448 = vmatprep.mubr.msk.f32.mxu0 %vm1196_vm2, %v2833_v36 }
 0x881   : > { %9449 = vmatmul.mubr.msk.f32.gmra.mxu0 %vm1196_vm2, %v2835_v37 }
 0x882   : > { %9451 = vmatprep.mubr.msk.f32.mxu0 %vm1196_vm2, %v2837_v30 }
 0x885   : > { %9452 = vmatmul.mubr.msk.f32.gmra.mxu0 %vm1196_vm2, %v2839_v2 }
 0x886   : > { %9486 = vmatprep.mubr.msk.f32.mxu0 %vm10693_vm3, %v13492_v43 }
 0x921   : > { %v9424_v40 = vpop.f32.mrf.mxu0 }
 0x922   : > { %v11712_v47 = vadd.f32 %v9424_v40, %v11513_v22 }
 0x923   : > { %v11714_v50 = vpop.f32.mrf.mxu0 }
 0x925   : > { %v9427_v24 = vpop.f32.mrf.mxu0 }
 0x926   : > { %v11719_v25 = vadd.f32 %v9427_v24, %v11517_v32 }
 0x927   : > { %v2795_v17 = vpop.f32.mrf.mxu0 }
 0x928   : > { %v11721_v42 = vadd.f32 %v2795_v17, %v2255_v1 }
 0x929   : > { %v9432_v4 = vpop.f32.mrf.mxu0 }
 0x92a   : > { %v11764_v51 = vsel %vm10875_vm1, %v9432_v4, -10000.0 }
 0x92b   : > { %v2938_v35 = vpop.f32.mrf.mxu0 }
 0x92c   : > { %v11759_v31 = vsel %vm10875_vm1, %v2938_v35, -10000.0 }
 0x92d   : > { %v9435_v48 = vpop.f32.mrf.mxu0 }
 0x92e   : > { %v11754_v3 = vsel %vm10875_vm1, %v9435_v48, -10000.0 }
 0x92f   : > { %v2948_v49 = vpop.f32.mrf.mxu0 }
 0x930   : > { %v11749_v21 = vsel %vm10875_vm1, %v2948_v49, -10000.0 }
 0x931   : > { %v9438_v10 = vpop.f32.mrf.mxu0 }
 0x932   : > { %v3022_v29 = vsel %vm10875_vm1, %v9438_v10, -10000.0 }
 0x933   : > { %v2958_v45 = vpop.f32.mrf.mxu0 }
 0x934   : > { %v3021_v46 = vsel %vm10875_vm1, %v2958_v45, -10000.0 }
 0x935   : > { %v9441_v22 = vpop.f32.mrf.mxu0 }
 0x936   : > { %v3024_v18 = vsel %vm10875_vm1, %v9441_v22, -10000.0 }
 0x937   : > { %v2968_v14 = vpop.f32.mrf.mxu0 }
 0x938   : > { %v3023_v9 = vsel %vm10875_vm1, %v2968_v14, -10000.0 }
 0x939   : > { %v9444_v26 = vpop.f32.mrf.mxu0 }
 0x93a   : > { %v3026_v39 = vsel %vm10875_vm1, %v9444_v26, -10000.0 }
 0x93b   : > { %v2978_v13 = vpop.f32.mrf.mxu0 }
 0x93c   : > { %v3025_v16 = vsel %vm10875_vm1, %v2978_v13, -10000.0 }
 0x93d   : > { %v9447_v7 = vpop.f32.mrf.mxu0 }
 0x93e   : > { %v3028_v38 = vsel %vm10875_vm1, %v9447_v7, -10000.0 }
 0x93f   : > { %v2988_v0 = vpop.f32.mrf.mxu0 }
 0x940   : > { %v3027_v6 = vsel %vm10875_vm1, %v2988_v0, -10000.0 }
 0x941   : > { %v9450_v11 = vpop.f32.mrf.mxu0 }
 0x942   : > { %v3030_v15 = vsel %vm10875_vm1, %v9450_v11, -10000.0 }
 0x943   : > { %v2998_v44 = vpop.f32.mrf.mxu0 }
 0x944   : > { %v3029_v28 = vsel %vm10875_vm1, %v2998_v44, -10000.0 }
 0x945   : > { %v9453_v33 = vpop.f32.mrf.mxu0 }
 0x946   : > { %v3032_v32 = vsel %vm10875_vm1, %v9453_v33, -10000.0 }
 0x947   : > { %3063 = vmax.xlane.f32.xlu1 %v3032_v32  ;;  %v3008_v19 = vpop.f32.mrf.mxu0 }
 0x948   : > { %v3031_v63 = vsel %vm10875_vm1, %v3008_v19, -10000.0 }
 0x949   : > { %3061 = vmax.xlane.f32.xlu0 %v3031_v63 }
 0x94b   : > { %3057 = vmax.xlane.f32.xlu1 %v3029_v28 }
 0x94d   : > { %3059 = vmax.xlane.f32.xlu0 %v3030_v15 }
 0x94f   : > { %3053 = vmax.xlane.f32.xlu1 %v3027_v6 }
 0x951   : > { %3055 = vmax.xlane.f32.xlu0 %v3028_v38 }
 0x953   : > { %3049 = vmax.xlane.f32.xlu1 %v3025_v16 }
 0x955   : > { %3051 = vmax.xlane.f32.xlu0 %v3026_v39 }
 0x957   : > { %3045 = vmax.xlane.f32.xlu1 %v3023_v9 }
 0x959   : > { %3047 = vmax.xlane.f32.xlu0 %v3024_v18 }
 0x95b   : > { %3041 = vmax.xlane.f32.xlu1 %v3021_v46 }
 0x95d   : > { %3043 = vmax.xlane.f32.xlu0 %v3022_v29 }
 0x95f   : > { %3037 = vmax.xlane.f32.xlu1 %v11749_v21 }
 0x961   : > { %3039 = vmax.xlane.f32.xlu0 %v11754_v3 }
 0x963   : > { %3033 = vmax.xlane.f32.xlu1 %v11759_v31 }
 0x965   : > { %3035 = vmax.xlane.f32.xlu0 %v11764_v51 }
 0x9d0   : > { %v3064_v52 = vpop.xlane.xlu1 %3063 }
 0x9d1   : > { %v3080_v53 = vsub.f32 %v3032_v32, %v3064_v52 }
 0x9d2   : > { %v3062_v54 = vpop.xlane.xlu0 %3061 }
 0x9d3   : > { %v3111_v55 = vmul.f32 1.442695, %v3080_v53  ;;  %v3079_v56 = vsub.f32 %v3031_v63, %v3062_v54 }
 0x9d4   : > { %v3058_v57 = vpop.xlane.xlu1 %3057 }
 0x9d5   : > { %10306 = vpow2.f32 %v3111_v55  ;;  %v3109_v27 = vmul.f32 1.442695, %v3079_v56  ;;  %v3077_v58 = vsub.f32 %v3029_v28, %v3058_v57 }
 0x9d6   : > { %v3060_v59 = vpop.xlane.xlu0 %3059 }
 0x9d7   : > { %10308 = vpow2.f32 %v3109_v27  ;;  %v3105_v60 = vmul.f32 1.442695, %v3077_v58  ;;  %v3078_v61 = vsub.f32 %v3030_v15, %v3060_v59  ;;  %v3353_v59 = vld [vmem:[%s10736_s29] sm:$0xff] }
 0x9d8   : > { %v3054_v62 = vpop.xlane.xlu1 %3053 }
 0x9d9   : > { %v3107_v34 = vmul.f32 1.442695, %v3078_v61  ;;  %v3075_v5 = vsub.f32 %v3027_v6, %v3054_v62  ;;  %10310 = vpow2.f32 %v3105_v60  ;;  %v3354_v60 = vld [vmem:[%s10736_s29 + $0x8] sm:$0xff]  ;;  %v941_v61 = vld [vmem:[%s10726_s21 + $0x58] sm:$0xff] }
 0x9da   : > { %v3056_v8 = vpop.xlane.xlu0 %3055  ;;  %v3356_v62 = vld [vmem:[%s10736_s29 + $0x18] sm:$0xff] }
 0x9db   : > { %10312 = vpow2.f32 %v3107_v34  ;;  %v3101_v23 = vmul.f32 1.442695, %v3075_v5  ;;  %v3076_v36 = vsub.f32 %v3028_v38, %v3056_v8  ;;  %v3355_v34 = vld [vmem:[%s10736_s29 + $0x10] sm:$0xff]  ;;  %v3388_v8 = vld [vmem:[%s10741_s3 + $0x18] sm:$0xff] }
 0x9dc   : > { %v3050_v37 = vpop.xlane.xlu1 %3049  ;;  %v3387_v5 = vld [vmem:[%s10741_s3 + $0x10] sm:$0xff] }
 0x9dd   : > { %v3103_v30 = vmul.f32 1.442695, %v3076_v36  ;;  %v3073_v2 = vsub.f32 %v3025_v16, %v3050_v37  ;;  %10314 = vpow2.f32 %v3101_v23  ;;  %v3386_v23 = vld [vmem:[%s10741_s3 + $0x8] sm:$0xff]  ;;  %v3392_v36 = vld [vmem:[%s10746_s8 + $0x18] sm:$0xff]  ;;  %v3385_v37 = vld [vmem:[%s10741_s3] sm:$0xff] }
 0x9de   : > { %v3052_v40 = vpop.xlane.xlu0 %3051 }
 0x9df   : > { %10316 = vpow2.f32 %v3103_v30  ;;  %v3097_v24 = vmul.f32 1.442695, %v3073_v2  ;;  %v3074_v1 = vsub.f32 %v3026_v39, %v3052_v40  ;;  %v3391_v30 = vld [vmem:[%s10746_s8 + $0x10] sm:$0xff]  ;;  %v3389_v2 = vld [vmem:[%s10746_s8] sm:$0xff]  ;;  %v3390_v40 = vld [vmem:[%s10746_s8 + $0x8] sm:$0xff] }
 0x9e0   : > { %v3046_v17 = vpop.xlane.xlu1 %3045 }
 0x9e1   : > { %v3099_v4 = vmul.f32 1.442695, %v3074_v1  ;;  %v3071_v35 = vsub.f32 %v3023_v9, %v3046_v17  ;;  %10318 = vpow2.f32 %v3097_v24 }
 0x9e2   : > { %v11767_v48 = vpop.eup %10306  ;;  %v3048_v49 = vpop.xlane.xlu0 %3047 }
 0x9e3   : > { %10320 = vpow2.f32 %v3099_v4  ;;  %v3093_v10 = vmul.f32 1.442695, %v3071_v35  ;;  %v3072_v45 = vsub.f32 %v3024_v18, %v3048_v49  ;;  %3143 = vadd.xlane.f32.xlu0 %v11767_v48 }
 0x9e4   : > { %v11770_v22 = vpop.eup %10308  ;;  %v3042_v14 = vpop.xlane.xlu1 %3041 }
 0x9e5   : > { %v3095_v26 = vmul.f32 1.442695, %v3072_v45  ;;  %v3069_v13 = vsub.f32 %v3021_v46, %v3042_v14  ;;  %3141 = vadd.xlane.f32.xlu1 %v11770_v22  ;;  %10322 = vpow2.f32 %v3093_v10 }
 0x9e6   : > { %v3044_v7 = vpop.xlane.xlu0 %3043  ;;  %v11773_v0 = vpop.eup %10310 }
 0x9e7   : > { %10324 = vpow2.f32 %v3095_v26  ;;  %v3089_v11 = vmul.f32 1.442695, %v3069_v13  ;;  %v3070_v44 = vsub.f32 %v3022_v29, %v3044_v7 }
 0x9e8   : > { %v11775_v33 = vpop.eup %10312  ;;  %v3038_v32 = vpop.xlane.xlu1 %3037 }
 0x9e9   : > { %v3091_v19 = vmul.f32 1.442695, %v3070_v44  ;;  %v3067_v63 = vsub.f32 %v11749_v21, %v3038_v32  ;;  %3137 = vadd.xlane.f32.xlu1 %v11773_v0  ;;  %3139 = vadd.xlane.f32.xlu0 %v11775_v33  ;;  %10326 = vpow2.f32 %v3089_v11 }
 0x9ea   : > { %v3040_v28 = vpop.xlane.xlu0 %3039  ;;  %v11780_v15 = vpop.eup %10314 }
 0x9eb   : > { %10328 = vpow2.f32 %v3091_v19  ;;  %v3085_v6 = vmul.f32 1.442695, %v3067_v63  ;;  %v3068_v38 = vsub.f32 %v11754_v3, %v3040_v28 }
 0x9ec   : > { %v11783_v16 = vpop.eup %10316  ;;  %v3034_v39 = vpop.xlane.xlu1 %3033 }
 0x9ed   : > { %v3087_v9 = vmul.f32 1.442695, %v3068_v38  ;;  %v3065_v18 = vsub.f32 %v11759_v31, %v3034_v39  ;;  %3133 = vadd.xlane.f32.xlu1 %v11780_v15  ;;  %3135 = vadd.xlane.f32.xlu0 %v11783_v16  ;;  %10330 = vpow2.f32 %v3085_v6 }
 0x9ee   : > { %v3036_v46 = vpop.xlane.xlu0 %3035  ;;  %v11788_v29 = vpop.eup %10318 }
 0x9ef   : > { %10332 = vpow2.f32 %v3087_v9  ;;  %v3081_v21 = vmul.f32 1.442695, %v3065_v18  ;;  %v3066_v52 = vsub.f32 %v11764_v51, %v3036_v46 }
 0x9f0   : > { %v11791_v53 = vpop.eup %10320 }
 0x9f1   : > { %v3083_v3 = vmul.f32 1.442695, %v3066_v52  ;;  %3129 = vadd.xlane.f32.xlu1 %v11788_v29  ;;  %3131 = vadd.xlane.f32.xlu0 %v11791_v53  ;;  %10334 = vpow2.f32 %v3081_v21 }
 0x9f2   : > { %v11795_v31 = vpop.eup %10322 }
 0x9f3   : > { %10336 = vpow2.f32 %v3083_v3 }
 0x9f4   : > { %v11797_v54 = vpop.eup %10324 }
 0x9f5   : > { %3125 = vadd.xlane.f32.xlu1 %v11795_v31  ;;  %3127 = vadd.xlane.f32.xlu0 %v11797_v54 }
 0x9f6   : > { %v11801_v51 = vpop.eup %10326 }
 0x9f8   : > { %v11803_v55 = vpop.eup %10328 }
 0x9f9   : > { %3121 = vadd.xlane.f32.xlu1 %v11801_v51  ;;  %3123 = vadd.xlane.f32.xlu0 %v11803_v55 }
 0x9fa   : > { %v11807_v56 = vpop.eup %10330 }
 0x9fc   : > { %v11809_v57 = vpop.eup %10332 }
 0x9fd   : > { %3117 = vadd.xlane.f32.xlu1 %v11807_v56  ;;  %3119 = vadd.xlane.f32.xlu0 %v11809_v57 }
 0x9fe   : > { %v11813_v27 = vpop.eup %10334 }
 0xa00   : > { %v11815_v58 = vpop.eup %10336 }
 0xa01   : > { %3113 = vadd.xlane.f32.xlu1 %v11813_v27  ;;  %3115 = vadd.xlane.f32.xlu0 %v11815_v58 }
 0xa12   : > { %3359 = vperm.xlu1 %10113, %v3353_v59  }
 0xa16   : > { %3364 = vperm.xlu1 %10113, %v3354_v60  }
 0xa17   : > { %999 = vperm.xlu0 %10112, %v941_v61  }
 0xa1a   : > { %3374 = vperm.xlu1 %10113, %v3356_v62  }
 0xa1b   : > { %3369 = vperm.xlu0 %10112, %v3355_v34  }
 0xa1e   : > { %3443 = vperm.xlu1 %10113, %v3387_v5  }
 0xa1f   : > { %3448 = vperm.xlu0 %10112, %v3388_v8  }
 0xa22   : > { %3438 = vperm.xlu1 %10113, %v3386_v23  }
 0xa23   : > { %3472 = vperm.xlu0 %10112, %v3392_v36  }
 0xa26   : > { %3433 = vperm.xlu1 %10113, %v3385_v37   ;;  %v13503_v37 = vld [vmem:[#allocation32_spill] sm:$0xff] }
 0xa27   : > { %3467 = vperm.xlu0 %10112, %v3391_v30   ;;  %v8411_v30 = vld [vmem:[%s10731_s25 + $0x60] sm:$0xff] }
 0xa28   : > { %9491 = vmatprep.mubr.msk.f32.mxu1 %vm1196_vm2, %v8411_v30 }
 0xa2a   : > { %3457 = vperm.xlu1 %10113, %v3389_v2  }
 0xa2b   : > { %3462 = vperm.xlu0 %10112, %v3390_v40   ;;  %v8412_v40 = vld [vmem:[%s10731_s25 + $0x68] sm:$0xff] }
 0xa6c   : > { %v3144_v24 = vpop.xlane.xlu0 %3143 }
 0xa6d   : > { %10338 = vrcp.f32 %v3144_v24 }
 0xa6e   : > { %v3142_v1 = vpop.xlane.xlu1 %3141 }
 0xa6f   : > { %10340 = vrcp.f32 %v3142_v1  ;;  %v8414_v1 = vld [vmem:[%s10731_s25 + $0x78] sm:$0xff] }
 0xa72   : > { %v3140_v17 = vpop.xlane.xlu0 %3139  ;;  %v3138_v4 = vpop.xlane.xlu1 %3137 }
 0xa73   : > { %10342 = vrcp.f32 %v3140_v17 }
 0xa74   : > { %10344 = vrcp.f32 %v3138_v4  ;;  %v2245_v4 = vadd.f32 %v11515_v41, %v11509_v20 }
 0xa76   : > { %v3136_v35 = vpop.xlane.xlu0 %3135  ;;  %v3134_v14 = vpop.xlane.xlu1 %3133 }
 0xa77   : > { %10346 = vrcp.f32 %v3136_v35 }
 0xa78   : > { %10348 = vrcp.f32 %v3134_v14 }
 0xa7a   : > { %v10339_v49 = vpop.eup %10338  ;;  %v3132_v13 = vpop.xlane.xlu0 %3131 }
 0xa7b   : > { %v3176_v10 = vmul.f32 %v10339_v49, %v11767_v48  ;;  %10350 = vrcp.f32 %v3132_v13  ;;  %v3130_v32 = vpop.xlane.xlu1 %3129 }
 0xa7c   : > { %v10341_v45 = vpop.eup %10340  ;;  %10352 = vrcp.f32 %v3130_v32 }
 0xa7d   : > { %9455 = vmatpush3.xpose.msra.mxu0 %v3176_v10  ;;  %v3175_v26 = vmul.f32 %v10341_v45, %v11770_v22  ;;  %v2804_v10 = vadd.f32 %v11714_v50, %v2245_v4 }
 0xa7e   : > { %9456 = vmatprep.subr.mxu0 %v13492_v43  ;;  %v3128_v63 = vpop.xlane.xlu0 %3127 }
 0xa7f   : > { %10354 = vrcp.f32 %v3128_v63  ;;  %v3126_v6 = vpop.xlane.xlu1 %3125 }
 0xa80   : > { %v10343_v7 = vpop.eup %10342  ;;  %10356 = vrcp.f32 %v3126_v6 }
 0xa81   : > { %9457 = vmatpush3.xpose.msra.mxu0 %v3175_v26  ;;  %v3174_v11 = vmul.f32 %v10343_v7, %v11775_v33  ;;  %v10345_v44 = vpop.eup %10344 }
 0xa82   : > { %9458 = vmatprep.subr.mxu0 %v13492_v43  ;;  %v3173_v48 = vmul.f32 %v10345_v44, %v11773_v0  ;;  %v3124_v39 = vpop.xlane.xlu0 %3123 }
 0xa83   : > { %10358 = vrcp.f32 %v3124_v39  ;;  %v3122_v18 = vpop.xlane.xlu1 %3121 }
 0xa84   : > { %v10347_v19 = vpop.eup %10346  ;;  %10360 = vrcp.f32 %v3122_v18  ;;  %v13507_v18 = vld [vmem:[#allocation21_spill] sm:$0xff] }
 0xa85   : > { %9459 = vmatpush3.xpose.msra.mxu0 %v3174_v11  ;;  %v3172_v22 = vmul.f32 %v10347_v19, %v11783_v16  ;;  %v10349_v28 = vpop.eup %10348  ;;  %v13504_v11 = vld [vmem:[#allocation22_spill] sm:$0xff] }
 0xa86   : > { %9460 = vmatprep.subr.mxu0 %v13492_v43  ;;  %v3171_v33 = vmul.f32 %v10349_v28, %v11780_v15  ;;  %v3120_v21 = vpop.xlane.xlu0 %3119 }
 0xa87   : > { %10362 = vrcp.f32 %v3120_v21  ;;  %v3118_v3 = vpop.xlane.xlu1 %3117 }
 0xa88   : > { %v10351_v38 = vpop.eup %10350  ;;  %10364 = vrcp.f32 %v3118_v3 }
 0xa89   : > { %9461 = vmatpush3.xpose.msra.mxu0 %v3173_v48  ;;  %v3170_v0 = vmul.f32 %v10351_v38, %v11791_v53  ;;  %v10353_v9 = vpop.eup %10352 }
 0xa8a   : > { %9462 = vmatprep.subr.mxu0 %v13492_v43  ;;  %v3169_v16 = vmul.f32 %v10353_v9, %v11788_v29  ;;  %v3116_v60 = vpop.xlane.xlu0 %3115 }
 0xa8b   : > { %10366 = vrcp.f32 %v3116_v60  ;;  %v3114_v62 = vpop.xlane.xlu1 %3113 }
 0xa8c   : > { %v10355_v46 = vpop.eup %10354  ;;  %10368 = vrcp.f32 %v3114_v62 }
 0xa8d   : > { %9463 = vmatpush3.xpose.msra.mxu0 %v3172_v22  ;;  %v3168_v15 = vmul.f32 %v10355_v46, %v11797_v54  ;;  %v10357_v52 = vpop.eup %10356  ;;  %v13505_v22 = vld [vmem:[#allocation23_spill] sm:$0xff] }
 0xa8e   : > { %9464 = vmatprep.subr.mxu0 %v13492_v43  ;;  %v3167_v53 = vmul.f32 %v10357_v52, %v11795_v31 }
 0xa8f   : > { %v3360_v17 = vpop.permute.xlu1 %3359 }
 0xa90   : > { %v10359_v59 = vpop.eup %10358 }
 0xa91   : > { %9465 = vmatpush3.xpose.msra.mxu0 %v3171_v33  ;;  %v3166_v29 = vmul.f32 %v10359_v59, %v11803_v55  ;;  %v10361_v61 = vpop.eup %10360 }
 0xa92   : > { %9466 = vmatprep.subr.mxu0 %v13492_v43  ;;  %v3165_v54 = vmul.f32 %v10361_v61, %v11801_v51 }
 0xa93   : > { %v3365_v35 = vpop.permute.xlu1 %3364 }
 0xa94   : > { %v10363_v34 = vpop.eup %10362 }
 0xa95   : > { %9467 = vmatpush3.xpose.msra.mxu0 %v3170_v0  ;;  %v3164_v31 = vmul.f32 %v10363_v34, %v11809_v57  ;;  %v10365_v5 = vpop.eup %10364  ;;  %v1000_v57 = vpop.permute.xlu0 %999  ;;  %v13506_v0 = vld [vmem:[#allocation20_spill] sm:$0xff] }
 0xa96   : > { %9468 = vmatprep.subr.mxu0 %v13492_v43  ;;  %v3163_v55 = vmul.f32 %v10365_v5, %v11807_v56  ;;  %v1161_v56 = vadd.f32 %v13503_v37, %v1000_v57 }
 0xa97   : > { %v3375_v19 = vpop.permute.xlu1 %3374 }
 0xa98   : > { %v10367_v8 = vpop.eup %10366 }
 0xa99   : > { %9469 = vmatpush3.xpose.msra.mxu0 %v3169_v16  ;;  %v3162_v51 = vmul.f32 %v10367_v8, %v11815_v58  ;;  %v10369_v23 = vpop.eup %10368  ;;  %v8413_v58 = vld [vmem:[%s10731_s25 + $0x70] sm:$0xff]  ;;  %v3370_v6 = vpop.permute.xlu0 %3369 }
 0xa9a   : > { %9470 = vmatprep.subr.mxu0 %v13492_v43  ;;  %v3161_v36 = vmul.f32 %v10369_v23, %v11813_v27  ;;  %v8419_v27 = vld [vmem:[%s10751_s14 + $0x40] sm:$0xff] }
 0xa9d   : > { %9471 = vmatpush3.xpose.msra.mxu0 %v3168_v15 }
 0xa9e   : > { %9472 = vmatprep.subr.mxu0 %v13492_v43 }
 0xaa1   : > { %9473 = vmatpush3.xpose.msra.mxu0 %v3167_v53 }
 0xaa2   : > { %9474 = vmatprep.subr.mxu0 %v13492_v43 }
 0xaa5   : > { %9475 = vmatpush3.xpose.msra.mxu0 %v3166_v29 }
 0xaa6   : > { %9476 = vmatprep.subr.mxu0 %v13492_v43 }
 0xaa9   : > { %9477 = vmatpush3.xpose.msra.mxu0 %v3165_v54 }
 0xaaa   : > { %9478 = vmatprep.subr.mxu0 %v13492_v43 }
 0xaad   : > { %9479 = vmatpush3.xpose.msra.mxu0 %v3164_v31 }
 0xaae   : > { %9480 = vmatprep.subr.mxu0 %v13492_v43 }
 0xab1   : > { %9481 = vmatpush3.xpose.msra.mxu0 %v3163_v55 }
 0xab2   : > { %9482 = vmatprep.subr.mxu0 %v13492_v43 }
 0xab5   : > { %9483 = vmatpush3.xpose.msra.mxu0 %v3162_v51 }
 0xab6   : > { %9484 = vmatprep.subr.mxu0 %v13492_v43 }
 0xab9   : > { %9485 = vmatpush3.xpose.msra.mxu0 %v3161_v36 }
 0xabc   : > { %9487 = vmatmul.mubr.f32.vlgmr.msra.gmra.mxu0 %v1161_v56 }
 0xb7c   : > { %v3243_v2 = vpop.f32.mrf.mxu0 }
 0xb7d   : > { %9489 = vmatprep.subr.mxu1 %v3243_v2 }
 0xb7e   : > { %v9488_v24 = vpop.f32.mrf.mxu0  ;;  %9490 = vmatpush3.msra.mxu1 %v3243_v2 }
 0xb7f   : > { %9492 = vmatmul.mubr.msk.f32.vlgmr.msra.gmra.mxu1 %vm1196_vm2, %v8412_v40  ;;  %v3444_v24 = vpop.permute.xlu1 %3443 }
 0xb80   : > { %9494 = vmatprep.mubr.msk.f32.mxu1 %vm1196_vm2, %v8413_v58  ;;  %v3449_v58 = vpop.permute.xlu0 %3448 }
 0xb83   : > { %9495 = vmatmul.mubr.msk.f32.gmra.mxu1 %vm1196_vm2, %v8414_v1 }
 0xb84   : > { %9505 = vmatprep.mubr.msk.f32.mxu1 %vm1002_vm0, %v8419_v27  ;;  %v3473_v1 = vpop.permute.xlu0 %3472  ;;  %v3439_v27 = vpop.permute.xlu1 %3438 }
 0xb88   : > { %v3468_v4 = vpop.permute.xlu0 %3467 }
 0xc3f   : > { %v9493_v49 = vpop.f32.mrf.mxu1 }
 0xc40   : > { %v3350_v45 = vadd.f32 %v9493_v49, %v11712_v47 }
 0xc41   : > { %v3330_v14 = vpop.f32.mrf.mxu1 }
 0xc42   : > { %v3378_v26 = vadd.f32 %v3365_v35, %v3350_v45  ;;  %v3349_v13 = vadd.f32 %v3330_v14, %v2804_v10  ;;  %v3434_v14 = vpop.permute.xlu1 %3433 }
 0xc43   : > { %v9496_v7 = vpop.f32.mrf.mxu1 }
 0xc44   : > { %v3382_v44 = vadd.f32 %v3378_v26, %v13504_v11  ;;  %v3377_v32 = vadd.f32 %v3360_v17, %v3349_v13  ;;  %v3352_v48 = vadd.f32 %v9496_v7, %v11719_v25 }
 0xc45   : > { %v3340_v63 = vpop.f32.mrf.mxu1 }
 0xc46   : > { %v3381_v28 = vadd.f32 %v3377_v32, %v13505_v22  ;;  %v3380_v20 = vadd.f32 %v3375_v19, %v3352_v48  ;;  %v3351_v41 = vadd.f32 %v3340_v63, %v11721_v42  ;;  %v3405_v50 = vmul.f32 %v3382_v44, %v3382_v44  ;;  %v3463_v48 = vpop.permute.xlu0 %3462  ;;  %v13508_v19 = vld [vmem:[#allocation19_spill] sm:$0xff] }
 0xc48   : > { %v3393_v33 = vadd.f32 %v3382_v44, %v3381_v28  ;;  %v3404_v47 = vmul.f32 %v3381_v28, %v3381_v28  ;;  %v3379_v38 = vadd.f32 %v3370_v6, %v3351_v41  ;;  %v3384_v9 = vadd.f32 %v3380_v20, %v13506_v0  ;;  %v3458_v20 = vpop.permute.xlu1 %3457  ;;  %v8423_v0 = vld [vmem:[%s10751_s14 + $0x60] sm:$0xff] }
 0xc4a   : > { %v3408_v39 = vadd.f32 %v3405_v50, %v3404_v47  ;;  %v3383_v16 = vadd.f32 %v3379_v38, %v13507_v18  ;;  %v3407_v25 = vmul.f32 %v3384_v9, %v3384_v9  ;;  %v8447_v50 = vld [vmem:[%s10751_s14 + $0x80] sm:$0xff]  ;;  %v8420_v47 = vld [vmem:[%s10751_s14 + $0x48] sm:$0xff]  ;;  %v8421_v38 = vld [vmem:[%s10751_s14 + $0x50] sm:$0xff] }
 0xc4b   : > { %9545 = vmatprep.mubr.msk.f32.mxu0 %vm1002_vm0, %v8447_v50  ;;  %v8424_v18 = vld [vmem:[%s10751_s14 + $0x68] sm:$0xff] }
 0xc4c   : > { %v3394_v46 = vadd.f32 %v3393_v33, %v3383_v16  ;;  %v3406_v21 = vmul.f32 %v3383_v16, %v3383_v16 }
 0xc4e   : > { %v3395_v15 = vadd.f32 %v3394_v46, %v3384_v9  ;;  %v3409_v52 = vadd.f32 %v3408_v39, %v3406_v21  ;;  %v8422_v39 = vld [vmem:[%s10751_s14 + $0x58] sm:$0xff]  ;;  %v8425_v46 = vld [vmem:[%s10751_s14 + $0x70] sm:$0xff]  ;;  %v3939_v21 = vld [vmem:[%s10756_s19 + $0x28] sm:$0xff] }
 0xc50   : > { %v3396_v3 = vrot.slane %v3395_v15, 4  ;;  %v3410_v53 = vadd.f32 %v3409_v52, %v3407_v25  ;;  %v8426_v25 = vld [vmem:[%s10751_s14 + $0x78] sm:$0xff]  ;;  %v3513_v52 = vld [vmem:[%s10751_s14] sm:$0xff] }
 0xc52   : > { %v3397_v59 = vadd.f32 %v3396_v3, %v3395_v15  ;;  %v3411_v60 = vrot.slane %v3410_v53, 4  ;;  %v3938_v15 = vld [vmem:[%s10756_s19 + $0x20] sm:$0xff]  ;;  %v3937_v3 = vld [vmem:[%s10756_s19 + $0x18] sm:$0xff] }
 0xc54   : > { %v3398_v42 = vrot.slane %v3397_v59, 2  ;;  %v3412_v29 = vadd.f32 %v3411_v60, %v3410_v53  ;;  %v3936_v53 = vld [vmem:[%s10756_s19 + $0x10] sm:$0xff]  ;;  %v3934_v60 = vld [vmem:[%s10756_s19] sm:$0xff] }
 0xc56   : > { %v3399_v61 = vadd.f32 %v3398_v42, %v3397_v59  ;;  %v3413_v62 = vrot.slane %v3412_v29, 2  ;;  %v3935_v59 = vld [vmem:[%s10756_s19 + $0x8] sm:$0xff]  ;;  %v13509_v42 = vld [vmem:[#allocation17_spill] sm:$0xff] }
 0xc57   : > { %vm3483_vm4 = vcmp.ge.s32.totalorder %v13509_v42, 1  ;;  %vm3498_vm5 = vcmp.lt.s32.totalorder %v13509_v42, 127 }
 0xc58   : > { %v3400_v54 = vrot.slane %v3399_v61, 1  ;;  %v3414_v34 = vadd.f32 %v3413_v62, %v3412_v29 }
 0xc5a   : > { %v3401_v31 = vadd.f32 %v3400_v54, %v3399_v61  ;;  %v3415_v5 = vrot.slane %v3414_v34, 1 }
 0xc5c   : > { %v3403_v55 = vmul.f32 0.03125, %v3401_v31  ;;  %v3416_v8 = vadd.f32 %v3415_v5, %v3414_v34  ;;  %v3514_v5 = vld [vmem:[%s10751_s14 + $0x8] sm:$0xff] }
 0xc5e   : > { %v3417_v51 = vmul.f32 0.03125, %v3416_v8  ;;  %v3418_v23 = vmul.f32 %v3403_v55, %v3403_v55  ;;  %v3423_v57 = vsub.f32 %v3383_v16, %v3403_v55  ;;  %v3424_v36 = vsub.f32 %v3384_v9, %v3403_v55  ;;  %v3941_v9 = vld [vmem:[%s10756_s19 + $0x38] sm:$0xff]  ;;  %v3940_v16 = vld [vmem:[%s10756_s19 + $0x30] sm:$0xff] }
 0xc5f   : > { %v3422_v37 = vsub.f32 %v3382_v44, %v3403_v55  ;;  %v3421_v56 = vsub.f32 %v3381_v28, %v3403_v55  ;;  %v3515_v55 = vld [vmem:[%s10751_s14 + $0x10] sm:$0xff] }
 0xc60   : > { %v3419_v30 = vsub.f32 %v3417_v51, %v3418_v23  ;;  %v3516_v51 = vld [vmem:[%s10751_s14 + $0x18] sm:$0xff] }
 0xc62   : > { %v3420_v2 = vmax.f32 %v3419_v30, 0.0  ;;  %v8450_v30 = vld [vmem:[%s10751_s14 + $0x98] sm:$0xff] }
 0xc64   : > { %v3425_v40 = vadd.f32 1e-05, %v3420_v2  ;;  %v3519_v2 = vld [vmem:[%s10751_s14 + $0x30] sm:$0xff] }
 0xc66   : > { %10370 = vrsqrt.f32 %v3425_v40  ;;  %v8451_v40 = vld [vmem:[%s10751_s14 + $0xa0] sm:$0xff] }
 0xc73   : > { %v10371_v17 = vpop.eup %10370 }
 0xc74   : > { %v3429_v35 = vmul.f32 %v10371_v17, %v3423_v57  ;;  %v3430_v49 = vmul.f32 %v10371_v17, %v3424_v36  ;;  %v3428_v10 = vmul.f32 %v10371_v17, %v3422_v37  ;;  %v3427_v45 = vmul.f32 %v10371_v17, %v3421_v56  ;;  %v8448_v57 = vld [vmem:[%s10751_s14 + $0x88] sm:$0xff]  ;;  %v3517_v36 = vld [vmem:[%s10751_s14 + $0x20] sm:$0xff]  ;;  %v8449_v37 = vld [vmem:[%s10751_s14 + $0x90] sm:$0xff] }
 0xc75   : > { %v3518_v56 = vld [vmem:[%s10751_s14 + $0x28] sm:$0xff] }
 0xc76   : > { %v3454_v26 = vmul.f32 %v3449_v58, %v3430_v49  ;;  %v3453_v13 = vmul.f32 %v3444_v24, %v3429_v35  ;;  %v3452_v7 = vmul.f32 %v3439_v27, %v3428_v10  ;;  %v3451_v32 = vmul.f32 %v3434_v14, %v3427_v45  ;;  %v3520_v58 = vld [vmem:[%s10751_s14 + $0x38] sm:$0xff]  ;;  %v8452_v24 = vld [vmem:[%s10751_s14 + $0xa8] sm:$0xff] }
 0xc77   : > { %v8454_v27 = vld [vmem:[%s10751_s14 + $0xb8] sm:$0xff] }
 0xc78   : > { %v11884_v11 = vadd.f32 %v3473_v1, %v3454_v26  ;;  %v11886_v44 = vadd.f32 %v3468_v4, %v3453_v13  ;;  %v11892_v28 = vadd.f32 %v3463_v48, %v3452_v7  ;;  %v11895_v41 = vadd.f32 %v3458_v20, %v3451_v32  ;;  %v8453_v1 = vld [vmem:[%s10751_s14 + $0xb0] sm:$0xff] }
 0xc7a   : > { %v3482_v63 = vmul.f32 %v13508_v19, %v11884_v11  ;;  %v3481_v22 = vmul.f32 %v13508_v19, %v11886_v44  ;;  %v3480_v6 = vmul.f32 %v13508_v19, %v11892_v28  ;;  %v3479_v33 = vmul.f32 %v13508_v19, %v11895_v41 }
 0xc7c   : > { %3490 = vrot.lane.b32.xlu0 %v3482_v63, %s10696_s22  ;;  %9497 = vmatprep.subr.mxu1 %v3482_v63 }
 0xc7d   : > { %3488 = vrot.lane.b32.xlu1 %v3481_v22, %s10696_s22  ;;  %9498 = vmatpush3.msra.mxu1 %v3482_v63 }
 0xc7e   : > { %9499 = vmatprep.subr.mxu1 %v3481_v22 }
 0xc7f   : > { %9500 = vmatpush3.msra.mxu1 %v3481_v22 }
 0xc80   : > { %3505 = vrot.lane.b32.xlu0 %v3482_v63, %s10697_s26  ;;  %9501 = vmatprep.subr.mxu1 %v3480_v6 }
 0xc81   : > { %3486 = vrot.lane.b32.xlu1 %v3480_v6, %s10696_s22  ;;  %9502 = vmatpush3.msra.mxu1 %v3480_v6 }
 0xc82   : > { %9503 = vmatprep.subr.mxu1 %v3479_v33 }
 0xc83   : > { %9504 = vmatpush3.msra.mxu1 %v3479_v33 }
 0xc84   : > { %3503 = vrot.lane.b32.xlu0 %v3481_v22, %s10697_s26  ;;  %9506 = vmatmul.mubr.msk.f32.vlgmr.msra.gmra.mxu1 %vm1002_vm0, %v8420_v47 }
 0xc85   : > { %3484 = vrot.lane.b32.xlu1 %v3479_v33, %s10696_s22  ;;  %9508 = vmatprep.mubr.msk.f32.mxu1 %vm1002_vm0, %v8421_v38 }
 0xc88   : > { %3501 = vrot.lane.b32.xlu0 %v3480_v6, %s10697_s26  ;;  %9509 = vmatmul.mubr.msk.f32.gmra.mxu1 %vm1002_vm0, %v8422_v39 }
 0xc89   : > { %3499 = vrot.lane.b32.xlu1 %v3479_v33, %s10697_s26  ;;  %9511 = vmatprep.mubr.msk.f32.mxu1 %vm1002_vm0, %v8423_v0 }
 0xc8c   : > { %3979 = vperm.xlu0 %10112, %v3941_v9   ;;  %9512 = vmatmul.mubr.msk.f32.gmra.mxu1 %vm1002_vm0, %v8424_v18 }
 0xc8d   : > { %3974 = vperm.xlu1 %10113, %v3940_v16   ;;  %9514 = vmatprep.mubr.msk.f32.mxu1 %vm1002_vm0, %v8425_v46 }
 0xc90   : > { %3969 = vperm.xlu0 %10112, %v3939_v21   ;;  %9515 = vmatmul.mubr.msk.f32.gmra.mxu1 %vm1002_vm0, %v8426_v25 }
 0xc91   : > { %3964 = vperm.xlu1 %10113, %v3938_v15   ;;  %9525 = vmatprep.mubr.msk.f32.mxu1 %vm1002_vm0, %v3513_v52 }
 0xc94   : > { %3959 = vperm.xlu0 %10112, %v3937_v3  }
 0xc95   : > { %3954 = vperm.xlu1 %10113, %v3936_v53  }
 0xc98   : > { %3949 = vperm.xlu0 %10112, %v3935_v59  }
 0xc99   : > { %3944 = vperm.xlu1 %10113, %v3934_v60  }
 0xcee   : > { %v3491_v29 = vpop.permute.xlu0 %3490 }
 0xcef   : > { %v3489_v61 = vpop.permute.xlu1 %3488  ;;  %9517 = vmatprep.subr.msk.mxu1 %vm3483_vm4, %v3491_v29 }
 0xcf0   : > { %9518 = vmatpush3.msk.msra.mxu1 %vm3483_vm4, %v3491_v29 }
 0xcf1   : > { %9519 = vmatprep.subr.msk.mxu1 %vm3483_vm4, %v3489_v61 }
 0xcf2   : > { %9520 = vmatpush3.msk.msra.mxu1 %vm3483_vm4, %v3489_v61  ;;  %v3506_v62 = vpop.permute.xlu0 %3505 }
 0xcf3   : > { %v3487_v54 = vpop.permute.xlu1 %3486  ;;  %9537 = vmatprep.subr.msk.mxu0 %vm3498_vm5, %v3506_v62 }
 0xcf4   : > { %9521 = vmatprep.subr.msk.mxu1 %vm3483_vm4, %v3487_v54  ;;  %9538 = vmatpush3.msk.msra.mxu0 %vm3498_vm5, %v3506_v62 }
 0xcf5   : > { %9522 = vmatpush3.msk.msra.mxu1 %vm3483_vm4, %v3487_v54 }
 0xcf6   : > { %v3504_v34 = vpop.permute.xlu0 %3503 }
 0xcf7   : > { %v3485_v31 = vpop.permute.xlu1 %3484  ;;  %9539 = vmatprep.subr.msk.mxu0 %vm3498_vm5, %v3504_v34 }
 0xcf8   : > { %9523 = vmatprep.subr.msk.mxu1 %vm3483_vm4, %v3485_v31  ;;  %9540 = vmatpush3.msk.msra.mxu0 %vm3498_vm5, %v3504_v34 }
 0xcf9   : > { %9524 = vmatpush3.msk.msra.mxu1 %vm3483_vm4, %v3485_v31 }
 0xcfa   : > { %9526 = vmatmul.mubr.msk.f32.vlgmr.msra.gmra.mxu1 %vm1002_vm0, %v3514_v5  ;;  %v3502_v8 = vpop.permute.xlu0 %3501 }
 0xcfb   : > { %9541 = vmatprep.subr.msk.mxu0 %vm3498_vm5, %v3502_v8  ;;  %9528 = vmatprep.mubr.msk.f32.mxu1 %vm1002_vm0, %v3515_v55  ;;  %v3500_v23 = vpop.permute.xlu1 %3499 }
 0xcfc   : > { %9542 = vmatpush3.msk.msra.mxu0 %vm3498_vm5, %v3502_v8 }
 0xcfd   : > { %9543 = vmatprep.subr.msk.mxu0 %vm3498_vm5, %v3500_v23 }
 0xcfe   : > { %9529 = vmatmul.mubr.msk.f32.gmra.mxu1 %vm1002_vm0, %v3516_v51  ;;  %9544 = vmatpush3.msk.msra.mxu0 %vm3498_vm5, %v3500_v23 }
 0xcff   : > { %9546 = vmatmul.mubr.msk.f32.vlgmr.msra.gmra.mxu0 %vm1002_vm0, %v8448_v57  ;;  %9531 = vmatprep.mubr.msk.f32.mxu1 %vm1002_vm0, %v3517_v36 }
 0xd00   : > { %9548 = vmatprep.mubr.msk.f32.mxu0 %vm1002_vm0, %v8449_v37 }
 0xd02   : > { %9532 = vmatmul.mubr.msk.f32.gmra.mxu1 %vm1002_vm0, %v3518_v56 }
 0xd03   : > { %9549 = vmatmul.mubr.msk.f32.gmra.mxu0 %vm1002_vm0, %v8450_v30  ;;  %9534 = vmatprep.mubr.msk.f32.mxu1 %vm1002_vm0, %v3519_v2  ;;  %v8467_v2 = vld [vmem:[%s10761_s24 + $0x20] sm:$0xff] }
 0xd04   : > { %9551 = vmatprep.mubr.msk.f32.mxu0 %vm1002_vm0, %v8451_v40 }
 0xd06   : > { %9535 = vmatmul.mubr.msk.f32.gmra.mxu1 %vm1002_vm0, %v3520_v58 }
 0xd07   : > { %9552 = vmatmul.mubr.msk.f32.gmra.mxu0 %vm1002_vm0, %v8452_v24  ;;  %v3980_v13 = vpop.permute.xlu0 %3979  ;;  %9573 = vmatprep.mubr.msk.f32.mxu1 %vm4063_vm6, %v8467_v2 }
 0xd08   : > { %9554 = vmatprep.mubr.msk.f32.mxu0 %vm1002_vm0, %v8453_v1  ;;  %v3975_v38 = vpop.permute.xlu1 %3974 }
 0xd0b   : > { %9555 = vmatmul.mubr.msk.f32.gmra.mxu0 %vm1002_vm0, %v8454_v27  ;;  %v3970_v63 = vpop.permute.xlu0 %3969 }
 0xd0c   : > { %v3965_v54 = vpop.permute.xlu1 %3964 }
 0xd0f   : > { %v3960_v9 = vpop.permute.xlu0 %3959 }
 0xd10   : > { %v3955_v1 = vpop.permute.xlu1 %3954 }
 0xd44   : > { %v9507_v17 = vpop.f32.mrf.mxu1 }
 0xd46   : > { %v3620_v4 = vpop.f32.mrf.mxu1 }
 0xd48   : > { %v9510_v35 = vpop.f32.mrf.mxu1 }
 0xd4a   : > { %v3630_v49 = vpop.f32.mrf.mxu1 }
 0xd4c   : > { %v9513_v10 = vpop.f32.mrf.mxu1 }
 0xd4e   : > { %v3640_v45 = vpop.f32.mrf.mxu1 }
 0xd50   : > { %v9516_v14 = vpop.f32.mrf.mxu1 }
 0xd52   : > { %v3650_v26 = vpop.f32.mrf.mxu1 }
 0xdba   : > { %v9527_v7 = vpop.f32.mrf.mxu1 }
 0xdbb   : > { %v3755_v40 = vadd.f32 %v9527_v7, %v9507_v17  ;;  %v3945_v7 = vpop.permute.xlu1 %3944 }
 0xdbc   : > { %v3749_v32 = vpop.f32.mrf.mxu1 }
 0xdbd   : > { %v3750_v27 = vadd.f32 %v3749_v32, %v3620_v4 }
 0xdbe   : > { %v9530_v48 = vpop.f32.mrf.mxu1 }
 0xdbf   : > { %v9547_v22 = vpop.f32.mrf.mxu0  ;;  %v3765_v50 = vadd.f32 %v9530_v48, %v9510_v35 }
 0xdc0   : > { %v3759_v20 = vpop.f32.mrf.mxu1  ;;  %v3927_v35 = vadd.f32 %v9547_v22, %v3755_v40 }
 0xdc1   : > { %v3887_v6 = vpop.f32.mrf.mxu0  ;;  %v3760_v51 = vadd.f32 %v3759_v20, %v3630_v49 }
 0xdc2   : > { %v9533_v33 = vpop.f32.mrf.mxu1 }
 0xdc3   : > { %v9550_v47 = vpop.f32.mrf.mxu0  ;;  %v3775_v16 = vadd.f32 %v9533_v33, %v9513_v10 }
 0xdc4   : > { %v3769_v39 = vpop.f32.mrf.mxu1  ;;  %v3929_v0 = vadd.f32 %v9550_v47, %v3765_v50  ;;  %v8468_v47 = vld [vmem:[%s10761_s24 + $0x28] sm:$0xff] }
 0xdc5   : > { %v3897_v18 = vpop.f32.mrf.mxu0  ;;  %v3770_v15 = vadd.f32 %v3769_v39, %v3640_v45  ;;  %v8470_v39 = vld [vmem:[%s10761_s24 + $0x38] sm:$0xff] }
 0xdc6   : > { %v3985_v46 = vadd.f32 %v3960_v9, %v3929_v0  ;;  %v9536_v21 = vpop.f32.mrf.mxu1  ;;  %v3928_v30 = vadd.f32 %v3897_v18, %v3760_v51  ;;  %v8487_v0 = vld [vmem:[%s10761_s24 + $0x40] sm:$0xff]  ;;  %v4365_v9 = vld [vmem:[%s10766_s30 + $0x8] sm:$0xff] }
 0xdc7   : > { %v9553_v25 = vpop.f32.mrf.mxu0  ;;  %v3785_v29 = vadd.f32 %v9536_v21, %v9516_v14  ;;  %v4364_v18 = vld [vmem:[%s10766_s30] sm:$0xff]  ;;  %v4402_v21 = vld [vmem:[%s10771_s6 + $0x10] sm:$0xff] }
 0xdc8   : > { %v3993_v52 = vmax.f32 %v3985_v46, 0.0  ;;  %v3931_v3 = vadd.f32 %v9553_v25, %v3775_v16  ;;  %v3779_v53 = vpop.f32.mrf.mxu1  ;;  %v3984_v14 = vadd.f32 %v3955_v1, %v3928_v30  ;;  %v4367_v16 = vld [vmem:[%s10766_s30 + $0x18] sm:$0xff]  ;;  %v4366_v46 = vld [vmem:[%s10766_s30 + $0x10] sm:$0xff] }
 0xdc9   : > { %v3907_v59 = vpop.f32.mrf.mxu0  ;;  %v3780_v31 = vadd.f32 %v3779_v53, %v3650_v26  ;;  %v3926_v26 = vadd.f32 %v3887_v6, %v3750_v27  ;;  %v4403_v25 = vld [vmem:[%s10771_s6 + $0x18] sm:$0xff]  ;;  %v4406_v53 = vld [vmem:[%s10776_s12 + $0x10] sm:$0xff] }
 0xdca   : > { %v11997_v60 = vmul.f32 %v13508_v19, %v3993_v52  ;;  %v3987_v61 = vadd.f32 %v3970_v63, %v3931_v3  ;;  %v3930_v62 = vadd.f32 %v3907_v59, %v3770_v15  ;;  %v3992_v32 = vmax.f32 %v3984_v14, 0.0  ;;  %v4054_v63 = vld [vmem:[%s10761_s24] sm:$0xff]  ;;  %v4401_v15 = vld [vmem:[%s10771_s6 + $0x8] sm:$0xff]  ;;  %v4407_v52 = vld [vmem:[%s10776_s12 + $0x18] sm:$0xff] }
 0xdcb   : > { %v9556_v34 = vpop.f32.mrf.mxu0  ;;  %v3982_v48 = vadd.f32 %v3945_v7, %v3926_v26  ;;  %9595 = vmatprep.mubr.msk.f32.mxu0 %vm4063_vm6, %v4054_v63  ;;  %v4400_v3 = vld [vmem:[%s10771_s6] sm:$0xff]  ;;  %v4056_v1 = vld [vmem:[%s10761_s24 + $0x10] sm:$0xff]  ;;  %v8490_v26 = vld [vmem:[%s10761_s24 + $0x58] sm:$0xff] }
 0xdcc   : > { %v3995_v5 = vmax.f32 %v3987_v61, 0.0  ;;  %v3986_v55 = vadd.f32 %v3965_v54, %v3930_v62  ;;  %v3933_v8 = vadd.f32 %v9556_v34, %v3785_v29  ;;  %4012 = vrot.lane.b32.xlu1 %v11997_v60, %s10696_s22  ;;  %v4000_v20 = vmul.f32 %v13508_v19, %v3992_v32  ;;  %v4404_v59 = vld [vmem:[%s10776_s12] sm:$0xff]  ;;  %v4506_v29 = vld [vmem:[%s13510_s4 + $0x8] sm:$0xff]  ;;  %v4508_v62 = vld [vmem:[%s13510_s4 + $0x18] sm:$0xff] }
 0xdcd   : > { %v3917_v23 = vpop.f32.mrf.mxu0  ;;  %v3990_v6 = vmax.f32 %v3982_v48, 0.0  ;;  %v4505_v61 = vld [vmem:[%s13510_s4] sm:$0xff]  ;;  %v4507_v54 = vld [vmem:[%s13510_s4 + $0x10] sm:$0xff] }
 0xdce   : > { %v4003_v57 = vmul.f32 %v13508_v19, %v3995_v5  ;;  %v3994_v36 = vmax.f32 %v3986_v55, 0.0  ;;  %v3989_v37 = vadd.f32 %v3980_v13, %v3933_v8  ;;  %v3932_v56 = vadd.f32 %v3917_v23, %v3780_v31  ;;  %v3950_v13 = vpop.permute.xlu0 %3949  ;;  %v4509_v34 = vld [vmem:[%s13510_s4 + $0x20] sm:$0xff]  ;;  %v4510_v31 = vld [vmem:[%s13510_s4 + $0x28] sm:$0xff]  ;;  %v8489_v14 = vld [vmem:[%s10761_s24 + $0x50] sm:$0xff] }
 0xdcf   : > { %v3983_v4 = vadd.f32 %v3950_v13, %v3927_v35  ;;  %v3998_v33 = vmul.f32 %v13508_v19, %v3990_v6  ;;  %v4057_v35 = vld [vmem:[%s10761_s24 + $0x18] sm:$0xff] }
 0xdd0   : > { %v3997_v58 = vmax.f32 %v3989_v37, 0.0  ;;  %v3988_v24 = vadd.f32 %v3975_v38, %v3932_v56  ;;  %4040 = vrot.lane.b32.xlu0 %v4003_v57, %s10697_s26  ;;  %4016 = vrot.lane.b32.xlu1 %v4003_v57, %s10696_s22  ;;  %v4002_v49 = vmul.f32 %v13508_v19, %v3994_v36  ;;  %v8469_v38 = vld [vmem:[%s10761_s24 + $0x30] sm:$0xff] }
 0xdd1   : > { %v3991_v22 = vmax.f32 %v3983_v4, 0.0 }
 0xdd2   : > { %v4005_v10 = vmul.f32 %v13508_v19, %v3997_v58  ;;  %v3996_v45 = vmax.f32 %v3988_v24, 0.0  ;;  %v4055_v24 = vld [vmem:[%s10761_s24 + $0x8] sm:$0xff] }
 0xdd3   : > { %v3999_v50 = vmul.f32 %v13508_v19, %v3991_v22 }
 0xdd4   : > { %v4004_v17 = vmul.f32 %v13508_v19, %v3996_v45  ;;  %9557 = vmatprep.subr.mxu1 %v4005_v10  ;;  %4038 = vrot.lane.b32.xlu0 %v4002_v49, %s10697_s26  ;;  %v8488_v45 = vld [vmem:[%s10761_s24 + $0x48] sm:$0xff] }
 0xdd5   : > { %4014 = vrot.lane.b32.xlu1 %v4002_v49, %s10696_s22  ;;  %9558 = vmatpush3.msra.mxu1 %v4005_v10 }
 0xdd6   : > { %9559 = vmatprep.subr.mxu1 %v4004_v17 }
 0xdd7   : > { %9560 = vmatpush3.msra.mxu1 %v4004_v17 }
 0xdd8   : > { %4020 = vrot.lane.b32.xlu0 %v4005_v10, %s10696_s22  ;;  %9561 = vmatprep.subr.mxu1 %v4003_v57 }
 0xdd9   : > { %4018 = vrot.lane.b32.xlu1 %v4004_v17, %s10696_s22  ;;  %9562 = vmatpush3.msra.mxu1 %v4003_v57 }
 0xdda   : > { %9563 = vmatprep.subr.mxu1 %v4002_v49 }
 0xddb   : > { %9564 = vmatpush3.msra.mxu1 %v4002_v49 }
 0xddc   : > { %4044 = vrot.lane.b32.xlu0 %v4005_v10, %s10697_s26  ;;  %9565 = vmatprep.subr.mxu1 %v11997_v60 }
 0xddd   : > { %4010 = vrot.lane.b32.xlu1 %v4000_v20, %s10696_s22  ;;  %9566 = vmatpush3.msra.mxu1 %v11997_v60 }
 0xdde   : > { %9567 = vmatprep.subr.mxu1 %v4000_v20 }
 0xddf   : > { %9568 = vmatpush3.msra.mxu1 %v4000_v20 }
 0xde0   : > { %4042 = vrot.lane.b32.xlu0 %v4004_v17, %s10697_s26  ;;  %9569 = vmatprep.subr.mxu1 %v3999_v50  ;;  %v4493_v17 = vld [vmem:[%s13511_s2] sm:$0xff] }
 0xde1   : > { %4008 = vrot.lane.b32.xlu1 %v3999_v50, %s10696_s22  ;;  %9570 = vmatpush3.msra.mxu1 %v3999_v50 }
 0xde2   : > { %9571 = vmatprep.subr.mxu1 %v3998_v33 }
 0xde3   : > { %9572 = vmatpush3.msra.mxu1 %v3998_v33 }
 0xde4   : > { %4036 = vrot.lane.b32.xlu0 %v11997_v60, %s10697_s26  ;;  %9574 = vmatmul.mubr.msk.f32.vlgmr.msra.gmra.mxu1 %vm4063_vm6, %v8468_v47  ;;  %v4405_v60 = vld [vmem:[%s10776_s12 + $0x8] sm:$0xff] }
 0xde5   : > { %4006 = vrot.lane.b32.xlu1 %v3998_v33, %s10696_s22  ;;  %9576 = vmatprep.mubr.msk.f32.mxu1 %vm4063_vm6, %v8469_v38 }
 0xde8   : > { %4034 = vrot.lane.b32.xlu0 %v4000_v20, %s10697_s26  ;;  %9577 = vmatmul.mubr.msk.f32.gmra.mxu1 %vm4063_vm6, %v8470_v39 }
 0xde9   : > { %4030 = vrot.lane.b32.xlu1 %v3998_v33, %s10697_s26  ;;  %9617 = vmatprep.mubr.msk.f32.mxu1 %vm4063_vm6, %v8487_v0 }
 0xdec   : > { %4032 = vrot.lane.b32.xlu0 %v3999_v50, %s10697_s26 }
 0xded   : > { %4375 = vperm.xlu1 %10113, %v4365_v9  }
 0xdf0   : > { %4370 = vperm.xlu0 %10112, %v4364_v18  }
 0xdf1   : > { %4385 = vperm.xlu1 %10113, %v4367_v16  }
 0xdf4   : > { %4380 = vperm.xlu0 %10112, %v4366_v46  }
 0xdf5   : > { %4457 = vperm.xlu1 %10113, %v4402_v21  }
 0xdf8   : > { %4462 = vperm.xlu0 %10112, %v4403_v25  }
 0xdf9   : > { %4452 = vperm.xlu1 %10113, %v4401_v15  }
 0xdfc   : > { %4486 = vperm.xlu0 %10112, %v4407_v52  }
 0xdfd   : > { %4447 = vperm.xlu1 %10113, %v4400_v3  }
 0xe00   : > { %4481 = vperm.xlu0 %10112, %v4406_v53  }
 0xe01   : > { %4471 = vperm.xlu1 %10113, %v4404_v59  }
 0xe04   : > { %4476 = vperm.xlu0 %10112, %v4405_v60  }
 0xe05   : > { %4524 = vperm.xlu1 %10113, %v4506_v29  }
 0xe08   : > { %4519 = vperm.xlu0 %10112, %v4505_v61  }
 0xe09   : > { %4534 = vperm.xlu1 %10113, %v4508_v62  }
 0xe0c   : > { %4529 = vperm.xlu0 %10112, %v4507_v54  }
 0xe10   : > { %4539 = vperm.xlu0 %10112, %v4509_v34  }
 0xe14   : > { %4544 = vperm.xlu0 %10112, %v4510_v31  }
 0xe3e   : > { %v4013_v5 = vpop.permute.xlu1 %4012 }
 0xe42   : > { %v4017_v55 = vpop.permute.xlu1 %4016  ;;  %v4041_v8 = vpop.permute.xlu0 %4040 }
 0xe46   : > { %v4039_v51 = vpop.permute.xlu0 %4038 }
 0xe47   : > { %v4015_v23 = vpop.permute.xlu1 %4014 }
 0xe4a   : > { %v4021_v57 = vpop.permute.xlu0 %4020 }
 0xe4b   : > { %v4019_v36 = vpop.permute.xlu1 %4018  ;;  %9579 = vmatprep.subr.msk.mxu0 %vm3483_vm4, %v4021_v57 }
 0xe4c   : > { %9580 = vmatpush3.msk.msra.mxu0 %vm3483_vm4, %v4021_v57 }
 0xe4d   : > { %9581 = vmatprep.subr.msk.mxu0 %vm3483_vm4, %v4019_v36 }
 0xe4e   : > { %9582 = vmatpush3.msk.msra.mxu0 %vm3483_vm4, %v4019_v36  ;;  %v4045_v37 = vpop.permute.xlu0 %4044 }
 0xe4f   : > { %v4011_v56 = vpop.permute.xlu1 %4010  ;;  %9583 = vmatprep.subr.msk.mxu0 %vm3483_vm4, %v4017_v55  ;;  %9601 = vmatprep.subr.msk.mxu1 %vm3498_vm5, %v4045_v37 }
 0xe50   : > { %9584 = vmatpush3.msk.msra.mxu0 %vm3483_vm4, %v4017_v55  ;;  %9602 = vmatpush3.msk.msra.mxu1 %vm3498_vm5, %v4045_v37 }
 0xe51   : > { %9585 = vmatprep.subr.msk.mxu0 %vm3483_vm4, %v4015_v23 }
 0xe52   : > { %9586 = vmatpush3.msk.msra.mxu0 %vm3483_vm4, %v4015_v23  ;;  %v4043_v30 = vpop.permute.xlu0 %4042 }
 0xe53   : > { %v4009_v2 = vpop.permute.xlu1 %4008  ;;  %9587 = vmatprep.subr.msk.mxu0 %vm3483_vm4, %v4013_v5  ;;  %9603 = vmatprep.subr.msk.mxu1 %vm3498_vm5, %v4043_v30 }
 0xe54   : > { %9588 = vmatpush3.msk.msra.mxu0 %vm3483_vm4, %v4013_v5  ;;  %9604 = vmatpush3.msk.msra.mxu1 %vm3498_vm5, %v4043_v30 }
 0xe55   : > { %9589 = vmatprep.subr.msk.mxu0 %vm3483_vm4, %v4011_v56  ;;  %9605 = vmatprep.subr.msk.mxu1 %vm3498_vm5, %v4041_v8 }
 0xe56   : > { %9590 = vmatpush3.msk.msra.mxu0 %vm3483_vm4, %v4011_v56  ;;  %9606 = vmatpush3.msk.msra.mxu1 %vm3498_vm5, %v4041_v8  ;;  %v4037_v40 = vpop.permute.xlu0 %4036 }
 0xe57   : > { %9591 = vmatprep.subr.msk.mxu0 %vm3483_vm4, %v4009_v2  ;;  %9607 = vmatprep.subr.msk.mxu1 %vm3498_vm5, %v4039_v51  ;;  %v4007_v58 = vpop.permute.xlu1 %4006 }
 0xe58   : > { %9592 = vmatpush3.msk.msra.mxu0 %vm3483_vm4, %v4009_v2  ;;  %9608 = vmatpush3.msk.msra.mxu1 %vm3498_vm5, %v4039_v51 }
 0xe59   : > { %9593 = vmatprep.subr.msk.mxu0 %vm3483_vm4, %v4007_v58  ;;  %9609 = vmatprep.subr.msk.mxu1 %vm3498_vm5, %v4037_v40 }
 0xe5a   : > { %9594 = vmatpush3.msk.msra.mxu0 %vm3483_vm4, %v4007_v58  ;;  %9610 = vmatpush3.msk.msra.mxu1 %vm3498_vm5, %v4037_v40  ;;  %v4035_v27 = vpop.permute.xlu0 %4034 }
 0xe5b   : > { %9596 = vmatmul.mubr.msk.f32.vlgmr.msra.gmra.mxu0 %vm4063_vm6, %v4055_v24  ;;  %9611 = vmatprep.subr.msk.mxu1 %vm3498_vm5, %v4035_v27  ;;  %v4031_v10 = vpop.permute.xlu1 %4030 }
 0xe5c   : > { %9612 = vmatpush3.msk.msra.mxu1 %vm3498_vm5, %v4035_v27  ;;  %9598 = vmatprep.mubr.msk.f32.mxu0 %vm4063_vm6, %v4056_v1 }
 0xe5e   : > { %v4033_v49 = vpop.permute.xlu0 %4032 }
 0xe5f   : > { %9599 = vmatmul.mubr.msk.f32.gmra.mxu0 %vm4063_vm6, %v4057_v35  ;;  %9613 = vmatprep.subr.msk.mxu1 %vm3498_vm5, %v4033_v49 }
 0xe60   : > { %9614 = vmatpush3.msk.msra.mxu1 %vm3498_vm5, %v4033_v49  ;;  %9631 = vmatprep.mubr.msk.f32.mxu0 %vm1002_vm0, %v4493_v17 }
 0xe61   : > { %9615 = vmatprep.subr.msk.mxu1 %vm3498_vm5, %v4031_v10 }
 0xe62   : > { %9616 = vmatpush3.msk.msra.mxu1 %vm3498_vm5, %v4031_v10 }
 0xe63   : > { %9618 = vmatmul.mubr.msk.f32.vlgmr.msra.gmra.mxu1 %vm4063_vm6, %v8488_v45 }
 0xe64   : > { %9620 = vmatprep.mubr.msk.f32.mxu1 %vm4063_vm6, %v8489_v14 }
 0xe67   : > { %9621 = vmatmul.mubr.msk.f32.gmra.mxu1 %vm4063_vm6, %v8490_v26 }
 0xe68   : > { %v4376_v6 = vpop.permute.xlu1 %4375 }
 0xe6b   : > { %v4371_v33 = vpop.permute.xlu0 %4370 }
 0xe6c   : > { %v4386_v3 = vpop.permute.xlu1 %4385 }
 0xe6f   : > { %v4381_v61 = vpop.permute.xlu0 %4380 }
 0xea4   : > { %v9575_v13 = vpop.f32.mrf.mxu1 }
 0xea6   : > { %v4142_v4 = vpop.f32.mrf.mxu1 }
 0xea8   : > { %v9578_v32 = vpop.f32.mrf.mxu1 }
 0xeaa   : > { %v4152_v63 = vpop.f32.mrf.mxu1 }
 0xf1b   : > { %v9597_v7 = vpop.f32.mrf.mxu0 }
 0xf1c   : > { %v4245_v20 = vadd.f32 %v9597_v7, %v9575_v13 }
 0xf1d   : > { %v4239_v48 = vpop.f32.mrf.mxu0 }
 0xf1e   : > { %v4240_v47 = vadd.f32 %v4239_v48, %v4142_v4  ;;  %v4463_v48 = vpop.permute.xlu0 %4462 }
 0xf1f   : > { %v9600_v22 = vpop.f32.mrf.mxu0 }
 0xf20   : > { %v4255_v9 = vadd.f32 %v9600_v22, %v9578_v32 }
 0xf21   : > { %v4249_v39 = vpop.f32.mrf.mxu0 }
 0xf22   : > { %v4250_v21 = vadd.f32 %v4249_v39, %v4152_v63  ;;  %v4458_v63 = vpop.permute.xlu1 %4457  ;;  %v4487_v22 = vpop.permute.xlu0 %4486 }
 0xf23   : > { %v9619_v50 = vpop.f32.mrf.mxu1 }
 0xf24   : > { %v4361_v38 = vadd.f32 %v9619_v50, %v4245_v20 }
 0xf25   : > { %v4341_v0 = vpop.f32.mrf.mxu1 }
 0xf26   : > { %v4389_v18 = vadd.f32 %v4376_v6, %v4361_v38  ;;  %v4360_v16 = vadd.f32 %v4341_v0, %v4240_v47  ;;  %v4453_v20 = vpop.permute.xlu1 %4452 }
 0xf27   : > { %v9622_v46 = vpop.f32.mrf.mxu1 }
 0xf28   : > { %v4393_v25 = vmul.f32 %v13508_v19, %v4389_v18  ;;  %v4388_v15 = vadd.f32 %v4371_v33, %v4360_v16  ;;  %v4363_v52 = vadd.f32 %v9622_v46, %v4255_v9  ;;  %v4482_v18 = vpop.permute.xlu0 %4481 }
 0xf29   : > { %v4351_v53 = vpop.f32.mrf.mxu1 }
 0xf2a   : > { %v4392_v59 = vmul.f32 %v13508_v19, %v4388_v15  ;;  %v4391_v60 = vadd.f32 %v4386_v3, %v4363_v52  ;;  %v4362_v29 = vadd.f32 %v4351_v53, %v4250_v21  ;;  %v4397_v62 = vadd.f32 %v4393_v25, %v11892_v28  ;;  %v4448_v25 = vpop.permute.xlu1 %4447 }
 0xf2c   : > { %v4396_v54 = vadd.f32 %v4392_v59, %v11895_v41  ;;  %v4395_v34 = vmul.f32 %v13508_v19, %v4391_v60  ;;  %v4390_v31 = vadd.f32 %v4381_v61, %v4362_v29  ;;  %v4419_v8 = vmul.f32 %v4397_v62, %v4397_v62  ;;  %v4477_v59 = vpop.permute.xlu0 %4476 }
 0xf2e   : > { %v4418_v5 = vmul.f32 %v4396_v54, %v4396_v54  ;;  %v4394_v55 = vmul.f32 %v13508_v19, %v4390_v31  ;;  %v4408_v51 = vadd.f32 %v4397_v62, %v4396_v54  ;;  %v4399_v23 = vadd.f32 %v4395_v34, %v11884_v11  ;;  %v4472_v29 = vpop.permute.xlu1 %4471  ;;  %v4496_v34 = vld [vmem:[%s13511_s2 + $0x18] sm:$0xff]  ;;  %v4497_v31 = vld [vmem:[%s13511_s2 + $0x20] sm:$0xff] }
 0xf30   : > { %v4398_v57 = vadd.f32 %v4394_v55, %v11886_v44  ;;  %v4422_v36 = vadd.f32 %v4419_v8, %v4418_v5  ;;  %v4421_v30 = vmul.f32 %v4399_v23, %v4399_v23  ;;  %v4498_v5 = vld [vmem:[%s13511_s2 + $0x28] sm:$0xff]  ;;  %v4520_v55 = vpop.permute.xlu0 %4519 }
 0xf32   : > { %v4409_v37 = vadd.f32 %v4408_v51, %v4398_v57  ;;  %v4420_v56 = vmul.f32 %v4398_v57, %v4398_v57 }
 0xf34   : > { %v4410_v2 = vadd.f32 %v4409_v37, %v4399_v23  ;;  %v4423_v28 = vadd.f32 %v4422_v36, %v4420_v56  ;;  %v4530_v8 = vpop.permute.xlu0 %4529  ;;  %v4525_v37 = vpop.permute.xlu1 %4524 }
 0xf36   : > { %v4411_v40 = vrot.slane %v4410_v2, 4  ;;  %v4424_v41 = vadd.f32 %v4423_v28, %v4421_v30 }
 0xf38   : > { %v4412_v58 = vadd.f32 %v4411_v40, %v4410_v2  ;;  %v4425_v24 = vrot.slane %v4424_v41, 4  ;;  %v4540_v56 = vpop.permute.xlu0 %4539 }
 0xf3a   : > { %v4413_v1 = vrot.slane %v4412_v58, 2  ;;  %v4426_v27 = vadd.f32 %v4425_v24, %v4424_v41 }
 0xf3c   : > { %v4414_v35 = vadd.f32 %v4413_v1, %v4412_v58  ;;  %v4427_v49 = vrot.slane %v4426_v27, 2  ;;  %v4545_v24 = vpop.permute.xlu0 %4544 }
 0xf3e   : > { %v4415_v10 = vrot.slane %v4414_v35, 1  ;;  %v4428_v45 = vadd.f32 %v4427_v49, %v4426_v27  ;;  %v4535_v27 = vpop.permute.xlu1 %4534 }
 0xf40   : > { %v4416_v14 = vadd.f32 %v4415_v10, %v4414_v35  ;;  %v4429_v11 = vrot.slane %v4428_v45, 1 }
 0xf42   : > { %v4417_v26 = vmul.f32 0.03125, %v4416_v14  ;;  %v4430_v44 = vadd.f32 %v4429_v11, %v4428_v45 }
 0xf44   : > { %v4431_v17 = vmul.f32 0.03125, %v4430_v44  ;;  %v4432_v13 = vmul.f32 %v4417_v26, %v4417_v26  ;;  %v4438_v6 = vsub.f32 %v4399_v23, %v4417_v26  ;;  %v4437_v50 = vsub.f32 %v4398_v57, %v4417_v26 }
 0xf45   : > { %v4436_v33 = vsub.f32 %v4397_v62, %v4417_v26  ;;  %v4435_v9 = vsub.f32 %v4396_v54, %v4417_v26  ;;  %v4494_v62 = vld [vmem:[%s13511_s2 + $0x8] sm:$0xff]  ;;  %v4495_v54 = vld [vmem:[%s13511_s2 + $0x10] sm:$0xff] }
 0xf46   : > { %v4433_v4 = vsub.f32 %v4431_v17, %v4432_v13 }
 0xf48   : > { %v4434_v7 = vmax.f32 %v4433_v4, 0.0 }
 0xf4a   : > { %v4439_v32 = vadd.f32 1e-05, %v4434_v7 }
 0xf4c   : > { %10372 = vrsqrt.f32 %v4439_v32 }
 0xf59   : > { %v10373_v47 = vpop.eup %10372 }
 0xf5a   : > { %v4444_v38 = vmul.f32 %v10373_v47, %v4438_v6  ;;  %v4443_v39 = vmul.f32 %v10373_v47, %v4437_v50  ;;  %v4442_v0 = vmul.f32 %v10373_v47, %v4436_v33  ;;  %v4441_v21 = vmul.f32 %v10373_v47, %v4435_v9 }
 0xf5c   : > { %v4468_v16 = vmul.f32 %v4463_v48, %v4444_v38  ;;  %v4467_v46 = vmul.f32 %v4458_v63, %v4443_v39  ;;  %v4466_v52 = vmul.f32 %v4453_v20, %v4442_v0  ;;  %v4465_v53 = vmul.f32 %v4448_v25, %v4441_v21 }
 0xf5e   : > { %v12142_v15 = vadd.f32 %v4487_v22, %v4468_v16  ;;  %v12145_v3 = vadd.f32 %v4482_v18, %v4467_v46  ;;  %v12149_v60 = vadd.f32 %v4477_v59, %v4466_v52  ;;  %v12153_v61 = vadd.f32 %v4472_v29, %v4465_v53 }
 0xf60   : > { %13512 = vst [vmem:[#allocation24_spill] sm:$0xff] %v12142_v15  ;;  %9623 = vmatprep.subr.mxu0 %v12142_v15  ;;  %13513 = vst [vmem:[#allocation25_spill] sm:$0xff] %v12145_v3 }
 0xf61   : > { %9624 = vmatpush3.msra.mxu0 %v12142_v15  ;;  %13514 = vst [vmem:[#allocation26_spill] sm:$0xff] %v12149_v60  ;;  %13515 = vst [vmem:[#allocation27_spill] sm:$0xff] %v12153_v61 }
 0xf62   : > { %9625 = vmatprep.subr.mxu0 %v12145_v3 }
 0xf63   : > { %9626 = vmatpush3.msra.mxu0 %v12145_v3 }
 0xf64   : > { %9627 = vmatprep.subr.mxu0 %v12149_v60 }
 0xf65   : > { %9628 = vmatpush3.msra.mxu0 %v12149_v60 }
 0xf66   : > { %9629 = vmatprep.subr.mxu0 %v12153_v61 }
 0xf67   : > { %9630 = vmatpush3.msra.mxu0 %v12153_v61 }
 0xf68   : > { %9632 = vmatmul.mubr.msk.f32.vlgmr.msra.gmra.mxu0 %vm1002_vm0, %v4494_v62  ;;  %9675 = vmatprep.subr.mxu0 %v13492_v43 }
 0xf69   : > { %9634 = vmatprep.mubr.msk.f32.mxu0 %vm1002_vm0, %v4495_v54 }
 0xf6c   : > { %9635 = vmatmul.mubr.msk.f32.gmra.mxu0 %vm1002_vm0, %v4496_v34 }
 0xf6d   : > { %9637 = vmatprep.mubr.msk.f32.mxu0 %vm1002_vm0, %v4497_v31 }
 0xf70   : > { %9638 = vmatmul.mubr.msk.f32.gmra.mxu0 %vm1002_vm0, %v4498_v5 }
0x1028   : > { %v9633_v51 = vpop.f32.mrf.mxu0 }
0x1029   : > { %v4685_v2 = vadd.f32 %v9633_v51, %v4525_v37 }
0x102a   : > { %v4679_v23 = vpop.f32.mrf.mxu0 }
0x102b   : > { %v4680_v57 = vadd.f32 %v4679_v23, %v4520_v55 }
0x102c   : > { %v9636_v36 = vpop.f32.mrf.mxu0 }
0x102d   : > { %4738 = vxpose.xlu1.b32.start [1/4] (short) %v4680_v57, 128  ;;  %v4695_v35 = vadd.f32 %v9636_v36, %v4535_v27 }
0x102e   : > { %v4689_v30 = vpop.f32.mrf.mxu0 }
0x102f   : > { %v4690_v41 = vadd.f32 %v4689_v30, %v4530_v8 }
0x1030   : > { %v9639_v28 = vpop.f32.mrf.mxu0 }
0x1031   : > { %4739 = vxpose.xlu1.b32.cont [2/4] (short) %v4685_v2, 128  ;;  %v4705_v1 = vadd.f32 %v9639_v28, %v4545_v24 }
0x1032   : > { %v4699_v40 = vpop.f32.mrf.mxu0 }
0x1033   : > { %v4700_v58 = vadd.f32 %v4699_v40, %v4540_v56 }
0x1035   : > { %4740 = vxpose.xlu1.b32.cont [3/4] (short) %v4690_v41, 128  ;;  %9649 = vmatprep.subr.mxu1 %v4700_v58 }
0x1036   : > { %9650 = vmatpush3.msra.mxu1 %v4700_v58 }
0x1037   : > { %9710 = vmatprep.subr.mxu1 %v4705_v1 }
0x1039   : > { %4741 = vxpose.xlu1.b32.end [4/4] (short) %v4695_v35, 128 }
0x10a9   : > { %v12169_v49 = vpop.trf.xlu1 }
0x10aa   : > { %9651 = vmatprep.mubr.msk.f32.mxu1 %vm1196_vm2, %v12169_v49  ;;  %5197 = vrot.lane.b32.xlu0 %v12169_v49, %s10692_s15 }
0x10ad   : > { %v12175_v10 = vpop.trf.xlu1 }
0x10ae   : > { %5199 = vrot.lane.b32.xlu0 %v12175_v10, %s10692_s15  ;;  %9652 = vmatmul.mubr.msk.f32.vlgmr.msra.gmra.mxu1 %vm1196_vm2, %v12175_v10 }
0x10af   : > { %9711 = vmatpush3.msra.mxu1 %v4705_v1 }
0x10b0   : > { %9736 = vmatprep.subr.mxu1 %v13492_v43 }
0x10b1   : > { %v12182_v45 = vpop.trf.xlu1 }
0x10b2   : > { %5201 = vrot.lane.b32.xlu0 %v12182_v45, %s10692_s15  ;;  %9654 = vmatprep.mubr.msk.f32.mxu1 %vm1196_vm2, %v12182_v45 }
0x10b5   : > { %v12188_v14 = vpop.trf.xlu1 }
0x10b6   : > { %5203 = vrot.lane.b32.xlu0 %v12188_v14, %s10692_s15  ;;  %9655 = vmatmul.mubr.msk.f32.gmra.mxu1 %vm1196_vm2, %v12188_v14 }
0x10b9   : > { %v12194_v11 = vpop.trf.xlu1 }
0x10ba   : > { %5205 = vrot.lane.b32.xlu0 %v12194_v11, %s10692_s15  ;;  %9657 = vmatprep.mubr.msk.f32.mxu1 %vm1196_vm2, %v12194_v11 }
0x10bd   : > { %v12200_v26 = vpop.trf.xlu1 }
0x10be   : > { %5207 = vrot.lane.b32.xlu0 %v12200_v26, %s10692_s15  ;;  %9658 = vmatmul.mubr.msk.f32.gmra.mxu1 %vm1196_vm2, %v12200_v26 }
0x10c1   : > { %v12206_v44 = vpop.trf.xlu1 }
0x10c2   : > { %5209 = vrot.lane.b32.xlu0 %v12206_v44, %s10692_s15  ;;  %9660 = vmatprep.mubr.msk.f32.mxu1 %vm1196_vm2, %v12206_v44 }
0x10c5   : > { %v12212_v17 = vpop.trf.xlu1 }
0x10c6   : > { %5211 = vrot.lane.b32.xlu0 %v12212_v17, %s10692_s15  ;;  %9661 = vmatmul.mubr.msk.f32.gmra.mxu1 %vm1196_vm2, %v12212_v17 }
0x10c9   : > { %v12218_v13 = vpop.trf.xlu1 }
0x10ca   : > { %5213 = vrot.lane.b32.xlu0 %v12218_v13, %s10692_s15  ;;  %9663 = vmatprep.mubr.msk.f32.mxu1 %vm1196_vm2, %v12218_v13 }
0x10cd   : > { %v12224_v4 = vpop.trf.xlu1 }
0x10ce   : > { %5215 = vrot.lane.b32.xlu0 %v12224_v4, %s10692_s15  ;;  %9664 = vmatmul.mubr.msk.f32.gmra.mxu1 %vm1196_vm2, %v12224_v4 }
0x10d1   : > { %v12230_v7 = vpop.trf.xlu1 }
0x10d2   : > { %5217 = vrot.lane.b32.xlu0 %v12230_v7, %s10692_s15  ;;  %9666 = vmatprep.mubr.msk.f32.mxu1 %vm1196_vm2, %v12230_v7 }
0x10d5   : > { %v12236_v32 = vpop.trf.xlu1 }
0x10d6   : > { %13516 = vst [vmem:[#allocation30_spill] sm:$0xff] %v12236_v32  ;;  %5219 = vrot.lane.b32.xlu0 %v12236_v32, %s10692_s15  ;;  %9667 = vmatmul.mubr.msk.f32.gmra.mxu1 %vm1196_vm2, %v12236_v32 }
0x10d9   : > { %v12242_v48 = vpop.trf.xlu1 }
0x10da   : > { %13517 = vst [vmem:[#allocation31_spill] sm:$0xff] %v12242_v48  ;;  %5221 = vrot.lane.b32.xlu1 %v12242_v48, %s10692_s15  ;;  %9669 = vmatprep.mubr.msk.f32.mxu1 %vm1196_vm2, %v12242_v48 }
0x10dd   : > { %v12248_v63 = vpop.trf.xlu1 }
0x10de   : > { %13518 = vst [vmem:[#allocation29_spill] sm:$0xff] %v12248_v63  ;;  %5223 = vrot.lane.b32.xlu0 %v12248_v63, %s10692_s15  ;;  %9670 = vmatmul.mubr.msk.f32.gmra.mxu1 %vm1196_vm2, %v12248_v63 }
0x10e1   : > { %v12254_v22 = vpop.trf.xlu1 }
0x10e2   : > { %13519 = vst [vmem:[#allocation33_spill] sm:$0xff] %v12254_v22  ;;  %5225 = vrot.lane.b32.xlu0 %v12254_v22, %s10692_s15  ;;  %9672 = vmatprep.mubr.msk.f32.mxu1 %vm1196_vm2, %v12254_v22 }
0x10e5   : > { %v12260_v20 = vpop.trf.xlu1 }
0x10e6   : > { %13520 = vst [vmem:[#allocation28_spill] sm:$0xff] %v12260_v20  ;;  %5227 = vrot.lane.b32.xlu0 %v12260_v20, %s10692_s15  ;;  %9673 = vmatmul.mubr.msk.f32.gmra.mxu1 %vm1196_vm2, %v12260_v20  ;;  %s13537_s15 = sld [smem:[#allocation13_spill]] }
0x111c   : > { %v5198_v6 = vpop.permute.xlu0 %5197 }
0x111d   : > { %9712 = vmatprep.mubr.msk.f32.mxu1 %vm1196_vm2, %v5198_v6 }
0x1120   : > { %v5200_v50 = vpop.permute.xlu0 %5199 }
0x1121   : > { %9713 = vmatmul.mubr.msk.f32.vlgmr.msra.gmra.mxu1 %vm1196_vm2, %v5200_v50 }
0x1124   : > { %v5202_v33 = vpop.permute.xlu0 %5201 }
0x1125   : > { %9715 = vmatprep.mubr.msk.f32.mxu1 %vm1196_vm2, %v5202_v33 }
0x1128   : > { %v5204_v47 = vpop.permute.xlu0 %5203 }
0x1129   : > { %9716 = vmatmul.mubr.msk.f32.gmra.mxu1 %vm1196_vm2, %v5204_v47 }
0x112c   : > { %v5206_v38 = vpop.permute.xlu0 %5205 }
0x112d   : > { %9718 = vmatprep.mubr.msk.f32.mxu1 %vm1196_vm2, %v5206_v38 }
0x1130   : > { %v5208_v39 = vpop.permute.xlu0 %5207 }
0x1131   : > { %9719 = vmatmul.mubr.msk.f32.gmra.mxu1 %vm1196_vm2, %v5208_v39 }
0x1134   : > { %v5210_v0 = vpop.permute.xlu0 %5209 }
0x1135   : > { %9721 = vmatprep.mubr.msk.f32.mxu1 %vm1196_vm2, %v5210_v0 }
0x1138   : > { %v5212_v9 = vpop.permute.xlu0 %5211 }
0x1139   : > { %9722 = vmatmul.mubr.msk.f32.gmra.mxu1 %vm1196_vm2, %v5212_v9 }
0x113c   : > { %v5214_v18 = vpop.permute.xlu0 %5213 }
0x113d   : > { %9724 = vmatprep.mubr.msk.f32.mxu1 %vm1196_vm2, %v5214_v18 }
0x1140   : > { %v5216_v16 = vpop.permute.xlu0 %5215 }
0x1141   : > { %9725 = vmatmul.mubr.msk.f32.gmra.mxu1 %vm1196_vm2, %v5216_v16 }
0x1144   : > { %v5218_v46 = vpop.permute.xlu0 %5217 }
0x1145   : > { %9727 = vmatprep.mubr.msk.f32.mxu1 %vm1196_vm2, %v5218_v46 }
0x1148   : > { %v5220_v21 = vpop.permute.xlu0 %5219 }
0x1149   : > { %9728 = vmatmul.mubr.msk.f32.gmra.mxu1 %vm1196_vm2, %v5220_v21 }
0x114c   : > { %v5222_v25 = vpop.permute.xlu1 %5221 }
0x114d   : > { %9730 = vmatprep.mubr.msk.f32.mxu1 %vm1196_vm2, %v5222_v25 }
0x1150   : > { %v5224_v52 = vpop.permute.xlu0 %5223 }
0x1151   : > { %9731 = vmatmul.mubr.msk.f32.gmra.mxu1 %vm1196_vm2, %v5224_v52 }
0x1154   : > { %v5226_v53 = vpop.permute.xlu0 %5225 }
0x1155   : > { %9733 = vmatprep.mubr.msk.f32.mxu1 %vm1196_vm2, %v5226_v53 }
0x1158   : > { %v5228_v59 = vpop.permute.xlu0 %5227 }
0x1159   : > { %9734 = vmatmul.mubr.msk.f32.gmra.mxu1 %vm1196_vm2, %v5228_v59 }
0x115a   : > { %9768 = vmatprep.mubr.msk.f32.mxu1 %vm10693_vm3, %v13492_v43 }
0x116e   : > { %v9653_v29 = vpop.f32.mrf.mxu1 }
0x116f   : > { %v12341_v33 = vsel %vm10875_vm1, %v9653_v29, -10000.0 }
0x1170   : > { %v12284_v62 = vpop.f32.mrf.mxu1 }
0x1176   : > { %v9656_v54 = vpop.f32.mrf.mxu1 }
0x1177   : > { %v12324_v1 = vsel %vm10875_vm1, %v9656_v54, -10000.0 }
0x1178   : > { %v4894_v34 = vpop.f32.mrf.mxu1 }
0x1179   : > { %v12331_v6 = vsel %vm10875_vm1, %v4894_v34, -10000.0 }
0x117e   : > { %v9659_v31 = vpop.f32.mrf.mxu1 }
0x117f   : > { %v12304_v2 = vsel %vm10875_vm1, %v9659_v31, -10000.0 }
0x1180   : > { %v4904_v5 = vpop.f32.mrf.mxu1 }
0x1181   : > { %v12314_v41 = vsel %vm10875_vm1, %v4904_v5, -10000.0 }
0x1186   : > { %v12286_v55 = vpop.f32.mrf.mxu1 }
0x1188   : > { %v4914_v8 = vpop.f32.mrf.mxu1 }
0x1189   : > { %v12299_v37 = vsel %vm10875_vm1, %v4914_v8, -10000.0 }
0x118e   : > { %v12288_v51 = vpop.f32.mrf.mxu1 }
0x1190   : > { %v12290_v23 = vpop.f32.mrf.mxu1 }
0x1196   : > { %v9668_v57 = vpop.f32.mrf.mxu1 }
0x1197   : > { %v12294_v36 = vsel %vm10875_vm1, %v9668_v57, -10000.0 }
0x1198   : > { %5001 = vmax.xlane.f32.xlu1 %v12294_v36  ;;  %v4934_v56 = vpop.f32.mrf.mxu1 }
0x119c   : > { %4991 = vmax.xlane.f32.xlu1 %v12299_v37 }
0x119e   : > { %v9671_v30 = vpop.f32.mrf.mxu1 }
0x119f   : > { %v12308_v28 = vsel %vm10875_vm1, %v9671_v30, -10000.0 }
0x11a0   : > { %4989 = vmax.xlane.f32.xlu1 %v12304_v2  ;;  %5005 = vmax.xlane.f32.xlu0 %v12308_v28  ;;  %v4944_v40 = vpop.f32.mrf.mxu1 }
0x11a1   : > { %v12318_v58 = vsel %vm10875_vm1, %v4944_v40, -10000.0 }
0x11a4   : > { %4987 = vmax.xlane.f32.xlu1 %v12314_v41  ;;  %5003 = vmax.xlane.f32.xlu0 %v12318_v58 }
0x11a6   : > { %v9674_v24 = vpop.f32.mrf.mxu1 }
0x11a7   : > { %v4978_v27 = vsel %vm10875_vm1, %v9674_v24, -10000.0 }
0x11a8   : > { %4985 = vmax.xlane.f32.xlu1 %v12324_v1  ;;  %5009 = vmax.xlane.f32.xlu0 %v4978_v27  ;;  %v4954_v35 = vpop.f32.mrf.mxu1 }
0x11a9   : > { %v12335_v50 = vsel %vm10875_vm1, %v4954_v35, -10000.0  ;;  %v12384_v35 = vsel %vm10875_vm1, %v4934_v56, -10000.0 }
0x11ac   : > { %4983 = vmax.xlane.f32.xlu1 %v12331_v6  ;;  %5007 = vmax.xlane.f32.xlu0 %v12335_v50 }
0x11b0   : > { %4981 = vmax.xlane.f32.xlu1 %v12341_v33 }
0x11e1   : > { %v12344_v47 = vpop.f32.mrf.mxu1 }
0x11e3   : > { %v12346_v38 = vpop.f32.mrf.mxu1 }
0x11e9   : > { %v9717_v39 = vpop.f32.mrf.mxu1 }
0x11eb   : > { %v12348_v0 = vpop.f32.mrf.mxu1 }
0x11f1   : > { %v9720_v9 = vpop.f32.mrf.mxu1 }
0x11f3   : > { %v5347_v18 = vpop.f32.mrf.mxu1 }
0x11f9   : > { %v9723_v16 = vpop.f32.mrf.mxu1 }
0x11fb   : > { %v5357_v46 = vpop.f32.mrf.mxu1 }
0x1201   : > { %v9726_v21 = vpop.f32.mrf.mxu1 }
0x1202   : > { %v12379_v24 = vsel %vm10875_vm1, %v9726_v21, -10000.0  ;;  %v12397_v21 = vsel %vm10875_vm1, %v12288_v51, -10000.0  ;;  %v12413_v51 = vsel %vm10875_vm1, %v5357_v46, -10000.0  ;;  %v4502_v46 = vld [vmem:[%s13511_s2 + $0x48] sm:$0xff] }
0x1203   : > { %v5367_v25 = vpop.f32.mrf.mxu1 }
0x1209   : > { %v9729_v52 = vpop.f32.mrf.mxu1 }
0x120a   : > { %v12352_v53 = vsel %vm10875_vm1, %v9729_v52, -10000.0 }
0x120b   : > { %5444 = vmax.xlane.f32.xlu0 %v12352_v53  ;;  %v5377_v59 = vpop.f32.mrf.mxu1 }
0x120c   : > { %v12357_v29 = vsel %vm10875_vm1, %v5377_v59, -10000.0  ;;  %v12389_v59 = vsel %vm10875_vm1, %v5367_v25, -10000.0 }
0x120f   : > { %5442 = vmax.xlane.f32.xlu0 %v12357_v29 }
0x1211   : > { %v9732_v54 = vpop.f32.mrf.mxu1 }
0x1212   : > { %v12362_v34 = vsel %vm10875_vm1, %v9732_v54, -10000.0 }
0x1213   : > { %5448 = vmax.xlane.f32.xlu0 %v12362_v34  ;;  %v5387_v31 = vpop.f32.mrf.mxu1 }
0x1214   : > { %v12367_v5 = vsel %vm10875_vm1, %v5387_v31, -10000.0  ;;  %v12402_v31 = vsel %vm10875_vm1, %v9723_v16, -10000.0  ;;  %v4499_v16 = vld [vmem:[%s13511_s2 + $0x30] sm:$0xff] }
0x1215   : > { %9640 = vmatprep.mubr.msk.f32.mxu0 %vm1002_vm0, %v4499_v16  ;;  %v12445_v16 = vsel %vm10875_vm1, %v9717_v39, -10000.0  ;;  %v12463_v39 = vsel %vm10875_vm1, %v12346_v38, -10000.0 }
0x1217   : > { %5446 = vmax.xlane.f32.xlu0 %v12367_v5 }
0x1219   : > { %v9735_v8 = vpop.f32.mrf.mxu1 }
0x121a   : > { %v5421_v57 = vsel %vm10875_vm1, %v9735_v8, -10000.0 }
0x121b   : > { %5452 = vmax.xlane.f32.xlu0 %v5421_v57  ;;  %v5397_v30 = vpop.f32.mrf.mxu1 }
0x121c   : > { %v12374_v40 = vsel %vm10875_vm1, %v5397_v30, -10000.0  ;;  %v12408_v30 = vsel %vm10875_vm1, %v12290_v23, -10000.0  ;;  %v12423_v23 = vsel %vm10875_vm1, %v12286_v55, -10000.0  ;;  %v12440_v55 = vsel %vm10875_vm1, %v5347_v18, -10000.0 }
0x121d   : > { %v12457_v18 = vsel %vm10875_vm1, %v12344_v47, -10000.0 }
0x121f   : > { %5450 = vmax.xlane.f32.xlu0 %v12374_v40 }
0x1221   : > { %v5002_v38 = vpop.xlane.xlu1 %5001 }
0x1223   : > { %5440 = vmax.xlane.f32.xlu0 %v12379_v24 }
0x1225   : > { %v12476_v32 = vpop.xlane.xlu1 %4991 }
0x1227   : > { %4999 = vmax.xlane.f32.xlu0 %v12384_v35 }
0x1229   : > { %v5006_v52 = vpop.xlane.xlu0 %5005 }
0x122a   : > { %v5024_v60 = vsub.f32 %v12308_v28, %v5006_v52 }
0x122b   : > { %5438 = vmax.xlane.f32.xlu0 %v12389_v59 }
0x122c   : > { %v5053_v48 = vmul.f32 1.442695, %v5024_v60 }
0x122d   : > { %v12392_v54 = vpop.xlane.xlu0 %5003 }
0x122f   : > { %4997 = vmax.xlane.f32.xlu0 %v12397_v21 }
0x1231   : > { %v5010_v56 = vpop.xlane.xlu0 %5009 }
0x1232   : > { %v5026_v25 = vsub.f32 %v4978_v27, %v5010_v56  ;;  %v4500_v27 = vld [vmem:[%s13511_s2 + $0x38] sm:$0xff]  ;;  %v4501_v56 = vld [vmem:[%s13511_s2 + $0x40] sm:$0xff] }
0x1233   : > { %5436 = vmax.xlane.f32.xlu0 %v12402_v31  ;;  %9641 = vmatmul.mubr.msk.f32.gmra.mxu0 %vm1002_vm0, %v4500_v27 }
0x1234   : > { %v5057_v8 = vmul.f32 1.442695, %v5026_v25  ;;  %9643 = vmatprep.mubr.msk.f32.mxu0 %vm1002_vm0, %v4501_v56  ;;  %v12432_v25 = vsel %vm10875_vm1, %v9720_v9, -10000.0  ;;  %v12451_v9 = vsel %vm10875_vm1, %v12348_v0, -10000.0  ;;  %v12469_v0 = vsel %vm10875_vm1, %v12284_v62, -10000.0 }
0x1235   : > { %v5008_v27 = vpop.xlane.xlu0 %5007 }
0x1236   : > { %10374 = vpow2.f32 %v5057_v8  ;;  %v5025_v19 = vsub.f32 %v12335_v50, %v5008_v27  ;;  %v5023_v50 = vsub.f32 %v12318_v58, %v12392_v54 }
0x1237   : > { %4995 = vmax.xlane.f32.xlu0 %v12408_v30  ;;  %9644 = vmatmul.mubr.msk.f32.gmra.mxu0 %vm1002_vm0, %v4502_v46 }
0x1238   : > { %v5055_v20 = vmul.f32 1.442695, %v5025_v19  ;;  %v5022_v19 = vsub.f32 %v12294_v36, %v5002_v38  ;;  %v5051_v28 = vmul.f32 1.442695, %v5023_v50 }
0x123a   : > { %v5049_v60 = vmul.f32 1.442695, %v5022_v19 }
0x123b   : > { %5434 = vmax.xlane.f32.xlu0 %v12413_v51 }
0x123f   : > { %4993 = vmax.xlane.f32.xlu0 %v12423_v23 }
0x1243   : > { %5432 = vmax.xlane.f32.xlu0 %v12432_v25  ;;  %v12435_v8 = vpop.eup %10374 }
0x1244   : > { %5089 = vadd.xlane.f32.xlu1 %v12435_v8 }
0x1247   : > { %5430 = vmax.xlane.f32.xlu0 %v12440_v55 }
0x124b   : > { %5428 = vmax.xlane.f32.xlu0 %v12445_v16 }
0x124f   : > { %5426 = vmax.xlane.f32.xlu0 %v12451_v9 }
0x1253   : > { %5424 = vmax.xlane.f32.xlu0 %v12457_v18 }
0x1257   : > { %5422 = vmax.xlane.f32.xlu0 %v12463_v39 }
0x125b   : > { %4979 = vmax.xlane.f32.xlu0 %v12469_v0 }
0x1294   : > { %v5445_v56 = vpop.xlane.xlu0 %5444 }
0x1298   : > { %v5443_v47 = vpop.xlane.xlu0 %5442 }
0x129c   : > { %v5449_v46 = vpop.xlane.xlu0 %5448 }
0x129d   : > { %v5467_v62 = vsub.f32 %v12362_v34, %v5449_v46  ;;  %v12483_v34 = vpop.xlane.xlu1 %4989 }
0x12a0   : > { %v5447_v42 = vpop.xlane.xlu0 %5446 }
0x12a4   : > { %v5453_v3 = vpop.xlane.xlu0 %5452 }
0x12a5   : > { %v5469_v15 = vsub.f32 %v5421_v57, %v5453_v3  ;;  %v5496_v57 = vmul.f32 1.442695, %v5467_v62 }
0x12a7   : > { %v5500_v61 = vmul.f32 1.442695, %v5469_v15  ;;  %v5466_v15 = vsub.f32 %v12367_v5, %v5447_v42 }
0x12a8   : > { %v5451_v63 = vpop.xlane.xlu0 %5450 }
0x12a9   : > { %10376 = vpow2.f32 %v5500_v61  ;;  %v5468_v12 = vsub.f32 %v12374_v40, %v5451_v63  ;;  %v5465_v63 = vsub.f32 %v12352_v53, %v5445_v56 }
0x12aa   : > { %10378 = vpow2.f32 %v5055_v20  ;;  %v5464_v20 = vsub.f32 %v12357_v29, %v5443_v47 }
0x12ab   : > { %v5498_v22 = vmul.f32 1.442695, %v5468_v12  ;;  %v5494_v12 = vmul.f32 1.442695, %v5466_v15  ;;  %v5492_v40 = vmul.f32 1.442695, %v5465_v63 }
0x12ac   : > { %v5441_v3 = vpop.xlane.xlu0 %5440  ;;  %v5490_v36 = vmul.f32 1.442695, %v5464_v20 }
0x12ad   : > { %10380 = vpow2.f32 %v5498_v22  ;;  %v5463_v53 = vsub.f32 %v12379_v24, %v5441_v3 }
0x12ae   : > { %10382 = vpow2.f32 %v5053_v48  ;;  %v12490_v48 = vpop.xlane.xlu1 %4987 }
0x12af   : > { %10384 = vpow2.f32 %v5496_v57 }
0x12b0   : > { %v5000_v61 = vpop.xlane.xlu0 %4999  ;;  %10386 = vpow2.f32 %v5051_v28 }
0x12b1   : > { %10388 = vpow2.f32 %v5494_v12  ;;  %v5021_v42 = vsub.f32 %v12384_v35, %v5000_v61  ;;  %v5488_v35 = vmul.f32 1.442695, %v5463_v53 }
0x12b2   : > { %10390 = vpow2.f32 %v5049_v60  ;;  %v12505_v62 = vpop.xlane.xlu1 %4985 }
0x12b3   : > { %10392 = vpow2.f32 %v5492_v40  ;;  %v5047_v29 = vmul.f32 1.442695, %v5021_v42 }
0x12b4   : > { %v5439_v58 = vpop.xlane.xlu0 %5438  ;;  %10394 = vpow2.f32 %v5490_v36 }
0x12b5   : > { %v5462_v56 = vsub.f32 %v12389_v59, %v5439_v58  ;;  %10396 = vpow2.f32 %v5047_v29  ;;  %v5016_v29 = vsub.f32 %v12304_v2, %v12483_v34  ;;  %v5015_v2 = vsub.f32 %v12314_v41, %v12490_v48 }
0x12b6   : > { %v12487_v22 = vpop.eup %10376  ;;  %10398 = vpow2.f32 %v5488_v35  ;;  %v12517_v28 = vpop.xlane.xlu1 %4983 }
0x12b7   : > { %5532 = vadd.xlane.f32.xlu1 %v12487_v22  ;;  %v12493_v52 = vpop.eup %10378 }
0x12b8   : > { %v4998_v5 = vpop.xlane.xlu0 %4997 }
0x12b9   : > { %v5020_v54 = vsub.f32 %v12397_v21, %v4998_v5  ;;  %v5486_v21 = vmul.f32 1.442695, %v5462_v56 }
0x12ba   : > { %v12496_v27 = vpop.eup %10380  ;;  %v4982_v53 = vpop.xlane.xlu1 %4981 }
0x12bb   : > { %5087 = vadd.xlane.f32.xlu1 %v12493_v52  ;;  %5530 = vadd.xlane.f32.xlu0 %v12496_v27  ;;  %v12501_v46 = vpop.eup %10382  ;;  %v5045_v24 = vmul.f32 1.442695, %v5020_v54 }
0x12bc   : > { %v5437_v47 = vpop.xlane.xlu0 %5436  ;;  %v12503_v38 = vpop.eup %10384 }
0x12bd   : > { %v12509_v3 = vpop.eup %10386  ;;  %10400 = vpow2.f32 %v5045_v24  ;;  %v5461_v59 = vsub.f32 %v12402_v31, %v5437_v47  ;;  %v5037_v47 = vmul.f32 1.442695, %v5016_v29 }
0x12be   : > { %v12513_v15 = vpop.eup %10388  ;;  %10402 = vpow2.f32 %v5486_v21 }
0x12bf   : > { %5085 = vadd.xlane.f32.xlu1 %v12501_v46  ;;  %5528 = vadd.xlane.f32.xlu0 %v12503_v38  ;;  %v12519_v63 = vpop.eup %10390  ;;  %v5484_v12 = vmul.f32 1.442695, %v5461_v59  ;;  %v5035_v59 = vmul.f32 1.442695, %v5015_v2 }
0x12c0   : > { %v4996_v50 = vpop.xlane.xlu0 %4995  ;;  %v12522_v31 = vpop.eup %10392 }
0x12c1   : > { %v5019_v57 = vsub.f32 %v12408_v30, %v4996_v50  ;;  %v5017_v30 = vsub.f32 %v12299_v37, %v12476_v32  ;;  %v12528_v40 = vpop.eup %10394 }
0x12c2   : > { %v12531_v36 = vpop.eup %10396 }
0x12c3   : > { %v5043_v19 = vmul.f32 1.442695, %v5019_v57  ;;  %5083 = vadd.xlane.f32.xlu1 %v12509_v3  ;;  %5526 = vadd.xlane.f32.xlu0 %v12513_v15  ;;  %v5039_v5 = vmul.f32 1.442695, %v5017_v30  ;;  %v12537_v37 = vpop.eup %10398  ;;  %v5014_v57 = vsub.f32 %v12324_v1, %v12505_v62 }
0x12c4   : > { %v5435_v61 = vpop.xlane.xlu0 %5434 }
0x12c5   : > { %10404 = vpow2.f32 %v5043_v19  ;;  %v5460_v60 = vsub.f32 %v12413_v51, %v5435_v61 }
0x12c6   : > { %10406 = vpow2.f32 %v5484_v12  ;;  %v5013_v12 = vsub.f32 %v12331_v6, %v12517_v28 }
0x12c7   : > { %5081 = vadd.xlane.f32.xlu1 %v12519_v63  ;;  %5524 = vadd.xlane.f32.xlu0 %v12522_v31  ;;  %v5482_v20 = vmul.f32 1.442695, %v5460_v60 }
0x12c8   : > { %v4994_v58 = vpop.xlane.xlu0 %4993 }
0x12c9   : > { %v5018_v42 = vsub.f32 %v12423_v23, %v4994_v58  ;;  %10408 = vpow2.f32 %v5482_v20  ;;  %v5031_v58 = vmul.f32 1.442695, %v5013_v12  ;;  %v4503_v12 = vld [vmem:[%s13511_s2 + $0x50] sm:$0xff] }
0x12ca   : > { %v12540_v23 = vpop.eup %10400  ;;  %9646 = vmatprep.mubr.msk.f32.mxu0 %vm1002_vm0, %v4503_v12 }
0x12cb   : > { %v5041_v51 = vmul.f32 1.442695, %v5018_v42  ;;  %5522 = vadd.xlane.f32.xlu0 %v12528_v40  ;;  %5079 = vadd.xlane.f32.xlu1 %v12531_v36  ;;  %v12546_v24 = vpop.eup %10402  ;;  %v5012_v42 = vsub.f32 %v12341_v33, %v4982_v53 }
0x12cc   : > { %v5433_v32 = vpop.xlane.xlu0 %5432 }
0x12cd   : > { %10410 = vpow2.f32 %v5041_v51  ;;  %v5459_v54 = vsub.f32 %v12432_v25, %v5433_v32  ;;  %v5090_v35 = vpop.xlane.xlu1 %5089  ;;  %v5029_v32 = vmul.f32 1.442695, %v5012_v42  ;;  %v13525_v42 = vld [vmem:[#allocation28_spill] sm:$0xff] }
0x12ce   : > { %10412 = vrcp.f32 %v5090_v35 }
0x12cf   : > { %v5480_v56 = vmul.f32 1.442695, %v5459_v54  ;;  %5520 = vadd.xlane.f32.xlu0 %v12537_v37  ;;  %5077 = vadd.xlane.f32.xlu1 %v12540_v23  ;;  %10414 = vpow2.f32 %v5039_v5 }
0x12d0   : > { %v5431_v34 = vpop.xlane.xlu0 %5430 }
0x12d1   : > { %10416 = vpow2.f32 %v5480_v56  ;;  %v5458_v25 = vsub.f32 %v12440_v55, %v5431_v34  ;;  %v5033_v55 = vmul.f32 1.442695, %v5014_v57 }
0x12d2   : > { %v12549_v21 = vpop.eup %10404  ;;  %10418 = vpow2.f32 %v5037_v47 }
0x12d3   : > { %v5478_v50 = vmul.f32 1.442695, %v5458_v25  ;;  %5518 = vadd.xlane.f32.xlu0 %v12546_v24  ;;  %5075 = vadd.xlane.f32.xlu1 %v12549_v21  ;;  %v12556_v48 = vpop.eup %10406 }
0x12d4   : > { %v5429_v19 = vpop.xlane.xlu0 %5428 }
0x12d5   : > { %10420 = vpow2.f32 %v5478_v50  ;;  %v5457_v41 = vsub.f32 %v12445_v16, %v5429_v19 }
0x12d6   : > { %10422 = vpow2.f32 %v5035_v59  ;;  %v12561_v30 = vpop.eup %10408 }
0x12d7   : > { %v5476_v61 = vmul.f32 1.442695, %v5457_v41  ;;  %5516 = vadd.xlane.f32.xlu0 %v12556_v48  ;;  %v4514_v41 = vld [vmem:[%s13510_s4 + $0x48] sm:$0xff] }
0x12d8   : > { %v5427_v60 = vpop.xlane.xlu0 %5426 }
0x12d9   : > { %10424 = vpow2.f32 %v5476_v61  ;;  %v5456_v1 = vsub.f32 %v12451_v9, %v5427_v60  ;;  %v4511_v61 = vld [vmem:[%s13510_s4 + $0x30] sm:$0xff]  ;;  %v4504_v60 = vld [vmem:[%s13511_s2 + $0x58] sm:$0xff]  ;;  %s13541_s2 = sld [smem:[#allocation16_spill]] }
0x12da   : > { %v12564_v62 = vpop.eup %10410  ;;  %10426 = vpow2.f32 %v5033_v55  ;;  %v4513_v55 = vld [vmem:[%s13510_s4 + $0x40] sm:$0xff]  ;;  %9647 = vmatmul.mubr.msk.f32.gmra.mxu0 %vm1002_vm0, %v4504_v60 }
0x12db   : > { %v5474_v20 = vmul.f32 1.442695, %v5456_v1  ;;  %5514 = vadd.xlane.f32.xlu0 %v12561_v30  ;;  %5073 = vadd.xlane.f32.xlu1 %v12564_v62  ;;  %v10413_v16 = vpop.eup %10412  ;;  %v13521_v1 = vld [vmem:[#allocation31_spill] sm:$0xff] }
0x12dc   : > { %v5425_v51 = vpop.xlane.xlu0 %5424  ;;  %v12569_v6 = vpop.eup %10414  ;;  %v5122_v9 = vmul.f32 %v10413_v16, %v12435_v8  ;;  %9707 = vmatprep.mubr.msk.f32.mxu0 %vm10693_vm3, %v13492_v43  ;;  %v13523_v16 = vld [vmem:[#allocation33_spill] sm:$0xff] }
0x12dd   : > { %10428 = vpow2.f32 %v5474_v20  ;;  %v5455_v28 = vsub.f32 %v12457_v18, %v5425_v51  ;;  %v13522_v20 = vld [vmem:[#allocation30_spill] sm:$0xff] }
0x12de   : > { %v12573_v5 = vpop.eup %10416  ;;  %9676 = vmatpush3.xpose.msra.mxu0 %v5122_v9  ;;  %10430 = vpow2.f32 %v5031_v58  ;;  %v13524_v58 = vld [vmem:[#allocation29_spill] sm:$0xff] }
0x12df   : > { %v5472_v29 = vmul.f32 1.442695, %v5455_v28  ;;  %5071 = vadd.xlane.f32.xlu1 %v12569_v6  ;;  %5512 = vadd.xlane.f32.xlu0 %v12573_v5  ;;  %v12578_v33 = vpop.eup %10418 }
0x12e0   : > { %v5423_v54 = vpop.xlane.xlu0 %5422  ;;  %9677 = vmatprep.subr.mxu0 %v13492_v43 }
0x12e1   : > { %10432 = vpow2.f32 %v5472_v29  ;;  %v5454_v18 = vsub.f32 %v12463_v39, %v5423_v54 }
0x12e2   : > { %v12581_v53 = vpop.eup %10420  ;;  %10434 = vpow2.f32 %v5029_v32 }
0x12e3   : > { %v5470_v8 = vmul.f32 1.442695, %v5454_v18  ;;  %5069 = vadd.xlane.f32.xlu1 %v12578_v33  ;;  %5510 = vadd.xlane.f32.xlu0 %v12581_v53  ;;  %v12585_v56 = vpop.eup %10422 }
0x12e4   : > { %v4980_v35 = vpop.xlane.xlu0 %4979 }
0x12e5   : > { %10436 = vpow2.f32 %v5470_v8  ;;  %v5011_v47 = vsub.f32 %v12469_v0, %v4980_v35 }
0x12e6   : > { %v12588_v2 = vpop.eup %10424 }
0x12e7   : > { %v5027_v34 = vmul.f32 1.442695, %v5011_v47  ;;  %5067 = vadd.xlane.f32.xlu1 %v12585_v56  ;;  %5508 = vadd.xlane.f32.xlu0 %v12588_v2  ;;  %v12592_v39 = vpop.eup %10426 }
0x12e9   : > { %10438 = vpow2.f32 %v5027_v34 }
0x12ea   : > { %v12594_v25 = vpop.eup %10428 }
0x12eb   : > { %5065 = vadd.xlane.f32.xlu1 %v12592_v39  ;;  %5506 = vadd.xlane.f32.xlu0 %v12594_v25  ;;  %v12598_v0 = vpop.eup %10430 }
0x12ee   : > { %v12600_v50 = vpop.eup %10432 }
0x12ef   : > { %5063 = vadd.xlane.f32.xlu1 %v12598_v0  ;;  %5504 = vadd.xlane.f32.xlu0 %v12600_v50  ;;  %v12604_v59 = vpop.eup %10434 }
0x12f2   : > { %v12606_v57 = vpop.eup %10436 }
0x12f3   : > { %5061 = vadd.xlane.f32.xlu1 %v12604_v59  ;;  %5502 = vadd.xlane.f32.xlu0 %v12606_v57 }
0x12f6   : > { %v12610_v19 = vpop.eup %10438 }
0x12f7   : > { %5059 = vadd.xlane.f32.xlu0 %v12610_v19 }
0x1304   : > { %4564 = vperm.xlu1 %10113, %v4514_v41  }
0x1308   : > { %4549 = vperm.xlu1 %10113, %v4511_v61  }
0x130c   : > { %5835 = vrot.lane.b32.xlu1 %v12169_v49, %s10694_s18 }
0x130d   : > { %4559 = vperm.xlu0 %10112, %v4513_v55  }
0x1310   : > { %5839 = vrot.lane.b32.xlu1 %v12182_v45, %s10694_s18 }
0x1311   : > { %5837 = vrot.lane.b32.xlu0 %v12175_v10, %s10694_s18 }
0x1314   : > { %5843 = vrot.lane.b32.xlu1 %v12194_v11, %s10694_s18 }
0x1315   : > { %5841 = vrot.lane.b32.xlu0 %v12188_v14, %s10694_s18 }
0x1318   : > { %5847 = vrot.lane.b32.xlu1 %v12206_v44, %s10694_s18 }
0x1319   : > { %5845 = vrot.lane.b32.xlu0 %v12200_v26, %s10694_s18 }
0x131c   : > { %5851 = vrot.lane.b32.xlu1 %v12218_v13, %s10694_s18 }
0x131d   : > { %5849 = vrot.lane.b32.xlu0 %v12212_v17, %s10694_s18 }
0x1320   : > { %5855 = vrot.lane.b32.xlu1 %v12230_v7, %s10694_s18 }
0x1321   : > { %5853 = vrot.lane.b32.xlu0 %v12224_v4, %s10694_s18 }
0x1324   : > { %5859 = vrot.lane.b32.xlu1 %v13521_v1, %s10694_s18 }
0x1325   : > { %5857 = vrot.lane.b32.xlu0 %v13522_v20, %s10694_s18 }
0x1328   : > { %5863 = vrot.lane.b32.xlu1 %v13523_v16, %s10694_s18 }
0x1329   : > { %5861 = vrot.lane.b32.xlu0 %v13524_v58, %s10694_s18 }
0x132d   : > { %5865 = vrot.lane.b32.xlu0 %v13525_v42, %s10694_s18  ;;  %s13539_s18 = sld [smem:[#allocation14_spill]] }
0x1340   : > { %v5533_v51 = vpop.xlane.xlu1 %5532 }
0x1341   : > { %10440 = vrcp.f32 %v5533_v51 }
0x1344   : > { %v5088_v28 = vpop.xlane.xlu1 %5087  ;;  %v5531_v9 = vpop.xlane.xlu0 %5530 }
0x1345   : > { %10442 = vrcp.f32 %v5088_v28 }
0x1346   : > { %10444 = vrcp.f32 %v5531_v9 }
0x1348   : > { %v5086_v29 = vpop.xlane.xlu1 %5085  ;;  %v5529_v32 = vpop.xlane.xlu0 %5528 }
0x1349   : > { %10446 = vrcp.f32 %v5086_v29 }
0x134a   : > { %10448 = vrcp.f32 %v5529_v32 }
0x134c   : > { %v5084_v54 = vpop.xlane.xlu1 %5083  ;;  %v5527_v18 = vpop.xlane.xlu0 %5526 }
0x134d   : > { %10450 = vrcp.f32 %v5084_v54 }
0x134e   : > { %v10441_v8 = vpop.eup %10440  ;;  %10452 = vrcp.f32 %v5527_v18 }
0x134f   : > { %v5565_v35 = vmul.f32 %v10441_v8, %v12487_v22 }
0x1350   : > { %v5082_v47 = vpop.xlane.xlu1 %5081  ;;  %v5525_v34 = vpop.xlane.xlu0 %5524 }
0x1351   : > { %10454 = vrcp.f32 %v5082_v47  ;;  %9737 = vmatpush3.xpose.msra.mxu1 %v5565_v35 }
0x1352   : > { %v10443_v41 = vpop.eup %10442  ;;  %10456 = vrcp.f32 %v5525_v34  ;;  %9738 = vmatprep.subr.mxu1 %v13492_v43 }
0x1353   : > { %v10445_v61 = vpop.eup %10444  ;;  %v5121_v55 = vmul.f32 %v10443_v41, %v12493_v52 }
0x1354   : > { %v5080_v12 = vpop.xlane.xlu1 %5079  ;;  %v5523_v60 = vpop.xlane.xlu0 %5522  ;;  %v5564_v51 = vmul.f32 %v10445_v61, %v12496_v27 }
0x1355   : > { %10458 = vrcp.f32 %v5080_v12  ;;  %9678 = vmatpush3.xpose.msra.mxu0 %v5121_v55 }
0x1356   : > { %v10447_v28 = vpop.eup %10446  ;;  %10460 = vrcp.f32 %v5523_v60  ;;  %9739 = vmatpush3.xpose.msra.mxu1 %v5564_v51  ;;  %9679 = vmatprep.subr.mxu0 %v13492_v43 }
0x1357   : > { %v10449_v22 = vpop.eup %10448  ;;  %9740 = vmatprep.subr.mxu1 %v13492_v43  ;;  %v5120_v9 = vmul.f32 %v10447_v28, %v12501_v46 }
0x1358   : > { %v5078_v29 = vpop.xlane.xlu1 %5077  ;;  %v5521_v32 = vpop.xlane.xlu0 %5520  ;;  %v5563_v52 = vmul.f32 %v10449_v22, %v12503_v38 }
0x1359   : > { %10462 = vrcp.f32 %v5078_v29  ;;  %9680 = vmatpush3.xpose.msra.mxu0 %v5120_v9 }
0x135a   : > { %v10451_v54 = vpop.eup %10450  ;;  %10464 = vrcp.f32 %v5521_v32  ;;  %9741 = vmatpush3.xpose.msra.mxu1 %v5563_v52  ;;  %9681 = vmatprep.subr.mxu0 %v13492_v43 }
0x135b   : > { %v10453_v27 = vpop.eup %10452  ;;  %9742 = vmatprep.subr.mxu1 %v13492_v43  ;;  %v5119_v18 = vmul.f32 %v10451_v54, %v12509_v3 }
0x135c   : > { %v5076_v8 = vpop.xlane.xlu1 %5075  ;;  %v5519_v35 = vpop.xlane.xlu0 %5518  ;;  %v5562_v46 = vmul.f32 %v10453_v27, %v12513_v15 }
0x135d   : > { %10466 = vrcp.f32 %v5076_v8  ;;  %9682 = vmatpush3.xpose.msra.mxu0 %v5119_v18 }
0x135e   : > { %v10455_v47 = vpop.eup %10454  ;;  %10468 = vrcp.f32 %v5519_v35  ;;  %9743 = vmatpush3.xpose.msra.mxu1 %v5562_v46  ;;  %9683 = vmatprep.subr.mxu0 %v13492_v43 }
0x135f   : > { %v10457_v38 = vpop.eup %10456  ;;  %9744 = vmatprep.subr.mxu1 %v13492_v43  ;;  %v5118_v34 = vmul.f32 %v10455_v47, %v12519_v63 }
0x1360   : > { %v5517_v41 = vpop.xlane.xlu0 %5516  ;;  %v5561_v61 = vmul.f32 %v10457_v38, %v12522_v31 }
0x1361   : > { %10470 = vrcp.f32 %v5517_v41  ;;  %9684 = vmatpush3.xpose.msra.mxu0 %v5118_v34 }
0x1362   : > { %v10459_v3 = vpop.eup %10458  ;;  %9745 = vmatpush3.xpose.msra.mxu1 %v5561_v61  ;;  %9685 = vmatprep.subr.mxu0 %v13492_v43 }
0x1363   : > { %v10461_v15 = vpop.eup %10460  ;;  %9746 = vmatprep.subr.mxu1 %v13492_v43  ;;  %v5117_v55 = vmul.f32 %v10459_v3, %v12531_v36 }
0x1364   : > { %v5074_v12 = vpop.xlane.xlu1 %5073  ;;  %v5515_v60 = vpop.xlane.xlu0 %5514  ;;  %v5560_v51 = vmul.f32 %v10461_v15, %v12528_v40 }
0x1365   : > { %10472 = vrcp.f32 %v5074_v12  ;;  %9686 = vmatpush3.xpose.msra.mxu0 %v5117_v55 }
0x1366   : > { %v10463_v63 = vpop.eup %10462  ;;  %10474 = vrcp.f32 %v5515_v60  ;;  %9747 = vmatpush3.xpose.msra.mxu1 %v5560_v51  ;;  %9687 = vmatprep.subr.mxu0 %v13492_v43 }
0x1367   : > { %v10465_v31 = vpop.eup %10464  ;;  %9748 = vmatprep.subr.mxu1 %v13492_v43  ;;  %v5116_v28 = vmul.f32 %v10463_v63, %v12540_v23 }
0x1368   : > { %v5072_v22 = vpop.xlane.xlu1 %5071  ;;  %v5559_v9 = vmul.f32 %v10465_v31, %v12537_v37  ;;  %v5513_v36 = vpop.xlane.xlu0 %5512 }
0x1369   : > { %10476 = vrcp.f32 %v5072_v22  ;;  %9688 = vmatpush3.xpose.msra.mxu0 %v5116_v28 }
0x136a   : > { %v10467_v29 = vpop.eup %10466  ;;  %10478 = vrcp.f32 %v5513_v36  ;;  %9749 = vmatpush3.xpose.msra.mxu1 %v5559_v9  ;;  %9689 = vmatprep.subr.mxu0 %v13492_v43  ;;  %v12703_v9 = vpop.f32.mrf.mxu0 }
0x136b   : > { %v10469_v40 = vpop.eup %10468  ;;  %9750 = vmatprep.subr.mxu1 %v13492_v43  ;;  %v5115_v32 = vmul.f32 %v10467_v29, %v12549_v21 }
0x136c   : > { %v5070_v52 = vpop.xlane.xlu1 %5069  ;;  %v5558_v54 = vmul.f32 %v10469_v40, %v12546_v24  ;;  %v5511_v23 = vpop.xlane.xlu0 %5510 }
0x136d   : > { %10480 = vrcp.f32 %v5070_v52  ;;  %9690 = vmatpush3.xpose.msra.mxu0 %v5115_v32  ;;  %v4709_v40 = vpop.f32.mrf.mxu0 }
0x136e   : > { %v10471_v37 = vpop.eup %10470  ;;  %10482 = vrcp.f32 %v5511_v23  ;;  %9751 = vmatpush3.xpose.msra.mxu1 %v5558_v54  ;;  %9691 = vmatprep.subr.mxu0 %v13492_v43 }
0x136f   : > { %9752 = vmatprep.subr.mxu1 %v13492_v43  ;;  %v5557_v27 = vmul.f32 %v10471_v37, %v12556_v48  ;;  %v9645_v54 = vpop.f32.mrf.mxu0 }
0x1370   : > { %v5068_v18 = vpop.xlane.xlu1 %5067  ;;  %v5509_v8 = vpop.xlane.xlu0 %5508 }
0x1371   : > { %10484 = vrcp.f32 %v5068_v18 }
0x1372   : > { %v10473_v35 = vpop.eup %10472  ;;  %10486 = vrcp.f32 %v5509_v8  ;;  %9753 = vmatpush3.xpose.msra.mxu1 %v5557_v27  ;;  %v4719_v27 = vpop.f32.mrf.mxu0 }
0x1373   : > { %v10475_v21 = vpop.eup %10474  ;;  %9754 = vmatprep.subr.mxu1 %v13492_v43  ;;  %v5114_v24 = vmul.f32 %v10473_v35, %v12564_v62  ;;  %v8547_v35 = vld [vmem:[%s13526_s7 + $0x20] sm:$0xff] }
0x1374   : > { %v5066_v46 = vpop.xlane.xlu1 %5065  ;;  %v5556_v47 = vmul.f32 %v10475_v21, %v12561_v30  ;;  %v5507_v38 = vpop.xlane.xlu0 %5506 }
0x1375   : > { %10488 = vrcp.f32 %v5066_v46  ;;  %9692 = vmatpush3.xpose.msra.mxu0 %v5114_v24 }
0x1376   : > { %v10477_v34 = vpop.eup %10476  ;;  %10490 = vrcp.f32 %v5507_v38  ;;  %9755 = vmatpush3.xpose.msra.mxu1 %v5556_v47  ;;  %9693 = vmatprep.subr.mxu0 %v13492_v43  ;;  %v8548_v47 = vld [vmem:[%s13526_s7 + $0x28] sm:$0xff] }
0x1377   : > { %v10479_v48 = vpop.eup %10478  ;;  %9756 = vmatprep.subr.mxu1 %v13492_v43  ;;  %v5113_v41 = vmul.f32 %v10477_v34, %v12569_v6  ;;  %v8549_v34 = vld [vmem:[%s13526_s7 + $0x30] sm:$0xff] }
0x1378   : > { %v5064_v61 = vpop.xlane.xlu1 %5063  ;;  %v5555_v3 = vmul.f32 %v10479_v48, %v12573_v5  ;;  %v5505_v62 = vpop.xlane.xlu0 %5504 }
0x1379   : > { %10492 = vrcp.f32 %v5064_v61  ;;  %9694 = vmatpush3.xpose.msra.mxu0 %v5113_v41  ;;  %v8550_v61 = vld [vmem:[%s13526_s7 + $0x38] sm:$0xff] }
0x137a   : > { %v10481_v30 = vpop.eup %10480  ;;  %10494 = vrcp.f32 %v5505_v62  ;;  %9757 = vmatpush3.xpose.msra.mxu1 %v5555_v3  ;;  %9695 = vmatprep.subr.mxu0 %v13492_v43  ;;  %v5193_v62 = vld [vmem:[%s13526_s7] sm:$0xff] }
0x137b   : > { %v10483_v15 = vpop.eup %10482  ;;  %9758 = vmatprep.subr.mxu1 %v13492_v43  ;;  %v5112_v55 = vmul.f32 %v10481_v30, %v12578_v33 }
0x137c   : > { %v5062_v12 = vpop.xlane.xlu1 %5061  ;;  %v5554_v60 = vmul.f32 %v10483_v15, %v12581_v53  ;;  %v5503_v6 = vpop.xlane.xlu0 %5502 }
0x137d   : > { %10496 = vrcp.f32 %v5062_v12  ;;  %9696 = vmatpush3.xpose.msra.mxu0 %v5112_v55  ;;  %v5194_v55 = vld [vmem:[%s13526_s7 + $0x8] sm:$0xff]  ;;  %v5195_v12 = vld [vmem:[%s13526_s7 + $0x10] sm:$0xff] }
0x137e   : > { %v10485_v5 = vpop.eup %10484  ;;  %10498 = vrcp.f32 %v5503_v6  ;;  %9759 = vmatpush3.xpose.msra.mxu1 %v5554_v60  ;;  %9697 = vmatprep.subr.mxu0 %v13492_v43  ;;  %v5196_v6 = vld [vmem:[%s13526_s7 + $0x18] sm:$0xff] }
0x137f   : > { %v10487_v51 = vpop.eup %10486  ;;  %9760 = vmatprep.subr.mxu1 %v13492_v43  ;;  %v5111_v63 = vmul.f32 %v10485_v5, %v12585_v56 }
0x1380   : > { %v5553_v31 = vmul.f32 %v10487_v51, %v12588_v2  ;;  %v5060_v28 = vpop.xlane.xlu0 %5059  ;;  %v4565_v23 = vpop.permute.xlu1 %4564 }
0x1381   : > { %9698 = vmatpush3.xpose.msra.mxu0 %v5111_v63  ;;  %10500 = vrcp.f32 %v5060_v28 }
0x1382   : > { %v10489_v33 = vpop.eup %10488  ;;  %9761 = vmatpush3.xpose.msra.mxu1 %v5553_v31  ;;  %9699 = vmatprep.subr.mxu0 %v13492_v43 }
0x1383   : > { %v10491_v53 = vpop.eup %10490  ;;  %9762 = vmatprep.subr.mxu1 %v13492_v43  ;;  %v5110_v22 = vmul.f32 %v10489_v33, %v12592_v39 }
0x1384   : > { %v5552_v36 = vmul.f32 %v10491_v53, %v12594_v25 }
0x1385   : > { %9700 = vmatpush3.xpose.msra.mxu0 %v5110_v22 }
0x1386   : > { %v10493_v56 = vpop.eup %10492  ;;  %9763 = vmatpush3.xpose.msra.mxu1 %v5552_v36  ;;  %9701 = vmatprep.subr.mxu0 %v13492_v43 }
0x1387   : > { %v10495_v2 = vpop.eup %10494  ;;  %9764 = vmatprep.subr.mxu1 %v13492_v43  ;;  %v5109_v29 = vmul.f32 %v10493_v56, %v12598_v0 }
0x1388   : > { %v5551_v32 = vmul.f32 %v10495_v2, %v12600_v50  ;;  %v4725_v50 = vadd.f32 %v9645_v54, %v4565_v23  ;;  %v4560_v18 = vpop.permute.xlu0 %4559 }
0x1389   : > { %9702 = vmatpush3.xpose.msra.mxu0 %v5109_v29 }
0x138a   : > { %v10497_v52 = vpop.eup %10496  ;;  %9765 = vmatpush3.xpose.msra.mxu1 %v5551_v32  ;;  %9703 = vmatprep.subr.mxu0 %v13492_v43 }
0x138b   : > { %v10499_v39 = vpop.eup %10498  ;;  %9766 = vmatprep.subr.mxu1 %v13492_v43  ;;  %v5108_v25 = vmul.f32 %v10497_v52, %v12604_v59  ;;  %v4720_v59 = vadd.f32 %v4719_v27, %v4560_v18 }
0x138c   : > { %v5550_v37 = vmul.f32 %v10499_v39, %v12606_v57  ;;  %v4550_v57 = vpop.permute.xlu1 %4549  ;;  %v5838_v48 = vpop.permute.xlu0 %5837 }
0x138d   : > { %9704 = vmatpush3.xpose.msra.mxu0 %v5108_v25  ;;  %v4710_v3 = vadd.f32 %v4709_v40, %v4550_v57 }
0x138e   : > { %9767 = vmatpush3.xpose.msra.mxu1 %v5550_v37  ;;  %9705 = vmatprep.subr.mxu0 %v13492_v43  ;;  %v10501_v0 = vpop.eup %10500 }
0x138f   : > { %v5107_v8 = vmul.f32 %v10501_v0, %v12610_v19 }
0x1390   : > { %v5836_v38 = vpop.permute.xlu1 %5835  ;;  %v5842_v60 = vpop.permute.xlu0 %5841 }
0x1391   : > { %9769 = vmatmul.mubr.f32.vlgmr.msra.gmra.mxu1 %v4725_v50  ;;  %9706 = vmatpush3.xpose.msra.mxu0 %v5107_v8 }
0x1394   : > { %9708 = vmatmul.mubr.f32.vlgmr.msra.gmra.mxu0 %v4720_v59  ;;  %v5840_v15 = vpop.permute.xlu1 %5839  ;;  %v5846_v51 = vpop.permute.xlu0 %5845 }
0x1395   : > { %9773 = vmatprep.mubr.msk.f32.mxu0 %vm1196_vm2, %v8547_v35 }
0x1398   : > { %v5844_v5 = vpop.permute.xlu1 %5843  ;;  %v5850_v31 = vpop.permute.xlu0 %5849 }
0x139a   : > { %v12718_v21 = vpop.f32.mrf.mxu0 }
0x139c   : > { %v12720_v46 = vpop.f32.mrf.mxu0  ;;  %v5848_v63 = vpop.permute.xlu1 %5847 }
0x139d   : > { %v5854_v33 = vpop.permute.xlu0 %5853 }
0x13a0   : > { %v5852_v28 = vpop.permute.xlu1 %5851 }
0x13a1   : > { %v5858_v22 = vpop.permute.xlu0 %5857 }
0x13a4   : > { %v5856_v53 = vpop.permute.xlu1 %5855 }
0x13a5   : > { %v5862_v56 = vpop.permute.xlu0 %5861 }
0x13a8   : > { %v5860_v36 = vpop.permute.xlu1 %5859 }
0x13a9   : > { %v5866_v29 = vpop.permute.xlu0 %5865 }
0x13ac   : > { %v5864_v2 = vpop.permute.xlu1 %5863 }
0x1451   : > { %v5632_v24 = vpop.f32.mrf.mxu1 }
0x1452   : > { %9771 = vmatprep.subr.mxu0 %v5632_v24 }
0x1453   : > { %v9770_v19 = vpop.f32.mrf.mxu1  ;;  %9772 = vmatpush3.msra.mxu0 %v5632_v24 }
0x1454   : > { %9774 = vmatmul.mubr.msk.f32.vlgmr.msra.gmra.mxu0 %vm1196_vm2, %v8548_v47  ;;  %v5189_v41 = vpop.f32.mrf.mxu0 }
0x1455   : > { %9776 = vmatprep.mubr.msk.f32.mxu0 %vm1196_vm2, %v8549_v34  ;;  %9779 = vmatprep.subr.mxu0 %v5189_v41 }
0x1456   : > { %v9709_v30 = vpop.f32.mrf.mxu0  ;;  %9780 = vmatpush3.msra.mxu0 %v5189_v41 }
0x1457   : > { %9787 = vmatprep.subr.mxu0 %v4710_v3 }
0x1458   : > { %9777 = vmatmul.mubr.msk.f32.gmra.mxu0 %vm1196_vm2, %v8550_v61 }
0x1459   : > { %9781 = vmatprep.mubr.msk.f32.mxu0 %vm1196_vm2, %v5193_v62 }
0x145c   : > { %9782 = vmatmul.mubr.msk.f32.vlgmr.msra.gmra.mxu0 %vm1196_vm2, %v5194_v55 }
0x145d   : > { %9788 = vmatpush3.msra.mxu0 %v4710_v3  ;;  %9784 = vmatprep.mubr.msk.f32.mxu0 %vm1196_vm2, %v5195_v12 }
0x145e   : > { %9813 = vmatprep.subr.mxu0 %v13492_v43 }
0x1460   : > { %9785 = vmatmul.mubr.msk.f32.gmra.mxu0 %vm1196_vm2, %v5196_v6 }
0x1461   : > { %9789 = vmatprep.mubr.msk.f32.mxu0 %vm1196_vm2, %v5836_v38 }
0x1464   : > { %9790 = vmatmul.mubr.msk.f32.vlgmr.msra.gmra.mxu0 %vm1196_vm2, %v5838_v48 }
0x1465   : > { %9792 = vmatprep.mubr.msk.f32.mxu0 %vm1196_vm2, %v5840_v15 }
0x1468   : > { %9793 = vmatmul.mubr.msk.f32.gmra.mxu0 %vm1196_vm2, %v5842_v60 }
0x1469   : > { %9795 = vmatprep.mubr.msk.f32.mxu0 %vm1196_vm2, %v5844_v5 }
0x146c   : > { %9796 = vmatmul.mubr.msk.f32.gmra.mxu0 %vm1196_vm2, %v5846_v51 }
0x146d   : > { %9798 = vmatprep.mubr.msk.f32.mxu0 %vm1196_vm2, %v5848_v63 }
0x1470   : > { %9799 = vmatmul.mubr.msk.f32.gmra.mxu0 %vm1196_vm2, %v5850_v31 }
0x1471   : > { %9801 = vmatprep.mubr.msk.f32.mxu0 %vm1196_vm2, %v5852_v28 }
0x1474   : > { %9802 = vmatmul.mubr.msk.f32.gmra.mxu0 %vm1196_vm2, %v5854_v33 }
0x1475   : > { %9804 = vmatprep.mubr.msk.f32.mxu0 %vm1196_vm2, %v5856_v53 }
0x1478   : > { %9805 = vmatmul.mubr.msk.f32.gmra.mxu0 %vm1196_vm2, %v5858_v22 }
0x1479   : > { %9807 = vmatprep.mubr.msk.f32.mxu0 %vm1196_vm2, %v5860_v36 }
0x147c   : > { %9808 = vmatmul.mubr.msk.f32.gmra.mxu0 %vm1196_vm2, %v5862_v56 }
0x147d   : > { %9810 = vmatprep.mubr.msk.f32.mxu0 %vm1196_vm2, %v5864_v2 }
0x1480   : > { %9811 = vmatmul.mubr.msk.f32.gmra.mxu0 %vm1196_vm2, %v5866_v29 }
0x1481   : > { %9845 = vmatprep.mubr.msk.f32.mxu0 %vm10693_vm3, %v13492_v43 }
0x1514   : > { %v9775_v40 = vpop.f32.mrf.mxu0 }
0x1516   : > { %v5719_v32 = vpop.f32.mrf.mxu0 }
0x1518   : > { %v9778_v52 = vpop.f32.mrf.mxu0 }
0x151a   : > { %v5729_v39 = vpop.f32.mrf.mxu0 }
0x151c   : > { %v9783_v25 = vpop.f32.mrf.mxu0 }
0x151d   : > { %v12755_v54 = vadd.f32 %v9783_v25, %v9775_v40 }
0x151e   : > { %v5816_v23 = vpop.f32.mrf.mxu0 }
0x151f   : > { %v12757_v37 = vadd.f32 %v5816_v23, %v5719_v32 }
0x1520   : > { %v9786_v0 = vpop.f32.mrf.mxu0 }
0x1521   : > { %v12759_v50 = vadd.f32 %v9786_v0, %v9778_v52 }
0x1522   : > { %v5826_v27 = vpop.f32.mrf.mxu0 }
0x1523   : > { %v12761_v18 = vadd.f32 %v5826_v27, %v5729_v39 }
0x1524   : > { %v9791_v8 = vpop.f32.mrf.mxu0 }
0x1525   : > { %v12804_v40 = vsel %vm10875_vm1, %v9791_v8, -10000.0 }
0x1526   : > { %v5965_v59 = vpop.f32.mrf.mxu0 }
0x1527   : > { %v12799_v29 = vsel %vm10875_vm1, %v5965_v59, -10000.0 }
0x1528   : > { %v9794_v35 = vpop.f32.mrf.mxu0 }
0x1529   : > { %v12794_v2 = vsel %vm10875_vm1, %v9794_v35, -10000.0 }
0x152a   : > { %v5975_v57 = vpop.f32.mrf.mxu0 }
0x152b   : > { %v12789_v56 = vsel %vm10875_vm1, %v5975_v57, -10000.0 }
0x152c   : > { %v9797_v24 = vpop.f32.mrf.mxu0 }
0x152d   : > { %v6049_v36 = vsel %vm10875_vm1, %v9797_v24, -10000.0 }
0x152e   : > { %v5985_v47 = vpop.f32.mrf.mxu0 }
0x152f   : > { %v6048_v22 = vsel %vm10875_vm1, %v5985_v47, -10000.0 }
0x1530   : > { %v9800_v38 = vpop.f32.mrf.mxu0 }
0x1531   : > { %v6051_v53 = vsel %vm10875_vm1, %v9800_v38, -10000.0 }
0x1532   : > { %v5995_v34 = vpop.f32.mrf.mxu0 }
0x1533   : > { %v6050_v33 = vsel %vm10875_vm1, %v5995_v34, -10000.0 }
0x1534   : > { %v9803_v19 = vpop.f32.mrf.mxu0 }
0x1535   : > { %v6053_v28 = vsel %vm10875_vm1, %v9803_v19, -10000.0 }
0x1536   : > { %v6005_v48 = vpop.f32.mrf.mxu0 }
0x1537   : > { %v6052_v31 = vsel %vm10875_vm1, %v6005_v48, -10000.0 }
0x1538   : > { %v9806_v41 = vpop.f32.mrf.mxu0 }
0x1539   : > { %v6055_v63 = vsel %vm10875_vm1, %v9806_v41, -10000.0 }
0x153a   : > { %v6015_v61 = vpop.f32.mrf.mxu0 }
0x153b   : > { %v6054_v51 = vsel %vm10875_vm1, %v6015_v61, -10000.0 }
0x153c   : > { %v9809_v3 = vpop.f32.mrf.mxu0 }
0x153d   : > { %v6057_v5 = vsel %vm10875_vm1, %v9809_v3, -10000.0 }
0x153e   : > { %v6025_v62 = vpop.f32.mrf.mxu0 }
0x153f   : > { %v6056_v6 = vsel %vm10875_vm1, %v6025_v62, -10000.0 }
0x1540   : > { %v9812_v30 = vpop.f32.mrf.mxu0 }
0x1541   : > { %v6059_v55 = vsel %vm10875_vm1, %v9812_v30, -10000.0 }
0x1542   : > { %6090 = vmax.xlane.f32.xlu1 %v6059_v55  ;;  %v6035_v12 = vpop.f32.mrf.mxu0 }
0x1543   : > { %v6058_v60 = vsel %vm10875_vm1, %v6035_v12, -10000.0 }
0x1544   : > { %6088 = vmax.xlane.f32.xlu0 %v6058_v60 }
0x1546   : > { %6084 = vmax.xlane.f32.xlu1 %v6056_v6 }
0x1548   : > { %6086 = vmax.xlane.f32.xlu0 %v6057_v5 }
0x154a   : > { %6080 = vmax.xlane.f32.xlu1 %v6054_v51 }
0x154c   : > { %6082 = vmax.xlane.f32.xlu0 %v6055_v63 }
0x154e   : > { %6076 = vmax.xlane.f32.xlu1 %v6052_v31 }
0x1550   : > { %6078 = vmax.xlane.f32.xlu0 %v6053_v28 }
0x1552   : > { %6072 = vmax.xlane.f32.xlu1 %v6050_v33 }
0x1554   : > { %6074 = vmax.xlane.f32.xlu0 %v6051_v53 }
0x1556   : > { %6068 = vmax.xlane.f32.xlu1 %v6048_v22 }
0x1558   : > { %6070 = vmax.xlane.f32.xlu0 %v6049_v36 }
0x155a   : > { %6064 = vmax.xlane.f32.xlu1 %v12789_v56 }
0x155c   : > { %6066 = vmax.xlane.f32.xlu0 %v12794_v2 }
0x155e   : > { %6060 = vmax.xlane.f32.xlu1 %v12799_v29 }
0x1560   : > { %6062 = vmax.xlane.f32.xlu0 %v12804_v40 }
0x15cb   : > { %v6091_v32 = vpop.xlane.xlu1 %6090 }
0x15cc   : > { %v6107_v52 = vsub.f32 %v6059_v55, %v6091_v32 }
0x15cd   : > { %v6089_v39 = vpop.xlane.xlu0 %6088 }
0x15ce   : > { %v6138_v25 = vmul.f32 1.442695, %v6107_v52  ;;  %v6106_v23 = vsub.f32 %v6058_v60, %v6089_v39 }
0x15cf   : > { %v6085_v0 = vpop.xlane.xlu1 %6084 }
0x15d0   : > { %10502 = vpow2.f32 %v6138_v25  ;;  %v6136_v27 = vmul.f32 1.442695, %v6106_v23  ;;  %v6104_v35 = vsub.f32 %v6056_v6, %v6085_v0 }
0x15d1   : > { %v6087_v57 = vpop.xlane.xlu0 %6086 }
0x15d2   : > { %10504 = vpow2.f32 %v6136_v27  ;;  %v6132_v59 = vmul.f32 1.442695, %v6104_v35  ;;  %v6105_v24 = vsub.f32 %v6057_v5, %v6087_v57 }
0x15d3   : > { %v6081_v47 = vpop.xlane.xlu1 %6080 }
0x15d4   : > { %v6134_v38 = vmul.f32 1.442695, %v6105_v24  ;;  %v6102_v34 = vsub.f32 %v6054_v51, %v6081_v47  ;;  %10506 = vpow2.f32 %v6132_v59 }
0x15d5   : > { %v6083_v8 = vpop.xlane.xlu0 %6082 }
0x15d6   : > { %10508 = vpow2.f32 %v6134_v38  ;;  %v6128_v19 = vmul.f32 1.442695, %v6102_v34  ;;  %v6103_v48 = vsub.f32 %v6055_v63, %v6083_v8 }
0x15d7   : > { %v6077_v41 = vpop.xlane.xlu1 %6076 }
0x15d8   : > { %v6130_v61 = vmul.f32 1.442695, %v6103_v48  ;;  %v6100_v3 = vsub.f32 %v6052_v31, %v6077_v41  ;;  %10510 = vpow2.f32 %v6128_v19 }
0x15d9   : > { %v6079_v62 = vpop.xlane.xlu0 %6078 }
0x15da   : > { %10512 = vpow2.f32 %v6130_v61  ;;  %v6124_v30 = vmul.f32 1.442695, %v6100_v3  ;;  %v6101_v55 = vsub.f32 %v6053_v28, %v6079_v62 }
0x15db   : > { %v6073_v12 = vpop.xlane.xlu1 %6072 }
0x15dc   : > { %v6126_v60 = vmul.f32 1.442695, %v6101_v55  ;;  %v6098_v6 = vsub.f32 %v6050_v33, %v6073_v12  ;;  %10514 = vpow2.f32 %v6124_v30 }
0x15dd   : > { %v12807_v5 = vpop.eup %10502  ;;  %v6075_v51 = vpop.xlane.xlu0 %6074 }
0x15de   : > { %10516 = vpow2.f32 %v6126_v60  ;;  %v6120_v32 = vmul.f32 1.442695, %v6098_v6  ;;  %v6099_v52 = vsub.f32 %v6051_v53, %v6075_v51  ;;  %6170 = vadd.xlane.f32.xlu0 %v12807_v5  ;;  %v4512_v6 = vld [vmem:[%s13510_s4 + $0x38] sm:$0xff]  ;;  %v4515_v51 = vld [vmem:[%s13510_s4 + $0x50] sm:$0xff] }
0x15df   : > { %v12810_v63 = vpop.eup %10504  ;;  %v6069_v31 = vpop.xlane.xlu1 %6068 }
0x15e0   : > { %v6122_v39 = vmul.f32 1.442695, %v6099_v52  ;;  %v6096_v25 = vsub.f32 %v6048_v22, %v6069_v31  ;;  %6168 = vadd.xlane.f32.xlu1 %v12810_v63  ;;  %10518 = vpow2.f32 %v6120_v32 }
0x15e1   : > { %v6071_v28 = vpop.xlane.xlu0 %6070  ;;  %v12813_v23 = vpop.eup %10506 }
0x15e2   : > { %10520 = vpow2.f32 %v6122_v39  ;;  %v6116_v33 = vmul.f32 1.442695, %v6096_v25  ;;  %v6097_v0 = vsub.f32 %v6049_v36, %v6071_v28 }
0x15e3   : > { %v12815_v27 = vpop.eup %10508  ;;  %v6065_v35 = vpop.xlane.xlu1 %6064 }
0x15e4   : > { %v6118_v53 = vmul.f32 1.442695, %v6097_v0  ;;  %v6094_v57 = vsub.f32 %v12789_v56, %v6065_v35  ;;  %6164 = vadd.xlane.f32.xlu1 %v12813_v23  ;;  %6166 = vadd.xlane.f32.xlu0 %v12815_v27  ;;  %10522 = vpow2.f32 %v6116_v33 }
0x15e5   : > { %v6067_v22 = vpop.xlane.xlu0 %6066  ;;  %v12820_v59 = vpop.eup %10510 }
0x15e6   : > { %10524 = vpow2.f32 %v6118_v53  ;;  %v6112_v24 = vmul.f32 1.442695, %v6094_v57  ;;  %v6095_v47 = vsub.f32 %v12794_v2, %v6067_v22 }
0x15e7   : > { %v12823_v38 = vpop.eup %10512  ;;  %v6061_v36 = vpop.xlane.xlu1 %6060 }
0x15e8   : > { %v6114_v34 = vmul.f32 1.442695, %v6095_v47  ;;  %v6092_v8 = vsub.f32 %v12799_v29, %v6061_v36  ;;  %6160 = vadd.xlane.f32.xlu1 %v12820_v59  ;;  %6162 = vadd.xlane.f32.xlu0 %v12823_v38  ;;  %10526 = vpow2.f32 %v6112_v24 }
0x15e9   : > { %v6063_v56 = vpop.xlane.xlu0 %6062  ;;  %v12828_v19 = vpop.eup %10514 }
0x15ea   : > { %10528 = vpow2.f32 %v6114_v34  ;;  %v6108_v48 = vmul.f32 1.442695, %v6092_v8  ;;  %v6093_v41 = vsub.f32 %v12804_v40, %v6063_v56 }
0x15eb   : > { %v12831_v61 = vpop.eup %10516 }
0x15ec   : > { %v6110_v2 = vmul.f32 1.442695, %v6093_v41  ;;  %6156 = vadd.xlane.f32.xlu1 %v12828_v19  ;;  %6158 = vadd.xlane.f32.xlu0 %v12831_v61  ;;  %10530 = vpow2.f32 %v6108_v48 }
0x15ed   : > { %v12835_v29 = vpop.eup %10518 }
0x15ee   : > { %10532 = vpow2.f32 %v6110_v2 }
0x15ef   : > { %v12837_v3 = vpop.eup %10520 }
0x15f0   : > { %6152 = vadd.xlane.f32.xlu1 %v12835_v29  ;;  %6154 = vadd.xlane.f32.xlu0 %v12837_v3 }
0x15f1   : > { %v12841_v40 = vpop.eup %10522 }
0x15f3   : > { %v12843_v62 = vpop.eup %10524 }
0x15f4   : > { %6148 = vadd.xlane.f32.xlu1 %v12841_v40  ;;  %6150 = vadd.xlane.f32.xlu0 %v12843_v62 }
0x15f5   : > { %v12847_v30 = vpop.eup %10526 }
0x15f7   : > { %v12849_v55 = vpop.eup %10528 }
0x15f8   : > { %6144 = vadd.xlane.f32.xlu1 %v12847_v30  ;;  %6146 = vadd.xlane.f32.xlu0 %v12849_v55 }
0x15f9   : > { %v12853_v12 = vpop.eup %10530 }
0x15fb   : > { %v12855_v60 = vpop.eup %10532 }
0x15fc   : > { %6140 = vadd.xlane.f32.xlu1 %v12853_v12  ;;  %6142 = vadd.xlane.f32.xlu0 %v12855_v60 }
0x160d   : > { %4554 = vperm.xlu1 %10113, %v4512_v6  }
0x1611   : > { %6380 = vrot.lane.b32.xlu1 %v12169_v49, %s10695_s1 }
0x1612   : > { %4569 = vperm.xlu0 %10112, %v4515_v51  }
0x1615   : > { %6384 = vrot.lane.b32.xlu1 %v12182_v45, %s10695_s1 }
0x1616   : > { %6382 = vrot.lane.b32.xlu0 %v12175_v10, %s10695_s1 }
0x1619   : > { %6388 = vrot.lane.b32.xlu1 %v12194_v11, %s10695_s1 }
0x161a   : > { %6386 = vrot.lane.b32.xlu0 %v12188_v14, %s10695_s1 }
0x161d   : > { %6392 = vrot.lane.b32.xlu1 %v12206_v44, %s10695_s1 }
0x161e   : > { %6390 = vrot.lane.b32.xlu0 %v12200_v26, %s10695_s1 }
0x1621   : > { %6396 = vrot.lane.b32.xlu1 %v12218_v13, %s10695_s1 }
0x1622   : > { %6394 = vrot.lane.b32.xlu0 %v12212_v17, %s10695_s1 }
0x1625   : > { %6400 = vrot.lane.b32.xlu1 %v12230_v7, %s10695_s1 }
0x1626   : > { %6398 = vrot.lane.b32.xlu0 %v12224_v4, %s10695_s1 }
0x1629   : > { %6404 = vrot.lane.b32.xlu1 %v13521_v1, %s10695_s1 }
0x162a   : > { %6402 = vrot.lane.b32.xlu0 %v13522_v20, %s10695_s1 }
0x162d   : > { %6408 = vrot.lane.b32.xlu1 %v13523_v16, %s10695_s1 }
0x162e   : > { %6406 = vrot.lane.b32.xlu0 %v13524_v58, %s10695_s1 }
0x1632   : > { %6410 = vrot.lane.b32.xlu0 %v13525_v42, %s10695_s1  ;;  %s13540_s1 = sld [smem:[#allocation15_spill]] }
0x1667   : > { %v6171_v49 = vpop.xlane.xlu0 %6170 }
0x1668   : > { %10534 = vrcp.f32 %v6171_v49 }
0x1669   : > { %v6169_v10 = vpop.xlane.xlu1 %6168 }
0x166a   : > { %10536 = vrcp.f32 %v6169_v10 }
0x166d   : > { %v6167_v45 = vpop.xlane.xlu0 %6166  ;;  %v6165_v14 = vpop.xlane.xlu1 %6164 }
0x166e   : > { %10538 = vrcp.f32 %v6167_v45  ;;  %v8576_v45 = vld [vmem:[%s13526_s7 + $0x48] sm:$0xff] }
0x166f   : > { %10540 = vrcp.f32 %v6165_v14 }
0x1671   : > { %v6163_v11 = vpop.xlane.xlu0 %6162  ;;  %v6161_v13 = vpop.xlane.xlu1 %6160 }
0x1672   : > { %10542 = vrcp.f32 %v6163_v11  ;;  %v8577_v11 = vld [vmem:[%s13526_s7 + $0x50] sm:$0xff] }
0x1673   : > { %10544 = vrcp.f32 %v6161_v13 }
0x1675   : > { %v10535_v26 = vpop.eup %10534  ;;  %v6159_v7 = vpop.xlane.xlu0 %6158 }
0x1676   : > { %v6203_v44 = vmul.f32 %v10535_v26, %v12807_v5  ;;  %10546 = vrcp.f32 %v6159_v7  ;;  %v6157_v58 = vpop.xlane.xlu1 %6156 }
0x1677   : > { %v10537_v17 = vpop.eup %10536  ;;  %10548 = vrcp.f32 %v6157_v58 }
0x1678   : > { %9814 = vmatpush3.xpose.msra.mxu0 %v6203_v44  ;;  %v6202_v4 = vmul.f32 %v10537_v17, %v12810_v63 }
0x1679   : > { %9815 = vmatprep.subr.mxu0 %v13492_v43  ;;  %v6155_v32 = vpop.xlane.xlu0 %6154 }
0x167a   : > { %10550 = vrcp.f32 %v6155_v32  ;;  %v6153_v31 = vpop.xlane.xlu1 %6152 }
0x167b   : > { %v10539_v1 = vpop.eup %10538  ;;  %10552 = vrcp.f32 %v6153_v31 }
0x167c   : > { %9816 = vmatpush3.xpose.msra.mxu0 %v6202_v4  ;;  %v6201_v20 = vmul.f32 %v10539_v1, %v12815_v27  ;;  %v10541_v16 = vpop.eup %10540 }
0x167d   : > { %9817 = vmatprep.subr.mxu0 %v13492_v43  ;;  %v6200_v42 = vmul.f32 %v10541_v16, %v12813_v23  ;;  %v6151_v28 = vpop.xlane.xlu0 %6150 }
0x167e   : > { %10554 = vrcp.f32 %v6151_v28  ;;  %v6149_v0 = vpop.xlane.xlu1 %6148 }
0x167f   : > { %v10543_v5 = vpop.eup %10542  ;;  %10556 = vrcp.f32 %v6149_v0 }
0x1680   : > { %9818 = vmatpush3.xpose.msra.mxu0 %v6201_v20  ;;  %v6199_v52 = vmul.f32 %v10543_v5, %v12823_v38  ;;  %v10545_v63 = vpop.eup %10544 }
0x1681   : > { %9819 = vmatprep.subr.mxu0 %v13492_v43  ;;  %v6198_v39 = vmul.f32 %v10545_v63, %v12820_v59  ;;  %v6147_v53 = vpop.xlane.xlu0 %6146 }
0x1682   : > { %10558 = vrcp.f32 %v6147_v53  ;;  %v6145_v59 = vpop.xlane.xlu1 %6144 }
0x1683   : > { %v10547_v25 = vpop.eup %10546  ;;  %10560 = vrcp.f32 %v6145_v59 }
0x1684   : > { %9820 = vmatpush3.xpose.msra.mxu0 %v6200_v42  ;;  %v6197_v23 = vmul.f32 %v10547_v25, %v12831_v61  ;;  %v10549_v33 = vpop.eup %10548 }
0x1685   : > { %9821 = vmatprep.subr.mxu0 %v13492_v43  ;;  %v6196_v27 = vmul.f32 %v10549_v33, %v12828_v19  ;;  %v6143_v38 = vpop.xlane.xlu0 %6142 }
0x1686   : > { %10562 = vrcp.f32 %v6143_v38  ;;  %v6141_v8 = vpop.xlane.xlu1 %6140 }
0x1687   : > { %v10551_v35 = vpop.eup %10550  ;;  %10564 = vrcp.f32 %v6141_v8 }
0x1688   : > { %9822 = vmatpush3.xpose.msra.mxu0 %v6199_v52  ;;  %v6195_v57 = vmul.f32 %v10551_v35, %v12837_v3  ;;  %v10553_v22 = vpop.eup %10552 }
0x1689   : > { %9823 = vmatprep.subr.mxu0 %v13492_v43  ;;  %v6194_v24 = vmul.f32 %v10553_v22, %v12835_v29 }
0x168a   : > { %v4555_v6 = vpop.permute.xlu1 %4554 }
0x168b   : > { %v10555_v47 = vpop.eup %10554  ;;  %v4715_v14 = vadd.f32 %v12703_v9, %v4555_v6 }
0x168c   : > { %9824 = vmatpush3.xpose.msra.mxu0 %v6198_v39  ;;  %v6193_v36 = vmul.f32 %v10555_v47, %v12843_v62  ;;  %v10557_v34 = vpop.eup %10556 }
0x168d   : > { %9825 = vmatprep.subr.mxu0 %v13492_v43  ;;  %v6192_v56 = vmul.f32 %v10557_v34, %v12841_v40  ;;  %v4570_v40 = vpop.permute.xlu0 %4569 }
0x168e   : > { %v6381_v51 = vpop.permute.xlu1 %6380 }
0x168f   : > { %v10559_v19 = vpop.eup %10558 }
0x1690   : > { %9826 = vmatpush3.xpose.msra.mxu0 %v6197_v23  ;;  %v6191_v48 = vmul.f32 %v10559_v19, %v12849_v55  ;;  %v10561_v41 = vpop.eup %10560  ;;  %v4730_v55 = vadd.f32 %v12720_v46, %v4570_v40  ;;  %v8578_v46 = vld [vmem:[%s13526_s7 + $0x58] sm:$0xff] }
0x1691   : > { %9827 = vmatprep.subr.mxu0 %v13492_v43  ;;  %v6190_v61 = vmul.f32 %v10561_v41, %v12847_v30  ;;  %v8575_v30 = vld [vmem:[%s13526_s7 + $0x40] sm:$0xff] }
0x1692   : > { %9850 = vmatprep.mubr.msk.f32.mxu1 %vm1196_vm2, %v8575_v30  ;;  %v6385_v49 = vpop.permute.xlu1 %6384 }
0x1693   : > { %v10563_v2 = vpop.eup %10562 }
0x1694   : > { %9828 = vmatpush3.xpose.msra.mxu0 %v6196_v27  ;;  %v6189_v29 = vmul.f32 %v10563_v2, %v12855_v60  ;;  %v10565_v3 = vpop.eup %10564  ;;  %v6383_v60 = vpop.permute.xlu0 %6382 }
0x1695   : > { %9829 = vmatprep.subr.mxu0 %v13492_v43  ;;  %v6188_v62 = vmul.f32 %v10565_v3, %v12853_v12 }
0x1696   : > { %v6389_v44 = vpop.permute.xlu1 %6388 }
0x1698   : > { %9830 = vmatpush3.xpose.msra.mxu0 %v6195_v57  ;;  %v6387_v26 = vpop.permute.xlu0 %6386 }
0x1699   : > { %9831 = vmatprep.subr.mxu0 %v13492_v43 }
0x169a   : > { %v6393_v9 = vpop.permute.xlu1 %6392 }
0x169c   : > { %9832 = vmatpush3.xpose.msra.mxu0 %v6194_v24  ;;  %v6391_v17 = vpop.permute.xlu0 %6390 }
0x169d   : > { %9833 = vmatprep.subr.mxu0 %v13492_v43 }
0x169e   : > { %v6397_v4 = vpop.permute.xlu1 %6396 }
0x16a0   : > { %9834 = vmatpush3.xpose.msra.mxu0 %v6193_v36  ;;  %v6395_v13 = vpop.permute.xlu0 %6394 }
0x16a1   : > { %9835 = vmatprep.subr.mxu0 %v13492_v43 }
0x16a2   : > { %v6401_v1 = vpop.permute.xlu1 %6400 }
0x16a4   : > { %9836 = vmatpush3.xpose.msra.mxu0 %v6192_v56  ;;  %v6399_v7 = vpop.permute.xlu0 %6398 }
0x16a5   : > { %9837 = vmatprep.subr.mxu0 %v13492_v43 }
0x16a6   : > { %v6405_v16 = vpop.permute.xlu1 %6404 }
0x16a8   : > { %9838 = vmatpush3.xpose.msra.mxu0 %v6191_v48  ;;  %v6403_v20 = vpop.permute.xlu0 %6402 }
0x16a9   : > { %9839 = vmatprep.subr.mxu0 %v13492_v43 }
0x16aa   : > { %v6409_v42 = vpop.permute.xlu1 %6408 }
0x16ac   : > { %9840 = vmatpush3.xpose.msra.mxu0 %v6190_v61  ;;  %v6407_v58 = vpop.permute.xlu0 %6406 }
0x16ad   : > { %9841 = vmatprep.subr.mxu0 %v13492_v43 }
0x16b0   : > { %9842 = vmatpush3.xpose.msra.mxu0 %v6189_v29  ;;  %v6411_v5 = vpop.permute.xlu0 %6410 }
0x16b1   : > { %9843 = vmatprep.subr.mxu0 %v13492_v43 }
0x16b4   : > { %9844 = vmatpush3.xpose.msra.mxu0 %v6188_v62 }
0x16b7   : > { %9846 = vmatmul.mubr.f32.vlgmr.msra.gmra.mxu0 %v4730_v55 }
0x1777   : > { %v6270_v10 = vpop.f32.mrf.mxu0 }
0x1778   : > { %9848 = vmatprep.subr.mxu1 %v6270_v10 }
0x1779   : > { %v9847_v12 = vpop.f32.mrf.mxu0  ;;  %9849 = vmatpush3.msra.mxu1 %v6270_v10 }
0x177a   : > { %9851 = vmatmul.mubr.msk.f32.vlgmr.msra.gmra.mxu1 %vm1196_vm2, %v8576_v45  ;;  %9856 = vmatprep.subr.mxu1 %v4715_v14 }
0x177b   : > { %9857 = vmatpush3.msra.mxu1 %v4715_v14  ;;  %9853 = vmatprep.mubr.msk.f32.mxu1 %vm1196_vm2, %v8577_v11 }
0x177c   : > { %9882 = vmatprep.subr.mxu1 %v13492_v43 }
0x177e   : > { %9854 = vmatmul.mubr.msk.f32.gmra.mxu1 %vm1196_vm2, %v8578_v46 }
0x177f   : > { %9858 = vmatprep.mubr.msk.f32.mxu1 %vm1196_vm2, %v6381_v51 }
0x1782   : > { %9859 = vmatmul.mubr.msk.f32.vlgmr.msra.gmra.mxu1 %vm1196_vm2, %v6383_v60 }
0x1783   : > { %9861 = vmatprep.mubr.msk.f32.mxu1 %vm1196_vm2, %v6385_v49 }
0x1786   : > { %9862 = vmatmul.mubr.msk.f32.gmra.mxu1 %vm1196_vm2, %v6387_v26 }
0x1787   : > { %9864 = vmatprep.mubr.msk.f32.mxu1 %vm1196_vm2, %v6389_v44 }
0x178a   : > { %9865 = vmatmul.mubr.msk.f32.gmra.mxu1 %vm1196_vm2, %v6391_v17 }
0x178b   : > { %9867 = vmatprep.mubr.msk.f32.mxu1 %vm1196_vm2, %v6393_v9 }
0x178e   : > { %9868 = vmatmul.mubr.msk.f32.gmra.mxu1 %vm1196_vm2, %v6395_v13 }
0x178f   : > { %9870 = vmatprep.mubr.msk.f32.mxu1 %vm1196_vm2, %v6397_v4 }
0x1792   : > { %9871 = vmatmul.mubr.msk.f32.gmra.mxu1 %vm1196_vm2, %v6399_v7 }
0x1793   : > { %9873 = vmatprep.mubr.msk.f32.mxu1 %vm1196_vm2, %v6401_v1 }
0x1796   : > { %9874 = vmatmul.mubr.msk.f32.gmra.mxu1 %vm1196_vm2, %v6403_v20 }
0x1797   : > { %9876 = vmatprep.mubr.msk.f32.mxu1 %vm1196_vm2, %v6405_v16 }
0x179a   : > { %9877 = vmatmul.mubr.msk.f32.gmra.mxu1 %vm1196_vm2, %v6407_v58 }
0x179b   : > { %9879 = vmatprep.mubr.msk.f32.mxu1 %vm1196_vm2, %v6409_v42 }
0x179e   : > { %9880 = vmatmul.mubr.msk.f32.gmra.mxu1 %vm1196_vm2, %v6411_v5 }
0x179f   : > { %9914 = vmatprep.mubr.msk.f32.mxu1 %vm10693_vm3, %v13492_v43 }
0x183a   : > { %v9852_v32 = vpop.f32.mrf.mxu1 }
0x183b   : > { %v12954_v52 = vadd.f32 %v9852_v32, %v12755_v54 }
0x183c   : > { %v6357_v63 = vpop.f32.mrf.mxu1 }
0x183d   : > { %v12957_v31 = vadd.f32 %v6357_v63, %v12757_v37 }
0x183e   : > { %v9855_v39 = vpop.f32.mrf.mxu1 }
0x183f   : > { %v12960_v25 = vadd.f32 %v9855_v39, %v12759_v50 }
0x1840   : > { %v6367_v28 = vpop.f32.mrf.mxu1 }
0x1841   : > { %v12963_v23 = vadd.f32 %v6367_v28, %v12761_v18 }
0x1842   : > { %v9860_v33 = vpop.f32.mrf.mxu1 }
0x1843   : > { %v13006_v51 = vsel %vm10875_vm1, %v9860_v33, -10000.0 }
0x1844   : > { %v6510_v0 = vpop.f32.mrf.mxu1 }
0x1845   : > { %v13001_v6 = vsel %vm10875_vm1, %v6510_v0, -10000.0 }
0x1846   : > { %v9863_v27 = vpop.f32.mrf.mxu1 }
0x1847   : > { %v12996_v30 = vsel %vm10875_vm1, %v9863_v27, -10000.0 }
0x1848   : > { %v6520_v35 = vpop.f32.mrf.mxu1 }
0x1849   : > { %v12991_v55 = vsel %vm10875_vm1, %v6520_v35, -10000.0 }
0x184a   : > { %v9866_v53 = vpop.f32.mrf.mxu1 }
0x184b   : > { %v6594_v62 = vsel %vm10875_vm1, %v9866_v53, -10000.0 }
0x184c   : > { %v6530_v57 = vpop.f32.mrf.mxu1 }
0x184d   : > { %v6593_v40 = vsel %vm10875_vm1, %v6530_v57, -10000.0 }
0x184e   : > { %v9869_v54 = vpop.f32.mrf.mxu1 }
0x184f   : > { %v6596_v3 = vsel %vm10875_vm1, %v9869_v54, -10000.0 }
0x1850   : > { %v6540_v22 = vpop.f32.mrf.mxu1 }
0x1851   : > { %v6595_v29 = vsel %vm10875_vm1, %v6540_v22, -10000.0 }
0x1852   : > { %v9872_v59 = vpop.f32.mrf.mxu1 }
0x1853   : > { %v6598_v2 = vsel %vm10875_vm1, %v9872_v59, -10000.0 }
0x1854   : > { %v6550_v24 = vpop.f32.mrf.mxu1 }
0x1855   : > { %v6597_v61 = vsel %vm10875_vm1, %v6550_v24, -10000.0 }
0x1856   : > { %v9875_v37 = vpop.f32.mrf.mxu1 }
0x1857   : > { %v6600_v41 = vsel %vm10875_vm1, %v9875_v37, -10000.0 }
0x1858   : > { %v6560_v47 = vpop.f32.mrf.mxu1 }
0x1859   : > { %v6599_v48 = vsel %vm10875_vm1, %v6560_v47, -10000.0 }
0x185a   : > { %v9878_v38 = vpop.f32.mrf.mxu1 }
0x185b   : > { %v6602_v19 = vsel %vm10875_vm1, %v9878_v38, -10000.0 }
0x185c   : > { %v6570_v36 = vpop.f32.mrf.mxu1 }
0x185d   : > { %v6601_v56 = vsel %vm10875_vm1, %v6570_v36, -10000.0 }
0x185e   : > { %v9881_v50 = vpop.f32.mrf.mxu1 }
0x185f   : > { %v6604_v34 = vsel %vm10875_vm1, %v9881_v50, -10000.0 }
0x1860   : > { %6635 = vmax.xlane.f32.xlu1 %v6604_v34  ;;  %v6580_v18 = vpop.f32.mrf.mxu1 }
0x1861   : > { %v6603_v8 = vsel %vm10875_vm1, %v6580_v18, -10000.0 }
0x1862   : > { %6633 = vmax.xlane.f32.xlu0 %v6603_v8 }
0x1864   : > { %6629 = vmax.xlane.f32.xlu1 %v6601_v56 }
0x1866   : > { %6631 = vmax.xlane.f32.xlu0 %v6602_v19 }
0x1868   : > { %6625 = vmax.xlane.f32.xlu1 %v6599_v48 }
0x186a   : > { %6627 = vmax.xlane.f32.xlu0 %v6600_v41 }
0x186c   : > { %6621 = vmax.xlane.f32.xlu1 %v6597_v61 }
0x186e   : > { %6623 = vmax.xlane.f32.xlu0 %v6598_v2 }
0x1870   : > { %6617 = vmax.xlane.f32.xlu1 %v6595_v29 }
0x1872   : > { %6619 = vmax.xlane.f32.xlu0 %v6596_v3 }
0x1874   : > { %6613 = vmax.xlane.f32.xlu1 %v6593_v40 }
0x1876   : > { %6615 = vmax.xlane.f32.xlu0 %v6594_v62 }
0x1878   : > { %6609 = vmax.xlane.f32.xlu1 %v12991_v55 }
0x187a   : > { %6611 = vmax.xlane.f32.xlu0 %v12996_v30 }
0x187c   : > { %6605 = vmax.xlane.f32.xlu1 %v13001_v6 }
0x187e   : > { %6607 = vmax.xlane.f32.xlu0 %v13006_v51 }
0x18e9   : > { %v6636_v60 = vpop.xlane.xlu1 %6635 }
0x18ea   : > { %v6652_v49 = vsub.f32 %v6604_v34, %v6636_v60 }
0x18eb   : > { %v6634_v10 = vpop.xlane.xlu0 %6633 }
0x18ec   : > { %v6683_v45 = vmul.f32 1.442695, %v6652_v49  ;;  %v6651_v14 = vsub.f32 %v6603_v8, %v6634_v10 }
0x18ed   : > { %v6630_v11 = vpop.xlane.xlu1 %6629 }
0x18ee   : > { %10566 = vpow2.f32 %v6683_v45  ;;  %v6681_v26 = vmul.f32 1.442695, %v6651_v14  ;;  %v6649_v12 = vsub.f32 %v6601_v56, %v6630_v11 }
0x18ef   : > { %v6632_v46 = vpop.xlane.xlu0 %6631 }
0x18f0   : > { %10568 = vpow2.f32 %v6681_v26  ;;  %v6677_v44 = vmul.f32 1.442695, %v6649_v12  ;;  %v6650_v17 = vsub.f32 %v6602_v19, %v6632_v46  ;;  %v6925_v26 = vld [vmem:[%s13528_s5] sm:$0xff]  ;;  %v6926_v12 = vld [vmem:[%s13528_s5 + $0x8] sm:$0xff]  ;;  %v4516_v46 = vld [vmem:[%s13510_s4 + $0x58] sm:$0xff] }
0x18f1   : > { %v6626_v9 = vpop.xlane.xlu1 %6625 }
0x18f2   : > { %v6679_v13 = vmul.f32 1.442695, %v6650_v17  ;;  %v6647_v15 = vsub.f32 %v6599_v48, %v6626_v9  ;;  %10570 = vpow2.f32 %v6677_v44  ;;  %v6928_v44 = vld [vmem:[%s13528_s5 + $0x18] sm:$0xff]  ;;  %v6927_v17 = vld [vmem:[%s13528_s5 + $0x10] sm:$0xff] }
0x18f3   : > { %v6628_v4 = vpop.xlane.xlu0 %6627  ;;  %v6959_v9 = vld [vmem:[%s13529_s10 + $0x10] sm:$0xff] }
0x18f4   : > { %10572 = vpow2.f32 %v6679_v13  ;;  %v6673_v7 = vmul.f32 1.442695, %v6647_v15  ;;  %v6648_v1 = vsub.f32 %v6600_v41, %v6628_v4  ;;  %v6960_v13 = vld [vmem:[%s13529_s10 + $0x18] sm:$0xff]  ;;  %v6958_v15 = vld [vmem:[%s13529_s10 + $0x8] sm:$0xff] }
0x18f5   : > { %v6622_v20 = vpop.xlane.xlu1 %6621  ;;  %v6964_v4 = vld [vmem:[%s13530_s11 + $0x18] sm:$0xff] }
0x18f6   : > { %v6675_v16 = vmul.f32 1.442695, %v6648_v1  ;;  %v6645_v58 = vsub.f32 %v6597_v61, %v6622_v20  ;;  %10574 = vpow2.f32 %v6673_v7  ;;  %v6957_v7 = vld [vmem:[%s13529_s10] sm:$0xff]  ;;  %v6963_v1 = vld [vmem:[%s13530_s11 + $0x10] sm:$0xff] }
0x18f7   : > { %v6624_v42 = vpop.xlane.xlu0 %6623  ;;  %v6961_v20 = vld [vmem:[%s13530_s11] sm:$0xff] }
0x18f8   : > { %10576 = vpow2.f32 %v6675_v16  ;;  %v6669_v5 = vmul.f32 1.442695, %v6645_v58  ;;  %v6646_v32 = vsub.f32 %v6598_v2, %v6624_v42  ;;  %v6962_v16 = vld [vmem:[%s13530_s11 + $0x8] sm:$0xff] }
0x18f9   : > { %v6618_v63 = vpop.xlane.xlu1 %6617 }
0x18fa   : > { %v6671_v39 = vmul.f32 1.442695, %v6646_v32  ;;  %v6643_v28 = vsub.f32 %v6595_v29, %v6618_v63  ;;  %10578 = vpow2.f32 %v6669_v5 }
0x18fb   : > { %v13009_v33 = vpop.eup %10566  ;;  %v6620_v0 = vpop.xlane.xlu0 %6619 }
0x18fc   : > { %10580 = vpow2.f32 %v6671_v39  ;;  %v6665_v27 = vmul.f32 1.442695, %v6643_v28  ;;  %v6644_v35 = vsub.f32 %v6596_v3, %v6620_v0  ;;  %6715 = vadd.xlane.f32.xlu0 %v13009_v33 }
0x18fd   : > { %v13012_v53 = vpop.eup %10568  ;;  %v6614_v57 = vpop.xlane.xlu1 %6613 }
0x18fe   : > { %v6667_v54 = vmul.f32 1.442695, %v6644_v35  ;;  %v6641_v22 = vsub.f32 %v6593_v40, %v6614_v57  ;;  %6713 = vadd.xlane.f32.xlu1 %v13012_v53  ;;  %10582 = vpow2.f32 %v6665_v27 }
0x18ff   : > { %v6616_v59 = vpop.xlane.xlu0 %6615  ;;  %v13015_v24 = vpop.eup %10570 }
0x1900   : > { %10584 = vpow2.f32 %v6667_v54  ;;  %v6661_v37 = vmul.f32 1.442695, %v6641_v22  ;;  %v6642_v47 = vsub.f32 %v6594_v62, %v6616_v59 }
0x1901   : > { %v13017_v38 = vpop.eup %10572  ;;  %v6610_v36 = vpop.xlane.xlu1 %6609 }
0x1902   : > { %v6663_v50 = vmul.f32 1.442695, %v6642_v47  ;;  %v6639_v34 = vsub.f32 %v12991_v55, %v6610_v36  ;;  %6709 = vadd.xlane.f32.xlu1 %v13015_v24  ;;  %6711 = vadd.xlane.f32.xlu0 %v13017_v38  ;;  %10586 = vpow2.f32 %v6661_v37 }
0x1903   : > { %v6612_v18 = vpop.xlane.xlu0 %6611  ;;  %v13022_v8 = vpop.eup %10574 }
0x1904   : > { %10588 = vpow2.f32 %v6663_v50  ;;  %v6657_v56 = vmul.f32 1.442695, %v6639_v34  ;;  %v6640_v19 = vsub.f32 %v12996_v30, %v6612_v18 }
0x1905   : > { %v13025_v48 = vpop.eup %10576  ;;  %v6606_v41 = vpop.xlane.xlu1 %6605 }
0x1906   : > { %v6659_v61 = vmul.f32 1.442695, %v6640_v19  ;;  %v6637_v2 = vsub.f32 %v13001_v6, %v6606_v41  ;;  %6705 = vadd.xlane.f32.xlu1 %v13022_v8  ;;  %6707 = vadd.xlane.f32.xlu0 %v13025_v48  ;;  %10590 = vpow2.f32 %v6657_v56 }
0x1907   : > { %v6608_v29 = vpop.xlane.xlu0 %6607  ;;  %v13030_v3 = vpop.eup %10578 }
0x1908   : > { %10592 = vpow2.f32 %v6659_v61  ;;  %v6653_v40 = vmul.f32 1.442695, %v6637_v2  ;;  %v6638_v62 = vsub.f32 %v13006_v51, %v6608_v29 }
0x1909   : > { %v13033_v55 = vpop.eup %10580 }
0x190a   : > { %v6655_v30 = vmul.f32 1.442695, %v6638_v62  ;;  %6701 = vadd.xlane.f32.xlu1 %v13030_v3  ;;  %6703 = vadd.xlane.f32.xlu0 %v13033_v55  ;;  %10594 = vpow2.f32 %v6653_v40 }
0x190b   : > { %v13037_v6 = vpop.eup %10582 }
0x190c   : > { %10596 = vpow2.f32 %v6655_v30 }
0x190d   : > { %v13039_v60 = vpop.eup %10584 }
0x190e   : > { %6697 = vadd.xlane.f32.xlu1 %v13037_v6  ;;  %6699 = vadd.xlane.f32.xlu0 %v13039_v60 }
0x190f   : > { %v13043_v51 = vpop.eup %10586 }
0x1911   : > { %v13045_v49 = vpop.eup %10588 }
0x1912   : > { %6693 = vadd.xlane.f32.xlu1 %v13043_v51  ;;  %6695 = vadd.xlane.f32.xlu0 %v13045_v49 }
0x1913   : > { %v13049_v10 = vpop.eup %10590 }
0x1915   : > { %v13051_v45 = vpop.eup %10592 }
0x1916   : > { %6689 = vadd.xlane.f32.xlu1 %v13049_v10  ;;  %6691 = vadd.xlane.f32.xlu0 %v13051_v45 }
0x1917   : > { %v13055_v14 = vpop.eup %10594 }
0x1919   : > { %v13057_v11 = vpop.eup %10596 }
0x191a   : > { %6685 = vadd.xlane.f32.xlu1 %v13055_v14  ;;  %6687 = vadd.xlane.f32.xlu0 %v13057_v11 }
0x192b   : > { %6931 = vperm.xlu1 %10113, %v6925_v26  }
0x192f   : > { %6936 = vperm.xlu1 %10113, %v6926_v12  }
0x1930   : > { %4574 = vperm.xlu0 %10112, %v4516_v46  }
0x1933   : > { %6946 = vperm.xlu1 %10113, %v6928_v44  }
0x1934   : > { %6941 = vperm.xlu0 %10112, %v6927_v17  }
0x1937   : > { %7014 = vperm.xlu1 %10113, %v6959_v9  }
0x1938   : > { %7019 = vperm.xlu0 %10112, %v6960_v13  }
0x193b   : > { %7009 = vperm.xlu1 %10113, %v6958_v15   ;;  %v8599_v15 = vld [vmem:[%s13526_s7 + $0x60] sm:$0xff] }
0x193c   : > { %7043 = vperm.xlu0 %10112, %v6964_v4   ;;  %9919 = vmatprep.mubr.msk.f32.mxu0 %vm1196_vm2, %v8599_v15 }
0x193f   : > { %7004 = vperm.xlu1 %10113, %v6957_v7   ;;  %v8600_v7 = vld [vmem:[%s13526_s7 + $0x68] sm:$0xff] }
0x1940   : > { %7038 = vperm.xlu0 %10112, %v6963_v1  }
0x1943   : > { %7028 = vperm.xlu1 %10113, %v6961_v20  }
0x1944   : > { %7033 = vperm.xlu0 %10112, %v6962_v16  }
0x1985   : > { %v6716_v58 = vpop.xlane.xlu0 %6715 }
0x1986   : > { %10598 = vrcp.f32 %v6716_v58 }
0x1987   : > { %v6714_v42 = vpop.xlane.xlu1 %6713 }
0x1988   : > { %10600 = vrcp.f32 %v6714_v42 }
0x198b   : > { %v6712_v5 = vpop.xlane.xlu0 %6711  ;;  %v6710_v32 = vpop.xlane.xlu1 %6709 }
0x198c   : > { %10602 = vrcp.f32 %v6712_v5 }
0x198d   : > { %10604 = vrcp.f32 %v6710_v32 }
0x198f   : > { %v6708_v63 = vpop.xlane.xlu0 %6707  ;;  %v6706_v27 = vpop.xlane.xlu1 %6705 }
0x1990   : > { %10606 = vrcp.f32 %v6708_v63 }
0x1991   : > { %10608 = vrcp.f32 %v6706_v27 }
0x1993   : > { %v10599_v39 = vpop.eup %10598  ;;  %v6704_v57 = vpop.xlane.xlu0 %6703 }
0x1994   : > { %v6748_v28 = vmul.f32 %v10599_v39, %v13009_v33  ;;  %10610 = vrcp.f32 %v6704_v57  ;;  %v6702_v37 = vpop.xlane.xlu1 %6701  ;;  %v13532_v39 = vld [vmem:[#allocation26_spill] sm:$0xff] }
0x1995   : > { %v10601_v0 = vpop.eup %10600  ;;  %10612 = vrcp.f32 %v6702_v37 }
0x1996   : > { %9883 = vmatpush3.xpose.msra.mxu1 %v6748_v28  ;;  %v6747_v35 = vmul.f32 %v10601_v0, %v13012_v53 }
0x1997   : > { %9884 = vmatprep.subr.mxu1 %v13492_v43  ;;  %v6700_v36 = vpop.xlane.xlu0 %6699 }
0x1998   : > { %10614 = vrcp.f32 %v6700_v36  ;;  %v6698_v34 = vpop.xlane.xlu1 %6697 }
0x1999   : > { %v10603_v54 = vpop.eup %10602  ;;  %10616 = vrcp.f32 %v6698_v34 }
0x199a   : > { %9885 = vmatpush3.xpose.msra.mxu1 %v6747_v35  ;;  %v6746_v22 = vmul.f32 %v10603_v54, %v13017_v38  ;;  %v10605_v59 = vpop.eup %10604  ;;  %v13533_v54 = vld [vmem:[#allocation27_spill] sm:$0xff] }
0x199b   : > { %9886 = vmatprep.subr.mxu1 %v13492_v43  ;;  %v6745_v33 = vmul.f32 %v10605_v59, %v13015_v24  ;;  %v6696_v56 = vpop.xlane.xlu0 %6695 }
0x199c   : > { %10618 = vrcp.f32 %v6696_v56  ;;  %v6694_v41 = vpop.xlane.xlu1 %6693 }
0x199d   : > { %v10607_v47 = vpop.eup %10606  ;;  %10620 = vrcp.f32 %v6694_v41 }
0x199e   : > { %9887 = vmatpush3.xpose.msra.mxu1 %v6746_v22  ;;  %v6744_v53 = vmul.f32 %v10607_v47, %v13025_v48  ;;  %v10609_v50 = vpop.eup %10608 }
0x199f   : > { %9888 = vmatprep.subr.mxu1 %v13492_v43  ;;  %v6743_v38 = vmul.f32 %v10609_v50, %v13022_v8  ;;  %v6692_v2 = vpop.xlane.xlu0 %6691 }
0x19a0   : > { %10622 = vrcp.f32 %v6692_v2  ;;  %v6690_v40 = vpop.xlane.xlu1 %6689 }
0x19a1   : > { %v10611_v18 = vpop.eup %10610  ;;  %10624 = vrcp.f32 %v6690_v40 }
0x19a2   : > { %9889 = vmatpush3.xpose.msra.mxu1 %v6745_v33  ;;  %v6742_v24 = vmul.f32 %v10611_v18, %v13033_v55  ;;  %v10613_v19 = vpop.eup %10612 }
0x19a3   : > { %9890 = vmatprep.subr.mxu1 %v13492_v43  ;;  %v6741_v48 = vmul.f32 %v10613_v19, %v13030_v3  ;;  %v6688_v30 = vpop.xlane.xlu0 %6687 }
0x19a4   : > { %10626 = vrcp.f32 %v6688_v30  ;;  %v6686_v12 = vpop.xlane.xlu1 %6685 }
0x19a5   : > { %v10615_v61 = vpop.eup %10614  ;;  %10628 = vrcp.f32 %v6686_v12 }
0x19a6   : > { %9891 = vmatpush3.xpose.msra.mxu1 %v6744_v53  ;;  %v6740_v8 = vmul.f32 %v10615_v61, %v13039_v60  ;;  %v10617_v29 = vpop.eup %10616 }
0x19a7   : > { %9892 = vmatprep.subr.mxu1 %v13492_v43  ;;  %v6739_v62 = vmul.f32 %v10617_v29, %v13037_v6 }
0x19a9   : > { %v10619_v55 = vpop.eup %10618 }
0x19aa   : > { %9893 = vmatpush3.xpose.msra.mxu1 %v6743_v38  ;;  %v6738_v3 = vmul.f32 %v10619_v55, %v13045_v49  ;;  %v10621_v26 = vpop.eup %10620  ;;  %v13535_v38 = vld [vmem:[#allocation25_spill] sm:$0xff] }
0x19ab   : > { %9894 = vmatprep.subr.mxu1 %v13492_v43  ;;  %v6737_v60 = vmul.f32 %v10621_v26, %v13043_v51 }
0x19ad   : > { %v10623_v46 = vpop.eup %10622 }
0x19ae   : > { %9895 = vmatpush3.xpose.msra.mxu1 %v6742_v24  ;;  %v6736_v6 = vmul.f32 %v10623_v46, %v13051_v45  ;;  %v10625_v44 = vpop.eup %10624  ;;  %v4575_v45 = vpop.permute.xlu0 %4574 }
0x19af   : > { %9896 = vmatprep.subr.mxu1 %v13492_v43  ;;  %v6735_v49 = vmul.f32 %v10625_v44, %v13049_v10  ;;  %v4735_v10 = vadd.f32 %v12718_v21, %v4575_v45  ;;  %v6932_v21 = vpop.permute.xlu1 %6931 }
0x19b1   : > { %v10627_v17 = vpop.eup %10626 }
0x19b2   : > { %9897 = vmatpush3.xpose.msra.mxu1 %v6741_v48  ;;  %v6734_v51 = vmul.f32 %v10627_v17, %v13057_v11  ;;  %v10629_v9 = vpop.eup %10628  ;;  %v8601_v11 = vld [vmem:[%s13526_s7 + $0x70] sm:$0xff]  ;;  %v6942_v33 = vpop.permute.xlu0 %6941 }
0x19b3   : > { %9898 = vmatprep.subr.mxu1 %v13492_v43  ;;  %v6733_v13 = vmul.f32 %v10629_v9, %v13055_v14  ;;  %v8607_v14 = vld [vmem:[%s13531_s20 + $0x40] sm:$0xff]  ;;  %v6937_v20 = vpop.permute.xlu1 %6936 }
0x19b6   : > { %9899 = vmatpush3.xpose.msra.mxu1 %v6740_v8 }
0x19b7   : > { %9900 = vmatprep.subr.mxu1 %v13492_v43  ;;  %v6947_v35 = vpop.permute.xlu1 %6946 }
0x19ba   : > { %9901 = vmatpush3.xpose.msra.mxu1 %v6739_v62 }
0x19bb   : > { %9902 = vmatprep.subr.mxu1 %v13492_v43  ;;  %v7015_v15 = vpop.permute.xlu1 %7014 }
0x19be   : > { %9903 = vmatpush3.xpose.msra.mxu1 %v6738_v3 }
0x19bf   : > { %9904 = vmatprep.subr.mxu1 %v13492_v43 }
0x19c2   : > { %9905 = vmatpush3.xpose.msra.mxu1 %v6737_v60 }
0x19c3   : > { %9906 = vmatprep.subr.mxu1 %v13492_v43 }
0x19c6   : > { %9907 = vmatpush3.xpose.msra.mxu1 %v6736_v6 }
0x19c7   : > { %9908 = vmatprep.subr.mxu1 %v13492_v43 }
0x19ca   : > { %9909 = vmatpush3.xpose.msra.mxu1 %v6735_v49 }
0x19cb   : > { %9910 = vmatprep.subr.mxu1 %v13492_v43 }
0x19ce   : > { %9911 = vmatpush3.xpose.msra.mxu1 %v6734_v51 }
0x19cf   : > { %9912 = vmatprep.subr.mxu1 %v13492_v43  ;;  %v8602_v43 = vld [vmem:[%s13526_s7 + $0x78] sm:$0xff] }
0x19d2   : > { %9913 = vmatpush3.xpose.msra.mxu1 %v6733_v13 }
0x19d5   : > { %9915 = vmatmul.mubr.f32.vlgmr.msra.gmra.mxu1 %v4735_v10  ;;  %v7020_v10 = vpop.permute.xlu0 %7019 }
0x1a95   : > { %v6815_v4 = vpop.f32.mrf.mxu1 }
0x1a96   : > { %9917 = vmatprep.subr.mxu0 %v6815_v4 }
0x1a97   : > { %v9916_v1 = vpop.f32.mrf.mxu1  ;;  %9918 = vmatpush3.msra.mxu0 %v6815_v4  ;;  %v7044_v4 = vpop.permute.xlu0 %7043 }
0x1a98   : > { %9920 = vmatmul.mubr.msk.f32.vlgmr.msra.gmra.mxu0 %vm1196_vm2, %v8600_v7  ;;  %v7010_v7 = vpop.permute.xlu1 %7009 }
0x1a99   : > { %9922 = vmatprep.mubr.msk.f32.mxu0 %vm1196_vm2, %v8601_v11 }
0x1a9b   : > { %v7039_v1 = vpop.permute.xlu0 %7038 }
0x1a9c   : > { %9923 = vmatmul.mubr.msk.f32.gmra.mxu0 %vm1196_vm2, %v8602_v43  ;;  %v7005_v43 = vpop.permute.xlu1 %7004 }
0x1a9d   : > { %9933 = vmatprep.mubr.msk.f32.mxu0 %vm1002_vm0, %v8607_v14 }
0x1b58   : > { %v9921_v16 = vpop.f32.mrf.mxu0 }
0x1b59   : > { %v6922_v58 = vadd.f32 %v9921_v16, %v12954_v52 }
0x1b5a   : > { %v6902_v42 = vpop.f32.mrf.mxu0 }
0x1b5b   : > { %v6950_v5 = vadd.f32 %v6937_v20, %v6922_v58  ;;  %v6921_v32 = vadd.f32 %v6902_v42, %v12957_v31  ;;  %v13534_v31 = vld [vmem:[#allocation24_spill] sm:$0xff] }
0x1b5c   : > { %v9924_v63 = vpop.f32.mrf.mxu0 }
0x1b5d   : > { %v6954_v28 = vadd.f32 %v6950_v5, %v13532_v39  ;;  %v6949_v0 = vadd.f32 %v6932_v21, %v6921_v32  ;;  %v6924_v27 = vadd.f32 %v9924_v63, %v12960_v25 }
0x1b5e   : > { %v6912_v57 = vpop.f32.mrf.mxu0 }
0x1b5f   : > { %v6953_v22 = vadd.f32 %v6949_v0, %v13533_v54  ;;  %v6952_v59 = vadd.f32 %v6947_v35, %v6924_v27  ;;  %v6923_v37 = vadd.f32 %v6912_v57, %v12963_v23  ;;  %v6976_v47 = vmul.f32 %v6954_v28, %v6954_v28  ;;  %v7029_v0 = vpop.permute.xlu1 %7028  ;;  %v13536_v27 = vld [vmem:[#allocation19_spill] sm:$0xff] }
0x1b61   : > { %v6965_v52 = vadd.f32 %v6954_v28, %v6953_v22  ;;  %v6975_v36 = vmul.f32 %v6953_v22, %v6953_v22  ;;  %v6951_v53 = vadd.f32 %v6942_v33, %v6923_v37  ;;  %v6956_v34 = vadd.f32 %v6952_v59, %v13534_v31  ;;  %v8608_v33 = vld [vmem:[%s13531_s20 + $0x48] sm:$0xff]  ;;  %v7505_v31 = vld [vmem:[%s13537_s15 + $0x30] sm:$0xff] }
0x1b63   : > { %v6979_v50 = vadd.f32 %v6976_v47, %v6975_v36  ;;  %v6955_v18 = vadd.f32 %v6951_v53, %v13535_v38  ;;  %v6978_v25 = vmul.f32 %v6956_v34, %v6956_v34  ;;  %v8609_v47 = vld [vmem:[%s13531_s20 + $0x50] sm:$0xff]  ;;  %v8611_v36 = vld [vmem:[%s13531_s20 + $0x60] sm:$0xff]  ;;  %v7506_v53 = vld [vmem:[%s13537_s15 + $0x38] sm:$0xff] }
0x1b64   : > { %v7504_v38 = vld [vmem:[%s13537_s15 + $0x28] sm:$0xff] }
0x1b65   : > { %v6966_v56 = vadd.f32 %v6965_v52, %v6955_v18  ;;  %v6977_v24 = vmul.f32 %v6955_v18, %v6955_v18  ;;  %v8610_v52 = vld [vmem:[%s13531_s20 + $0x58] sm:$0xff] }
0x1b67   : > { %v6967_v19 = vadd.f32 %v6966_v56, %v6956_v34  ;;  %v6980_v41 = vadd.f32 %v6979_v50, %v6977_v24  ;;  %v8612_v50 = vld [vmem:[%s13531_s20 + $0x68] sm:$0xff]  ;;  %v7503_v56 = vld [vmem:[%s13537_s15 + $0x20] sm:$0xff] }
0x1b68   : > { %v7078_v24 = vld [vmem:[%s13531_s20] sm:$0xff] }
0x1b69   : > { %v6968_v48 = vrot.slane %v6967_v19, 4  ;;  %v6981_v61 = vadd.f32 %v6980_v41, %v6978_v25  ;;  %v7502_v25 = vld [vmem:[%s13537_s15 + $0x18] sm:$0xff]  ;;  %v7500_v41 = vld [vmem:[%s13537_s15 + $0x8] sm:$0xff] }
0x1b6b   : > { %v6969_v2 = vadd.f32 %v6968_v48, %v6967_v19  ;;  %v6982_v8 = vrot.slane %v6981_v61, 4  ;;  %v7501_v19 = vld [vmem:[%s13537_s15 + $0x10] sm:$0xff]  ;;  %v7499_v48 = vld [vmem:[%s13537_s15] sm:$0xff] }
0x1b6d   : > { %v6970_v23 = vrot.slane %v6969_v2, 2  ;;  %v6983_v29 = vadd.f32 %v6982_v8, %v6981_v61 }
0x1b6f   : > { %v6971_v40 = vadd.f32 %v6970_v23, %v6969_v2  ;;  %v6984_v62 = vrot.slane %v6983_v29, 2 }
0x1b71   : > { %v6972_v55 = vrot.slane %v6971_v40, 1  ;;  %v6985_v30 = vadd.f32 %v6984_v62, %v6983_v29  ;;  %v7080_v62 = vld [vmem:[%s13531_s20 + $0x10] sm:$0xff] }
0x1b73   : > { %v6973_v3 = vadd.f32 %v6972_v55, %v6971_v40  ;;  %v6986_v26 = vrot.slane %v6985_v30, 1  ;;  %v7079_v40 = vld [vmem:[%s13531_s20 + $0x8] sm:$0xff] }
0x1b75   : > { %v6974_v12 = vmul.f32 0.03125, %v6973_v3  ;;  %v6987_v60 = vadd.f32 %v6986_v26, %v6985_v30  ;;  %v7081_v3 = vld [vmem:[%s13531_s20 + $0x18] sm:$0xff]  ;;  %v7082_v26 = vld [vmem:[%s13531_s20 + $0x20] sm:$0xff] }
0x1b77   : > { %v6988_v46 = vmul.f32 0.03125, %v6987_v60  ;;  %v6989_v6 = vmul.f32 %v6974_v12, %v6974_v12  ;;  %v6994_v44 = vsub.f32 %v6955_v18, %v6974_v12  ;;  %v6995_v49 = vsub.f32 %v6956_v34, %v6974_v12  ;;  %v8613_v34 = vld [vmem:[%s13531_s20 + $0x70] sm:$0xff]  ;;  %v8614_v18 = vld [vmem:[%s13531_s20 + $0x78] sm:$0xff] }
0x1b78   : > { %v6992_v17 = vsub.f32 %v6953_v22, %v6974_v12  ;;  %v6993_v51 = vsub.f32 %v6954_v28, %v6974_v12  ;;  %v7034_v28 = vpop.permute.xlu0 %7033 }
0x1b79   : > { %v6990_v9 = vsub.f32 %v6988_v46, %v6989_v6  ;;  %v7083_v46 = vld [vmem:[%s13531_s20 + $0x28] sm:$0xff]  ;;  %v7084_v6 = vld [vmem:[%s13531_s20 + $0x30] sm:$0xff] }
0x1b7b   : > { %v6991_v45 = vmax.f32 %v6990_v9, 0.0  ;;  %v8638_v9 = vld [vmem:[%s13531_s20 + $0x98] sm:$0xff] }
0x1b7d   : > { %v6996_v13 = vadd.f32 1e-05, %v6991_v45  ;;  %v8639_v45 = vld [vmem:[%s13531_s20 + $0xa0] sm:$0xff] }
0x1b7f   : > { %10630 = vrsqrt.f32 %v6996_v13  ;;  %v8640_v13 = vld [vmem:[%s13531_s20 + $0xa8] sm:$0xff] }
0x1b8c   : > { %v10631_v11 = vpop.eup %10630 }
0x1b8d   : > { %v7000_v14 = vmul.f32 %v10631_v11, %v6994_v44  ;;  %v7001_v21 = vmul.f32 %v10631_v11, %v6995_v49  ;;  %v6998_v20 = vmul.f32 %v10631_v11, %v6992_v17  ;;  %v6999_v16 = vmul.f32 %v10631_v11, %v6993_v51  ;;  %v7085_v44 = vld [vmem:[%s13531_s20 + $0x38] sm:$0xff]  ;;  %v8635_v49 = vld [vmem:[%s13531_s20 + $0x80] sm:$0xff]  ;;  %v8636_v17 = vld [vmem:[%s13531_s20 + $0x88] sm:$0xff] }
0x1b8e   : > { %v8637_v51 = vld [vmem:[%s13531_s20 + $0x90] sm:$0xff] }
0x1b8f   : > { %v7025_v58 = vmul.f32 %v7020_v10, %v7001_v21  ;;  %v7024_v42 = vmul.f32 %v7015_v15, %v7000_v14  ;;  %v7023_v5 = vmul.f32 %v7010_v7, %v6999_v16  ;;  %v7022_v32 = vmul.f32 %v7005_v43, %v6998_v20  ;;  %v8641_v10 = vld [vmem:[%s13531_s20 + $0xb0] sm:$0xff]  ;;  %v8642_v15 = vld [vmem:[%s13531_s20 + $0xb8] sm:$0xff] }
0x1b91   : > { %v13124_v63 = vadd.f32 %v7044_v4, %v7025_v58  ;;  %v13126_v39 = vadd.f32 %v7039_v1, %v7024_v42  ;;  %v13132_v54 = vadd.f32 %v7034_v28, %v7023_v5  ;;  %v13134_v22 = vadd.f32 %v7029_v0, %v7022_v32 }
0x1b93   : > { %v7053_v35 = vmul.f32 %v13536_v27, %v13124_v63  ;;  %v7052_v57 = vmul.f32 %v13536_v27, %v13126_v39  ;;  %v7051_v59 = vmul.f32 %v13536_v27, %v13132_v54  ;;  %v7050_v37 = vmul.f32 %v13536_v27, %v13134_v22 }
0x1b95   : > { %7060 = vrot.lane.b32.xlu0 %v7053_v35, %s10696_s22  ;;  %9925 = vmatprep.subr.mxu0 %v7053_v35 }
0x1b96   : > { %7058 = vrot.lane.b32.xlu1 %v7052_v57, %s10696_s22  ;;  %9926 = vmatpush3.msra.mxu0 %v7053_v35 }
0x1b97   : > { %9927 = vmatprep.subr.mxu0 %v7052_v57 }
0x1b98   : > { %9928 = vmatpush3.msra.mxu0 %v7052_v57 }
0x1b99   : > { %7056 = vrot.lane.b32.xlu0 %v7051_v59, %s10696_s22  ;;  %9929 = vmatprep.subr.mxu0 %v7051_v59 }
0x1b9a   : > { %7054 = vrot.lane.b32.xlu1 %v7050_v37, %s10696_s22  ;;  %9930 = vmatpush3.msra.mxu0 %v7051_v59 }
0x1b9b   : > { %9931 = vmatprep.subr.mxu0 %v7050_v37 }
0x1b9c   : > { %9932 = vmatpush3.msra.mxu0 %v7050_v37 }
0x1b9d   : > { %7072 = vrot.lane.b32.xlu0 %v7053_v35, %s10697_s26  ;;  %9934 = vmatmul.mubr.msk.f32.vlgmr.msra.gmra.mxu0 %vm1002_vm0, %v8608_v33 }
0x1b9e   : > { %7070 = vrot.lane.b32.xlu1 %v7052_v57, %s10697_s26  ;;  %9936 = vmatprep.mubr.msk.f32.mxu0 %vm1002_vm0, %v8609_v47 }
0x1ba1   : > { %7068 = vrot.lane.b32.xlu0 %v7051_v59, %s10697_s26  ;;  %9937 = vmatmul.mubr.msk.f32.gmra.mxu0 %vm1002_vm0, %v8610_v52 }
0x1ba2   : > { %7066 = vrot.lane.b32.xlu1 %v7050_v37, %s10697_s26  ;;  %9939 = vmatprep.mubr.msk.f32.mxu0 %vm1002_vm0, %v8611_v36 }
0x1ba5   : > { %7544 = vperm.xlu0 %10112, %v7506_v53   ;;  %9940 = vmatmul.mubr.msk.f32.gmra.mxu0 %vm1002_vm0, %v8612_v50 }
0x1ba6   : > { %7539 = vperm.xlu1 %10113, %v7505_v31   ;;  %9942 = vmatprep.mubr.msk.f32.mxu0 %vm1002_vm0, %v8613_v34 }
0x1ba9   : > { %7534 = vperm.xlu0 %10112, %v7504_v38   ;;  %9943 = vmatmul.mubr.msk.f32.gmra.mxu0 %vm1002_vm0, %v8614_v18 }
0x1baa   : > { %7529 = vperm.xlu1 %10113, %v7503_v56   ;;  %9953 = vmatprep.mubr.msk.f32.mxu0 %vm1002_vm0, %v7078_v24 }
0x1bad   : > { %7524 = vperm.xlu0 %10112, %v7502_v25  }
0x1bae   : > { %7519 = vperm.xlu1 %10113, %v7501_v19  }
0x1bb1   : > { %7514 = vperm.xlu0 %10112, %v7500_v41  }
0x1bb2   : > { %7509 = vperm.xlu1 %10113, %v7499_v48  }
0x1c07   : > { %v7061_v61 = vpop.permute.xlu0 %7060 }
0x1c08   : > { %v7059_v2 = vpop.permute.xlu1 %7058  ;;  %9945 = vmatprep.subr.msk.mxu0 %vm3483_vm4, %v7061_v61 }
0x1c09   : > { %9946 = vmatpush3.msk.msra.mxu0 %vm3483_vm4, %v7061_v61 }
0x1c0a   : > { %9947 = vmatprep.subr.msk.mxu0 %vm3483_vm4, %v7059_v2 }
0x1c0b   : > { %9948 = vmatpush3.msk.msra.mxu0 %vm3483_vm4, %v7059_v2  ;;  %v7057_v23 = vpop.permute.xlu0 %7056 }
0x1c0c   : > { %v7055_v29 = vpop.permute.xlu1 %7054  ;;  %9949 = vmatprep.subr.msk.mxu0 %vm3483_vm4, %v7057_v23 }
0x1c0d   : > { %9950 = vmatpush3.msk.msra.mxu0 %vm3483_vm4, %v7057_v23 }
0x1c0e   : > { %9951 = vmatprep.subr.msk.mxu0 %vm3483_vm4, %v7055_v29 }
0x1c0f   : > { %9952 = vmatpush3.msk.msra.mxu0 %vm3483_vm4, %v7055_v29  ;;  %v7073_v55 = vpop.permute.xlu0 %7072 }
0x1c10   : > { %v7071_v30 = vpop.permute.xlu1 %7070  ;;  %9954 = vmatmul.mubr.msk.f32.vlgmr.msra.gmra.mxu0 %vm1002_vm0, %v7079_v40  ;;  %9965 = vmatprep.subr.msk.mxu0 %vm3498_vm5, %v7073_v55 }
0x1c11   : > { %9966 = vmatpush3.msk.msra.mxu0 %vm3498_vm5, %v7073_v55  ;;  %9956 = vmatprep.mubr.msk.f32.mxu0 %vm1002_vm0, %v7080_v62 }
0x1c12   : > { %9967 = vmatprep.subr.msk.mxu0 %vm3498_vm5, %v7071_v30 }
0x1c13   : > { %9968 = vmatpush3.msk.msra.mxu0 %vm3498_vm5, %v7071_v30  ;;  %v7069_v12 = vpop.permute.xlu0 %7068 }
0x1c14   : > { %9957 = vmatmul.mubr.msk.f32.gmra.mxu0 %vm1002_vm0, %v7081_v3  ;;  %9969 = vmatprep.subr.msk.mxu0 %vm3498_vm5, %v7069_v12  ;;  %v7067_v60 = vpop.permute.xlu1 %7066 }
0x1c15   : > { %9970 = vmatpush3.msk.msra.mxu0 %vm3498_vm5, %v7069_v12  ;;  %9959 = vmatprep.mubr.msk.f32.mxu0 %vm1002_vm0, %v7082_v26 }
0x1c16   : > { %9971 = vmatprep.subr.msk.mxu0 %vm3498_vm5, %v7067_v60 }
0x1c17   : > { %9972 = vmatpush3.msk.msra.mxu0 %vm3498_vm5, %v7067_v60 }
0x1c18   : > { %9960 = vmatmul.mubr.msk.f32.gmra.mxu0 %vm1002_vm0, %v7083_v46 }
0x1c19   : > { %9962 = vmatprep.mubr.msk.f32.mxu0 %vm1002_vm0, %v7084_v6 }
0x1c1c   : > { %9963 = vmatmul.mubr.msk.f32.gmra.mxu0 %vm1002_vm0, %v7085_v44 }
0x1c1d   : > { %9973 = vmatprep.mubr.msk.f32.mxu0 %vm1002_vm0, %v8635_v49  ;;  %v8655_v49 = vld [vmem:[%s13539_s18 + $0x20] sm:$0xff] }
0x1c1e   : > { %10001 = vmatprep.mubr.msk.f32.mxu1 %vm4063_vm6, %v8655_v49  ;;  %v7621_v49 = vld [vmem:[%s13539_s18 + $0x10] sm:$0xff] }
0x1c20   : > { %9974 = vmatmul.mubr.msk.f32.vlgmr.msra.gmra.mxu0 %vm1002_vm0, %v8636_v17  ;;  %v7545_v28 = vpop.permute.xlu0 %7544 }
0x1c21   : > { %9976 = vmatprep.mubr.msk.f32.mxu0 %vm1002_vm0, %v8637_v51  ;;  %v7540_v36 = vpop.permute.xlu1 %7539 }
0x1c24   : > { %9977 = vmatmul.mubr.msk.f32.gmra.mxu0 %vm1002_vm0, %v8638_v9  ;;  %v7535_v59 = vpop.permute.xlu0 %7534 }
0x1c25   : > { %9979 = vmatprep.mubr.msk.f32.mxu0 %vm1002_vm0, %v8639_v45  ;;  %v7530_v23 = vpop.permute.xlu1 %7529 }
0x1c28   : > { %9980 = vmatmul.mubr.msk.f32.gmra.mxu0 %vm1002_vm0, %v8640_v13  ;;  %v7525_v50 = vpop.permute.xlu0 %7524 }
0x1c29   : > { %9982 = vmatprep.mubr.msk.f32.mxu0 %vm1002_vm0, %v8641_v10  ;;  %v7520_v45 = vpop.permute.xlu1 %7519 }
0x1c2c   : > { %9983 = vmatmul.mubr.msk.f32.gmra.mxu0 %vm1002_vm0, %v8642_v15 }
0x1c5d   : > { %v9935_v4 = vpop.f32.mrf.mxu0 }
0x1c5f   : > { %v7185_v7 = vpop.f32.mrf.mxu0 }
0x1c61   : > { %v9938_v11 = vpop.f32.mrf.mxu0 }
0x1c63   : > { %v7195_v1 = vpop.f32.mrf.mxu0 }
0x1c65   : > { %v9941_v43 = vpop.f32.mrf.mxu0 }
0x1c67   : > { %v7205_v14 = vpop.f32.mrf.mxu0 }
0x1c69   : > { %v9944_v21 = vpop.f32.mrf.mxu0 }
0x1c6b   : > { %v7215_v20 = vpop.f32.mrf.mxu0 }
0x1cd0   : > { %v9955_v16 = vpop.f32.mrf.mxu0 }
0x1cd1   : > { %v7320_v17 = vadd.f32 %v9955_v16, %v9935_v4 }
0x1cd2   : > { %v7314_v58 = vpop.f32.mrf.mxu0 }
0x1cd3   : > { %v7315_v13 = vadd.f32 %v7314_v58, %v7185_v7 }
0x1cd4   : > { %v9958_v42 = vpop.f32.mrf.mxu0 }
0x1cd5   : > { %v7330_v47 = vadd.f32 %v9958_v42, %v9938_v11  ;;  %v7619_v42 = vld [vmem:[%s13539_s18] sm:$0xff] }
0x1cd6   : > { %v7324_v5 = vpop.f32.mrf.mxu0  ;;  %10023 = vmatprep.mubr.msk.f32.mxu0 %vm4063_vm6, %v7619_v42 }
0x1cd7   : > { %v7325_v3 = vadd.f32 %v7324_v5, %v7195_v1 }
0x1cd8   : > { %v9961_v32 = vpop.f32.mrf.mxu0 }
0x1cd9   : > { %v7340_v34 = vadd.f32 %v9961_v32, %v9941_v43 }
0x1cda   : > { %v7334_v0 = vpop.f32.mrf.mxu0 }
0x1cdb   : > { %v7335_v56 = vadd.f32 %v7334_v0, %v7205_v14 }
0x1cdc   : > { %v9964_v35 = vpop.f32.mrf.mxu0 }
0x1cdd   : > { %v7350_v41 = vadd.f32 %v9964_v35, %v9944_v21  ;;  %v7515_v21 = vpop.permute.xlu0 %7514 }
0x1cde   : > { %v7344_v57 = vpop.f32.mrf.mxu0 }
0x1cdf   : > { %v7345_v40 = vadd.f32 %v7344_v57, %v7215_v20  ;;  %v7510_v20 = vpop.permute.xlu1 %7509  ;;  %v8656_v57 = vld [vmem:[%s13539_s18 + $0x28] sm:$0xff] }
0x1ce0   : > { %v9975_v37 = vpop.f32.mrf.mxu0 }
0x1ce1   : > { %v7492_v10 = vadd.f32 %v9975_v37, %v7320_v17  ;;  %v8658_v37 = vld [vmem:[%s13539_s18 + $0x38] sm:$0xff] }
0x1ce2   : > { %v7452_v33 = vpop.f32.mrf.mxu0 }
0x1ce3   : > { %v7491_v14 = vadd.f32 %v7452_v33, %v7315_v13  ;;  %v7548_v7 = vadd.f32 %v7515_v21, %v7492_v10  ;;  %v8675_v33 = vld [vmem:[%s13539_s18 + $0x40] sm:$0xff]  ;;  %v8676_v13 = vld [vmem:[%s13539_s18 + $0x48] sm:$0xff]  ;;  %v8677_v10 = vld [vmem:[%s13539_s18 + $0x50] sm:$0xff] }
0x1ce4   : > { %v9978_v52 = vpop.f32.mrf.mxu0 }
0x1ce5   : > { %v7494_v53 = vadd.f32 %v9978_v52, %v7330_v47  ;;  %v7547_v58 = vadd.f32 %v7510_v20, %v7491_v14  ;;  %v7556_v5 = vmax.f32 %v7548_v7, 0.0  ;;  %v7929_v47 = vld [vmem:[%s13540_s1 + $0x8] sm:$0xff]  ;;  %v7928_v52 = vld [vmem:[%s13540_s1] sm:$0xff] }
0x1ce6   : > { %v7462_v31 = vpop.f32.mrf.mxu0 }
0x1ce7   : > { %v7550_v38 = vadd.f32 %v7525_v50, %v7494_v53  ;;  %v7493_v44 = vadd.f32 %v7462_v31, %v7325_v3  ;;  %v7564_v0 = vmul.f32 %v13536_v27, %v7556_v5  ;;  %v7930_v53 = vld [vmem:[%s13540_s1 + $0x10] sm:$0xff]  ;;  %v7967_v31 = vld [vmem:[%s13541_s2 + $0x18] sm:$0xff] }
0x1ce8   : > { %v9981_v18 = vpop.f32.mrf.mxu0  ;;  %v7966_v50 = vld [vmem:[%s13541_s2 + $0x10] sm:$0xff] }
0x1ce9   : > { %v7558_v24 = vmax.f32 %v7550_v38, 0.0  ;;  %v7496_v25 = vadd.f32 %v9981_v18, %v7340_v34  ;;  %v7549_v43 = vadd.f32 %v7520_v45, %v7493_v44  ;;  %v7965_v34 = vld [vmem:[%s13541_s2 + $0x8] sm:$0xff]  ;;  %v7971_v38 = vld [vmem:[%s10836_s16 + $0x18] sm:$0xff]  ;;  %v7964_v18 = vld [vmem:[%s13541_s2] sm:$0xff] }
0x1cea   : > { %v7472_v19 = vpop.f32.mrf.mxu0  ;;  %v7620_v44 = vld [vmem:[%s13539_s18 + $0x8] sm:$0xff] }
0x1ceb   : > { %v13235_v48 = vmul.f32 %v13536_v27, %v7558_v24  ;;  %v7552_v61 = vadd.f32 %v7535_v59, %v7496_v25  ;;  %v7495_v2 = vadd.f32 %v7472_v19, %v7335_v56  ;;  %v7557_v16 = vmax.f32 %v7549_v43, 0.0  ;;  %v8657_v59 = vld [vmem:[%s13539_s18 + $0x30] sm:$0xff]  ;;  %v7968_v24 = vld [vmem:[%s10836_s16] sm:$0xff]  ;;  %v7969_v25 = vld [vmem:[%s10836_s16 + $0x8] sm:$0xff] }
0x1cec   : > { %v9984_v29 = vpop.f32.mrf.mxu0  ;;  %v7970_v56 = vld [vmem:[%s10836_s16 + $0x10] sm:$0xff]  ;;  %v8068_v19 = vld [vmem:[%s10847_s28 + $0x18] sm:$0xff] }
0x1ced   : > { %v7560_v62 = vmax.f32 %v7552_v61, 0.0  ;;  %v7551_v55 = vadd.f32 %v7530_v23, %v7495_v2  ;;  %v7498_v30 = vadd.f32 %v9984_v29, %v7350_v41  ;;  %7577 = vrot.lane.b32.xlu1 %v13235_v48, %s10696_s22  ;;  %v7565_v32 = vmul.f32 %v13536_v27, %v7557_v16  ;;  %v8067_v41 = vld [vmem:[%s10847_s28 + $0x10] sm:$0xff]  ;;  %v8065_v61 = vld [vmem:[%s10847_s28] sm:$0xff] }
0x1cee   : > { %v7482_v26 = vpop.f32.mrf.mxu0 }
0x1cef   : > { %v7568_v12 = vmul.f32 %v13536_v27, %v7560_v62  ;;  %v7559_v60 = vmax.f32 %v7551_v55, 0.0  ;;  %v7554_v46 = vadd.f32 %v7545_v28, %v7498_v30  ;;  %v7497_v6 = vadd.f32 %v7482_v26, %v7345_v40 }
0x1cf0   : > { %v7555_v28 = vmax.f32 %v7547_v58, 0.0 }
0x1cf1   : > { %v7562_v51 = vmax.f32 %v7554_v46, 0.0  ;;  %v7553_v9 = vadd.f32 %v7540_v36, %v7497_v6  ;;  %7605 = vrot.lane.b32.xlu0 %v7568_v12, %s10697_s26  ;;  %7581 = vrot.lane.b32.xlu1 %v7568_v12, %s10696_s22  ;;  %v7567_v15 = vmul.f32 %v13536_v27, %v7559_v60  ;;  %v7931_v36 = vld [vmem:[%s13540_s1 + $0x18] sm:$0xff]  ;;  %s13542_s1 = sld [smem:[#allocation5_spill]] }
0x1cf2   : > { %v7563_v35 = vmul.f32 %v13536_v27, %v7555_v28 }
0x1cf3   : > { %v7570_v11 = vmul.f32 %v13536_v27, %v7562_v51  ;;  %v7561_v1 = vmax.f32 %v7553_v9, 0.0  ;;  %v7622_v51 = vld [vmem:[%s13539_s18 + $0x18] sm:$0xff] }
0x1cf5   : > { %v7569_v4 = vmul.f32 %v13536_v27, %v7561_v1  ;;  %9985 = vmatprep.subr.mxu1 %v7570_v11  ;;  %7603 = vrot.lane.b32.xlu0 %v7567_v15, %s10697_s26 }
0x1cf6   : > { %7579 = vrot.lane.b32.xlu1 %v7567_v15, %s10696_s22  ;;  %9986 = vmatpush3.msra.mxu1 %v7570_v11 }
0x1cf7   : > { %9987 = vmatprep.subr.mxu1 %v7569_v4 }
0x1cf8   : > { %9988 = vmatpush3.msra.mxu1 %v7569_v4 }
0x1cf9   : > { %7585 = vrot.lane.b32.xlu0 %v7570_v11, %s10696_s22  ;;  %9989 = vmatprep.subr.mxu1 %v7568_v12 }
0x1cfa   : > { %7583 = vrot.lane.b32.xlu1 %v7569_v4, %s10696_s22  ;;  %9990 = vmatpush3.msra.mxu1 %v7568_v12 }
0x1cfb   : > { %9991 = vmatprep.subr.mxu1 %v7567_v15 }
0x1cfc   : > { %9992 = vmatpush3.msra.mxu1 %v7567_v15  ;;  %v8678_v15 = vld [vmem:[%s13539_s18 + $0x58] sm:$0xff] }
0x1cfd   : > { %7609 = vrot.lane.b32.xlu0 %v7570_v11, %s10697_s26  ;;  %9993 = vmatprep.subr.mxu1 %v13235_v48  ;;  %v8061_v11 = vld [vmem:[%s10841_s23] sm:$0xff] }
0x1cfe   : > { %7575 = vrot.lane.b32.xlu1 %v7565_v32, %s10696_s22  ;;  %9994 = vmatpush3.msra.mxu1 %v13235_v48 }
0x1cff   : > { %9995 = vmatprep.subr.mxu1 %v7565_v32 }
0x1d00   : > { %9996 = vmatpush3.msra.mxu1 %v7565_v32 }
0x1d01   : > { %7607 = vrot.lane.b32.xlu0 %v7569_v4, %s10697_s26  ;;  %9997 = vmatprep.subr.mxu1 %v7564_v0 }
0x1d02   : > { %7573 = vrot.lane.b32.xlu1 %v7564_v0, %s10696_s22  ;;  %9998 = vmatpush3.msra.mxu1 %v7564_v0 }
0x1d03   : > { %9999 = vmatprep.subr.mxu1 %v7563_v35 }
0x1d04   : > { %10000 = vmatpush3.msra.mxu1 %v7563_v35 }
0x1d05   : > { %7601 = vrot.lane.b32.xlu0 %v13235_v48, %s10697_s26  ;;  %10002 = vmatmul.mubr.msk.f32.vlgmr.msra.gmra.mxu1 %vm4063_vm6, %v8656_v57  ;;  %v8066_v48 = vld [vmem:[%s10847_s28 + $0x8] sm:$0xff] }
0x1d06   : > { %7571 = vrot.lane.b32.xlu1 %v7563_v35, %s10696_s22  ;;  %10004 = vmatprep.mubr.msk.f32.mxu1 %vm4063_vm6, %v8657_v59  ;;  %s10065_s22 = smul.u32 48, %s13544_s0 }
0x1d09   : > { %7599 = vrot.lane.b32.xlu0 %v7565_v32, %s10697_s26  ;;  %10005 = vmatmul.mubr.msk.f32.gmra.mxu1 %vm4063_vm6, %v8658_v37 }
0x1d0a   : > { %7595 = vrot.lane.b32.xlu1 %v7563_v35, %s10697_s26  ;;  %10045 = vmatprep.mubr.msk.f32.mxu1 %vm4063_vm6, %v8675_v33 }
0x1d0d   : > { %7597 = vrot.lane.b32.xlu0 %v7564_v0, %s10697_s26  ;;  %s13390_s26 = scalar_lea.vmem %s10852_s13, %s10065_s22  ;;  %s8698_s22 = sshll.u32 %s13544_s0, 4 }
0x1d0e   : > { %7939 = vperm.xlu1 %10113, %v7929_v47   ;;  %s897_s2 = scalar_lea.vmem %s13542_s1, %s8698_s22 }
0x1d11   : > { %7934 = vperm.xlu0 %10112, %v7928_v52  }
0x1d12   : > { %7949 = vperm.xlu1 %10113, %v7931_v36  }
0x1d15   : > { %7944 = vperm.xlu0 %10112, %v7930_v53  }
0x1d16   : > { %8021 = vperm.xlu1 %10113, %v7966_v50  }
0x1d19   : > { %8026 = vperm.xlu0 %10112, %v7967_v31  }
0x1d1a   : > { %8016 = vperm.xlu1 %10113, %v7965_v34  }
0x1d1d   : > { %8050 = vperm.xlu0 %10112, %v7971_v38  }
0x1d1e   : > { %8011 = vperm.xlu1 %10113, %v7964_v18  }
0x1d21   : > { %8045 = vperm.xlu0 %10112, %v7970_v56  }
0x1d22   : > { %8035 = vperm.xlu1 %10113, %v7968_v24  }
0x1d25   : > { %8040 = vperm.xlu0 %10112, %v7969_v25  }
0x1d26   : > { %8086 = vperm.xlu1 %10113, %v8068_v19  }
0x1d29   : > { %8081 = vperm.xlu0 %10112, %v8067_v41  }
0x1d2a   : > { %8076 = vperm.xlu1 %10113, %v8066_v48  }
0x1d2d   : > { %8071 = vperm.xlu0 %10112, %v8065_v61  }
0x1d5f   : > { %v7578_v2 = vpop.permute.xlu1 %7577 }
0x1d63   : > { %v7582_v23 = vpop.permute.xlu1 %7581  ;;  %v7606_v29 = vpop.permute.xlu0 %7605 }
0x1d67   : > { %v7604_v40 = vpop.permute.xlu0 %7603 }
0x1d68   : > { %v7580_v62 = vpop.permute.xlu1 %7579 }
0x1d6b   : > { %v7586_v55 = vpop.permute.xlu0 %7585 }
0x1d6c   : > { %v7584_v30 = vpop.permute.xlu1 %7583  ;;  %10007 = vmatprep.subr.msk.mxu0 %vm3483_vm4, %v7586_v55 }
0x1d6d   : > { %10008 = vmatpush3.msk.msra.mxu0 %vm3483_vm4, %v7586_v55 }
0x1d6e   : > { %10009 = vmatprep.subr.msk.mxu0 %vm3483_vm4, %v7584_v30 }
0x1d6f   : > { %10010 = vmatpush3.msk.msra.mxu0 %vm3483_vm4, %v7584_v30  ;;  %v7610_v3 = vpop.permute.xlu0 %7609 }
0x1d70   : > { %v7576_v26 = vpop.permute.xlu1 %7575  ;;  %10011 = vmatprep.subr.msk.mxu0 %vm3483_vm4, %v7582_v23  ;;  %10029 = vmatprep.subr.msk.mxu1 %vm3498_vm5, %v7610_v3 }
0x1d71   : > { %10012 = vmatpush3.msk.msra.mxu0 %vm3483_vm4, %v7582_v23  ;;  %10030 = vmatpush3.msk.msra.mxu1 %vm3498_vm5, %v7610_v3 }
0x1d72   : > { %10013 = vmatprep.subr.msk.mxu0 %vm3483_vm4, %v7580_v62 }
0x1d73   : > { %10014 = vmatpush3.msk.msra.mxu0 %vm3483_vm4, %v7580_v62  ;;  %v7608_v12 = vpop.permute.xlu0 %7607 }
0x1d74   : > { %v7574_v60 = vpop.permute.xlu1 %7573  ;;  %10015 = vmatprep.subr.msk.mxu0 %vm3483_vm4, %v7578_v2  ;;  %10031 = vmatprep.subr.msk.mxu1 %vm3498_vm5, %v7608_v12 }
0x1d75   : > { %10016 = vmatpush3.msk.msra.mxu0 %vm3483_vm4, %v7578_v2  ;;  %10032 = vmatpush3.msk.msra.mxu1 %vm3498_vm5, %v7608_v12 }
0x1d76   : > { %10017 = vmatprep.subr.msk.mxu0 %vm3483_vm4, %v7576_v26  ;;  %10033 = vmatprep.subr.msk.mxu1 %vm3498_vm5, %v7606_v29 }
0x1d77   : > { %10018 = vmatpush3.msk.msra.mxu0 %vm3483_vm4, %v7576_v26  ;;  %10034 = vmatpush3.msk.msra.mxu1 %vm3498_vm5, %v7606_v29  ;;  %v7602_v46 = vpop.permute.xlu0 %7601 }
0x1d78   : > { %10019 = vmatprep.subr.msk.mxu0 %vm3483_vm4, %v7574_v60  ;;  %10035 = vmatprep.subr.msk.mxu1 %vm3498_vm5, %v7604_v40  ;;  %v7572_v6 = vpop.permute.xlu1 %7571 }
0x1d79   : > { %10020 = vmatpush3.msk.msra.mxu0 %vm3483_vm4, %v7574_v60  ;;  %10036 = vmatpush3.msk.msra.mxu1 %vm3498_vm5, %v7604_v40 }
0x1d7a   : > { %10021 = vmatprep.subr.msk.mxu0 %vm3483_vm4, %v7572_v6  ;;  %10037 = vmatprep.subr.msk.mxu1 %vm3498_vm5, %v7602_v46 }
0x1d7b   : > { %10022 = vmatpush3.msk.msra.mxu0 %vm3483_vm4, %v7572_v6  ;;  %10038 = vmatpush3.msk.msra.mxu1 %vm3498_vm5, %v7602_v46  ;;  %v7600_v17 = vpop.permute.xlu0 %7599 }
0x1d7c   : > { %10024 = vmatmul.mubr.msk.f32.vlgmr.msra.gmra.mxu0 %vm4063_vm6, %v7620_v44  ;;  %10039 = vmatprep.subr.msk.mxu1 %vm3498_vm5, %v7600_v17  ;;  %v7596_v45 = vpop.permute.xlu1 %7595 }
0x1d7d   : > { %10040 = vmatpush3.msk.msra.mxu1 %vm3498_vm5, %v7600_v17  ;;  %10026 = vmatprep.mubr.msk.f32.mxu0 %vm4063_vm6, %v7621_v49 }
0x1d7f   : > { %v7598_v9 = vpop.permute.xlu0 %7597 }
0x1d80   : > { %10041 = vmatprep.subr.msk.mxu1 %vm3498_vm5, %v7598_v9  ;;  %10027 = vmatmul.mubr.msk.f32.gmra.mxu0 %vm4063_vm6, %v7622_v51 }
0x1d81   : > { %10042 = vmatpush3.msk.msra.mxu1 %vm3498_vm5, %v7598_v9  ;;  %10059 = vmatprep.mubr.msk.f32.mxu0 %vm1002_vm0, %v8061_v11 }
0x1d82   : > { %10043 = vmatprep.subr.msk.mxu1 %vm3498_vm5, %v7596_v45 }
0x1d83   : > { %10044 = vmatpush3.msk.msra.mxu1 %vm3498_vm5, %v7596_v45 }
0x1d84   : > { %10046 = vmatmul.mubr.msk.f32.vlgmr.msra.gmra.mxu1 %vm4063_vm6, %v8676_v13 }
0x1d85   : > { %10048 = vmatprep.mubr.msk.f32.mxu1 %vm4063_vm6, %v8677_v10 }
0x1d88   : > { %10049 = vmatmul.mubr.msk.f32.gmra.mxu1 %vm4063_vm6, %v8678_v15 }
0x1d89   : > { %v7940_v8 = vpop.permute.xlu1 %7939 }
0x1d8c   : > { %v7935_v42 = vpop.permute.xlu0 %7934 }
0x1d8d   : > { %v7950_v53 = vpop.permute.xlu1 %7949 }
0x1d90   : > { %v7945_v18 = vpop.permute.xlu0 %7944 }
0x1dc5   : > { %v10003_v1 = vpop.f32.mrf.mxu1 }
0x1dc7   : > { %v7706_v14 = vpop.f32.mrf.mxu1 }
0x1dc9   : > { %v10006_v21 = vpop.f32.mrf.mxu1 }
0x1dcb   : > { %v7716_v7 = vpop.f32.mrf.mxu1 }
0x1e3c   : > { %v10025_v43 = vpop.f32.mrf.mxu0 }
0x1e3d   : > { %v7809_v16 = vadd.f32 %v10025_v43, %v10003_v1  ;;  %v8027_v43 = vpop.permute.xlu0 %8026 }
0x1e3e   : > { %v7803_v4 = vpop.f32.mrf.mxu0 }
0x1e3f   : > { %v7804_v5 = vadd.f32 %v7803_v4, %v7706_v14  ;;  %v8022_v14 = vpop.permute.xlu1 %8021 }
0x1e40   : > { %v10028_v20 = vpop.f32.mrf.mxu0 }
0x1e41   : > { %v7819_v57 = vadd.f32 %v10028_v20, %v10006_v21  ;;  %v8051_v4 = vpop.permute.xlu0 %8050 }
0x1e42   : > { %v7813_v0 = vpop.f32.mrf.mxu0 }
0x1e43   : > { %v7814_v52 = vadd.f32 %v7813_v0, %v7716_v7  ;;  %v8017_v21 = vpop.permute.xlu1 %8016 }
0x1e44   : > { %v10047_v58 = vpop.f32.mrf.mxu1 }
0x1e45   : > { %v7925_v32 = vadd.f32 %v10047_v58, %v7809_v16 }
0x1e46   : > { %v7905_v28 = vpop.f32.mrf.mxu1 }
0x1e47   : > { %v7953_v35 = vadd.f32 %v7940_v8, %v7925_v32  ;;  %v7924_v59 = vadd.f32 %v7905_v28, %v7804_v5 }
0x1e48   : > { %v10050_v37 = vpop.f32.mrf.mxu1 }
0x1e49   : > { %v7957_v33 = vmul.f32 %v13536_v27, %v7953_v35  ;;  %v7952_v47 = vadd.f32 %v7935_v42, %v7924_v59  ;;  %v7927_v36 = vadd.f32 %v10050_v37, %v7819_v57  ;;  %v8046_v42 = vpop.permute.xlu0 %8045  ;;  %v8012_v35 = vpop.permute.xlu1 %8011 }
0x1e4a   : > { %v7915_v50 = vpop.f32.mrf.mxu1 }
0x1e4b   : > { %v7956_v31 = vmul.f32 %v13536_v27, %v7952_v47  ;;  %v7955_v34 = vadd.f32 %v7950_v53, %v7927_v36  ;;  %v7926_v38 = vadd.f32 %v7915_v50, %v7814_v52  ;;  %v7961_v56 = vadd.f32 %v7957_v33, %v13132_v54 }
0x1e4d   : > { %v7960_v24 = vadd.f32 %v7956_v31, %v13134_v22  ;;  %v7959_v25 = vmul.f32 %v13536_v27, %v7955_v34  ;;  %v7954_v19 = vadd.f32 %v7945_v18, %v7926_v38  ;;  %v7983_v61 = vmul.f32 %v7961_v56, %v7961_v56  ;;  %v8041_v36 = vpop.permute.xlu0 %8040  ;;  %v8036_v31 = vpop.permute.xlu1 %8035 }
0x1e4f   : > { %v7982_v41 = vmul.f32 %v7960_v24, %v7960_v24  ;;  %v7958_v48 = vmul.f32 %v13536_v27, %v7954_v19  ;;  %v7972_v2 = vadd.f32 %v7961_v56, %v7960_v24  ;;  %v7963_v23 = vadd.f32 %v7959_v25, %v13124_v63  ;;  %v8063_v25 = vld [vmem:[%s10841_s23 + $0x10] sm:$0xff]  ;;  %v8064_v19 = vld [vmem:[%s10841_s23 + $0x18] sm:$0xff] }
0x1e51   : > { %v7962_v29 = vadd.f32 %v7958_v48, %v13126_v39  ;;  %v7986_v40 = vadd.f32 %v7983_v61, %v7982_v41  ;;  %v7985_v30 = vmul.f32 %v7963_v23, %v7963_v23  ;;  %v8087_v41 = vpop.permute.xlu1 %8086  ;;  %v8082_v48 = vpop.permute.xlu0 %8081 }
0x1e53   : > { %v7973_v62 = vadd.f32 %v7972_v2, %v7962_v29  ;;  %v7984_v55 = vmul.f32 %v7962_v29, %v7962_v29 }
0x1e55   : > { %v7974_v3 = vadd.f32 %v7973_v62, %v7963_v23  ;;  %v7987_v54 = vadd.f32 %v7986_v40, %v7984_v55  ;;  %v8077_v61 = vpop.permute.xlu1 %8076 }
0x1e57   : > { %v7975_v26 = vrot.slane %v7974_v3, 4  ;;  %v7988_v22 = vadd.f32 %v7987_v54, %v7985_v30 }
0x1e59   : > { %v7976_v12 = vadd.f32 %v7975_v26, %v7974_v3  ;;  %v7989_v60 = vrot.slane %v7988_v22, 4 }
0x1e5b   : > { %v7977_v46 = vrot.slane %v7976_v12, 2  ;;  %v7990_v6 = vadd.f32 %v7989_v60, %v7988_v22 }
0x1e5d   : > { %v7978_v44 = vadd.f32 %v7977_v46, %v7976_v12  ;;  %v7991_v49 = vrot.slane %v7990_v6, 2 }
0x1e5f   : > { %v7979_v17 = vrot.slane %v7978_v44, 1  ;;  %v7992_v51 = vadd.f32 %v7991_v49, %v7990_v6 }
0x1e61   : > { %v7980_v9 = vadd.f32 %v7979_v17, %v7978_v44  ;;  %v7993_v63 = vrot.slane %v7992_v51, 1  ;;  %v8191_v44 = vld [vmem:[%s897_s2 + $0x8] sm:$0xff]  ;;  %v8190_v17 = vld [vmem:[%s897_s2] sm:$0xff] }
0x1e63   : > { %v7981_v45 = vmul.f32 0.03125, %v7980_v9  ;;  %v7994_v39 = vadd.f32 %v7993_v63, %v7992_v51 }
0x1e65   : > { %v7995_v13 = vmul.f32 0.03125, %v7994_v39  ;;  %v7996_v10 = vmul.f32 %v7981_v45, %v7981_v45  ;;  %v8001_v7 = vsub.f32 %v7962_v29, %v7981_v45  ;;  %v8002_v20 = vsub.f32 %v7963_v23, %v7981_v45  ;;  %v8072_v29 = vpop.permute.xlu0 %8071 }
0x1e66   : > { %v8000_v16 = vsub.f32 %v7961_v56, %v7981_v45  ;;  %v7999_v8 = vsub.f32 %v7960_v24, %v7981_v45  ;;  %v8062_v24 = vld [vmem:[%s10841_s23 + $0x8] sm:$0xff] }
0x1e67   : > { %v7997_v15 = vsub.f32 %v7995_v13, %v7996_v10 }
0x1e69   : > { %v7998_v11 = vmax.f32 %v7997_v15, 0.0 }
0x1e6b   : > { %v8003_v1 = vadd.f32 1e-05, %v7998_v11 }
0x1e6d   : > { %10632 = vrsqrt.f32 %v8003_v1 }
0x1e7a   : > { %v10633_v58 = vpop.eup %10632 }
0x1e7b   : > { %v8008_v5 = vmul.f32 %v10633_v58, %v8002_v20  ;;  %v8007_v32 = vmul.f32 %v10633_v58, %v8001_v7  ;;  %v8006_v28 = vmul.f32 %v10633_v58, %v8000_v16  ;;  %v8005_v0 = vmul.f32 %v10633_v58, %v7999_v8 }
0x1e7d   : > { %v8032_v57 = vmul.f32 %v8027_v43, %v8008_v5  ;;  %v8031_v59 = vmul.f32 %v8022_v14, %v8007_v32  ;;  %v8030_v37 = vmul.f32 %v8017_v21, %v8006_v28  ;;  %v8029_v52 = vmul.f32 %v8012_v35, %v8005_v0 }
0x1e7f   : > { %v8056_v33 = vadd.f32 %v8051_v4, %v8032_v57  ;;  %v8055_v47 = vadd.f32 %v8046_v42, %v8031_v59  ;;  %v8054_v50 = vadd.f32 %v8041_v36, %v8030_v37  ;;  %v8053_v38 = vadd.f32 %v8036_v31, %v8029_v52 }
0x1e81   : > { %v8060_v53 = vmul.f32 %v13536_v27, %v8056_v33  ;;  %v8059_v34 = vmul.f32 %v13536_v27, %v8055_v47  ;;  %v8058_v18 = vmul.f32 %v13536_v27, %v8054_v50  ;;  %v8057_v56 = vmul.f32 %v13536_v27, %v8053_v38 }
0x1e83   : > { %10051 = vmatprep.subr.mxu0 %v8060_v53 }
0x1e84   : > { %10052 = vmatpush3.msra.mxu0 %v8060_v53 }
0x1e85   : > { %10053 = vmatprep.subr.mxu0 %v8059_v34 }
0x1e86   : > { %10054 = vmatpush3.msra.mxu0 %v8059_v34 }
0x1e87   : > { %10055 = vmatprep.subr.mxu0 %v8058_v18 }
0x1e88   : > { %10056 = vmatpush3.msra.mxu0 %v8058_v18 }
0x1e89   : > { %10057 = vmatprep.subr.mxu0 %v8057_v56 }
0x1e8a   : > { %10058 = vmatpush3.msra.mxu0 %v8057_v56 }
0x1e8b   : > { %10060 = vmatmul.mubr.msk.f32.vlgmr.msra.gmra.mxu0 %vm1002_vm0, %v8062_v24 }
0x1e8c   : > { %10062 = vmatprep.mubr.msk.f32.mxu0 %vm1002_vm0, %v8063_v25 }
0x1e8f   : > { %10063 = vmatmul.mubr.msk.f32.gmra.mxu0 %vm1002_vm0, %v8064_v19 }
0x1f4b   : > { %v10061_v2 = vpop.f32.mrf.mxu0 }
0x1f4c   : > { %v8173_v23 = vadd.f32 %v10061_v2, %v8077_v61 }
0x1f4d   : > { %v8167_v40 = vpop.f32.mrf.mxu0 }
0x1f4e   : > { %v8187_v62 = vmul.f32 %v13536_v27, %v8173_v23  ;;  %v8168_v55 = vadd.f32 %v8167_v40, %v8072_v29 }
0x1f4f   : > { %v10064_v30 = vpop.f32.mrf.mxu0 }
0x1f50   : > { %8205 = vst [vmem:[%s13390_s26 + $0x18] sm:$0xff] %v8187_v62  ;;  %v8186_v3 = vmul.f32 %v13536_v27, %v8168_v55  ;;  %v8183_v54 = vadd.f32 %v10064_v30, %v8087_v41 }
0x1f51   : > { %v8177_v26 = vpop.f32.mrf.mxu0 }
0x1f52   : > { %8204 = vst [vmem:[%s13390_s26 + $0x10] sm:$0xff] %v8186_v3  ;;  %v8189_v22 = vmul.f32 %v13536_v27, %v8183_v54  ;;  %v8178_v12 = vadd.f32 %v8177_v26, %v8082_v48 }
0x1f54   : > { %v8194_v60 = vmul.f32 1.442695, %v8189_v22  ;;  %8207 = vst [vmem:[%s13390_s26 + $0x28] sm:$0xff] %v8189_v22  ;;  %v8188_v46 = vmul.f32 %v13536_v27, %v8178_v12 }
0x1f56   : > { %10634 = vpow2.f32 %v8194_v60  ;;  %v8192_v6 = vmul.f32 1.442695, %v8188_v46  ;;  %8206 = vst [vmem:[%s13390_s26 + $0x20] sm:$0xff] %v8188_v46 }
0x1f58   : > { %10636 = vpow2.f32 %v8192_v6 }
0x1f63   : > { %v10635_v49 = vpop.eup %10634 }
0x1f64   : > { %v8197_v51 = vmul.f32 %v10635_v49, %v8191_v44 }
0x1f65   : > { %v10637_v9 = vpop.eup %10636 }
0x1f66   : > { %v8199_v63 = vadd.f32 %v8197_v51, %v8187_v62  ;;  %v8196_v45 = vmul.f32 %v10637_v9, %v8190_v17 }
0x1f68   : > { %v8201_v39 = vmul.f32 %v13536_v27, %v8199_v63  ;;  %v8198_v13 = vadd.f32 %v8196_v45, %v8186_v3 }
0x1f6a   : > { %8203 = vst [vmem:[%s13390_s26 + $0x8] sm:$0xff] %v8201_v39  ;;  %v8200_v10 = vmul.f32 %v13536_v27, %v8198_v13 }
0x1f6c   : > { %8202 = vst [vmem:[%s13390_s26] sm:$0xff] %v8200_v10 }
0x1f6d PF: > { %s75_s27 = sadd.s32 1, %s10658_s27  }
0x1f6e   : > { %p72_p9 = scmp.ge.s32.totalorder %s75_s27, 4  }
0x1f70   :  { %74 = sbr.rel (!%p72_p9) target bundleno = 50 (0x32), region = 208 }

</bundles_post_ra>
